<compile_context>
chip_gen: v6e
topology: v6e:2x2x1
jax: 0.10.0
libtpu: 0.0.40
codegen_flags: <defaults>
</compile_context>

<pallas_src>
import numpy as np

import jax
import jax.numpy as jnp
from jax import lax
from jax.experimental import pallas as pl
from jax.experimental.pallas import tpu as pltpu

_K = 4          # Conv3d kernel size
_S = 2          # stride
_P = 1          # padding
_NEG_SLOPE = 0.01  # nn.LeakyReLU() default
_LANE = 128


def _round_up(x, m):
    return ((x + m - 1) // m) * m


def _fold_weight(w, w_in, block_stride):
    """PyTorch Conv3d weight (C_out, C_in, 4, 4, 4) -> fold-W GEMM matrix.

    Shape (16 * block_stride, (w_in // 2) * C_out).
      row    = (kd*4 + kh) * block_stride + w * C_in + c_in
      column = w_out * C_out + c_out
      entry  = w[c_out, c_in, kd, kh, kw]  iff  w == 2*w_out + kw - 1  (else 0)
    i.e. the W-axis stride-2/pad-1 convolution is encoded in the weights so the
    kernel never has to gather along the lane (W*C) dimension.
    """
    w_np = np.asarray(w, dtype=np.float32)
    c_out, c_in = int(w_np.shape[0]), int(w_np.shape[1])
    w_out = w_in // 2
    mat = np.zeros((16 * block_stride, w_out * c_out), np.float32)
    for kd in range(_K):
        for kh in range(_K):
            blk = (kd * _K + kh) * block_stride
            for kw in range(_K):
                wslice = w_np[:, :, kd, kh, kw].T  # (c_in, c_out)
                for wo in range(w_out):
                    wi = _S * wo + kw - _P
                    if 0 <= wi < w_in:
                        r0 = blk + wi * c_in
                        c0 = wo * c_out
                        mat[r0:r0 + c_in, c0:c0 + c_out] = wslice
    return jnp.asarray(mat)


def _make_fused_kernel(dims, negative_slope):
    """Build the single fused 3-layer kernel for one batch element."""
    (D1o, H1o, N1), (D2o, H2o, N2, bs2), (D3o, H3o, N3, bs3) = dims
    Hp1 = H1o + 2   # padded H extent of the layer-1 output plane
    Hp2 = H2o + 2   # padded H extent of the layer-2 output plane

    def leaky(y):
        return jnp.where(y >= 0.0, y, negative_slope * y)

    def kernel(a1_ref, w1_ref, b1_ref, w2_ref, b2_ref, w3_ref, b3_ref,
               out_ref, s1, a2, s2, a3):
        # ---------------- layer 1: fused GEMM + bias + LeakyReLU (MXU) -------
        y1 = leaky(jnp.dot(a1_ref[0], w1_ref[...],
                           preferred_element_type=jnp.float32) + b1_ref[...])

        # Scatter layer-1 output rows (d1, h1) into the zero-padded plane
        # scratch s1: row = (d1 + 1) * Hp1 + (h1 + 1).  Stays in VMEM.
        s1[...] = jnp.zeros(((D1o + 2) * Hp1, N1), jnp.float32)
        for d in range(D1o):
            r = (d + 1) * Hp1 + 1
            s1[r:r + H1o, :] = y1[d * H1o:(d + 1) * H1o, :]

        # -------- in-VMEM im2col for layer 2 (D/H offsets via row gather; the
        # W offsets are already folded into w2) --------------------------------
        a2[...] = jnp.zeros((D2o * H2o, 16 * bs2), jnp.float32)
        for kd in range(_K):
            for kh in range(_K):
                col = (kd * _K + kh) * bs2
                for d in range(D2o):
                    for h in range(H2o):
                        src = (2 * d + kd) * Hp1 + (2 * h + kh)
                        dst = d * H2o + h
                        a2[dst:dst + 1, col:col + N1] = s1[src:src + 1, :]

        # ---------------- layer 2 --------------------------------------------
        y2 = leaky(jnp.dot(a2[...], w2_ref[...],
                           preferred_element_type=jnp.float32) + b2_ref[...])

        s2[...] = jnp.zeros(((D2o + 2) * Hp2, N2), jnp.float32)
        for d in range(D2o):
            r = (d + 1) * Hp2 + 1
            s2[r:r + H2o, :] = y2[d * H2o:(d + 1) * H2o, :]

        a3[...] = jnp.zeros((D3o * H3o, 16 * bs3), jnp.float32)
        for kd in range(_K):
            for kh in range(_K):
                col = (kd * _K + kh) * bs3
                for d in range(D3o):
                    for h in range(H3o):
                        src = (2 * d + kd) * Hp2 + (2 * h + kh)
                        dst = d * H3o + h
                        a3[dst:dst + 1, col:col + N2] = s2[src:src + 1, :]

        # ---------------- layer 3 --------------------------------------------
        y3 = leaky(jnp.dot(a3[...], w3_ref[...],
                           preferred_element_type=jnp.float32) + b3_ref[...])
        out_ref[0, :, :] = y3

    return kernel


def conv3d_encode_forward(x, conv_params, *, negative_slope=_NEG_SLOPE):
    """x: (B, C, D, H, W) float32; conv_params: 3x (torch-layout w, b)."""
    B, C0, D0, H0, W0 = (int(s) for s in x.shape)
    assert D0 % 8 == 0 and H0 % 8 == 0 and W0 % 8 == 0, "spatial dims must be /8"
    (w1, b1), (w2, b2), (w3, b3) = conv_params
    C1, C2, C3 = int(w1.shape[0]), int(w2.shape[0]), int(w3.shape[0])

    D1o, H1o, W1o = D0 // 2, H0 // 2, W0 // 2
    D2o, H2o, W2o = D1o // 2, H1o // 2, W1o // 2
    D3o, H3o, W3o = D2o // 2, H2o // 2, W2o // 2

    N1, N2, N3 = W1o * C1, W2o * C2, W3o * C3   # GEMM output widths (w_o, c_o)
    bs1 = W0 * C0                               # layer-1 K block (host-built, dense)
    bs2 = _round_up(N1, _LANE)                  # lane-aligned K blocks for the
    bs3 = _round_up(N2, _LANE)                  # in-kernel patch matrices
    K1, K2, K3 = 16 * bs1, 16 * bs2, 16 * bs3
    M1, M2, M3 = D1o * H1o, D2o * H2o, D3o * H3o

    # ----- init-style layout transforms (weights / biases) -------------------
    w1f = _fold_weight(w1, W0, bs1)
    w2f = _fold_weight(w2, W1o, bs2)
    w3f = _fold_weight(w3, W2o, bs3)
    b1f = jnp.tile(jnp.asarray(b1), W1o).reshape(1, N1)
    b2f = jnp.tile(jnp.asarray(b2), W2o).reshape(1, N2)
    b3f = jnp.tile(jnp.asarray(b3), W3o).reshape(1, N3)

    # ----- layer-1 patches, built once from the HBM input (one XLA fusion).
    # TODO(synk): the stride-2 D/H gather on the raw HBM input has no clean
    # rectangular BlockSpec, so it stays wrapper-side; layers 2/3 do their
    # im2col entirely inside VMEM.
    x_cl = jnp.transpose(x, (0, 2, 3, 4, 1))                       # (B, D, H, W, C)
    xp = jnp.pad(x_cl, ((0, 0), (1, 1), (1, 1), (0, 0), (0, 0)))   # pad D, H only
    blocks = []
    for kd in range(_K):
        for kh in range(_K):
            blk = xp[:, kd:kd + 2 * D1o:2, kh:kh + 2 * H1o:2, :, :]
            blocks.append(blk.reshape(B, M1, bs1))
    a1 = jnp.concatenate(blocks, axis=-1)                          # (B, M1, K1)

    kernel = _make_fused_kernel(
        ((D1o, H1o, N1), (D2o, H2o, N2, bs2), (D3o, H3o, N3, bs3)),
        negative_slope)

    out = pl.pallas_call(
        kernel,
        out_shape=jax.ShapeDtypeStruct((B, M3, N3), jnp.float32),
        grid=(B,),
        in_specs=[
            pl.BlockSpec((1, M1, K1), lambda b: (b, 0, 0)),   # per-batch patches
            pl.BlockSpec((K1, N1), lambda b: (0, 0)),         # weights: resident
            pl.BlockSpec((1, N1), lambda b: (0, 0)),
            pl.BlockSpec((K2, N2), lambda b: (0, 0)),
            pl.BlockSpec((1, N2), lambda b: (0, 0)),
            pl.BlockSpec((K3, N3), lambda b: (0, 0)),
            pl.BlockSpec((1, N3), lambda b: (0, 0)),
        ],
        out_specs=pl.BlockSpec((1, M3, N3), lambda b: (b, 0, 0)),
        scratch_shapes=[
            pltpu.VMEM(((D1o + 2) * (H1o + 2), N1), jnp.float32),  # padded act1
            pltpu.VMEM((M2, K2), jnp.float32),                     # layer-2 patches
            pltpu.VMEM(((D2o + 2) * (H2o + 2), N2), jnp.float32),  # padded act2
            pltpu.VMEM((M3, K3), jnp.float32),                     # layer-3 patches
        ],
        compiler_params=pltpu.CompilerParams(
            dimension_semantics=("parallel",),   # batch shards across TCs on v7x
        ),
    )(a1, w1f, b1f, w2f, b2f, w3f, b3f)

    # Kernel output: rows = (d3, h3), lanes = (w3, c3).  Re-order once at the
    # network boundary so the flatten matches PyTorch's out.view(B, -1) on
    # (B, C_out, D', H', W').
    out = out.reshape(B, D3o, H3o, W3o, C3)
    out = jnp.transpose(out, (0, 4, 1, 2, 3)).reshape(B, -1)
    return out


class Conv3DEncodePallas:
    """JAX/Pallas equivalent of the PyTorch Conv3DEncode module."""

    def __init__(self, input_dims, output_dims, key=None):
        if key is None:
            key = jax.random.PRNGKey(0)
        chans = [input_dims, 16, 16, output_dims]
        self.conv_params = []  # PyTorch layout (w: (O, C, 4, 4, 4), b: (O,))
        for c_in, c_out in zip(chans[:-1], chans[1:]):
            key, kw_key, kb_key = jax.random.split(key, 3)
            fan_in = c_in * _K ** 3
            bound = 1.0 / (fan_in ** 0.5)  # nn.Conv3d default uniform init bound
            w = jax.random.uniform(
                kw_key, (c_out, c_in, _K, _K, _K), jnp.float32,
                minval=-bound, maxval=bound)
            b = jax.random.uniform(
                kb_key, (c_out,), jnp.float32, minval=-bound, maxval=bound)
            self.conv_params.append((w, b))

    def __call__(self, x):
        return conv3d_encode_forward(x, self.conv_params)


def _reference_conv3d_encode(x, conv_params):
    """Pure-JAX reference (lax.conv) for correctness checking."""
    out = x
    for w, b in conv_params:
        out = lax.conv_general_dilated(
            out,
            w,
            window_strides=(_S,) * 3,
            padding=[(_P, _P)] * 3,
            dimension_numbers=("NCDHW", "OIDHW", "NCDHW"),
            precision=lax.Precision.HIGHEST,
        )
        out = out + b.reshape(1, -1, 1, 1, 1)
        out = jnp.where(out >= 0.0, out, _NEG_SLOPE * out)
    return out.reshape(out.shape[0], -1)


if __name__ == "__main__":
    key = jax.random.PRNGKey(0)
    k_in, k_model = jax.random.split(key)

    batch, in_channels, spatial = 2, 4, 16
    output_dims = 8

    x = jax.random.normal(
        k_in, (batch, in_channels, spatial, spatial, spatial), dtype=jnp.float32
    )

    model = Conv3DEncodePallas(in_channels, output_dims, key=k_model)

    out = jax.block_until_ready(model(x))

    ref = _reference_conv3d_encode(x, model.conv_params)
    final_spatial = spatial // 8
    assert out.shape == (batch, output_dims * final_spatial ** 3), out.shape
    max_err = float(jnp.max(jnp.abs(out - ref)))
    assert jnp.allclose(out, ref, atol=2e-3, rtol=2e-3), (
        f"mismatch vs reference: {max_err}")

    print("KERNEL_OK")
</pallas_src>

<mosaic_0001>
module attributes {stable_mosaic.version = 11 : i64} {
  func.func @kernel(%arg0: i32, %arg1: memref<1x64x1024xf32, #tpu.memory_space<vmem>>, %arg2: memref<1024x128xf32, #tpu.memory_space<vmem>>, %arg3: memref<1x128xf32, #tpu.memory_space<vmem>>, %arg4: memref<2048x64xf32, #tpu.memory_space<vmem>>, %arg5: memref<1x64xf32, #tpu.memory_space<vmem>>, %arg6: memref<2048x16xf32, #tpu.memory_space<vmem>>, %arg7: memref<1x16xf32, #tpu.memory_space<vmem>>, %arg8: memref<1x4x16xf32, #tpu.memory_space<vmem>>, %arg9: memref<100x128xf32, #tpu.memory_space<vmem>>, %arg10: memref<16x2048xf32, #tpu.memory_space<vmem>>, %arg11: memref<36x64xf32, #tpu.memory_space<vmem>>, %arg12: memref<4x2048xf32, #tpu.memory_space<vmem>>) attributes {dimension_semantics = [#tpu.dimension_semantics<parallel>], iteration_bounds = array<i64: 2>, scalar_prefetch = 0 : i64, scratch_operands = 4 : i64, tpu.core_type = #tpu.core_type<tc>, window_params = [{transform_indices = @transform_0, window_bounds = array<i64: 1, 64, 1024>}, {pipeline_mode = #tpu.pipeline_mode<synchronous>, transform_indices = @transform_1, window_bounds = array<i64: 1024, 128>}, {pipeline_mode = #tpu.pipeline_mode<synchronous>, transform_indices = @transform_2, window_bounds = array<i64: 1, 128>}, {pipeline_mode = #tpu.pipeline_mode<synchronous>, transform_indices = @transform_3, window_bounds = array<i64: 2048, 64>}, {pipeline_mode = #tpu.pipeline_mode<synchronous>, transform_indices = @transform_4, window_bounds = array<i64: 1, 64>}, {pipeline_mode = #tpu.pipeline_mode<synchronous>, transform_indices = @transform_5, window_bounds = array<i64: 2048, 16>}, {pipeline_mode = #tpu.pipeline_mode<synchronous>, transform_indices = @transform_6, window_bounds = array<i64: 1, 16>}, {transform_indices = @transform_7, window_bounds = array<i64: 1, 4, 16>}]} {
    %c0 = arith.constant 0 : index
    %c0_0 = arith.constant 0 : index
    %c0_1 = arith.constant 0 : index
    %0 = vector.load %arg1[%c0, %c0_0, %c0_1] : memref<1x64x1024xf32, #tpu.memory_space<vmem>>, vector<1x64x1024xf32>
    %1 = vector.shape_cast %0 : vector<1x64x1024xf32> to vector<64x1024xf32>
    %c0_2 = arith.constant 0 : index
    %c0_3 = arith.constant 0 : index
    %2 = vector.load %arg2[%c0_2, %c0_3] : memref<1024x128xf32, #tpu.memory_space<vmem>>, vector<1024x128xf32>
    %cst = arith.constant dense<0.000000e+00> : vector<64x128xf32>
    %3 = tpu.matmul %1, %2, %cst {dimension_numbers = #tpu.dot_dimension_numbers<[1], [0], [0], [1], [0, 0, 1, 1], [], []>} : vector<64x1024xf32>, vector<1024x128xf32>, vector<64x128xf32> -> vector<64x128xf32>
    %c0_4 = arith.constant 0 : index
    %c0_5 = arith.constant 0 : index
    %4 = vector.load %arg3[%c0_4, %c0_5] : memref<1x128xf32, #tpu.memory_space<vmem>>, vector<1x128xf32>
    %5 = vector.broadcast %4 : vector<1x128xf32> to vector<64x128xf32>
    %6 = arith.addf %3, %5 : vector<64x128xf32>
    %cst_6 = arith.constant 0.000000e+00 : f32
    %7 = vector.broadcast %cst_6 : f32 to vector<64x128xf32>
    %8 = arith.cmpf oge, %6, %7 : vector<64x128xf32>
    %cst_7 = arith.constant 0.00999999977 : f32
    %9 = vector.broadcast %cst_7 : f32 to vector<64x128xf32>
    %10 = arith.mulf %9, %6 : vector<64x128xf32>
    %11 = arith.select %8, %6, %10 : vector<64x128xi1>, vector<64x128xf32>
    %cst_8 = arith.constant 0.000000e+00 : f32
    %12 = vector.broadcast %cst_8 : f32 to vector<100x128xf32>
    %c0_9 = arith.constant 0 : index
    %c0_10 = arith.constant 0 : index
    %13 = vector.load %arg9[%c0_9, %c0_10] : memref<100x128xf32, #tpu.memory_space<vmem>>, vector<100x128xf32>
    tpu.vector_store %arg9[%c0_9, %c0_10], %12 {strides = array<i32>} : memref<100x128xf32, #tpu.memory_space<vmem>>, vector<100x128xf32>,
    %14 = vector.extract_strided_slice %11 {offsets = [0, 0], sizes = [8, 128], strides = [1, 1]} : vector<64x128xf32> to vector<8x128xf32>
    %c11 = arith.constant 11 : index
    %c0_11 = arith.constant 0 : index
    %15 = vector.load %arg9[%c11, %c0_11] : memref<100x128xf32, #tpu.memory_space<vmem>>, vector<8x128xf32>
    tpu.vector_store %arg9[%c11, %c0_11], %14 {strides = array<i32>} : memref<100x128xf32, #tpu.memory_space<vmem>>, vector<8x128xf32>,
    %16 = vector.extract_strided_slice %11 {offsets = [8, 0], sizes = [8, 128], strides = [1, 1]} : vector<64x128xf32> to vector<8x128xf32>
    %c21 = arith.constant 21 : index
    %c0_12 = arith.constant 0 : index
    %17 = vector.load %arg9[%c21, %c0_12] : memref<100x128xf32, #tpu.memory_space<vmem>>, vector<8x128xf32>
    tpu.vector_store %arg9[%c21, %c0_12], %16 {strides = array<i32>} : memref<100x128xf32, #tpu.memory_space<vmem>>, vector<8x128xf32>,
    %18 = vector.extract_strided_slice %11 {offsets = [16, 0], sizes = [8, 128], strides = [1, 1]} : vector<64x128xf32> to vector<8x128xf32>
    %c31 = arith.constant 31 : index
    %c0_13 = arith.constant 0 : index
    %19 = vector.load %arg9[%c31, %c0_13] : memref<100x128xf32, #tpu.memory_space<vmem>>, vector<8x128xf32>
    tpu.vector_store %arg9[%c31, %c0_13], %18 {strides = array<i32>} : memref<100x128xf32, #tpu.memory_space<vmem>>, vector<8x128xf32>,
    %20 = vector.extract_strided_slice %11 {offsets = [24, 0], sizes = [8, 128], strides = [1, 1]} : vector<64x128xf32> to vector<8x128xf32>
    %c41 = arith.constant 41 : index
    %c0_14 = arith.constant 0 : index
    %21 = vector.load %arg9[%c41, %c0_14] : memref<100x128xf32, #tpu.memory_space<vmem>>, vector<8x128xf32>
    tpu.vector_store %arg9[%c41, %c0_14], %20 {strides = array<i32>} : memref<100x128xf32, #tpu.memory_space<vmem>>, vector<8x128xf32>,
    %22 = vector.extract_strided_slice %11 {offsets = [32, 0], sizes = [8, 128], strides = [1, 1]} : vector<64x128xf32> to vector<8x128xf32>
    %c51 = arith.constant 51 : index
    %c0_15 = arith.constant 0 : index
    %23 = vector.load %arg9[%c51, %c0_15] : memref<100x128xf32, #tpu.memory_space<vmem>>, vector<8x128xf32>
    tpu.vector_store %arg9[%c51, %c0_15], %22 {strides = array<i32>} : memref<100x128xf32, #tpu.memory_space<vmem>>, vector<8x128xf32>,
    %24 = vector.extract_strided_slice %11 {offsets = [40, 0], sizes = [8, 128], strides = [1, 1]} : vector<64x128xf32> to vector<8x128xf32>
    %c61 = arith.constant 61 : index
    %c0_16 = arith.constant 0 : index
    %25 = vector.load %arg9[%c61, %c0_16] : memref<100x128xf32, #tpu.memory_space<vmem>>, vector<8x128xf32>
    tpu.vector_store %arg9[%c61, %c0_16], %24 {strides = array<i32>} : memref<100x128xf32, #tpu.memory_space<vmem>>, vector<8x128xf32>,
    %26 = vector.extract_strided_slice %11 {offsets = [48, 0], sizes = [8, 128], strides = [1, 1]} : vector<64x128xf32> to vector<8x128xf32>
    %c71 = arith.constant 71 : index
    %c0_17 = arith.constant 0 : index
    %27 = vector.load %arg9[%c71, %c0_17] : memref<100x128xf32, #tpu.memory_space<vmem>>, vector<8x128xf32>
    tpu.vector_store %arg9[%c71, %c0_17], %26 {strides = array<i32>} : memref<100x128xf32, #tpu.memory_space<vmem>>, vector<8x128xf32>,
    %28 = vector.extract_strided_slice %11 {offsets = [56, 0], sizes = [8, 128], strides = [1, 1]} : vector<64x128xf32> to vector<8x128xf32>
    %c81 = arith.constant 81 : index
    %c0_18 = arith.constant 0 : index
    %29 = vector.load %arg9[%c81, %c0_18] : memref<100x128xf32, #tpu.memory_space<vmem>>, vector<8x128xf32>
    tpu.vector_store %arg9[%c81, %c0_18], %28 {strides = array<i32>} : memref<100x128xf32, #tpu.memory_space<vmem>>, vector<8x128xf32>,
    %cst_19 = arith.constant 0.000000e+00 : f32
    %30 = vector.broadcast %cst_19 : f32 to vector<16x2048xf32>
    %c0_20 = arith.constant 0 : index
    %c0_21 = arith.constant 0 : index
    %31 = vector.load %arg10[%c0_20, %c0_21] : memref<16x2048xf32, #tpu.memory_space<vmem>>, vector<16x2048xf32>
    tpu.vector_store %arg10[%c0_20, %c0_21], %30 {strides = array<i32>} : memref<16x2048xf32, #tpu.memory_space<vmem>>, vector<16x2048xf32>,
    %c0_22 = arith.constant 0 : index
    %c0_23 = arith.constant 0 : index
    %32 = vector.load %arg9[%c0_22, %c0_23] : memref<100x128xf32, #tpu.memory_space<vmem>>, vector<1x128xf32>
    %c0_24 = arith.constant 0 : index
    %c0_25 = arith.constant 0 : index
    %33 = vector.load %arg10[%c0_24, %c0_25] : memref<16x2048xf32, #tpu.memory_space<vmem>>, vector<1x128xf32>
    tpu.vector_store %arg10[%c0_24, %c0_25], %32 {strides = array<i32>} : memref<16x2048xf32, #tpu.memory_space<vmem>>, vector<1x128xf32>,
    %c2 = arith.constant 2 : index
    %c0_26 = arith.constant 0 : index
    %34 = vector.load %arg9[%c2, %c0_26] : memref<100x128xf32, #tpu.memory_space<vmem>>, vector<1x128xf32>
    %c1 = arith.constant 1 : index
    %c0_27 = arith.constant 0 : index
    %35 = vector.load %arg10[%c1, %c0_27] : memref<16x2048xf32, #tpu.memory_space<vmem>>, vector<1x128xf32>
    tpu.vector_store %arg10[%c1, %c0_27], %34 {strides = array<i32>} : memref<16x2048xf32, #tpu.memory_space<vmem>>, vector<1x128xf32>,
    %c4 = arith.constant 4 : index
    %c0_28 = arith.constant 0 : index
    %36 = vector.load %arg9[%c4, %c0_28] : memref<100x128xf32, #tpu.memory_space<vmem>>, vector<1x128xf32>
    %c2_29 = arith.constant 2 : index
    %c0_30 = arith.constant 0 : index
    %37 = vector.load %arg10[%c2_29, %c0_30] : memref<16x2048xf32, #tpu.memory_space<vmem>>, vector<1x128xf32>
    tpu.vector_store %arg10[%c2_29, %c0_30], %36 {strides = array<i32>} : memref<16x2048xf32, #tpu.memory_space<vmem>>, vector<1x128xf32>,
    %c6 = arith.constant 6 : index
    %c0_31 = arith.constant 0 : index
    %38 = vector.load %arg9[%c6, %c0_31] : memref<100x128xf32, #tpu.memory_space<vmem>>, vector<1x128xf32>
    %c3 = arith.constant 3 : index
    %c0_32 = arith.constant 0 : index
    %39 = vector.load %arg10[%c3, %c0_32] : memref<16x2048xf32, #tpu.memory_space<vmem>>, vector<1x128xf32>
    tpu.vector_store %arg10[%c3, %c0_32], %38 {strides = array<i32>} : memref<16x2048xf32, #tpu.memory_space<vmem>>, vector<1x128xf32>,
    %c20 = arith.constant 20 : index
    %c0_33 = arith.constant 0 : index
    %40 = vector.load %arg9[%c20, %c0_33] : memref<100x128xf32, #tpu.memory_space<vmem>>, vector<1x128xf32>
    %c4_34 = arith.constant 4 : index
    %c0_35 = arith.constant 0 : index
    %41 = vector.load %arg10[%c4_34, %c0_35] : memref<16x2048xf32, #tpu.memory_space<vmem>>, vector<1x128xf32>
    tpu.vector_store %arg10[%c4_34, %c0_35], %40 {strides = array<i32>} : memref<16x2048xf32, #tpu.memory_space<vmem>>, vector<1x128xf32>,
    %c22 = arith.constant 22 : index
    %c0_36 = arith.constant 0 : index
    %42 = vector.load %arg9[%c22, %c0_36] : memref<100x128xf32, #tpu.memory_space<vmem>>, vector<1x128xf32>
    %c5 = arith.constant 5 : index
    %c0_37 = arith.constant 0 : index
    %43 = vector.load %arg10[%c5, %c0_37] : memref<16x2048xf32, #tpu.memory_space<vmem>>, vector<1x128xf32>
    tpu.vector_store %arg10[%c5, %c0_37], %42 {strides = array<i32>} : memref<16x2048xf32, #tpu.memory_space<vmem>>, vector<1x128xf32>,
    %c24 = arith.constant 24 : index
    %c0_38 = arith.constant 0 : index
    %44 = vector.load %arg9[%c24, %c0_38] : memref<100x128xf32, #tpu.memory_space<vmem>>, vector<1x128xf32>
    %c6_39 = arith.constant 6 : index
    %c0_40 = arith.constant 0 : index
    %45 = vector.load %arg10[%c6_39, %c0_40] : memref<16x2048xf32, #tpu.memory_space<vmem>>, vector<1x128xf32>
    tpu.vector_store %arg10[%c6_39, %c0_40], %44 {strides = array<i32>} : memref<16x2048xf32, #tpu.memory_space<vmem>>, vector<1x128xf32>,
    %c26 = arith.constant 26 : index
    %c0_41 = arith.constant 0 : index
    %46 = vector.load %arg9[%c26, %c0_41] : memref<100x128xf32, #tpu.memory_space<vmem>>, vector<1x128xf32>
    %c7 = arith.constant 7 : index
    %c0_42 = arith.constant 0 : index
    %47 = vector.load %arg10[%c7, %c0_42] : memref<16x2048xf32, #tpu.memory_space<vmem>>, vector<1x128xf32>
    tpu.vector_store %arg10[%c7, %c0_42], %46 {strides = array<i32>} : memref<16x2048xf32, #tpu.memory_space<vmem>>, vector<1x128xf32>,
    %c40 = arith.constant 40 : index
    %c0_43 = arith.constant 0 : index
    %48 = vector.load %arg9[%c40, %c0_43] : memref<100x128xf32, #tpu.memory_space<vmem>>, vector<1x128xf32>
    %c8 = arith.constant 8 : index
    %c0_44 = arith.constant 0 : index
    %49 = vector.load %arg10[%c8, %c0_44] : memref<16x2048xf32, #tpu.memory_space<vmem>>, vector<1x128xf32>
    tpu.vector_store %arg10[%c8, %c0_44], %48 {strides = array<i32>} : memref<16x2048xf32, #tpu.memory_space<vmem>>, vector<1x128xf32>,
    %c42 = arith.constant 42 : index
    %c0_45 = arith.constant 0 : index
    %50 = vector.load %arg9[%c42, %c0_45] : memref<100x128xf32, #tpu.memory_space<vmem>>, vector<1x128xf32>
    %c9 = arith.constant 9 : index
    %c0_46 = arith.constant 0 : index
    %51 = vector.load %arg10[%c9, %c0_46] : memref<16x2048xf32, #tpu.memory_space<vmem>>, vector<1x128xf32>
    tpu.vector_store %arg10[%c9, %c0_46], %50 {strides = array<i32>} : memref<16x2048xf32, #tpu.memory_space<vmem>>, vector<1x128xf32>,
    %c44 = arith.constant 44 : index
    %c0_47 = arith.constant 0 : index
    %52 = vector.load %arg9[%c44, %c0_47] : memref<100x128xf32, #tpu.memory_space<vmem>>, vector<1x128xf32>
    %c10 = arith.constant 10 : index
    %c0_48 = arith.constant 0 : index
    %53 = vector.load %arg10[%c10, %c0_48] : memref<16x2048xf32, #tpu.memory_space<vmem>>, vector<1x128xf32>
    tpu.vector_store %arg10[%c10, %c0_48], %52 {strides = array<i32>} : memref<16x2048xf32, #tpu.memory_space<vmem>>, vector<1x128xf32>,
    %c46 = arith.constant 46 : index
    %c0_49 = arith.constant 0 : index
    %54 = vector.load %arg9[%c46, %c0_49] : memref<100x128xf32, #tpu.memory_space<vmem>>, vector<1x128xf32>
    %c11_50 = arith.constant 11 : index
    %c0_51 = arith.constant 0 : index
    %55 = vector.load %arg10[%c11_50, %c0_51] : memref<16x2048xf32, #tpu.memory_space<vmem>>, vector<1x128xf32>
    tpu.vector_store %arg10[%c11_50, %c0_51], %54 {strides = array<i32>} : memref<16x2048xf32, #tpu.memory_space<vmem>>, vector<1x128xf32>,
    %c60 = arith.constant 60 : index
    %c0_52 = arith.constant 0 : index
    %56 = vector.load %arg9[%c60, %c0_52] : memref<100x128xf32, #tpu.memory_space<vmem>>, vector<1x128xf32>
    %c12 = arith.constant 12 : index
    %c0_53 = arith.constant 0 : index
    %57 = vector.load %arg10[%c12, %c0_53] : memref<16x2048xf32, #tpu.memory_space<vmem>>, vector<1x128xf32>
    tpu.vector_store %arg10[%c12, %c0_53], %56 {strides = array<i32>} : memref<16x2048xf32, #tpu.memory_space<vmem>>, vector<1x128xf32>,
    %c62 = arith.constant 62 : index
    %c0_54 = arith.constant 0 : index
    %58 = vector.load %arg9[%c62, %c0_54] : memref<100x128xf32, #tpu.memory_space<vmem>>, vector<1x128xf32>
    %c13 = arith.constant 13 : index
    %c0_55 = arith.constant 0 : index
    %59 = vector.load %arg10[%c13, %c0_55] : memref<16x2048xf32, #tpu.memory_space<vmem>>, vector<1x128xf32>
    tpu.vector_store %arg10[%c13, %c0_55], %58 {strides = array<i32>} : memref<16x2048xf32, #tpu.memory_space<vmem>>, vector<1x128xf32>,
    %c64 = arith.constant 64 : index
    %c0_56 = arith.constant 0 : index
    %60 = vector.load %arg9[%c64, %c0_56] : memref<100x128xf32, #tpu.memory_space<vmem>>, vector<1x128xf32>
    %c14 = arith.constant 14 : index
    %c0_57 = arith.constant 0 : index
    %61 = vector.load %arg10[%c14, %c0_57] : memref<16x2048xf32, #tpu.memory_space<vmem>>, vector<1x128xf32>
    tpu.vector_store %arg10[%c14, %c0_57], %60 {strides = array<i32>} : memref<16x2048xf32, #tpu.memory_space<vmem>>, vector<1x128xf32>,
    %c66 = arith.constant 66 : index
    %c0_58 = arith.constant 0 : index
    %62 = vector.load %arg9[%c66, %c0_58] : memref<100x128xf32, #tpu.memory_space<vmem>>, vector<1x128xf32>
    %c15 = arith.constant 15 : index
    %c0_59 = arith.constant 0 : index
    %63 = vector.load %arg10[%c15, %c0_59] : memref<16x2048xf32, #tpu.memory_space<vmem>>, vector<1x128xf32>
    tpu.vector_store %arg10[%c15, %c0_59], %62 {strides = array<i32>} : memref<16x2048xf32, #tpu.memory_space<vmem>>, vector<1x128xf32>,
    %c1_60 = arith.constant 1 : index
    %c0_61 = arith.constant 0 : index
    %64 = vector.load %arg9[%c1_60, %c0_61] : memref<100x128xf32, #tpu.memory_space<vmem>>, vector<1x128xf32>
    %c0_62 = arith.constant 0 : index
    %c128 = arith.constant 128 : index
    %65 = vector.load %arg10[%c0_62, %c128] : memref<16x2048xf32, #tpu.memory_space<vmem>>, vector<1x128xf32>
    tpu.vector_store %arg10[%c0_62, %c128], %64 {strides = array<i32>} : memref<16x2048xf32, #tpu.memory_space<vmem>>, vector<1x128xf32>,
    %c3_63 = arith.constant 3 : index
    %c0_64 = arith.constant 0 : index
    %66 = vector.load %arg9[%c3_63, %c0_64] : memref<100x128xf32, #tpu.memory_space<vmem>>, vector<1x128xf32>
    %c1_65 = arith.constant 1 : index
    %c128_66 = arith.constant 128 : index
    %67 = vector.load %arg10[%c1_65, %c128_66] : memref<16x2048xf32, #tpu.memory_space<vmem>>, vector<1x128xf32>
    tpu.vector_store %arg10[%c1_65, %c128_66], %66 {strides = array<i32>} : memref<16x2048xf32, #tpu.memory_space<vmem>>, vector<1x128xf32>,
    %c5_67 = arith.constant 5 : index
    %c0_68 = arith.constant 0 : index
    %68 = vector.load %arg9[%c5_67, %c0_68] : memref<100x128xf32, #tpu.memory_space<vmem>>, vector<1x128xf32>
    %c2_69 = arith.constant 2 : index
    %c128_70 = arith.constant 128 : index
    %69 = vector.load %arg10[%c2_69, %c128_70] : memref<16x2048xf32, #tpu.memory_space<vmem>>, vector<1x128xf32>
    tpu.vector_store %arg10[%c2_69, %c128_70], %68 {strides = array<i32>} : memref<16x2048xf32, #tpu.memory_space<vmem>>, vector<1x128xf32>,
    %c7_71 = arith.constant 7 : index
    %c0_72 = arith.constant 0 : index
    %70 = vector.load %arg9[%c7_71, %c0_72] : memref<100x128xf32, #tpu.memory_space<vmem>>, vector<1x128xf32>
    %c3_73 = arith.constant 3 : index
    %c128_74 = arith.constant 128 : index
    %71 = vector.load %arg10[%c3_73, %c128_74] : memref<16x2048xf32, #tpu.memory_space<vmem>>, vector<1x128xf32>
    tpu.vector_store %arg10[%c3_73, %c128_74], %70 {strides = array<i32>} : memref<16x2048xf32, #tpu.memory_space<vmem>>, vector<1x128xf32>,
    %c21_75 = arith.constant 21 : index
    %c0_76 = arith.constant 0 : index
    %72 = vector.load %arg9[%c21_75, %c0_76] : memref<100x128xf32, #tpu.memory_space<vmem>>, vector<1x128xf32>
    %c4_77 = arith.constant 4 : index
    %c128_78 = arith.constant 128 : index
    %73 = vector.load %arg10[%c4_77, %c128_78] : memref<16x2048xf32, #tpu.memory_space<vmem>>, vector<1x128xf32>
    tpu.vector_store %arg10[%c4_77, %c128_78], %72 {strides = array<i32>} : memref<16x2048xf32, #tpu.memory_space<vmem>>, vector<1x128xf32>,
    %c23 = arith.constant 23 : index
    %c0_79 = arith.constant 0 : index
    %74 = vector.load %arg9[%c23, %c0_79] : memref<100x128xf32, #tpu.memory_space<vmem>>, vector<1x128xf32>
    %c5_80 = arith.constant 5 : index
    %c128_81 = arith.constant 128 : index
    %75 = vector.load %arg10[%c5_80, %c128_81] : memref<16x2048xf32, #tpu.memory_space<vmem>>, vector<1x128xf32>
    tpu.vector_store %arg10[%c5_80, %c128_81], %74 {strides = array<i32>} : memref<16x2048xf32, #tpu.memory_space<vmem>>, vector<1x128xf32>,
    %c25 = arith.constant 25 : index
    %c0_82 = arith.constant 0 : index
    %76 = vector.load %arg9[%c25, %c0_82] : memref<100x128xf32, #tpu.memory_space<vmem>>, vector<1x128xf32>
    %c6_83 = arith.constant 6 : index
    %c128_84 = arith.constant 128 : index
    %77 = vector.load %arg10[%c6_83, %c128_84] : memref<16x2048xf32, #tpu.memory_space<vmem>>, vector<1x128xf32>
    tpu.vector_store %arg10[%c6_83, %c128_84], %76 {strides = array<i32>} : memref<16x2048xf32, #tpu.memory_space<vmem>>, vector<1x128xf32>,
    %c27 = arith.constant 27 : index
    %c0_85 = arith.constant 0 : index
    %78 = vector.load %arg9[%c27, %c0_85] : memref<100x128xf32, #tpu.memory_space<vmem>>, vector<1x128xf32>
    %c7_86 = arith.constant 7 : index
    %c128_87 = arith.constant 128 : index
    %79 = vector.load %arg10[%c7_86, %c128_87] : memref<16x2048xf32, #tpu.memory_space<vmem>>, vector<1x128xf32>
    tpu.vector_store %arg10[%c7_86, %c128_87], %78 {strides = array<i32>} : memref<16x2048xf32, #tpu.memory_space<vmem>>, vector<1x128xf32>,
    %c41_88 = arith.constant 41 : index
    %c0_89 = arith.constant 0 : index
    %80 = vector.load %arg9[%c41_88, %c0_89] : memref<100x128xf32, #tpu.memory_space<vmem>>, vector<1x128xf32>
    %c8_90 = arith.constant 8 : index
    %c128_91 = arith.constant 128 : index
    %81 = vector.load %arg10[%c8_90, %c128_91] : memref<16x2048xf32, #tpu.memory_space<vmem>>, vector<1x128xf32>
    tpu.vector_store %arg10[%c8_90, %c128_91], %80 {strides = array<i32>} : memref<16x2048xf32, #tpu.memory_space<vmem>>, vector<1x128xf32>,
    %c43 = arith.constant 43 : index
    %c0_92 = arith.constant 0 : index
    %82 = vector.load %arg9[%c43, %c0_92] : memref<100x128xf32, #tpu.memory_space<vmem>>, vector<1x128xf32>
    %c9_93 = arith.constant 9 : index
    %c128_94 = arith.constant 128 : index
    %83 = vector.load %arg10[%c9_93, %c128_94] : memref<16x2048xf32, #tpu.memory_space<vmem>>, vector<1x128xf32>
    tpu.vector_store %arg10[%c9_93, %c128_94], %82 {strides = array<i32>} : memref<16x2048xf32, #tpu.memory_space<vmem>>, vector<1x128xf32>,
    %c45 = arith.constant 45 : index
    %c0_95 = arith.constant 0 : index
    %84 = vector.load %arg9[%c45, %c0_95] : memref<100x128xf32, #tpu.memory_space<vmem>>, vector<1x128xf32>
    %c10_96 = arith.constant 10 : index
    %c128_97 = arith.constant 128 : index
    %85 = vector.load %arg10[%c10_96, %c128_97] : memref<16x2048xf32, #tpu.memory_space<vmem>>, vector<1x128xf32>
    tpu.vector_store %arg10[%c10_96, %c128_97], %84 {strides = array<i32>} : memref<16x2048xf32, #tpu.memory_space<vmem>>, vector<1x128xf32>,
    %c47 = arith.constant 47 : index
    %c0_98 = arith.constant 0 : index
    %86 = vector.load %arg9[%c47, %c0_98] : memref<100x128xf32, #tpu.memory_space<vmem>>, vector<1x128xf32>
    %c11_99 = arith.constant 11 : index
    %c128_100 = arith.constant 128 : index
    %87 = vector.load %arg10[%c11_99, %c128_100] : memref<16x2048xf32, #tpu.memory_space<vmem>>, vector<1x128xf32>
    tpu.vector_store %arg10[%c11_99, %c128_100], %86 {strides = array<i32>} : memref<16x2048xf32, #tpu.memory_space<vmem>>, vector<1x128xf32>,
    %c61_101 = arith.constant 61 : index
    %c0_102 = arith.constant 0 : index
    %88 = vector.load %arg9[%c61_101, %c0_102] : memref<100x128xf32, #tpu.memory_space<vmem>>, vector<1x128xf32>
    %c12_103 = arith.constant 12 : index
    %c128_104 = arith.constant 128 : index
    %89 = vector.load %arg10[%c12_103, %c128_104] : memref<16x2048xf32, #tpu.memory_space<vmem>>, vector<1x128xf32>
    tpu.vector_store %arg10[%c12_103, %c128_104], %88 {strides = array<i32>} : memref<16x2048xf32, #tpu.memory_space<vmem>>, vector<1x128xf32>,
    %c63 = arith.constant 63 : index
    %c0_105 = arith.constant 0 : index
    %90 = vector.load %arg9[%c63, %c0_105] : memref<100x128xf32, #tpu.memory_space<vmem>>, vector<1x128xf32>
    %c13_106 = arith.constant 13 : index
    %c128_107 = arith.constant 128 : index
    %91 = vector.load %arg10[%c13_106, %c128_107] : memref<16x2048xf32, #tpu.memory_space<vmem>>, vector<1x128xf32>
    tpu.vector_store %arg10[%c13_106, %c128_107], %90 {strides = array<i32>} : memref<16x2048xf32, #tpu.memory_space<vmem>>, vector<1x128xf32>,
    %c65 = arith.constant 65 : index
    %c0_108 = arith.constant 0 : index
    %92 = vector.load %arg9[%c65, %c0_108] : memref<100x128xf32, #tpu.memory_space<vmem>>, vector<1x128xf32>
    %c14_109 = arith.constant 14 : index
    %c128_110 = arith.constant 128 : index
    %93 = vector.load %arg10[%c14_109, %c128_110] : memref<16x2048xf32, #tpu.memory_space<vmem>>, vector<1x128xf32>
    tpu.vector_store %arg10[%c14_109, %c128_110], %92 {strides = array<i32>} : memref<16x2048xf32, #tpu.memory_space<vmem>>, vector<1x128xf32>,
    %c67 = arith.constant 67 : index
    %c0_111 = arith.constant 0 : index
    %94 = vector.load %arg9[%c67, %c0_111] : memref<100x128xf32, #tpu.memory_space<vmem>>, vector<1x128xf32>
    %c15_112 = arith.constant 15 : index
    %c128_113 = arith.constant 128 : index
    %95 = vector.load %arg10[%c15_112, %c128_113] : memref<16x2048xf32, #tpu.memory_space<vmem>>, vector<1x128xf32>
    tpu.vector_store %arg10[%c15_112, %c128_113], %94 {strides = array<i32>} : memref<16x2048xf32, #tpu.memory_space<vmem>>, vector<1x128xf32>,
    %c2_114 = arith.constant 2 : index
    %c0_115 = arith.constant 0 : index
    %96 = vector.load %arg9[%c2_114, %c0_115] : memref<100x128xf32, #tpu.memory_space<vmem>>, vector<1x128xf32>
    %c0_116 = arith.constant 0 : index
    %c256 = arith.constant 256 : index
    %97 = vector.load %arg10[%c0_116, %c256] : memref<16x2048xf32, #tpu.memory_space<vmem>>, vector<1x128xf32>
    tpu.vector_store %arg10[%c0_116, %c256], %96 {strides = array<i32>} : memref<16x2048xf32, #tpu.memory_space<vmem>>, vector<1x128xf32>,
    %c4_117 = arith.constant 4 : index
    %c0_118 = arith.constant 0 : index
    %98 = vector.load %arg9[%c4_117, %c0_118] : memref<100x128xf32, #tpu.memory_space<vmem>>, vector<1x128xf32>
    %c1_119 = arith.constant 1 : index
    %c256_120 = arith.constant 256 : index
    %99 = vector.load %arg10[%c1_119, %c256_120] : memref<16x2048xf32, #tpu.memory_space<vmem>>, vector<1x128xf32>
    tpu.vector_store %arg10[%c1_119, %c256_120], %98 {strides = array<i32>} : memref<16x2048xf32, #tpu.memory_space<vmem>>, vector<1x128xf32>,
    %c6_121 = arith.constant 6 : index
    %c0_122 = arith.constant 0 : index
    %100 = vector.load %arg9[%c6_121, %c0_122] : memref<100x128xf32, #tpu.memory_space<vmem>>, vector<1x128xf32>
    %c2_123 = arith.constant 2 : index
    %c256_124 = arith.constant 256 : index
    %101 = vector.load %arg10[%c2_123, %c256_124] : memref<16x2048xf32, #tpu.memory_space<vmem>>, vector<1x128xf32>
    tpu.vector_store %arg10[%c2_123, %c256_124], %100 {strides = array<i32>} : memref<16x2048xf32, #tpu.memory_space<vmem>>, vector<1x128xf32>,
    %c8_125 = arith.constant 8 : index
    %c0_126 = arith.constant 0 : index
    %102 = vector.load %arg9[%c8_125, %c0_126] : memref<100x128xf32, #tpu.memory_space<vmem>>, vector<1x128xf32>
    %c3_127 = arith.constant 3 : index
    %c256_128 = arith.constant 256 : index
    %103 = vector.load %arg10[%c3_127, %c256_128] : memref<16x2048xf32, #tpu.memory_space<vmem>>, vector<1x128xf32>
    tpu.vector_store %arg10[%c3_127, %c256_128], %102 {strides = array<i32>} : memref<16x2048xf32, #tpu.memory_space<vmem>>, vector<1x128xf32>,
    %c22_129 = arith.constant 22 : index
    %c0_130 = arith.constant 0 : index
    %104 = vector.load %arg9[%c22_129, %c0_130] : memref<100x128xf32, #tpu.memory_space<vmem>>, vector<1x128xf32>
    %c4_131 = arith.constant 4 : index
    %c256_132 = arith.constant 256 : index
    %105 = vector.load %arg10[%c4_131, %c256_132] : memref<16x2048xf32, #tpu.memory_space<vmem>>, vector<1x128xf32>
    tpu.vector_store %arg10[%c4_131, %c256_132], %104 {strides = array<i32>} : memref<16x2048xf32, #tpu.memory_space<vmem>>, vector<1x128xf32>,
    %c24_133 = arith.constant 24 : index
    %c0_134 = arith.constant 0 : index
    %106 = vector.load %arg9[%c24_133, %c0_134] : memref<100x128xf32, #tpu.memory_space<vmem>>, vector<1x128xf32>
    %c5_135 = arith.constant 5 : index
    %c256_136 = arith.constant 256 : index
    %107 = vector.load %arg10[%c5_135, %c256_136] : memref<16x2048xf32, #tpu.memory_space<vmem>>, vector<1x128xf32>
    tpu.vector_store %arg10[%c5_135, %c256_136], %106 {strides = array<i32>} : memref<16x2048xf32, #tpu.memory_space<vmem>>, vector<1x128xf32>,
    %c26_137 = arith.constant 26 : index
    %c0_138 = arith.constant 0 : index
    %108 = vector.load %arg9[%c26_137, %c0_138] : memref<100x128xf32, #tpu.memory_space<vmem>>, vector<1x128xf32>
    %c6_139 = arith.constant 6 : index
    %c256_140 = arith.constant 256 : index
    %109 = vector.load %arg10[%c6_139, %c256_140] : memref<16x2048xf32, #tpu.memory_space<vmem>>, vector<1x128xf32>
    tpu.vector_store %arg10[%c6_139, %c256_140], %108 {strides = array<i32>} : memref<16x2048xf32, #tpu.memory_space<vmem>>, vector<1x128xf32>,
    %c28 = arith.constant 28 : index
    %c0_141 = arith.constant 0 : index
    %110 = vector.load %arg9[%c28, %c0_141] : memref<100x128xf32, #tpu.memory_space<vmem>>, vector<1x128xf32>
    %c7_142 = arith.constant 7 : index
    %c256_143 = arith.constant 256 : index
    %111 = vector.load %arg10[%c7_142, %c256_143] : memref<16x2048xf32, #tpu.memory_space<vmem>>, vector<1x128xf32>
    tpu.vector_store %arg10[%c7_142, %c256_143], %110 {strides = array<i32>} : memref<16x2048xf32, #tpu.memory_space<vmem>>, vector<1x128xf32>,
    %c42_144 = arith.constant 42 : index
    %c0_145 = arith.constant 0 : index
    %112 = vector.load %arg9[%c42_144, %c0_145] : memref<100x128xf32, #tpu.memory_space<vmem>>, vector<1x128xf32>
    %c8_146 = arith.constant 8 : index
    %c256_147 = arith.constant 256 : index
    %113 = vector.load %arg10[%c8_146, %c256_147] : memref<16x2048xf32, #tpu.memory_space<vmem>>, vector<1x128xf32>
    tpu.vector_store %arg10[%c8_146, %c256_147], %112 {strides = array<i32>} : memref<16x2048xf32, #tpu.memory_space<vmem>>, vector<1x128xf32>,
    %c44_148 = arith.constant 44 : index
    %c0_149 = arith.constant 0 : index
    %114 = vector.load %arg9[%c44_148, %c0_149] : memref<100x128xf32, #tpu.memory_space<vmem>>, vector<1x128xf32>
    %c9_150 = arith.constant 9 : index
    %c256_151 = arith.constant 256 : index
    %115 = vector.load %arg10[%c9_150, %c256_151] : memref<16x2048xf32, #tpu.memory_space<vmem>>, vector<1x128xf32>
    tpu.vector_store %arg10[%c9_150, %c256_151], %114 {strides = array<i32>} : memref<16x2048xf32, #tpu.memory_space<vmem>>, vector<1x128xf32>,
    %c46_152 = arith.constant 46 : index
    %c0_153 = arith.constant 0 : index
    %116 = vector.load %arg9[%c46_152, %c0_153] : memref<100x128xf32, #tpu.memory_space<vmem>>, vector<1x128xf32>
    %c10_154 = arith.constant 10 : index
    %c256_155 = arith.constant 256 : index
    %117 = vector.load %arg10[%c10_154, %c256_155] : memref<16x2048xf32, #tpu.memory_space<vmem>>, vector<1x128xf32>
    tpu.vector_store %arg10[%c10_154, %c256_155], %116 {strides = array<i32>} : memref<16x2048xf32, #tpu.memory_space<vmem>>, vector<1x128xf32>,
    %c48 = arith.constant 48 : index
    %c0_156 = arith.constant 0 : index
    %118 = vector.load %arg9[%c48, %c0_156] : memref<100x128xf32, #tpu.memory_space<vmem>>, vector<1x128xf32>
    %c11_157 = arith.constant 11 : index
    %c256_158 = arith.constant 256 : index
    %119 = vector.load %arg10[%c11_157, %c256_158] : memref<16x2048xf32, #tpu.memory_space<vmem>>, vector<1x128xf32>
    tpu.vector_store %arg10[%c11_157, %c256_158], %118 {strides = array<i32>} : memref<16x2048xf32, #tpu.memory_space<vmem>>, vector<1x128xf32>,
    %c62_159 = arith.constant 62 : index
    %c0_160 = arith.constant 0 : index
    %120 = vector.load %arg9[%c62_159, %c0_160] : memref<100x128xf32, #tpu.memory_space<vmem>>, vector<1x128xf32>
    %c12_161 = arith.constant 12 : index
    %c256_162 = arith.constant 256 : index
    %121 = vector.load %arg10[%c12_161, %c256_162] : memref<16x2048xf32, #tpu.memory_space<vmem>>, vector<1x128xf32>
    tpu.vector_store %arg10[%c12_161, %c256_162], %120 {strides = array<i32>} : memref<16x2048xf32, #tpu.memory_space<vmem>>, vector<1x128xf32>,
    %c64_163 = arith.constant 64 : index
    %c0_164 = arith.constant 0 : index
    %122 = vector.load %arg9[%c64_163, %c0_164] : memref<100x128xf32, #tpu.memory_space<vmem>>, vector<1x128xf32>
    %c13_165 = arith.constant 13 : index
    %c256_166 = arith.constant 256 : index
    %123 = vector.load %arg10[%c13_165, %c256_166] : memref<16x2048xf32, #tpu.memory_space<vmem>>, vector<1x128xf32>
    tpu.vector_store %arg10[%c13_165, %c256_166], %122 {strides = array<i32>} : memref<16x2048xf32, #tpu.memory_space<vmem>>, vector<1x128xf32>,
    %c66_167 = arith.constant 66 : index
    %c0_168 = arith.constant 0 : index
    %124 = vector.load %arg9[%c66_167, %c0_168] : memref<100x128xf32, #tpu.memory_space<vmem>>, vector<1x128xf32>
    %c14_169 = arith.constant 14 : index
    %c256_170 = arith.constant 256 : index
    %125 = vector.load %arg10[%c14_169, %c256_170] : memref<16x2048xf32, #tpu.memory_space<vmem>>, vector<1x128xf32>
    tpu.vector_store %arg10[%c14_169, %c256_170], %124 {strides = array<i32>} : memref<16x2048xf32, #tpu.memory_space<vmem>>, vector<1x128xf32>,
    %c68 = arith.constant 68 : index
    %c0_171 = arith.constant 0 : index
    %126 = vector.load %arg9[%c68, %c0_171] : memref<100x128xf32, #tpu.memory_space<vmem>>, vector<1x128xf32>
    %c15_172 = arith.constant 15 : index
    %c256_173 = arith.constant 256 : index
    %127 = vector.load %arg10[%c15_172, %c256_173] : memref<16x2048xf32, #tpu.memory_space<vmem>>, vector<1x128xf32>
    tpu.vector_store %arg10[%c15_172, %c256_173], %126 {strides = array<i32>} : memref<16x2048xf32, #tpu.memory_space<vmem>>, vector<1x128xf32>,
    %c3_174 = arith.constant 3 : index
    %c0_175 = arith.constant 0 : index
    %128 = vector.load %arg9[%c3_174, %c0_175] : memref<100x128xf32, #tpu.memory_space<vmem>>, vector<1x128xf32>
    %c0_176 = arith.constant 0 : index
    %c384 = arith.constant 384 : index
    %129 = vector.load %arg10[%c0_176, %c384] : memref<16x2048xf32, #tpu.memory_space<vmem>>, vector<1x128xf32>
    tpu.vector_store %arg10[%c0_176, %c384], %128 {strides = array<i32>} : memref<16x2048xf32, #tpu.memory_space<vmem>>, vector<1x128xf32>,
    %c5_177 = arith.constant 5 : index
    %c0_178 = arith.constant 0 : index
    %130 = vector.load %arg9[%c5_177, %c0_178] : memref<100x128xf32, #tpu.memory_space<vmem>>, vector<1x128xf32>
    %c1_179 = arith.constant 1 : index
    %c384_180 = arith.constant 384 : index
    %131 = vector.load %arg10[%c1_179, %c384_180] : memref<16x2048xf32, #tpu.memory_space<vmem>>, vector<1x128xf32>
    tpu.vector_store %arg10[%c1_179, %c384_180], %130 {strides = array<i32>} : memref<16x2048xf32, #tpu.memory_space<vmem>>, vector<1x128xf32>,
    %c7_181 = arith.constant 7 : index
    %c0_182 = arith.constant 0 : index
    %132 = vector.load %arg9[%c7_181, %c0_182] : memref<100x128xf32, #tpu.memory_space<vmem>>, vector<1x128xf32>
    %c2_183 = arith.constant 2 : index
    %c384_184 = arith.constant 384 : index
    %133 = vector.load %arg10[%c2_183, %c384_184] : memref<16x2048xf32, #tpu.memory_space<vmem>>, vector<1x128xf32>
    tpu.vector_store %arg10[%c2_183, %c384_184], %132 {strides = array<i32>} : memref<16x2048xf32, #tpu.memory_space<vmem>>, vector<1x128xf32>,
    %c9_185 = arith.constant 9 : index
    %c0_186 = arith.constant 0 : index
    %134 = vector.load %arg9[%c9_185, %c0_186] : memref<100x128xf32, #tpu.memory_space<vmem>>, vector<1x128xf32>
    %c3_187 = arith.constant 3 : index
    %c384_188 = arith.constant 384 : index
    %135 = vector.load %arg10[%c3_187, %c384_188] : memref<16x2048xf32, #tpu.memory_space<vmem>>, vector<1x128xf32>
    tpu.vector_store %arg10[%c3_187, %c384_188], %134 {strides = array<i32>} : memref<16x2048xf32, #tpu.memory_space<vmem>>, vector<1x128xf32>,
    %c23_189 = arith.constant 23 : index
    %c0_190 = arith.constant 0 : index
    %136 = vector.load %arg9[%c23_189, %c0_190] : memref<100x128xf32, #tpu.memory_space<vmem>>, vector<1x128xf32>
    %c4_191 = arith.constant 4 : index
    %c384_192 = arith.constant 384 : index
    %137 = vector.load %arg10[%c4_191, %c384_192] : memref<16x2048xf32, #tpu.memory_space<vmem>>, vector<1x128xf32>
    tpu.vector_store %arg10[%c4_191, %c384_192], %136 {strides = array<i32>} : memref<16x2048xf32, #tpu.memory_space<vmem>>, vector<1x128xf32>,
    %c25_193 = arith.constant 25 : index
    %c0_194 = arith.constant 0 : index
    %138 = vector.load %arg9[%c25_193, %c0_194] : memref<100x128xf32, #tpu.memory_space<vmem>>, vector<1x128xf32>
    %c5_195 = arith.constant 5 : index
    %c384_196 = arith.constant 384 : index
    %139 = vector.load %arg10[%c5_195, %c384_196] : memref<16x2048xf32, #tpu.memory_space<vmem>>, vector<1x128xf32>
    tpu.vector_store %arg10[%c5_195, %c384_196], %138 {strides = array<i32>} : memref<16x2048xf32, #tpu.memory_space<vmem>>, vector<1x128xf32>,
    %c27_197 = arith.constant 27 : index
    %c0_198 = arith.constant 0 : index
    %140 = vector.load %arg9[%c27_197, %c0_198] : memref<100x128xf32, #tpu.memory_space<vmem>>, vector<1x128xf32>
    %c6_199 = arith.constant 6 : index
    %c384_200 = arith.constant 384 : index
    %141 = vector.load %arg10[%c6_199, %c384_200] : memref<16x2048xf32, #tpu.memory_space<vmem>>, vector<1x128xf32>
    tpu.vector_store %arg10[%c6_199, %c384_200], %140 {strides = array<i32>} : memref<16x2048xf32, #tpu.memory_space<vmem>>, vector<1x128xf32>,
    %c29 = arith.constant 29 : index
    %c0_201 = arith.constant 0 : index
    %142 = vector.load %arg9[%c29, %c0_201] : memref<100x128xf32, #tpu.memory_space<vmem>>, vector<1x128xf32>
    %c7_202 = arith.constant 7 : index
    %c384_203 = arith.constant 384 : index
    %143 = vector.load %arg10[%c7_202, %c384_203] : memref<16x2048xf32, #tpu.memory_space<vmem>>, vector<1x128xf32>
    tpu.vector_store %arg10[%c7_202, %c384_203], %142 {strides = array<i32>} : memref<16x2048xf32, #tpu.memory_space<vmem>>, vector<1x128xf32>,
    %c43_204 = arith.constant 43 : index
    %c0_205 = arith.constant 0 : index
    %144 = vector.load %arg9[%c43_204, %c0_205] : memref<100x128xf32, #tpu.memory_space<vmem>>, vector<1x128xf32>
    %c8_206 = arith.constant 8 : index
    %c384_207 = arith.constant 384 : index
    %145 = vector.load %arg10[%c8_206, %c384_207] : memref<16x2048xf32, #tpu.memory_space<vmem>>, vector<1x128xf32>
    tpu.vector_store %arg10[%c8_206, %c384_207], %144 {strides = array<i32>} : memref<16x2048xf32, #tpu.memory_space<vmem>>, vector<1x128xf32>,
    %c45_208 = arith.constant 45 : index
    %c0_209 = arith.constant 0 : index
    %146 = vector.load %arg9[%c45_208, %c0_209] : memref<100x128xf32, #tpu.memory_space<vmem>>, vector<1x128xf32>
    %c9_210 = arith.constant 9 : index
    %c384_211 = arith.constant 384 : index
    %147 = vector.load %arg10[%c9_210, %c384_211] : memref<16x2048xf32, #tpu.memory_space<vmem>>, vector<1x128xf32>
    tpu.vector_store %arg10[%c9_210, %c384_211], %146 {strides = array<i32>} : memref<16x2048xf32, #tpu.memory_space<vmem>>, vector<1x128xf32>,
    %c47_212 = arith.constant 47 : index
    %c0_213 = arith.constant 0 : index
    %148 = vector.load %arg9[%c47_212, %c0_213] : memref<100x128xf32, #tpu.memory_space<vmem>>, vector<1x128xf32>
    %c10_214 = arith.constant 10 : index
    %c384_215 = arith.constant 384 : index
    %149 = vector.load %arg10[%c10_214, %c384_215] : memref<16x2048xf32, #tpu.memory_space<vmem>>, vector<1x128xf32>
    tpu.vector_store %arg10[%c10_214, %c384_215], %148 {strides = array<i32>} : memref<16x2048xf32, #tpu.memory_space<vmem>>, vector<1x128xf32>,
    %c49 = arith.constant 49 : index
    %c0_216 = arith.constant 0 : index
    %150 = vector.load %arg9[%c49, %c0_216] : memref<100x128xf32, #tpu.memory_space<vmem>>, vector<1x128xf32>
    %c11_217 = arith.constant 11 : index
    %c384_218 = arith.constant 384 : index
    %151 = vector.load %arg10[%c11_217, %c384_218] : memref<16x2048xf32, #tpu.memory_space<vmem>>, vector<1x128xf32>
    tpu.vector_store %arg10[%c11_217, %c384_218], %150 {strides = array<i32>} : memref<16x2048xf32, #tpu.memory_space<vmem>>, vector<1x128xf32>,
    %c63_219 = arith.constant 63 : index
    %c0_220 = arith.constant 0 : index
    %152 = vector.load %arg9[%c63_219, %c0_220] : memref<100x128xf32, #tpu.memory_space<vmem>>, vector<1x128xf32>
    %c12_221 = arith.constant 12 : index
    %c384_222 = arith.constant 384 : index
    %153 = vector.load %arg10[%c12_221, %c384_222] : memref<16x2048xf32, #tpu.memory_space<vmem>>, vector<1x128xf32>
    tpu.vector_store %arg10[%c12_221, %c384_222], %152 {strides = array<i32>} : memref<16x2048xf32, #tpu.memory_space<vmem>>, vector<1x128xf32>,
    %c65_223 = arith.constant 65 : index
    %c0_224 = arith.constant 0 : index
    %154 = vector.load %arg9[%c65_223, %c0_224] : memref<100x128xf32, #tpu.memory_space<vmem>>, vector<1x128xf32>
    %c13_225 = arith.constant 13 : index
    %c384_226 = arith.constant 384 : index
    %155 = vector.load %arg10[%c13_225, %c384_226] : memref<16x2048xf32, #tpu.memory_space<vmem>>, vector<1x128xf32>
    tpu.vector_store %arg10[%c13_225, %c384_226], %154 {strides = array<i32>} : memref<16x2048xf32, #tpu.memory_space<vmem>>, vector<1x128xf32>,
    %c67_227 = arith.constant 67 : index
    %c0_228 = arith.constant 0 : index
    %156 = vector.load %arg9[%c67_227, %c0_228] : memref<100x128xf32, #tpu.memory_space<vmem>>, vector<1x128xf32>
    %c14_229 = arith.constant 14 : index
    %c384_230 = arith.constant 384 : index
    %157 = vector.load %arg10[%c14_229, %c384_230] : memref<16x2048xf32, #tpu.memory_space<vmem>>, vector<1x128xf32>
    tpu.vector_store %arg10[%c14_229, %c384_230], %156 {strides = array<i32>} : memref<16x2048xf32, #tpu.memory_space<vmem>>, vector<1x128xf32>,
    %c69 = arith.constant 69 : index
    %c0_231 = arith.constant 0 : index
    %158 = vector.load %arg9[%c69, %c0_231] : memref<100x128xf32, #tpu.memory_space<vmem>>, vector<1x128xf32>
    %c15_232 = arith.constant 15 : index
    %c384_233 = arith.constant 384 : index
    %159 = vector.load %arg10[%c15_232, %c384_233] : memref<16x2048xf32, #tpu.memory_space<vmem>>, vector<1x128xf32>
    tpu.vector_store %arg10[%c15_232, %c384_233], %158 {strides = array<i32>} : memref<16x2048xf32, #tpu.memory_space<vmem>>, vector<1x128xf32>,
    %c10_234 = arith.constant 10 : index
    %c0_235 = arith.constant 0 : index
    %160 = vector.load %arg9[%c10_234, %c0_235] : memref<100x128xf32, #tpu.memory_space<vmem>>, vector<1x128xf32>
    %c0_236 = arith.constant 0 : index
    %c512 = arith.constant 512 : index
    %161 = vector.load %arg10[%c0_236, %c512] : memref<16x2048xf32, #tpu.memory_space<vmem>>, vector<1x128xf32>
    tpu.vector_store %arg10[%c0_236, %c512], %160 {strides = array<i32>} : memref<16x2048xf32, #tpu.memory_space<vmem>>, vector<1x128xf32>,
    %c12_237 = arith.constant 12 : index
    %c0_238 = arith.constant 0 : index
    %162 = vector.load %arg9[%c12_237, %c0_238] : memref<100x128xf32, #tpu.memory_space<vmem>>, vector<1x128xf32>
    %c1_239 = arith.constant 1 : index
    %c512_240 = arith.constant 512 : index
    %163 = vector.load %arg10[%c1_239, %c512_240] : memref<16x2048xf32, #tpu.memory_space<vmem>>, vector<1x128xf32>
    tpu.vector_store %arg10[%c1_239, %c512_240], %162 {strides = array<i32>} : memref<16x2048xf32, #tpu.memory_space<vmem>>, vector<1x128xf32>,
    %c14_241 = arith.constant 14 : index
    %c0_242 = arith.constant 0 : index
    %164 = vector.load %arg9[%c14_241, %c0_242] : memref<100x128xf32, #tpu.memory_space<vmem>>, vector<1x128xf32>
    %c2_243 = arith.constant 2 : index
    %c512_244 = arith.constant 512 : index
    %165 = vector.load %arg10[%c2_243, %c512_244] : memref<16x2048xf32, #tpu.memory_space<vmem>>, vector<1x128xf32>
    tpu.vector_store %arg10[%c2_243, %c512_244], %164 {strides = array<i32>} : memref<16x2048xf32, #tpu.memory_space<vmem>>, vector<1x128xf32>,
    %c16 = arith.constant 16 : index
    %c0_245 = arith.constant 0 : index
    %166 = vector.load %arg9[%c16, %c0_245] : memref<100x128xf32, #tpu.memory_space<vmem>>, vector<1x128xf32>
    %c3_246 = arith.constant 3 : index
    %c512_247 = arith.constant 512 : index
    %167 = vector.load %arg10[%c3_246, %c512_247] : memref<16x2048xf32, #tpu.memory_space<vmem>>, vector<1x128xf32>
    tpu.vector_store %arg10[%c3_246, %c512_247], %166 {strides = array<i32>} : memref<16x2048xf32, #tpu.memory_space<vmem>>, vector<1x128xf32>,
    %c30 = arith.constant 30 : index
    %c0_248 = arith.constant 0 : index
    %168 = vector.load %arg9[%c30, %c0_248] : memref<100x128xf32, #tpu.memory_space<vmem>>, vector<1x128xf32>
    %c4_249 = arith.constant 4 : index
    %c512_250 = arith.constant 512 : index
    %169 = vector.load %arg10[%c4_249, %c512_250] : memref<16x2048xf32, #tpu.memory_space<vmem>>, vector<1x128xf32>
    tpu.vector_store %arg10[%c4_249, %c512_250], %168 {strides = array<i32>} : memref<16x2048xf32, #tpu.memory_space<vmem>>, vector<1x128xf32>,
    %c32 = arith.constant 32 : index
    %c0_251 = arith.constant 0 : index
    %170 = vector.load %arg9[%c32, %c0_251] : memref<100x128xf32, #tpu.memory_space<vmem>>, vector<1x128xf32>
    %c5_252 = arith.constant 5 : index
    %c512_253 = arith.constant 512 : index
    %171 = vector.load %arg10[%c5_252, %c512_253] : memref<16x2048xf32, #tpu.memory_space<vmem>>, vector<1x128xf32>
    tpu.vector_store %arg10[%c5_252, %c512_253], %170 {strides = array<i32>} : memref<16x2048xf32, #tpu.memory_space<vmem>>, vector<1x128xf32>,
    %c34 = arith.constant 34 : index
    %c0_254 = arith.constant 0 : index
    %172 = vector.load %arg9[%c34, %c0_254] : memref<100x128xf32, #tpu.memory_space<vmem>>, vector<1x128xf32>
    %c6_255 = arith.constant 6 : index
    %c512_256 = arith.constant 512 : index
    %173 = vector.load %arg10[%c6_255, %c512_256] : memref<16x2048xf32, #tpu.memory_space<vmem>>, vector<1x128xf32>
    tpu.vector_store %arg10[%c6_255, %c512_256], %172 {strides = array<i32>} : memref<16x2048xf32, #tpu.memory_space<vmem>>, vector<1x128xf32>,
    %c36 = arith.constant 36 : index
    %c0_257 = arith.constant 0 : index
    %174 = vector.load %arg9[%c36, %c0_257] : memref<100x128xf32, #tpu.memory_space<vmem>>, vector<1x128xf32>
    %c7_258 = arith.constant 7 : index
    %c512_259 = arith.constant 512 : index
    %175 = vector.load %arg10[%c7_258, %c512_259] : memref<16x2048xf32, #tpu.memory_space<vmem>>, vector<1x128xf32>
    tpu.vector_store %arg10[%c7_258, %c512_259], %174 {strides = array<i32>} : memref<16x2048xf32, #tpu.memory_space<vmem>>, vector<1x128xf32>,
    %c50 = arith.constant 50 : index
    %c0_260 = arith.constant 0 : index
    %176 = vector.load %arg9[%c50, %c0_260] : memref<100x128xf32, #tpu.memory_space<vmem>>, vector<1x128xf32>
    %c8_261 = arith.constant 8 : index
    %c512_262 = arith.constant 512 : index
    %177 = vector.load %arg10[%c8_261, %c512_262] : memref<16x2048xf32, #tpu.memory_space<vmem>>, vector<1x128xf32>
    tpu.vector_store %arg10[%c8_261, %c512_262], %176 {strides = array<i32>} : memref<16x2048xf32, #tpu.memory_space<vmem>>, vector<1x128xf32>,
    %c52 = arith.constant 52 : index
    %c0_263 = arith.constant 0 : index
    %178 = vector.load %arg9[%c52, %c0_263] : memref<100x128xf32, #tpu.memory_space<vmem>>, vector<1x128xf32>
    %c9_264 = arith.constant 9 : index
    %c512_265 = arith.constant 512 : index
    %179 = vector.load %arg10[%c9_264, %c512_265] : memref<16x2048xf32, #tpu.memory_space<vmem>>, vector<1x128xf32>
    tpu.vector_store %arg10[%c9_264, %c512_265], %178 {strides = array<i32>} : memref<16x2048xf32, #tpu.memory_space<vmem>>, vector<1x128xf32>,
    %c54 = arith.constant 54 : index
    %c0_266 = arith.constant 0 : index
    %180 = vector.load %arg9[%c54, %c0_266] : memref<100x128xf32, #tpu.memory_space<vmem>>, vector<1x128xf32>
    %c10_267 = arith.constant 10 : index
    %c512_268 = arith.constant 512 : index
    %181 = vector.load %arg10[%c10_267, %c512_268] : memref<16x2048xf32, #tpu.memory_space<vmem>>, vector<1x128xf32>
    tpu.vector_store %arg10[%c10_267, %c512_268], %180 {strides = array<i32>} : memref<16x2048xf32, #tpu.memory_space<vmem>>, vector<1x128xf32>,
    %c56 = arith.constant 56 : index
    %c0_269 = arith.constant 0 : index
    %182 = vector.load %arg9[%c56, %c0_269] : memref<100x128xf32, #tpu.memory_space<vmem>>, vector<1x128xf32>
    %c11_270 = arith.constant 11 : index
    %c512_271 = arith.constant 512 : index
    %183 = vector.load %arg10[%c11_270, %c512_271] : memref<16x2048xf32, #tpu.memory_space<vmem>>, vector<1x128xf32>
    tpu.vector_store %arg10[%c11_270, %c512_271], %182 {strides = array<i32>} : memref<16x2048xf32, #tpu.memory_space<vmem>>, vector<1x128xf32>,
    %c70 = arith.constant 70 : index
    %c0_272 = arith.constant 0 : index
    %184 = vector.load %arg9[%c70, %c0_272] : memref<100x128xf32, #tpu.memory_space<vmem>>, vector<1x128xf32>
    %c12_273 = arith.constant 12 : index
    %c512_274 = arith.constant 512 : index
    %185 = vector.load %arg10[%c12_273, %c512_274] : memref<16x2048xf32, #tpu.memory_space<vmem>>, vector<1x128xf32>
    tpu.vector_store %arg10[%c12_273, %c512_274], %184 {strides = array<i32>} : memref<16x2048xf32, #tpu.memory_space<vmem>>, vector<1x128xf32>,
    %c72 = arith.constant 72 : index
    %c0_275 = arith.constant 0 : index
    %186 = vector.load %arg9[%c72, %c0_275] : memref<100x128xf32, #tpu.memory_space<vmem>>, vector<1x128xf32>
    %c13_276 = arith.constant 13 : index
    %c512_277 = arith.constant 512 : index
    %187 = vector.load %arg10[%c13_276, %c512_277] : memref<16x2048xf32, #tpu.memory_space<vmem>>, vector<1x128xf32>
    tpu.vector_store %arg10[%c13_276, %c512_277], %186 {strides = array<i32>} : memref<16x2048xf32, #tpu.memory_space<vmem>>, vector<1x128xf32>,
    %c74 = arith.constant 74 : index
    %c0_278 = arith.constant 0 : index
    %188 = vector.load %arg9[%c74, %c0_278] : memref<100x128xf32, #tpu.memory_space<vmem>>, vector<1x128xf32>
    %c14_279 = arith.constant 14 : index
    %c512_280 = arith.constant 512 : index
    %189 = vector.load %arg10[%c14_279, %c512_280] : memref<16x2048xf32, #tpu.memory_space<vmem>>, vector<1x128xf32>
    tpu.vector_store %arg10[%c14_279, %c512_280], %188 {strides = array<i32>} : memref<16x2048xf32, #tpu.memory_space<vmem>>, vector<1x128xf32>,
    %c76 = arith.constant 76 : index
    %c0_281 = arith.constant 0 : index
    %190 = vector.load %arg9[%c76, %c0_281] : memref<100x128xf32, #tpu.memory_space<vmem>>, vector<1x128xf32>
    %c15_282 = arith.constant 15 : index
    %c512_283 = arith.constant 512 : index
    %191 = vector.load %arg10[%c15_282, %c512_283] : memref<16x2048xf32, #tpu.memory_space<vmem>>, vector<1x128xf32>
    tpu.vector_store %arg10[%c15_282, %c512_283], %190 {strides = array<i32>} : memref<16x2048xf32, #tpu.memory_space<vmem>>, vector<1x128xf32>,
    %c11_284 = arith.constant 11 : index
    %c0_285 = arith.constant 0 : index
    %192 = vector.load %arg9[%c11_284, %c0_285] : memref<100x128xf32, #tpu.memory_space<vmem>>, vector<1x128xf32>
    %c0_286 = arith.constant 0 : index
    %c640 = arith.constant 640 : index
    %193 = vector.load %arg10[%c0_286, %c640] : memref<16x2048xf32, #tpu.memory_space<vmem>>, vector<1x128xf32>
    tpu.vector_store %arg10[%c0_286, %c640], %192 {strides = array<i32>} : memref<16x2048xf32, #tpu.memory_space<vmem>>, vector<1x128xf32>,
    %c13_287 = arith.constant 13 : index
    %c0_288 = arith.constant 0 : index
    %194 = vector.load %arg9[%c13_287, %c0_288] : memref<100x128xf32, #tpu.memory_space<vmem>>, vector<1x128xf32>
    %c1_289 = arith.constant 1 : index
    %c640_290 = arith.constant 640 : index
    %195 = vector.load %arg10[%c1_289, %c640_290] : memref<16x2048xf32, #tpu.memory_space<vmem>>, vector<1x128xf32>
    tpu.vector_store %arg10[%c1_289, %c640_290], %194 {strides = array<i32>} : memref<16x2048xf32, #tpu.memory_space<vmem>>, vector<1x128xf32>,
    %c15_291 = arith.constant 15 : index
    %c0_292 = arith.constant 0 : index
    %196 = vector.load %arg9[%c15_291, %c0_292] : memref<100x128xf32, #tpu.memory_space<vmem>>, vector<1x128xf32>
    %c2_293 = arith.constant 2 : index
    %c640_294 = arith.constant 640 : index
    %197 = vector.load %arg10[%c2_293, %c640_294] : memref<16x2048xf32, #tpu.memory_space<vmem>>, vector<1x128xf32>
    tpu.vector_store %arg10[%c2_293, %c640_294], %196 {strides = array<i32>} : memref<16x2048xf32, #tpu.memory_space<vmem>>, vector<1x128xf32>,
    %c17 = arith.constant 17 : index
    %c0_295 = arith.constant 0 : index
    %198 = vector.load %arg9[%c17, %c0_295] : memref<100x128xf32, #tpu.memory_space<vmem>>, vector<1x128xf32>
    %c3_296 = arith.constant 3 : index
    %c640_297 = arith.constant 640 : index
    %199 = vector.load %arg10[%c3_296, %c640_297] : memref<16x2048xf32, #tpu.memory_space<vmem>>, vector<1x128xf32>
    tpu.vector_store %arg10[%c3_296, %c640_297], %198 {strides = array<i32>} : memref<16x2048xf32, #tpu.memory_space<vmem>>, vector<1x128xf32>,
    %c31_298 = arith.constant 31 : index
    %c0_299 = arith.constant 0 : index
    %200 = vector.load %arg9[%c31_298, %c0_299] : memref<100x128xf32, #tpu.memory_space<vmem>>, vector<1x128xf32>
    %c4_300 = arith.constant 4 : index
    %c640_301 = arith.constant 640 : index
    %201 = vector.load %arg10[%c4_300, %c640_301] : memref<16x2048xf32, #tpu.memory_space<vmem>>, vector<1x128xf32>
    tpu.vector_store %arg10[%c4_300, %c640_301], %200 {strides = array<i32>} : memref<16x2048xf32, #tpu.memory_space<vmem>>, vector<1x128xf32>,
    %c33 = arith.constant 33 : index
    %c0_302 = arith.constant 0 : index
    %202 = vector.load %arg9[%c33, %c0_302] : memref<100x128xf32, #tpu.memory_space<vmem>>, vector<1x128xf32>
    %c5_303 = arith.constant 5 : index
    %c640_304 = arith.constant 640 : index
    %203 = vector.load %arg10[%c5_303, %c640_304] : memref<16x2048xf32, #tpu.memory_space<vmem>>, vector<1x128xf32>
    tpu.vector_store %arg10[%c5_303, %c640_304], %202 {strides = array<i32>} : memref<16x2048xf32, #tpu.memory_space<vmem>>, vector<1x128xf32>,
    %c35 = arith.constant 35 : index
    %c0_305 = arith.constant 0 : index
    %204 = vector.load %arg9[%c35, %c0_305] : memref<100x128xf32, #tpu.memory_space<vmem>>, vector<1x128xf32>
    %c6_306 = arith.constant 6 : index
    %c640_307 = arith.constant 640 : index
    %205 = vector.load %arg10[%c6_306, %c640_307] : memref<16x2048xf32, #tpu.memory_space<vmem>>, vector<1x128xf32>
    tpu.vector_store %arg10[%c6_306, %c640_307], %204 {strides = array<i32>} : memref<16x2048xf32, #tpu.memory_space<vmem>>, vector<1x128xf32>,
    %c37 = arith.constant 37 : index
    %c0_308 = arith.constant 0 : index
    %206 = vector.load %arg9[%c37, %c0_308] : memref<100x128xf32, #tpu.memory_space<vmem>>, vector<1x128xf32>
    %c7_309 = arith.constant 7 : index
    %c640_310 = arith.constant 640 : index
    %207 = vector.load %arg10[%c7_309, %c640_310] : memref<16x2048xf32, #tpu.memory_space<vmem>>, vector<1x128xf32>
    tpu.vector_store %arg10[%c7_309, %c640_310], %206 {strides = array<i32>} : memref<16x2048xf32, #tpu.memory_space<vmem>>, vector<1x128xf32>,
    %c51_311 = arith.constant 51 : index
    %c0_312 = arith.constant 0 : index
    %208 = vector.load %arg9[%c51_311, %c0_312] : memref<100x128xf32, #tpu.memory_space<vmem>>, vector<1x128xf32>
    %c8_313 = arith.constant 8 : index
    %c640_314 = arith.constant 640 : index
    %209 = vector.load %arg10[%c8_313, %c640_314] : memref<16x2048xf32, #tpu.memory_space<vmem>>, vector<1x128xf32>
    tpu.vector_store %arg10[%c8_313, %c640_314], %208 {strides = array<i32>} : memref<16x2048xf32, #tpu.memory_space<vmem>>, vector<1x128xf32>,
    %c53 = arith.constant 53 : index
    %c0_315 = arith.constant 0 : index
    %210 = vector.load %arg9[%c53, %c0_315] : memref<100x128xf32, #tpu.memory_space<vmem>>, vector<1x128xf32>
    %c9_316 = arith.constant 9 : index
    %c640_317 = arith.constant 640 : index
    %211 = vector.load %arg10[%c9_316, %c640_317] : memref<16x2048xf32, #tpu.memory_space<vmem>>, vector<1x128xf32>
    tpu.vector_store %arg10[%c9_316, %c640_317], %210 {strides = array<i32>} : memref<16x2048xf32, #tpu.memory_space<vmem>>, vector<1x128xf32>,
    %c55 = arith.constant 55 : index
    %c0_318 = arith.constant 0 : index
    %212 = vector.load %arg9[%c55, %c0_318] : memref<100x128xf32, #tpu.memory_space<vmem>>, vector<1x128xf32>
    %c10_319 = arith.constant 10 : index
    %c640_320 = arith.constant 640 : index
    %213 = vector.load %arg10[%c10_319, %c640_320] : memref<16x2048xf32, #tpu.memory_space<vmem>>, vector<1x128xf32>
    tpu.vector_store %arg10[%c10_319, %c640_320], %212 {strides = array<i32>} : memref<16x2048xf32, #tpu.memory_space<vmem>>, vector<1x128xf32>,
    %c57 = arith.constant 57 : index
    %c0_321 = arith.constant 0 : index
    %214 = vector.load %arg9[%c57, %c0_321] : memref<100x128xf32, #tpu.memory_space<vmem>>, vector<1x128xf32>
    %c11_322 = arith.constant 11 : index
    %c640_323 = arith.constant 640 : index
    %215 = vector.load %arg10[%c11_322, %c640_323] : memref<16x2048xf32, #tpu.memory_space<vmem>>, vector<1x128xf32>
    tpu.vector_store %arg10[%c11_322, %c640_323], %214 {strides = array<i32>} : memref<16x2048xf32, #tpu.memory_space<vmem>>, vector<1x128xf32>,
    %c71_324 = arith.constant 71 : index
    %c0_325 = arith.constant 0 : index
    %216 = vector.load %arg9[%c71_324, %c0_325] : memref<100x128xf32, #tpu.memory_space<vmem>>, vector<1x128xf32>
    %c12_326 = arith.constant 12 : index
    %c640_327 = arith.constant 640 : index
    %217 = vector.load %arg10[%c12_326, %c640_327] : memref<16x2048xf32, #tpu.memory_space<vmem>>, vector<1x128xf32>
    tpu.vector_store %arg10[%c12_326, %c640_327], %216 {strides = array<i32>} : memref<16x2048xf32, #tpu.memory_space<vmem>>, vector<1x128xf32>,
    %c73 = arith.constant 73 : index
    %c0_328 = arith.constant 0 : index
    %218 = vector.load %arg9[%c73, %c0_328] : memref<100x128xf32, #tpu.memory_space<vmem>>, vector<1x128xf32>
    %c13_329 = arith.constant 13 : index
    %c640_330 = arith.constant 640 : index
    %219 = vector.load %arg10[%c13_329, %c640_330] : memref<16x2048xf32, #tpu.memory_space<vmem>>, vector<1x128xf32>
    tpu.vector_store %arg10[%c13_329, %c640_330], %218 {strides = array<i32>} : memref<16x2048xf32, #tpu.memory_space<vmem>>, vector<1x128xf32>,
    %c75 = arith.constant 75 : index
    %c0_331 = arith.constant 0 : index
    %220 = vector.load %arg9[%c75, %c0_331] : memref<100x128xf32, #tpu.memory_space<vmem>>, vector<1x128xf32>
    %c14_332 = arith.constant 14 : index
    %c640_333 = arith.constant 640 : index
    %221 = vector.load %arg10[%c14_332, %c640_333] : memref<16x2048xf32, #tpu.memory_space<vmem>>, vector<1x128xf32>
    tpu.vector_store %arg10[%c14_332, %c640_333], %220 {strides = array<i32>} : memref<16x2048xf32, #tpu.memory_space<vmem>>, vector<1x128xf32>,
    %c77 = arith.constant 77 : index
    %c0_334 = arith.constant 0 : index
    %222 = vector.load %arg9[%c77, %c0_334] : memref<100x128xf32, #tpu.memory_space<vmem>>, vector<1x128xf32>
    %c15_335 = arith.constant 15 : index
    %c640_336 = arith.constant 640 : index
    %223 = vector.load %arg10[%c15_335, %c640_336] : memref<16x2048xf32, #tpu.memory_space<vmem>>, vector<1x128xf32>
    tpu.vector_store %arg10[%c15_335, %c640_336], %222 {strides = array<i32>} : memref<16x2048xf32, #tpu.memory_space<vmem>>, vector<1x128xf32>,
    %c12_337 = arith.constant 12 : index
    %c0_338 = arith.constant 0 : index
    %224 = vector.load %arg9[%c12_337, %c0_338] : memref<100x128xf32, #tpu.memory_space<vmem>>, vector<1x128xf32>
    %c0_339 = arith.constant 0 : index
    %c768 = arith.constant 768 : index
    %225 = vector.load %arg10[%c0_339, %c768] : memref<16x2048xf32, #tpu.memory_space<vmem>>, vector<1x128xf32>
    tpu.vector_store %arg10[%c0_339, %c768], %224 {strides = array<i32>} : memref<16x2048xf32, #tpu.memory_space<vmem>>, vector<1x128xf32>,
    %c14_340 = arith.constant 14 : index
    %c0_341 = arith.constant 0 : index
    %226 = vector.load %arg9[%c14_340, %c0_341] : memref<100x128xf32, #tpu.memory_space<vmem>>, vector<1x128xf32>
    %c1_342 = arith.constant 1 : index
    %c768_343 = arith.constant 768 : index
    %227 = vector.load %arg10[%c1_342, %c768_343] : memref<16x2048xf32, #tpu.memory_space<vmem>>, vector<1x128xf32>
    tpu.vector_store %arg10[%c1_342, %c768_343], %226 {strides = array<i32>} : memref<16x2048xf32, #tpu.memory_space<vmem>>, vector<1x128xf32>,
    %c16_344 = arith.constant 16 : index
    %c0_345 = arith.constant 0 : index
    %228 = vector.load %arg9[%c16_344, %c0_345] : memref<100x128xf32, #tpu.memory_space<vmem>>, vector<1x128xf32>
    %c2_346 = arith.constant 2 : index
    %c768_347 = arith.constant 768 : index
    %229 = vector.load %arg10[%c2_346, %c768_347] : memref<16x2048xf32, #tpu.memory_space<vmem>>, vector<1x128xf32>
    tpu.vector_store %arg10[%c2_346, %c768_347], %228 {strides = array<i32>} : memref<16x2048xf32, #tpu.memory_space<vmem>>, vector<1x128xf32>,
    %c18 = arith.constant 18 : index
    %c0_348 = arith.constant 0 : index
    %230 = vector.load %arg9[%c18, %c0_348] : memref<100x128xf32, #tpu.memory_space<vmem>>, vector<1x128xf32>
    %c3_349 = arith.constant 3 : index
    %c768_350 = arith.constant 768 : index
    %231 = vector.load %arg10[%c3_349, %c768_350] : memref<16x2048xf32, #tpu.memory_space<vmem>>, vector<1x128xf32>
    tpu.vector_store %arg10[%c3_349, %c768_350], %230 {strides = array<i32>} : memref<16x2048xf32, #tpu.memory_space<vmem>>, vector<1x128xf32>,
    %c32_351 = arith.constant 32 : index
    %c0_352 = arith.constant 0 : index
    %232 = vector.load %arg9[%c32_351, %c0_352] : memref<100x128xf32, #tpu.memory_space<vmem>>, vector<1x128xf32>
    %c4_353 = arith.constant 4 : index
    %c768_354 = arith.constant 768 : index
    %233 = vector.load %arg10[%c4_353, %c768_354] : memref<16x2048xf32, #tpu.memory_space<vmem>>, vector<1x128xf32>
    tpu.vector_store %arg10[%c4_353, %c768_354], %232 {strides = array<i32>} : memref<16x2048xf32, #tpu.memory_space<vmem>>, vector<1x128xf32>,
    %c34_355 = arith.constant 34 : index
    %c0_356 = arith.constant 0 : index
    %234 = vector.load %arg9[%c34_355, %c0_356] : memref<100x128xf32, #tpu.memory_space<vmem>>, vector<1x128xf32>
    %c5_357 = arith.constant 5 : index
    %c768_358 = arith.constant 768 : index
    %235 = vector.load %arg10[%c5_357, %c768_358] : memref<16x2048xf32, #tpu.memory_space<vmem>>, vector<1x128xf32>
    tpu.vector_store %arg10[%c5_357, %c768_358], %234 {strides = array<i32>} : memref<16x2048xf32, #tpu.memory_space<vmem>>, vector<1x128xf32>,
    %c36_359 = arith.constant 36 : index
    %c0_360 = arith.constant 0 : index
    %236 = vector.load %arg9[%c36_359, %c0_360] : memref<100x128xf32, #tpu.memory_space<vmem>>, vector<1x128xf32>
    %c6_361 = arith.constant 6 : index
    %c768_362 = arith.constant 768 : index
    %237 = vector.load %arg10[%c6_361, %c768_362] : memref<16x2048xf32, #tpu.memory_space<vmem>>, vector<1x128xf32>
    tpu.vector_store %arg10[%c6_361, %c768_362], %236 {strides = array<i32>} : memref<16x2048xf32, #tpu.memory_space<vmem>>, vector<1x128xf32>,
    %c38 = arith.constant 38 : index
    %c0_363 = arith.constant 0 : index
    %238 = vector.load %arg9[%c38, %c0_363] : memref<100x128xf32, #tpu.memory_space<vmem>>, vector<1x128xf32>
    %c7_364 = arith.constant 7 : index
    %c768_365 = arith.constant 768 : index
    %239 = vector.load %arg10[%c7_364, %c768_365] : memref<16x2048xf32, #tpu.memory_space<vmem>>, vector<1x128xf32>
    tpu.vector_store %arg10[%c7_364, %c768_365], %238 {strides = array<i32>} : memref<16x2048xf32, #tpu.memory_space<vmem>>, vector<1x128xf32>,
    %c52_366 = arith.constant 52 : index
    %c0_367 = arith.constant 0 : index
    %240 = vector.load %arg9[%c52_366, %c0_367] : memref<100x128xf32, #tpu.memory_space<vmem>>, vector<1x128xf32>
    %c8_368 = arith.constant 8 : index
    %c768_369 = arith.constant 768 : index
    %241 = vector.load %arg10[%c8_368, %c768_369] : memref<16x2048xf32, #tpu.memory_space<vmem>>, vector<1x128xf32>
    tpu.vector_store %arg10[%c8_368, %c768_369], %240 {strides = array<i32>} : memref<16x2048xf32, #tpu.memory_space<vmem>>, vector<1x128xf32>,
    %c54_370 = arith.constant 54 : index
    %c0_371 = arith.constant 0 : index
    %242 = vector.load %arg9[%c54_370, %c0_371] : memref<100x128xf32, #tpu.memory_space<vmem>>, vector<1x128xf32>
    %c9_372 = arith.constant 9 : index
    %c768_373 = arith.constant 768 : index
    %243 = vector.load %arg10[%c9_372, %c768_373] : memref<16x2048xf32, #tpu.memory_space<vmem>>, vector<1x128xf32>
    tpu.vector_store %arg10[%c9_372, %c768_373], %242 {strides = array<i32>} : memref<16x2048xf32, #tpu.memory_space<vmem>>, vector<1x128xf32>,
    %c56_374 = arith.constant 56 : index
    %c0_375 = arith.constant 0 : index
    %244 = vector.load %arg9[%c56_374, %c0_375] : memref<100x128xf32, #tpu.memory_space<vmem>>, vector<1x128xf32>
    %c10_376 = arith.constant 10 : index
    %c768_377 = arith.constant 768 : index
    %245 = vector.load %arg10[%c10_376, %c768_377] : memref<16x2048xf32, #tpu.memory_space<vmem>>, vector<1x128xf32>
    tpu.vector_store %arg10[%c10_376, %c768_377], %244 {strides = array<i32>} : memref<16x2048xf32, #tpu.memory_space<vmem>>, vector<1x128xf32>,
    %c58 = arith.constant 58 : index
    %c0_378 = arith.constant 0 : index
    %246 = vector.load %arg9[%c58, %c0_378] : memref<100x128xf32, #tpu.memory_space<vmem>>, vector<1x128xf32>
    %c11_379 = arith.constant 11 : index
    %c768_380 = arith.constant 768 : index
    %247 = vector.load %arg10[%c11_379, %c768_380] : memref<16x2048xf32, #tpu.memory_space<vmem>>, vector<1x128xf32>
    tpu.vector_store %arg10[%c11_379, %c768_380], %246 {strides = array<i32>} : memref<16x2048xf32, #tpu.memory_space<vmem>>, vector<1x128xf32>,
    %c72_381 = arith.constant 72 : index
    %c0_382 = arith.constant 0 : index
    %248 = vector.load %arg9[%c72_381, %c0_382] : memref<100x128xf32, #tpu.memory_space<vmem>>, vector<1x128xf32>
    %c12_383 = arith.constant 12 : index
    %c768_384 = arith.constant 768 : index
    %249 = vector.load %arg10[%c12_383, %c768_384] : memref<16x2048xf32, #tpu.memory_space<vmem>>, vector<1x128xf32>
    tpu.vector_store %arg10[%c12_383, %c768_384], %248 {strides = array<i32>} : memref<16x2048xf32, #tpu.memory_space<vmem>>, vector<1x128xf32>,
    %c74_385 = arith.constant 74 : index
    %c0_386 = arith.constant 0 : index
    %250 = vector.load %arg9[%c74_385, %c0_386] : memref<100x128xf32, #tpu.memory_space<vmem>>, vector<1x128xf32>
    %c13_387 = arith.constant 13 : index
    %c768_388 = arith.constant 768 : index
    %251 = vector.load %arg10[%c13_387, %c768_388] : memref<16x2048xf32, #tpu.memory_space<vmem>>, vector<1x128xf32>
    tpu.vector_store %arg10[%c13_387, %c768_388], %250 {strides = array<i32>} : memref<16x2048xf32, #tpu.memory_space<vmem>>, vector<1x128xf32>,
    %c76_389 = arith.constant 76 : index
    %c0_390 = arith.constant 0 : index
    %252 = vector.load %arg9[%c76_389, %c0_390] : memref<100x128xf32, #tpu.memory_space<vmem>>, vector<1x128xf32>
    %c14_391 = arith.constant 14 : index
    %c768_392 = arith.constant 768 : index
    %253 = vector.load %arg10[%c14_391, %c768_392] : memref<16x2048xf32, #tpu.memory_space<vmem>>, vector<1x128xf32>
    tpu.vector_store %arg10[%c14_391, %c768_392], %252 {strides = array<i32>} : memref<16x2048xf32, #tpu.memory_space<vmem>>, vector<1x128xf32>,
    %c78 = arith.constant 78 : index
    %c0_393 = arith.constant 0 : index
    %254 = vector.load %arg9[%c78, %c0_393] : memref<100x128xf32, #tpu.memory_space<vmem>>, vector<1x128xf32>
    %c15_394 = arith.constant 15 : index
    %c768_395 = arith.constant 768 : index
    %255 = vector.load %arg10[%c15_394, %c768_395] : memref<16x2048xf32, #tpu.memory_space<vmem>>, vector<1x128xf32>
    tpu.vector_store %arg10[%c15_394, %c768_395], %254 {strides = array<i32>} : memref<16x2048xf32, #tpu.memory_space<vmem>>, vector<1x128xf32>,
    %c13_396 = arith.constant 13 : index
    %c0_397 = arith.constant 0 : index
    %256 = vector.load %arg9[%c13_396, %c0_397] : memref<100x128xf32, #tpu.memory_space<vmem>>, vector<1x128xf32>
    %c0_398 = arith.constant 0 : index
    %c896 = arith.constant 896 : index
    %257 = vector.load %arg10[%c0_398, %c896] : memref<16x2048xf32, #tpu.memory_space<vmem>>, vector<1x128xf32>
    tpu.vector_store %arg10[%c0_398, %c896], %256 {strides = array<i32>} : memref<16x2048xf32, #tpu.memory_space<vmem>>, vector<1x128xf32>,
    %c15_399 = arith.constant 15 : index
    %c0_400 = arith.constant 0 : index
    %258 = vector.load %arg9[%c15_399, %c0_400] : memref<100x128xf32, #tpu.memory_space<vmem>>, vector<1x128xf32>
    %c1_401 = arith.constant 1 : index
    %c896_402 = arith.constant 896 : index
    %259 = vector.load %arg10[%c1_401, %c896_402] : memref<16x2048xf32, #tpu.memory_space<vmem>>, vector<1x128xf32>
    tpu.vector_store %arg10[%c1_401, %c896_402], %258 {strides = array<i32>} : memref<16x2048xf32, #tpu.memory_space<vmem>>, vector<1x128xf32>,
    %c17_403 = arith.constant 17 : index
    %c0_404 = arith.constant 0 : index
    %260 = vector.load %arg9[%c17_403, %c0_404] : memref<100x128xf32, #tpu.memory_space<vmem>>, vector<1x128xf32>
    %c2_405 = arith.constant 2 : index
    %c896_406 = arith.constant 896 : index
    %261 = vector.load %arg10[%c2_405, %c896_406] : memref<16x2048xf32, #tpu.memory_space<vmem>>, vector<1x128xf32>
    tpu.vector_store %arg10[%c2_405, %c896_406], %260 {strides = array<i32>} : memref<16x2048xf32, #tpu.memory_space<vmem>>, vector<1x128xf32>,
    %c19 = arith.constant 19 : index
    %c0_407 = arith.constant 0 : index
    %262 = vector.load %arg9[%c19, %c0_407] : memref<100x128xf32, #tpu.memory_space<vmem>>, vector<1x128xf32>
    %c3_408 = arith.constant 3 : index
    %c896_409 = arith.constant 896 : index
    %263 = vector.load %arg10[%c3_408, %c896_409] : memref<16x2048xf32, #tpu.memory_space<vmem>>, vector<1x128xf32>
    tpu.vector_store %arg10[%c3_408, %c896_409], %262 {strides = array<i32>} : memref<16x2048xf32, #tpu.memory_space<vmem>>, vector<1x128xf32>,
    %c33_410 = arith.constant 33 : index
    %c0_411 = arith.constant 0 : index
    %264 = vector.load %arg9[%c33_410, %c0_411] : memref<100x128xf32, #tpu.memory_space<vmem>>, vector<1x128xf32>
    %c4_412 = arith.constant 4 : index
    %c896_413 = arith.constant 896 : index
    %265 = vector.load %arg10[%c4_412, %c896_413] : memref<16x2048xf32, #tpu.memory_space<vmem>>, vector<1x128xf32>
    tpu.vector_store %arg10[%c4_412, %c896_413], %264 {strides = array<i32>} : memref<16x2048xf32, #tpu.memory_space<vmem>>, vector<1x128xf32>,
    %c35_414 = arith.constant 35 : index
    %c0_415 = arith.constant 0 : index
    %266 = vector.load %arg9[%c35_414, %c0_415] : memref<100x128xf32, #tpu.memory_space<vmem>>, vector<1x128xf32>
    %c5_416 = arith.constant 5 : index
    %c896_417 = arith.constant 896 : index
    %267 = vector.load %arg10[%c5_416, %c896_417] : memref<16x2048xf32, #tpu.memory_space<vmem>>, vector<1x128xf32>
    tpu.vector_store %arg10[%c5_416, %c896_417], %266 {strides = array<i32>} : memref<16x2048xf32, #tpu.memory_space<vmem>>, vector<1x128xf32>,
    %c37_418 = arith.constant 37 : index
    %c0_419 = arith.constant 0 : index
    %268 = vector.load %arg9[%c37_418, %c0_419] : memref<100x128xf32, #tpu.memory_space<vmem>>, vector<1x128xf32>
    %c6_420 = arith.constant 6 : index
    %c896_421 = arith.constant 896 : index
    %269 = vector.load %arg10[%c6_420, %c896_421] : memref<16x2048xf32, #tpu.memory_space<vmem>>, vector<1x128xf32>
    tpu.vector_store %arg10[%c6_420, %c896_421], %268 {strides = array<i32>} : memref<16x2048xf32, #tpu.memory_space<vmem>>, vector<1x128xf32>,
    %c39 = arith.constant 39 : index
    %c0_422 = arith.constant 0 : index
    %270 = vector.load %arg9[%c39, %c0_422] : memref<100x128xf32, #tpu.memory_space<vmem>>, vector<1x128xf32>
    %c7_423 = arith.constant 7 : index
    %c896_424 = arith.constant 896 : index
    %271 = vector.load %arg10[%c7_423, %c896_424] : memref<16x2048xf32, #tpu.memory_space<vmem>>, vector<1x128xf32>
    tpu.vector_store %arg10[%c7_423, %c896_424], %270 {strides = array<i32>} : memref<16x2048xf32, #tpu.memory_space<vmem>>, vector<1x128xf32>,
    %c53_425 = arith.constant 53 : index
    %c0_426 = arith.constant 0 : index
    %272 = vector.load %arg9[%c53_425, %c0_426] : memref<100x128xf32, #tpu.memory_space<vmem>>, vector<1x128xf32>
    %c8_427 = arith.constant 8 : index
    %c896_428 = arith.constant 896 : index
    %273 = vector.load %arg10[%c8_427, %c896_428] : memref<16x2048xf32, #tpu.memory_space<vmem>>, vector<1x128xf32>
    tpu.vector_store %arg10[%c8_427, %c896_428], %272 {strides = array<i32>} : memref<16x2048xf32, #tpu.memory_space<vmem>>, vector<1x128xf32>,
    %c55_429 = arith.constant 55 : index
    %c0_430 = arith.constant 0 : index
    %274 = vector.load %arg9[%c55_429, %c0_430] : memref<100x128xf32, #tpu.memory_space<vmem>>, vector<1x128xf32>
    %c9_431 = arith.constant 9 : index
    %c896_432 = arith.constant 896 : index
    %275 = vector.load %arg10[%c9_431, %c896_432] : memref<16x2048xf32, #tpu.memory_space<vmem>>, vector<1x128xf32>
    tpu.vector_store %arg10[%c9_431, %c896_432], %274 {strides = array<i32>} : memref<16x2048xf32, #tpu.memory_space<vmem>>, vector<1x128xf32>,
    %c57_433 = arith.constant 57 : index
    %c0_434 = arith.constant 0 : index
    %276 = vector.load %arg9[%c57_433, %c0_434] : memref<100x128xf32, #tpu.memory_space<vmem>>, vector<1x128xf32>
    %c10_435 = arith.constant 10 : index
    %c896_436 = arith.constant 896 : index
    %277 = vector.load %arg10[%c10_435, %c896_436] : memref<16x2048xf32, #tpu.memory_space<vmem>>, vector<1x128xf32>
    tpu.vector_store %arg10[%c10_435, %c896_436], %276 {strides = array<i32>} : memref<16x2048xf32, #tpu.memory_space<vmem>>, vector<1x128xf32>,
    %c59 = arith.constant 59 : index
    %c0_437 = arith.constant 0 : index
    %278 = vector.load %arg9[%c59, %c0_437] : memref<100x128xf32, #tpu.memory_space<vmem>>, vector<1x128xf32>
    %c11_438 = arith.constant 11 : index
    %c896_439 = arith.constant 896 : index
    %279 = vector.load %arg10[%c11_438, %c896_439] : memref<16x2048xf32, #tpu.memory_space<vmem>>, vector<1x128xf32>
    tpu.vector_store %arg10[%c11_438, %c896_439], %278 {strides = array<i32>} : memref<16x2048xf32, #tpu.memory_space<vmem>>, vector<1x128xf32>,
    %c73_440 = arith.constant 73 : index
    %c0_441 = arith.constant 0 : index
    %280 = vector.load %arg9[%c73_440, %c0_441] : memref<100x128xf32, #tpu.memory_space<vmem>>, vector<1x128xf32>
    %c12_442 = arith.constant 12 : index
    %c896_443 = arith.constant 896 : index
    %281 = vector.load %arg10[%c12_442, %c896_443] : memref<16x2048xf32, #tpu.memory_space<vmem>>, vector<1x128xf32>
    tpu.vector_store %arg10[%c12_442, %c896_443], %280 {strides = array<i32>} : memref<16x2048xf32, #tpu.memory_space<vmem>>, vector<1x128xf32>,
    %c75_444 = arith.constant 75 : index
    %c0_445 = arith.constant 0 : index
    %282 = vector.load %arg9[%c75_444, %c0_445] : memref<100x128xf32, #tpu.memory_space<vmem>>, vector<1x128xf32>
    %c13_446 = arith.constant 13 : index
    %c896_447 = arith.constant 896 : index
    %283 = vector.load %arg10[%c13_446, %c896_447] : memref<16x2048xf32, #tpu.memory_space<vmem>>, vector<1x128xf32>
    tpu.vector_store %arg10[%c13_446, %c896_447], %282 {strides = array<i32>} : memref<16x2048xf32, #tpu.memory_space<vmem>>, vector<1x128xf32>,
    %c77_448 = arith.constant 77 : index
    %c0_449 = arith.constant 0 : index
    %284 = vector.load %arg9[%c77_448, %c0_449] : memref<100x128xf32, #tpu.memory_space<vmem>>, vector<1x128xf32>
    %c14_450 = arith.constant 14 : index
    %c896_451 = arith.constant 896 : index
    %285 = vector.load %arg10[%c14_450, %c896_451] : memref<16x2048xf32, #tpu.memory_space<vmem>>, vector<1x128xf32>
    tpu.vector_store %arg10[%c14_450, %c896_451], %284 {strides = array<i32>} : memref<16x2048xf32, #tpu.memory_space<vmem>>, vector<1x128xf32>,
    %c79 = arith.constant 79 : index
    %c0_452 = arith.constant 0 : index
    %286 = vector.load %arg9[%c79, %c0_452] : memref<100x128xf32, #tpu.memory_space<vmem>>, vector<1x128xf32>
    %c15_453 = arith.constant 15 : index
    %c896_454 = arith.constant 896 : index
    %287 = vector.load %arg10[%c15_453, %c896_454] : memref<16x2048xf32, #tpu.memory_space<vmem>>, vector<1x128xf32>
    tpu.vector_store %arg10[%c15_453, %c896_454], %286 {strides = array<i32>} : memref<16x2048xf32, #tpu.memory_space<vmem>>, vector<1x128xf32>,
    %c20_455 = arith.constant 20 : index
    %c0_456 = arith.constant 0 : index
    %288 = vector.load %arg9[%c20_455, %c0_456] : memref<100x128xf32, #tpu.memory_space<vmem>>, vector<1x128xf32>
    %c0_457 = arith.constant 0 : index
    %c1024 = arith.constant 1024 : index
    %289 = vector.load %arg10[%c0_457, %c1024] : memref<16x2048xf32, #tpu.memory_space<vmem>>, vector<1x128xf32>
    tpu.vector_store %arg10[%c0_457, %c1024], %288 {strides = array<i32>} : memref<16x2048xf32, #tpu.memory_space<vmem>>, vector<1x128xf32>,
    %c22_458 = arith.constant 22 : index
    %c0_459 = arith.constant 0 : index
    %290 = vector.load %arg9[%c22_458, %c0_459] : memref<100x128xf32, #tpu.memory_space<vmem>>, vector<1x128xf32>
    %c1_460 = arith.constant 1 : index
    %c1024_461 = arith.constant 1024 : index
    %291 = vector.load %arg10[%c1_460, %c1024_461] : memref<16x2048xf32, #tpu.memory_space<vmem>>, vector<1x128xf32>
    tpu.vector_store %arg10[%c1_460, %c1024_461], %290 {strides = array<i32>} : memref<16x2048xf32, #tpu.memory_space<vmem>>, vector<1x128xf32>,
    %c24_462 = arith.constant 24 : index
    %c0_463 = arith.constant 0 : index
    %292 = vector.load %arg9[%c24_462, %c0_463] : memref<100x128xf32, #tpu.memory_space<vmem>>, vector<1x128xf32>
    %c2_464 = arith.constant 2 : index
    %c1024_465 = arith.constant 1024 : index
    %293 = vector.load %arg10[%c2_464, %c1024_465] : memref<16x2048xf32, #tpu.memory_space<vmem>>, vector<1x128xf32>
    tpu.vector_store %arg10[%c2_464, %c1024_465], %292 {strides = array<i32>} : memref<16x2048xf32, #tpu.memory_space<vmem>>, vector<1x128xf32>,
    %c26_466 = arith.constant 26 : index
    %c0_467 = arith.constant 0 : index
    %294 = vector.load %arg9[%c26_466, %c0_467] : memref<100x128xf32, #tpu.memory_space<vmem>>, vector<1x128xf32>
    %c3_468 = arith.constant 3 : index
    %c1024_469 = arith.constant 1024 : index
    %295 = vector.load %arg10[%c3_468, %c1024_469] : memref<16x2048xf32, #tpu.memory_space<vmem>>, vector<1x128xf32>
    tpu.vector_store %arg10[%c3_468, %c1024_469], %294 {strides = array<i32>} : memref<16x2048xf32, #tpu.memory_space<vmem>>, vector<1x128xf32>,
    %c40_470 = arith.constant 40 : index
    %c0_471 = arith.constant 0 : index
    %296 = vector.load %arg9[%c40_470, %c0_471] : memref<100x128xf32, #tpu.memory_space<vmem>>, vector<1x128xf32>
    %c4_472 = arith.constant 4 : index
    %c1024_473 = arith.constant 1024 : index
    %297 = vector.load %arg10[%c4_472, %c1024_473] : memref<16x2048xf32, #tpu.memory_space<vmem>>, vector<1x128xf32>
    tpu.vector_store %arg10[%c4_472, %c1024_473], %296 {strides = array<i32>} : memref<16x2048xf32, #tpu.memory_space<vmem>>, vector<1x128xf32>,
    %c42_474 = arith.constant 42 : index
    %c0_475 = arith.constant 0 : index
    %298 = vector.load %arg9[%c42_474, %c0_475] : memref<100x128xf32, #tpu.memory_space<vmem>>, vector<1x128xf32>
    %c5_476 = arith.constant 5 : index
    %c1024_477 = arith.constant 1024 : index
    %299 = vector.load %arg10[%c5_476, %c1024_477] : memref<16x2048xf32, #tpu.memory_space<vmem>>, vector<1x128xf32>
    tpu.vector_store %arg10[%c5_476, %c1024_477], %298 {strides = array<i32>} : memref<16x2048xf32, #tpu.memory_space<vmem>>, vector<1x128xf32>,
    %c44_478 = arith.constant 44 : index
    %c0_479 = arith.constant 0 : index
    %300 = vector.load %arg9[%c44_478, %c0_479] : memref<100x128xf32, #tpu.memory_space<vmem>>, vector<1x128xf32>
    %c6_480 = arith.constant 6 : index
    %c1024_481 = arith.constant 1024 : index
    %301 = vector.load %arg10[%c6_480, %c1024_481] : memref<16x2048xf32, #tpu.memory_space<vmem>>, vector<1x128xf32>
    tpu.vector_store %arg10[%c6_480, %c1024_481], %300 {strides = array<i32>} : memref<16x2048xf32, #tpu.memory_space<vmem>>, vector<1x128xf32>,
    %c46_482 = arith.constant 46 : index
    %c0_483 = arith.constant 0 : index
    %302 = vector.load %arg9[%c46_482, %c0_483] : memref<100x128xf32, #tpu.memory_space<vmem>>, vector<1x128xf32>
    %c7_484 = arith.constant 7 : index
    %c1024_485 = arith.constant 1024 : index
    %303 = vector.load %arg10[%c7_484, %c1024_485] : memref<16x2048xf32, #tpu.memory_space<vmem>>, vector<1x128xf32>
    tpu.vector_store %arg10[%c7_484, %c1024_485], %302 {strides = array<i32>} : memref<16x2048xf32, #tpu.memory_space<vmem>>, vector<1x128xf32>,
    %c60_486 = arith.constant 60 : index
    %c0_487 = arith.constant 0 : index
    %304 = vector.load %arg9[%c60_486, %c0_487] : memref<100x128xf32, #tpu.memory_space<vmem>>, vector<1x128xf32>
    %c8_488 = arith.constant 8 : index
    %c1024_489 = arith.constant 1024 : index
    %305 = vector.load %arg10[%c8_488, %c1024_489] : memref<16x2048xf32, #tpu.memory_space<vmem>>, vector<1x128xf32>
    tpu.vector_store %arg10[%c8_488, %c1024_489], %304 {strides = array<i32>} : memref<16x2048xf32, #tpu.memory_space<vmem>>, vector<1x128xf32>,
    %c62_490 = arith.constant 62 : index
    %c0_491 = arith.constant 0 : index
    %306 = vector.load %arg9[%c62_490, %c0_491] : memref<100x128xf32, #tpu.memory_space<vmem>>, vector<1x128xf32>
    %c9_492 = arith.constant 9 : index
    %c1024_493 = arith.constant 1024 : index
    %307 = vector.load %arg10[%c9_492, %c1024_493] : memref<16x2048xf32, #tpu.memory_space<vmem>>, vector<1x128xf32>
    tpu.vector_store %arg10[%c9_492, %c1024_493], %306 {strides = array<i32>} : memref<16x2048xf32, #tpu.memory_space<vmem>>, vector<1x128xf32>,
    %c64_494 = arith.constant 64 : index
    %c0_495 = arith.constant 0 : index
    %308 = vector.load %arg9[%c64_494, %c0_495] : memref<100x128xf32, #tpu.memory_space<vmem>>, vector<1x128xf32>
    %c10_496 = arith.constant 10 : index
    %c1024_497 = arith.constant 1024 : index
    %309 = vector.load %arg10[%c10_496, %c1024_497] : memref<16x2048xf32, #tpu.memory_space<vmem>>, vector<1x128xf32>
    tpu.vector_store %arg10[%c10_496, %c1024_497], %308 {strides = array<i32>} : memref<16x2048xf32, #tpu.memory_space<vmem>>, vector<1x128xf32>,
    %c66_498 = arith.constant 66 : index
    %c0_499 = arith.constant 0 : index
    %310 = vector.load %arg9[%c66_498, %c0_499] : memref<100x128xf32, #tpu.memory_space<vmem>>, vector<1x128xf32>
    %c11_500 = arith.constant 11 : index
    %c1024_501 = arith.constant 1024 : index
    %311 = vector.load %arg10[%c11_500, %c1024_501] : memref<16x2048xf32, #tpu.memory_space<vmem>>, vector<1x128xf32>
    tpu.vector_store %arg10[%c11_500, %c1024_501], %310 {strides = array<i32>} : memref<16x2048xf32, #tpu.memory_space<vmem>>, vector<1x128xf32>,
    %c80 = arith.constant 80 : index
    %c0_502 = arith.constant 0 : index
    %312 = vector.load %arg9[%c80, %c0_502] : memref<100x128xf32, #tpu.memory_space<vmem>>, vector<1x128xf32>
    %c12_503 = arith.constant 12 : index
    %c1024_504 = arith.constant 1024 : index
    %313 = vector.load %arg10[%c12_503, %c1024_504] : memref<16x2048xf32, #tpu.memory_space<vmem>>, vector<1x128xf32>
    tpu.vector_store %arg10[%c12_503, %c1024_504], %312 {strides = array<i32>} : memref<16x2048xf32, #tpu.memory_space<vmem>>, vector<1x128xf32>,
    %c82 = arith.constant 82 : index
    %c0_505 = arith.constant 0 : index
    %314 = vector.load %arg9[%c82, %c0_505] : memref<100x128xf32, #tpu.memory_space<vmem>>, vector<1x128xf32>
    %c13_506 = arith.constant 13 : index
    %c1024_507 = arith.constant 1024 : index
    %315 = vector.load %arg10[%c13_506, %c1024_507] : memref<16x2048xf32, #tpu.memory_space<vmem>>, vector<1x128xf32>
    tpu.vector_store %arg10[%c13_506, %c1024_507], %314 {strides = array<i32>} : memref<16x2048xf32, #tpu.memory_space<vmem>>, vector<1x128xf32>,
    %c84 = arith.constant 84 : index
    %c0_508 = arith.constant 0 : index
    %316 = vector.load %arg9[%c84, %c0_508] : memref<100x128xf32, #tpu.memory_space<vmem>>, vector<1x128xf32>
    %c14_509 = arith.constant 14 : index
    %c1024_510 = arith.constant 1024 : index
    %317 = vector.load %arg10[%c14_509, %c1024_510] : memref<16x2048xf32, #tpu.memory_space<vmem>>, vector<1x128xf32>
    tpu.vector_store %arg10[%c14_509, %c1024_510], %316 {strides = array<i32>} : memref<16x2048xf32, #tpu.memory_space<vmem>>, vector<1x128xf32>,
    %c86 = arith.constant 86 : index
    %c0_511 = arith.constant 0 : index
    %318 = vector.load %arg9[%c86, %c0_511] : memref<100x128xf32, #tpu.memory_space<vmem>>, vector<1x128xf32>
    %c15_512 = arith.constant 15 : index
    %c1024_513 = arith.constant 1024 : index
    %319 = vector.load %arg10[%c15_512, %c1024_513] : memref<16x2048xf32, #tpu.memory_space<vmem>>, vector<1x128xf32>
    tpu.vector_store %arg10[%c15_512, %c1024_513], %318 {strides = array<i32>} : memref<16x2048xf32, #tpu.memory_space<vmem>>, vector<1x128xf32>,
    %c21_514 = arith.constant 21 : index
    %c0_515 = arith.constant 0 : index
    %320 = vector.load %arg9[%c21_514, %c0_515] : memref<100x128xf32, #tpu.memory_space<vmem>>, vector<1x128xf32>
    %c0_516 = arith.constant 0 : index
    %c1152 = arith.constant 1152 : index
    %321 = vector.load %arg10[%c0_516, %c1152] : memref<16x2048xf32, #tpu.memory_space<vmem>>, vector<1x128xf32>
    tpu.vector_store %arg10[%c0_516, %c1152], %320 {strides = array<i32>} : memref<16x2048xf32, #tpu.memory_space<vmem>>, vector<1x128xf32>,
    %c23_517 = arith.constant 23 : index
    %c0_518 = arith.constant 0 : index
    %322 = vector.load %arg9[%c23_517, %c0_518] : memref<100x128xf32, #tpu.memory_space<vmem>>, vector<1x128xf32>
    %c1_519 = arith.constant 1 : index
    %c1152_520 = arith.constant 1152 : index
    %323 = vector.load %arg10[%c1_519, %c1152_520] : memref<16x2048xf32, #tpu.memory_space<vmem>>, vector<1x128xf32>
    tpu.vector_store %arg10[%c1_519, %c1152_520], %322 {strides = array<i32>} : memref<16x2048xf32, #tpu.memory_space<vmem>>, vector<1x128xf32>,
    %c25_521 = arith.constant 25 : index
    %c0_522 = arith.constant 0 : index
    %324 = vector.load %arg9[%c25_521, %c0_522] : memref<100x128xf32, #tpu.memory_space<vmem>>, vector<1x128xf32>
    %c2_523 = arith.constant 2 : index
    %c1152_524 = arith.constant 1152 : index
    %325 = vector.load %arg10[%c2_523, %c1152_524] : memref<16x2048xf32, #tpu.memory_space<vmem>>, vector<1x128xf32>
    tpu.vector_store %arg10[%c2_523, %c1152_524], %324 {strides = array<i32>} : memref<16x2048xf32, #tpu.memory_space<vmem>>, vector<1x128xf32>,
    %c27_525 = arith.constant 27 : index
    %c0_526 = arith.constant 0 : index
    %326 = vector.load %arg9[%c27_525, %c0_526] : memref<100x128xf32, #tpu.memory_space<vmem>>, vector<1x128xf32>
    %c3_527 = arith.constant 3 : index
    %c1152_528 = arith.constant 1152 : index
    %327 = vector.load %arg10[%c3_527, %c1152_528] : memref<16x2048xf32, #tpu.memory_space<vmem>>, vector<1x128xf32>
    tpu.vector_store %arg10[%c3_527, %c1152_528], %326 {strides = array<i32>} : memref<16x2048xf32, #tpu.memory_space<vmem>>, vector<1x128xf32>,
    %c41_529 = arith.constant 41 : index
    %c0_530 = arith.constant 0 : index
    %328 = vector.load %arg9[%c41_529, %c0_530] : memref<100x128xf32, #tpu.memory_space<vmem>>, vector<1x128xf32>
    %c4_531 = arith.constant 4 : index
    %c1152_532 = arith.constant 1152 : index
    %329 = vector.load %arg10[%c4_531, %c1152_532] : memref<16x2048xf32, #tpu.memory_space<vmem>>, vector<1x128xf32>
    tpu.vector_store %arg10[%c4_531, %c1152_532], %328 {strides = array<i32>} : memref<16x2048xf32, #tpu.memory_space<vmem>>, vector<1x128xf32>,
    %c43_533 = arith.constant 43 : index
    %c0_534 = arith.constant 0 : index
    %330 = vector.load %arg9[%c43_533, %c0_534] : memref<100x128xf32, #tpu.memory_space<vmem>>, vector<1x128xf32>
    %c5_535 = arith.constant 5 : index
    %c1152_536 = arith.constant 1152 : index
    %331 = vector.load %arg10[%c5_535, %c1152_536] : memref<16x2048xf32, #tpu.memory_space<vmem>>, vector<1x128xf32>
    tpu.vector_store %arg10[%c5_535, %c1152_536], %330 {strides = array<i32>} : memref<16x2048xf32, #tpu.memory_space<vmem>>, vector<1x128xf32>,
    %c45_537 = arith.constant 45 : index
    %c0_538 = arith.constant 0 : index
    %332 = vector.load %arg9[%c45_537, %c0_538] : memref<100x128xf32, #tpu.memory_space<vmem>>, vector<1x128xf32>
    %c6_539 = arith.constant 6 : index
    %c1152_540 = arith.constant 1152 : index
    %333 = vector.load %arg10[%c6_539, %c1152_540] : memref<16x2048xf32, #tpu.memory_space<vmem>>, vector<1x128xf32>
    tpu.vector_store %arg10[%c6_539, %c1152_540], %332 {strides = array<i32>} : memref<16x2048xf32, #tpu.memory_space<vmem>>, vector<1x128xf32>,
    %c47_541 = arith.constant 47 : index
    %c0_542 = arith.constant 0 : index
    %334 = vector.load %arg9[%c47_541, %c0_542] : memref<100x128xf32, #tpu.memory_space<vmem>>, vector<1x128xf32>
    %c7_543 = arith.constant 7 : index
    %c1152_544 = arith.constant 1152 : index
    %335 = vector.load %arg10[%c7_543, %c1152_544] : memref<16x2048xf32, #tpu.memory_space<vmem>>, vector<1x128xf32>
    tpu.vector_store %arg10[%c7_543, %c1152_544], %334 {strides = array<i32>} : memref<16x2048xf32, #tpu.memory_space<vmem>>, vector<1x128xf32>,
    %c61_545 = arith.constant 61 : index
    %c0_546 = arith.constant 0 : index
    %336 = vector.load %arg9[%c61_545, %c0_546] : memref<100x128xf32, #tpu.memory_space<vmem>>, vector<1x128xf32>
    %c8_547 = arith.constant 8 : index
    %c1152_548 = arith.constant 1152 : index
    %337 = vector.load %arg10[%c8_547, %c1152_548] : memref<16x2048xf32, #tpu.memory_space<vmem>>, vector<1x128xf32>
    tpu.vector_store %arg10[%c8_547, %c1152_548], %336 {strides = array<i32>} : memref<16x2048xf32, #tpu.memory_space<vmem>>, vector<1x128xf32>,
    %c63_549 = arith.constant 63 : index
    %c0_550 = arith.constant 0 : index
    %338 = vector.load %arg9[%c63_549, %c0_550] : memref<100x128xf32, #tpu.memory_space<vmem>>, vector<1x128xf32>
    %c9_551 = arith.constant 9 : index
    %c1152_552 = arith.constant 1152 : index
    %339 = vector.load %arg10[%c9_551, %c1152_552] : memref<16x2048xf32, #tpu.memory_space<vmem>>, vector<1x128xf32>
    tpu.vector_store %arg10[%c9_551, %c1152_552], %338 {strides = array<i32>} : memref<16x2048xf32, #tpu.memory_space<vmem>>, vector<1x128xf32>,
    %c65_553 = arith.constant 65 : index
    %c0_554 = arith.constant 0 : index
    %340 = vector.load %arg9[%c65_553, %c0_554] : memref<100x128xf32, #tpu.memory_space<vmem>>, vector<1x128xf32>
    %c10_555 = arith.constant 10 : index
    %c1152_556 = arith.constant 1152 : index
    %341 = vector.load %arg10[%c10_555, %c1152_556] : memref<16x2048xf32, #tpu.memory_space<vmem>>, vector<1x128xf32>
    tpu.vector_store %arg10[%c10_555, %c1152_556], %340 {strides = array<i32>} : memref<16x2048xf32, #tpu.memory_space<vmem>>, vector<1x128xf32>,
    %c67_557 = arith.constant 67 : index
    %c0_558 = arith.constant 0 : index
    %342 = vector.load %arg9[%c67_557, %c0_558] : memref<100x128xf32, #tpu.memory_space<vmem>>, vector<1x128xf32>
    %c11_559 = arith.constant 11 : index
    %c1152_560 = arith.constant 1152 : index
    %343 = vector.load %arg10[%c11_559, %c1152_560] : memref<16x2048xf32, #tpu.memory_space<vmem>>, vector<1x128xf32>
    tpu.vector_store %arg10[%c11_559, %c1152_560], %342 {strides = array<i32>} : memref<16x2048xf32, #tpu.memory_space<vmem>>, vector<1x128xf32>,
    %c81_561 = arith.constant 81 : index
    %c0_562 = arith.constant 0 : index
    %344 = vector.load %arg9[%c81_561, %c0_562] : memref<100x128xf32, #tpu.memory_space<vmem>>, vector<1x128xf32>
    %c12_563 = arith.constant 12 : index
    %c1152_564 = arith.constant 1152 : index
    %345 = vector.load %arg10[%c12_563, %c1152_564] : memref<16x2048xf32, #tpu.memory_space<vmem>>, vector<1x128xf32>
    tpu.vector_store %arg10[%c12_563, %c1152_564], %344 {strides = array<i32>} : memref<16x2048xf32, #tpu.memory_space<vmem>>, vector<1x128xf32>,
    %c83 = arith.constant 83 : index
    %c0_565 = arith.constant 0 : index
    %346 = vector.load %arg9[%c83, %c0_565] : memref<100x128xf32, #tpu.memory_space<vmem>>, vector<1x128xf32>
    %c13_566 = arith.constant 13 : index
    %c1152_567 = arith.constant 1152 : index
    %347 = vector.load %arg10[%c13_566, %c1152_567] : memref<16x2048xf32, #tpu.memory_space<vmem>>, vector<1x128xf32>
    tpu.vector_store %arg10[%c13_566, %c1152_567], %346 {strides = array<i32>} : memref<16x2048xf32, #tpu.memory_space<vmem>>, vector<1x128xf32>,
    %c85 = arith.constant 85 : index
    %c0_568 = arith.constant 0 : index
    %348 = vector.load %arg9[%c85, %c0_568] : memref<100x128xf32, #tpu.memory_space<vmem>>, vector<1x128xf32>
    %c14_569 = arith.constant 14 : index
    %c1152_570 = arith.constant 1152 : index
    %349 = vector.load %arg10[%c14_569, %c1152_570] : memref<16x2048xf32, #tpu.memory_space<vmem>>, vector<1x128xf32>
    tpu.vector_store %arg10[%c14_569, %c1152_570], %348 {strides = array<i32>} : memref<16x2048xf32, #tpu.memory_space<vmem>>, vector<1x128xf32>,
    %c87 = arith.constant 87 : index
    %c0_571 = arith.constant 0 : index
    %350 = vector.load %arg9[%c87, %c0_571] : memref<100x128xf32, #tpu.memory_space<vmem>>, vector<1x128xf32>
    %c15_572 = arith.constant 15 : index
    %c1152_573 = arith.constant 1152 : index
    %351 = vector.load %arg10[%c15_572, %c1152_573] : memref<16x2048xf32, #tpu.memory_space<vmem>>, vector<1x128xf32>
    tpu.vector_store %arg10[%c15_572, %c1152_573], %350 {strides = array<i32>} : memref<16x2048xf32, #tpu.memory_space<vmem>>, vector<1x128xf32>,
    %c22_574 = arith.constant 22 : index
    %c0_575 = arith.constant 0 : index
    %352 = vector.load %arg9[%c22_574, %c0_575] : memref<100x128xf32, #tpu.memory_space<vmem>>, vector<1x128xf32>
    %c0_576 = arith.constant 0 : index
    %c1280 = arith.constant 1280 : index
    %353 = vector.load %arg10[%c0_576, %c1280] : memref<16x2048xf32, #tpu.memory_space<vmem>>, vector<1x128xf32>
    tpu.vector_store %arg10[%c0_576, %c1280], %352 {strides = array<i32>} : memref<16x2048xf32, #tpu.memory_space<vmem>>, vector<1x128xf32>,
    %c24_577 = arith.constant 24 : index
    %c0_578 = arith.constant 0 : index
    %354 = vector.load %arg9[%c24_577, %c0_578] : memref<100x128xf32, #tpu.memory_space<vmem>>, vector<1x128xf32>
    %c1_579 = arith.constant 1 : index
    %c1280_580 = arith.constant 1280 : index
    %355 = vector.load %arg10[%c1_579, %c1280_580] : memref<16x2048xf32, #tpu.memory_space<vmem>>, vector<1x128xf32>
    tpu.vector_store %arg10[%c1_579, %c1280_580], %354 {strides = array<i32>} : memref<16x2048xf32, #tpu.memory_space<vmem>>, vector<1x128xf32>,
    %c26_581 = arith.constant 26 : index
    %c0_582 = arith.constant 0 : index
    %356 = vector.load %arg9[%c26_581, %c0_582] : memref<100x128xf32, #tpu.memory_space<vmem>>, vector<1x128xf32>
    %c2_583 = arith.constant 2 : index
    %c1280_584 = arith.constant 1280 : index
    %357 = vector.load %arg10[%c2_583, %c1280_584] : memref<16x2048xf32, #tpu.memory_space<vmem>>, vector<1x128xf32>
    tpu.vector_store %arg10[%c2_583, %c1280_584], %356 {strides = array<i32>} : memref<16x2048xf32, #tpu.memory_space<vmem>>, vector<1x128xf32>,
    %c28_585 = arith.constant 28 : index
    %c0_586 = arith.constant 0 : index
    %358 = vector.load %arg9[%c28_585, %c0_586] : memref<100x128xf32, #tpu.memory_space<vmem>>, vector<1x128xf32>
    %c3_587 = arith.constant 3 : index
    %c1280_588 = arith.constant 1280 : index
    %359 = vector.load %arg10[%c3_587, %c1280_588] : memref<16x2048xf32, #tpu.memory_space<vmem>>, vector<1x128xf32>
    tpu.vector_store %arg10[%c3_587, %c1280_588], %358 {strides = array<i32>} : memref<16x2048xf32, #tpu.memory_space<vmem>>, vector<1x128xf32>,
    %c42_589 = arith.constant 42 : index
    %c0_590 = arith.constant 0 : index
    %360 = vector.load %arg9[%c42_589, %c0_590] : memref<100x128xf32, #tpu.memory_space<vmem>>, vector<1x128xf32>
    %c4_591 = arith.constant 4 : index
    %c1280_592 = arith.constant 1280 : index
    %361 = vector.load %arg10[%c4_591, %c1280_592] : memref<16x2048xf32, #tpu.memory_space<vmem>>, vector<1x128xf32>
    tpu.vector_store %arg10[%c4_591, %c1280_592], %360 {strides = array<i32>} : memref<16x2048xf32, #tpu.memory_space<vmem>>, vector<1x128xf32>,
    %c44_593 = arith.constant 44 : index
    %c0_594 = arith.constant 0 : index
    %362 = vector.load %arg9[%c44_593, %c0_594] : memref<100x128xf32, #tpu.memory_space<vmem>>, vector<1x128xf32>
    %c5_595 = arith.constant 5 : index
    %c1280_596 = arith.constant 1280 : index
    %363 = vector.load %arg10[%c5_595, %c1280_596] : memref<16x2048xf32, #tpu.memory_space<vmem>>, vector<1x128xf32>
    tpu.vector_store %arg10[%c5_595, %c1280_596], %362 {strides = array<i32>} : memref<16x2048xf32, #tpu.memory_space<vmem>>, vector<1x128xf32>,
    %c46_597 = arith.constant 46 : index
    %c0_598 = arith.constant 0 : index
    %364 = vector.load %arg9[%c46_597, %c0_598] : memref<100x128xf32, #tpu.memory_space<vmem>>, vector<1x128xf32>
    %c6_599 = arith.constant 6 : index
    %c1280_600 = arith.constant 1280 : index
    %365 = vector.load %arg10[%c6_599, %c1280_600] : memref<16x2048xf32, #tpu.memory_space<vmem>>, vector<1x128xf32>
    tpu.vector_store %arg10[%c6_599, %c1280_600], %364 {strides = array<i32>} : memref<16x2048xf32, #tpu.memory_space<vmem>>, vector<1x128xf32>,
    %c48_601 = arith.constant 48 : index
    %c0_602 = arith.constant 0 : index
    %366 = vector.load %arg9[%c48_601, %c0_602] : memref<100x128xf32, #tpu.memory_space<vmem>>, vector<1x128xf32>
    %c7_603 = arith.constant 7 : index
    %c1280_604 = arith.constant 1280 : index
    %367 = vector.load %arg10[%c7_603, %c1280_604] : memref<16x2048xf32, #tpu.memory_space<vmem>>, vector<1x128xf32>
    tpu.vector_store %arg10[%c7_603, %c1280_604], %366 {strides = array<i32>} : memref<16x2048xf32, #tpu.memory_space<vmem>>, vector<1x128xf32>,
    %c62_605 = arith.constant 62 : index
    %c0_606 = arith.constant 0 : index
    %368 = vector.load %arg9[%c62_605, %c0_606] : memref<100x128xf32, #tpu.memory_space<vmem>>, vector<1x128xf32>
    %c8_607 = arith.constant 8 : index
    %c1280_608 = arith.constant 1280 : index
    %369 = vector.load %arg10[%c8_607, %c1280_608] : memref<16x2048xf32, #tpu.memory_space<vmem>>, vector<1x128xf32>
    tpu.vector_store %arg10[%c8_607, %c1280_608], %368 {strides = array<i32>} : memref<16x2048xf32, #tpu.memory_space<vmem>>, vector<1x128xf32>,
    %c64_609 = arith.constant 64 : index
    %c0_610 = arith.constant 0 : index
    %370 = vector.load %arg9[%c64_609, %c0_610] : memref<100x128xf32, #tpu.memory_space<vmem>>, vector<1x128xf32>
    %c9_611 = arith.constant 9 : index
    %c1280_612 = arith.constant 1280 : index
    %371 = vector.load %arg10[%c9_611, %c1280_612] : memref<16x2048xf32, #tpu.memory_space<vmem>>, vector<1x128xf32>
    tpu.vector_store %arg10[%c9_611, %c1280_612], %370 {strides = array<i32>} : memref<16x2048xf32, #tpu.memory_space<vmem>>, vector<1x128xf32>,
    %c66_613 = arith.constant 66 : index
    %c0_614 = arith.constant 0 : index
    %372 = vector.load %arg9[%c66_613, %c0_614] : memref<100x128xf32, #tpu.memory_space<vmem>>, vector<1x128xf32>
    %c10_615 = arith.constant 10 : index
    %c1280_616 = arith.constant 1280 : index
    %373 = vector.load %arg10[%c10_615, %c1280_616] : memref<16x2048xf32, #tpu.memory_space<vmem>>, vector<1x128xf32>
    tpu.vector_store %arg10[%c10_615, %c1280_616], %372 {strides = array<i32>} : memref<16x2048xf32, #tpu.memory_space<vmem>>, vector<1x128xf32>,
    %c68_617 = arith.constant 68 : index
    %c0_618 = arith.constant 0 : index
    %374 = vector.load %arg9[%c68_617, %c0_618] : memref<100x128xf32, #tpu.memory_space<vmem>>, vector<1x128xf32>
    %c11_619 = arith.constant 11 : index
    %c1280_620 = arith.constant 1280 : index
    %375 = vector.load %arg10[%c11_619, %c1280_620] : memref<16x2048xf32, #tpu.memory_space<vmem>>, vector<1x128xf32>
    tpu.vector_store %arg10[%c11_619, %c1280_620], %374 {strides = array<i32>} : memref<16x2048xf32, #tpu.memory_space<vmem>>, vector<1x128xf32>,
    %c82_621 = arith.constant 82 : index
    %c0_622 = arith.constant 0 : index
    %376 = vector.load %arg9[%c82_621, %c0_622] : memref<100x128xf32, #tpu.memory_space<vmem>>, vector<1x128xf32>
    %c12_623 = arith.constant 12 : index
    %c1280_624 = arith.constant 1280 : index
    %377 = vector.load %arg10[%c12_623, %c1280_624] : memref<16x2048xf32, #tpu.memory_space<vmem>>, vector<1x128xf32>
    tpu.vector_store %arg10[%c12_623, %c1280_624], %376 {strides = array<i32>} : memref<16x2048xf32, #tpu.memory_space<vmem>>, vector<1x128xf32>,
    %c84_625 = arith.constant 84 : index
    %c0_626 = arith.constant 0 : index
    %378 = vector.load %arg9[%c84_625, %c0_626] : memref<100x128xf32, #tpu.memory_space<vmem>>, vector<1x128xf32>
    %c13_627 = arith.constant 13 : index
    %c1280_628 = arith.constant 1280 : index
    %379 = vector.load %arg10[%c13_627, %c1280_628] : memref<16x2048xf32, #tpu.memory_space<vmem>>, vector<1x128xf32>
    tpu.vector_store %arg10[%c13_627, %c1280_628], %378 {strides = array<i32>} : memref<16x2048xf32, #tpu.memory_space<vmem>>, vector<1x128xf32>,
    %c86_629 = arith.constant 86 : index
    %c0_630 = arith.constant 0 : index
    %380 = vector.load %arg9[%c86_629, %c0_630] : memref<100x128xf32, #tpu.memory_space<vmem>>, vector<1x128xf32>
    %c14_631 = arith.constant 14 : index
    %c1280_632 = arith.constant 1280 : index
    %381 = vector.load %arg10[%c14_631, %c1280_632] : memref<16x2048xf32, #tpu.memory_space<vmem>>, vector<1x128xf32>
    tpu.vector_store %arg10[%c14_631, %c1280_632], %380 {strides = array<i32>} : memref<16x2048xf32, #tpu.memory_space<vmem>>, vector<1x128xf32>,
    %c88 = arith.constant 88 : index
    %c0_633 = arith.constant 0 : index
    %382 = vector.load %arg9[%c88, %c0_633] : memref<100x128xf32, #tpu.memory_space<vmem>>, vector<1x128xf32>
    %c15_634 = arith.constant 15 : index
    %c1280_635 = arith.constant 1280 : index
    %383 = vector.load %arg10[%c15_634, %c1280_635] : memref<16x2048xf32, #tpu.memory_space<vmem>>, vector<1x128xf32>
    tpu.vector_store %arg10[%c15_634, %c1280_635], %382 {strides = array<i32>} : memref<16x2048xf32, #tpu.memory_space<vmem>>, vector<1x128xf32>,
    %c23_636 = arith.constant 23 : index
    %c0_637 = arith.constant 0 : index
    %384 = vector.load %arg9[%c23_636, %c0_637] : memref<100x128xf32, #tpu.memory_space<vmem>>, vector<1x128xf32>
    %c0_638 = arith.constant 0 : index
    %c1408 = arith.constant 1408 : index
    %385 = vector.load %arg10[%c0_638, %c1408] : memref<16x2048xf32, #tpu.memory_space<vmem>>, vector<1x128xf32>
    tpu.vector_store %arg10[%c0_638, %c1408], %384 {strides = array<i32>} : memref<16x2048xf32, #tpu.memory_space<vmem>>, vector<1x128xf32>,
    %c25_639 = arith.constant 25 : index
    %c0_640 = arith.constant 0 : index
    %386 = vector.load %arg9[%c25_639, %c0_640] : memref<100x128xf32, #tpu.memory_space<vmem>>, vector<1x128xf32>
    %c1_641 = arith.constant 1 : index
    %c1408_642 = arith.constant 1408 : index
    %387 = vector.load %arg10[%c1_641, %c1408_642] : memref<16x2048xf32, #tpu.memory_space<vmem>>, vector<1x128xf32>
    tpu.vector_store %arg10[%c1_641, %c1408_642], %386 {strides = array<i32>} : memref<16x2048xf32, #tpu.memory_space<vmem>>, vector<1x128xf32>,
    %c27_643 = arith.constant 27 : index
    %c0_644 = arith.constant 0 : index
    %388 = vector.load %arg9[%c27_643, %c0_644] : memref<100x128xf32, #tpu.memory_space<vmem>>, vector<1x128xf32>
    %c2_645 = arith.constant 2 : index
    %c1408_646 = arith.constant 1408 : index
    %389 = vector.load %arg10[%c2_645, %c1408_646] : memref<16x2048xf32, #tpu.memory_space<vmem>>, vector<1x128xf32>
    tpu.vector_store %arg10[%c2_645, %c1408_646], %388 {strides = array<i32>} : memref<16x2048xf32, #tpu.memory_space<vmem>>, vector<1x128xf32>,
    %c29_647 = arith.constant 29 : index
    %c0_648 = arith.constant 0 : index
    %390 = vector.load %arg9[%c29_647, %c0_648] : memref<100x128xf32, #tpu.memory_space<vmem>>, vector<1x128xf32>
    %c3_649 = arith.constant 3 : index
    %c1408_650 = arith.constant 1408 : index
    %391 = vector.load %arg10[%c3_649, %c1408_650] : memref<16x2048xf32, #tpu.memory_space<vmem>>, vector<1x128xf32>
    tpu.vector_store %arg10[%c3_649, %c1408_650], %390 {strides = array<i32>} : memref<16x2048xf32, #tpu.memory_space<vmem>>, vector<1x128xf32>,
    %c43_651 = arith.constant 43 : index
    %c0_652 = arith.constant 0 : index
    %392 = vector.load %arg9[%c43_651, %c0_652] : memref<100x128xf32, #tpu.memory_space<vmem>>, vector<1x128xf32>
    %c4_653 = arith.constant 4 : index
    %c1408_654 = arith.constant 1408 : index
    %393 = vector.load %arg10[%c4_653, %c1408_654] : memref<16x2048xf32, #tpu.memory_space<vmem>>, vector<1x128xf32>
    tpu.vector_store %arg10[%c4_653, %c1408_654], %392 {strides = array<i32>} : memref<16x2048xf32, #tpu.memory_space<vmem>>, vector<1x128xf32>,
    %c45_655 = arith.constant 45 : index
    %c0_656 = arith.constant 0 : index
    %394 = vector.load %arg9[%c45_655, %c0_656] : memref<100x128xf32, #tpu.memory_space<vmem>>, vector<1x128xf32>
    %c5_657 = arith.constant 5 : index
    %c1408_658 = arith.constant 1408 : index
    %395 = vector.load %arg10[%c5_657, %c1408_658] : memref<16x2048xf32, #tpu.memory_space<vmem>>, vector<1x128xf32>
    tpu.vector_store %arg10[%c5_657, %c1408_658], %394 {strides = array<i32>} : memref<16x2048xf32, #tpu.memory_space<vmem>>, vector<1x128xf32>,
    %c47_659 = arith.constant 47 : index
    %c0_660 = arith.constant 0 : index
    %396 = vector.load %arg9[%c47_659, %c0_660] : memref<100x128xf32, #tpu.memory_space<vmem>>, vector<1x128xf32>
    %c6_661 = arith.constant 6 : index
    %c1408_662 = arith.constant 1408 : index
    %397 = vector.load %arg10[%c6_661, %c1408_662] : memref<16x2048xf32, #tpu.memory_space<vmem>>, vector<1x128xf32>
    tpu.vector_store %arg10[%c6_661, %c1408_662], %396 {strides = array<i32>} : memref<16x2048xf32, #tpu.memory_space<vmem>>, vector<1x128xf32>,
    %c49_663 = arith.constant 49 : index
    %c0_664 = arith.constant 0 : index
    %398 = vector.load %arg9[%c49_663, %c0_664] : memref<100x128xf32, #tpu.memory_space<vmem>>, vector<1x128xf32>
    %c7_665 = arith.constant 7 : index
    %c1408_666 = arith.constant 1408 : index
    %399 = vector.load %arg10[%c7_665, %c1408_666] : memref<16x2048xf32, #tpu.memory_space<vmem>>, vector<1x128xf32>
    tpu.vector_store %arg10[%c7_665, %c1408_666], %398 {strides = array<i32>} : memref<16x2048xf32, #tpu.memory_space<vmem>>, vector<1x128xf32>,
    %c63_667 = arith.constant 63 : index
    %c0_668 = arith.constant 0 : index
    %400 = vector.load %arg9[%c63_667, %c0_668] : memref<100x128xf32, #tpu.memory_space<vmem>>, vector<1x128xf32>
    %c8_669 = arith.constant 8 : index
    %c1408_670 = arith.constant 1408 : index
    %401 = vector.load %arg10[%c8_669, %c1408_670] : memref<16x2048xf32, #tpu.memory_space<vmem>>, vector<1x128xf32>
    tpu.vector_store %arg10[%c8_669, %c1408_670], %400 {strides = array<i32>} : memref<16x2048xf32, #tpu.memory_space<vmem>>, vector<1x128xf32>,
    %c65_671 = arith.constant 65 : index
    %c0_672 = arith.constant 0 : index
    %402 = vector.load %arg9[%c65_671, %c0_672] : memref<100x128xf32, #tpu.memory_space<vmem>>, vector<1x128xf32>
    %c9_673 = arith.constant 9 : index
    %c1408_674 = arith.constant 1408 : index
    %403 = vector.load %arg10[%c9_673, %c1408_674] : memref<16x2048xf32, #tpu.memory_space<vmem>>, vector<1x128xf32>
    tpu.vector_store %arg10[%c9_673, %c1408_674], %402 {strides = array<i32>} : memref<16x2048xf32, #tpu.memory_space<vmem>>, vector<1x128xf32>,
    %c67_675 = arith.constant 67 : index
    %c0_676 = arith.constant 0 : index
    %404 = vector.load %arg9[%c67_675, %c0_676] : memref<100x128xf32, #tpu.memory_space<vmem>>, vector<1x128xf32>
    %c10_677 = arith.constant 10 : index
    %c1408_678 = arith.constant 1408 : index
    %405 = vector.load %arg10[%c10_677, %c1408_678] : memref<16x2048xf32, #tpu.memory_space<vmem>>, vector<1x128xf32>
    tpu.vector_store %arg10[%c10_677, %c1408_678], %404 {strides = array<i32>} : memref<16x2048xf32, #tpu.memory_space<vmem>>, vector<1x128xf32>,
    %c69_679 = arith.constant 69 : index
    %c0_680 = arith.constant 0 : index
    %406 = vector.load %arg9[%c69_679, %c0_680] : memref<100x128xf32, #tpu.memory_space<vmem>>, vector<1x128xf32>
    %c11_681 = arith.constant 11 : index
    %c1408_682 = arith.constant 1408 : index
    %407 = vector.load %arg10[%c11_681, %c1408_682] : memref<16x2048xf32, #tpu.memory_space<vmem>>, vector<1x128xf32>
    tpu.vector_store %arg10[%c11_681, %c1408_682], %406 {strides = array<i32>} : memref<16x2048xf32, #tpu.memory_space<vmem>>, vector<1x128xf32>,
    %c83_683 = arith.constant 83 : index
    %c0_684 = arith.constant 0 : index
    %408 = vector.load %arg9[%c83_683, %c0_684] : memref<100x128xf32, #tpu.memory_space<vmem>>, vector<1x128xf32>
    %c12_685 = arith.constant 12 : index
    %c1408_686 = arith.constant 1408 : index
    %409 = vector.load %arg10[%c12_685, %c1408_686] : memref<16x2048xf32, #tpu.memory_space<vmem>>, vector<1x128xf32>
    tpu.vector_store %arg10[%c12_685, %c1408_686], %408 {strides = array<i32>} : memref<16x2048xf32, #tpu.memory_space<vmem>>, vector<1x128xf32>,
    %c85_687 = arith.constant 85 : index
    %c0_688 = arith.constant 0 : index
    %410 = vector.load %arg9[%c85_687, %c0_688] : memref<100x128xf32, #tpu.memory_space<vmem>>, vector<1x128xf32>
    %c13_689 = arith.constant 13 : index
    %c1408_690 = arith.constant 1408 : index
    %411 = vector.load %arg10[%c13_689, %c1408_690] : memref<16x2048xf32, #tpu.memory_space<vmem>>, vector<1x128xf32>
    tpu.vector_store %arg10[%c13_689, %c1408_690], %410 {strides = array<i32>} : memref<16x2048xf32, #tpu.memory_space<vmem>>, vector<1x128xf32>,
    %c87_691 = arith.constant 87 : index
    %c0_692 = arith.constant 0 : index
    %412 = vector.load %arg9[%c87_691, %c0_692] : memref<100x128xf32, #tpu.memory_space<vmem>>, vector<1x128xf32>
    %c14_693 = arith.constant 14 : index
    %c1408_694 = arith.constant 1408 : index
    %413 = vector.load %arg10[%c14_693, %c1408_694] : memref<16x2048xf32, #tpu.memory_space<vmem>>, vector<1x128xf32>
    tpu.vector_store %arg10[%c14_693, %c1408_694], %412 {strides = array<i32>} : memref<16x2048xf32, #tpu.memory_space<vmem>>, vector<1x128xf32>,
    %c89 = arith.constant 89 : index
    %c0_695 = arith.constant 0 : index
    %414 = vector.load %arg9[%c89, %c0_695] : memref<100x128xf32, #tpu.memory_space<vmem>>, vector<1x128xf32>
    %c15_696 = arith.constant 15 : index
    %c1408_697 = arith.constant 1408 : index
    %415 = vector.load %arg10[%c15_696, %c1408_697] : memref<16x2048xf32, #tpu.memory_space<vmem>>, vector<1x128xf32>
    tpu.vector_store %arg10[%c15_696, %c1408_697], %414 {strides = array<i32>} : memref<16x2048xf32, #tpu.memory_space<vmem>>, vector<1x128xf32>,
    %c30_698 = arith.constant 30 : index
    %c0_699 = arith.constant 0 : index
    %416 = vector.load %arg9[%c30_698, %c0_699] : memref<100x128xf32, #tpu.memory_space<vmem>>, vector<1x128xf32>
    %c0_700 = arith.constant 0 : index
    %c1536 = arith.constant 1536 : index
    %417 = vector.load %arg10[%c0_700, %c1536] : memref<16x2048xf32, #tpu.memory_space<vmem>>, vector<1x128xf32>
    tpu.vector_store %arg10[%c0_700, %c1536], %416 {strides = array<i32>} : memref<16x2048xf32, #tpu.memory_space<vmem>>, vector<1x128xf32>,
    %c32_701 = arith.constant 32 : index
    %c0_702 = arith.constant 0 : index
    %418 = vector.load %arg9[%c32_701, %c0_702] : memref<100x128xf32, #tpu.memory_space<vmem>>, vector<1x128xf32>
    %c1_703 = arith.constant 1 : index
    %c1536_704 = arith.constant 1536 : index
    %419 = vector.load %arg10[%c1_703, %c1536_704] : memref<16x2048xf32, #tpu.memory_space<vmem>>, vector<1x128xf32>
    tpu.vector_store %arg10[%c1_703, %c1536_704], %418 {strides = array<i32>} : memref<16x2048xf32, #tpu.memory_space<vmem>>, vector<1x128xf32>,
    %c34_705 = arith.constant 34 : index
    %c0_706 = arith.constant 0 : index
    %420 = vector.load %arg9[%c34_705, %c0_706] : memref<100x128xf32, #tpu.memory_space<vmem>>, vector<1x128xf32>
    %c2_707 = arith.constant 2 : index
    %c1536_708 = arith.constant 1536 : index
    %421 = vector.load %arg10[%c2_707, %c1536_708] : memref<16x2048xf32, #tpu.memory_space<vmem>>, vector<1x128xf32>
    tpu.vector_store %arg10[%c2_707, %c1536_708], %420 {strides = array<i32>} : memref<16x2048xf32, #tpu.memory_space<vmem>>, vector<1x128xf32>,
    %c36_709 = arith.constant 36 : index
    %c0_710 = arith.constant 0 : index
    %422 = vector.load %arg9[%c36_709, %c0_710] : memref<100x128xf32, #tpu.memory_space<vmem>>, vector<1x128xf32>
    %c3_711 = arith.constant 3 : index
    %c1536_712 = arith.constant 1536 : index
    %423 = vector.load %arg10[%c3_711, %c1536_712] : memref<16x2048xf32, #tpu.memory_space<vmem>>, vector<1x128xf32>
    tpu.vector_store %arg10[%c3_711, %c1536_712], %422 {strides = array<i32>} : memref<16x2048xf32, #tpu.memory_space<vmem>>, vector<1x128xf32>,
    %c50_713 = arith.constant 50 : index
    %c0_714 = arith.constant 0 : index
    %424 = vector.load %arg9[%c50_713, %c0_714] : memref<100x128xf32, #tpu.memory_space<vmem>>, vector<1x128xf32>
    %c4_715 = arith.constant 4 : index
    %c1536_716 = arith.constant 1536 : index
    %425 = vector.load %arg10[%c4_715, %c1536_716] : memref<16x2048xf32, #tpu.memory_space<vmem>>, vector<1x128xf32>
    tpu.vector_store %arg10[%c4_715, %c1536_716], %424 {strides = array<i32>} : memref<16x2048xf32, #tpu.memory_space<vmem>>, vector<1x128xf32>,
    %c52_717 = arith.constant 52 : index
    %c0_718 = arith.constant 0 : index
    %426 = vector.load %arg9[%c52_717, %c0_718] : memref<100x128xf32, #tpu.memory_space<vmem>>, vector<1x128xf32>
    %c5_719 = arith.constant 5 : index
    %c1536_720 = arith.constant 1536 : index
    %427 = vector.load %arg10[%c5_719, %c1536_720] : memref<16x2048xf32, #tpu.memory_space<vmem>>, vector<1x128xf32>
    tpu.vector_store %arg10[%c5_719, %c1536_720], %426 {strides = array<i32>} : memref<16x2048xf32, #tpu.memory_space<vmem>>, vector<1x128xf32>,
    %c54_721 = arith.constant 54 : index
    %c0_722 = arith.constant 0 : index
    %428 = vector.load %arg9[%c54_721, %c0_722] : memref<100x128xf32, #tpu.memory_space<vmem>>, vector<1x128xf32>
    %c6_723 = arith.constant 6 : index
    %c1536_724 = arith.constant 1536 : index
    %429 = vector.load %arg10[%c6_723, %c1536_724] : memref<16x2048xf32, #tpu.memory_space<vmem>>, vector<1x128xf32>
    tpu.vector_store %arg10[%c6_723, %c1536_724], %428 {strides = array<i32>} : memref<16x2048xf32, #tpu.memory_space<vmem>>, vector<1x128xf32>,
    %c56_725 = arith.constant 56 : index
    %c0_726 = arith.constant 0 : index
    %430 = vector.load %arg9[%c56_725, %c0_726] : memref<100x128xf32, #tpu.memory_space<vmem>>, vector<1x128xf32>
    %c7_727 = arith.constant 7 : index
    %c1536_728 = arith.constant 1536 : index
    %431 = vector.load %arg10[%c7_727, %c1536_728] : memref<16x2048xf32, #tpu.memory_space<vmem>>, vector<1x128xf32>
    tpu.vector_store %arg10[%c7_727, %c1536_728], %430 {strides = array<i32>} : memref<16x2048xf32, #tpu.memory_space<vmem>>, vector<1x128xf32>,
    %c70_729 = arith.constant 70 : index
    %c0_730 = arith.constant 0 : index
    %432 = vector.load %arg9[%c70_729, %c0_730] : memref<100x128xf32, #tpu.memory_space<vmem>>, vector<1x128xf32>
    %c8_731 = arith.constant 8 : index
    %c1536_732 = arith.constant 1536 : index
    %433 = vector.load %arg10[%c8_731, %c1536_732] : memref<16x2048xf32, #tpu.memory_space<vmem>>, vector<1x128xf32>
    tpu.vector_store %arg10[%c8_731, %c1536_732], %432 {strides = array<i32>} : memref<16x2048xf32, #tpu.memory_space<vmem>>, vector<1x128xf32>,
    %c72_733 = arith.constant 72 : index
    %c0_734 = arith.constant 0 : index
    %434 = vector.load %arg9[%c72_733, %c0_734] : memref<100x128xf32, #tpu.memory_space<vmem>>, vector<1x128xf32>
    %c9_735 = arith.constant 9 : index
    %c1536_736 = arith.constant 1536 : index
    %435 = vector.load %arg10[%c9_735, %c1536_736] : memref<16x2048xf32, #tpu.memory_space<vmem>>, vector<1x128xf32>
    tpu.vector_store %arg10[%c9_735, %c1536_736], %434 {strides = array<i32>} : memref<16x2048xf32, #tpu.memory_space<vmem>>, vector<1x128xf32>,
    %c74_737 = arith.constant 74 : index
    %c0_738 = arith.constant 0 : index
    %436 = vector.load %arg9[%c74_737, %c0_738] : memref<100x128xf32, #tpu.memory_space<vmem>>, vector<1x128xf32>
    %c10_739 = arith.constant 10 : index
    %c1536_740 = arith.constant 1536 : index
    %437 = vector.load %arg10[%c10_739, %c1536_740] : memref<16x2048xf32, #tpu.memory_space<vmem>>, vector<1x128xf32>
    tpu.vector_store %arg10[%c10_739, %c1536_740], %436 {strides = array<i32>} : memref<16x2048xf32, #tpu.memory_space<vmem>>, vector<1x128xf32>,
    %c76_741 = arith.constant 76 : index
    %c0_742 = arith.constant 0 : index
    %438 = vector.load %arg9[%c76_741, %c0_742] : memref<100x128xf32, #tpu.memory_space<vmem>>, vector<1x128xf32>
    %c11_743 = arith.constant 11 : index
    %c1536_744 = arith.constant 1536 : index
    %439 = vector.load %arg10[%c11_743, %c1536_744] : memref<16x2048xf32, #tpu.memory_space<vmem>>, vector<1x128xf32>
    tpu.vector_store %arg10[%c11_743, %c1536_744], %438 {strides = array<i32>} : memref<16x2048xf32, #tpu.memory_space<vmem>>, vector<1x128xf32>,
    %c90 = arith.constant 90 : index
    %c0_745 = arith.constant 0 : index
    %440 = vector.load %arg9[%c90, %c0_745] : memref<100x128xf32, #tpu.memory_space<vmem>>, vector<1x128xf32>
    %c12_746 = arith.constant 12 : index
    %c1536_747 = arith.constant 1536 : index
    %441 = vector.load %arg10[%c12_746, %c1536_747] : memref<16x2048xf32, #tpu.memory_space<vmem>>, vector<1x128xf32>
    tpu.vector_store %arg10[%c12_746, %c1536_747], %440 {strides = array<i32>} : memref<16x2048xf32, #tpu.memory_space<vmem>>, vector<1x128xf32>,
    %c92 = arith.constant 92 : index
    %c0_748 = arith.constant 0 : index
    %442 = vector.load %arg9[%c92, %c0_748] : memref<100x128xf32, #tpu.memory_space<vmem>>, vector<1x128xf32>
    %c13_749 = arith.constant 13 : index
    %c1536_750 = arith.constant 1536 : index
    %443 = vector.load %arg10[%c13_749, %c1536_750] : memref<16x2048xf32, #tpu.memory_space<vmem>>, vector<1x128xf32>
    tpu.vector_store %arg10[%c13_749, %c1536_750], %442 {strides = array<i32>} : memref<16x2048xf32, #tpu.memory_space<vmem>>, vector<1x128xf32>,
    %c94 = arith.constant 94 : index
    %c0_751 = arith.constant 0 : index
    %444 = vector.load %arg9[%c94, %c0_751] : memref<100x128xf32, #tpu.memory_space<vmem>>, vector<1x128xf32>
    %c14_752 = arith.constant 14 : index
    %c1536_753 = arith.constant 1536 : index
    %445 = vector.load %arg10[%c14_752, %c1536_753] : memref<16x2048xf32, #tpu.memory_space<vmem>>, vector<1x128xf32>
    tpu.vector_store %arg10[%c14_752, %c1536_753], %444 {strides = array<i32>} : memref<16x2048xf32, #tpu.memory_space<vmem>>, vector<1x128xf32>,
    %c96 = arith.constant 96 : index
    %c0_754 = arith.constant 0 : index
    %446 = vector.load %arg9[%c96, %c0_754] : memref<100x128xf32, #tpu.memory_space<vmem>>, vector<1x128xf32>
    %c15_755 = arith.constant 15 : index
    %c1536_756 = arith.constant 1536 : index
    %447 = vector.load %arg10[%c15_755, %c1536_756] : memref<16x2048xf32, #tpu.memory_space<vmem>>, vector<1x128xf32>
    tpu.vector_store %arg10[%c15_755, %c1536_756], %446 {strides = array<i32>} : memref<16x2048xf32, #tpu.memory_space<vmem>>, vector<1x128xf32>,
    %c31_757 = arith.constant 31 : index
    %c0_758 = arith.constant 0 : index
    %448 = vector.load %arg9[%c31_757, %c0_758] : memref<100x128xf32, #tpu.memory_space<vmem>>, vector<1x128xf32>
    %c0_759 = arith.constant 0 : index
    %c1664 = arith.constant 1664 : index
    %449 = vector.load %arg10[%c0_759, %c1664] : memref<16x2048xf32, #tpu.memory_space<vmem>>, vector<1x128xf32>
    tpu.vector_store %arg10[%c0_759, %c1664], %448 {strides = array<i32>} : memref<16x2048xf32, #tpu.memory_space<vmem>>, vector<1x128xf32>,
    %c33_760 = arith.constant 33 : index
    %c0_761 = arith.constant 0 : index
    %450 = vector.load %arg9[%c33_760, %c0_761] : memref<100x128xf32, #tpu.memory_space<vmem>>, vector<1x128xf32>
    %c1_762 = arith.constant 1 : index
    %c1664_763 = arith.constant 1664 : index
    %451 = vector.load %arg10[%c1_762, %c1664_763] : memref<16x2048xf32, #tpu.memory_space<vmem>>, vector<1x128xf32>
    tpu.vector_store %arg10[%c1_762, %c1664_763], %450 {strides = array<i32>} : memref<16x2048xf32, #tpu.memory_space<vmem>>, vector<1x128xf32>,
    %c35_764 = arith.constant 35 : index
    %c0_765 = arith.constant 0 : index
    %452 = vector.load %arg9[%c35_764, %c0_765] : memref<100x128xf32, #tpu.memory_space<vmem>>, vector<1x128xf32>
    %c2_766 = arith.constant 2 : index
    %c1664_767 = arith.constant 1664 : index
    %453 = vector.load %arg10[%c2_766, %c1664_767] : memref<16x2048xf32, #tpu.memory_space<vmem>>, vector<1x128xf32>
    tpu.vector_store %arg10[%c2_766, %c1664_767], %452 {strides = array<i32>} : memref<16x2048xf32, #tpu.memory_space<vmem>>, vector<1x128xf32>,
    %c37_768 = arith.constant 37 : index
    %c0_769 = arith.constant 0 : index
    %454 = vector.load %arg9[%c37_768, %c0_769] : memref<100x128xf32, #tpu.memory_space<vmem>>, vector<1x128xf32>
    %c3_770 = arith.constant 3 : index
    %c1664_771 = arith.constant 1664 : index
    %455 = vector.load %arg10[%c3_770, %c1664_771] : memref<16x2048xf32, #tpu.memory_space<vmem>>, vector<1x128xf32>
    tpu.vector_store %arg10[%c3_770, %c1664_771], %454 {strides = array<i32>} : memref<16x2048xf32, #tpu.memory_space<vmem>>, vector<1x128xf32>,
    %c51_772 = arith.constant 51 : index
    %c0_773 = arith.constant 0 : index
    %456 = vector.load %arg9[%c51_772, %c0_773] : memref<100x128xf32, #tpu.memory_space<vmem>>, vector<1x128xf32>
    %c4_774 = arith.constant 4 : index
    %c1664_775 = arith.constant 1664 : index
    %457 = vector.load %arg10[%c4_774, %c1664_775] : memref<16x2048xf32, #tpu.memory_space<vmem>>, vector<1x128xf32>
    tpu.vector_store %arg10[%c4_774, %c1664_775], %456 {strides = array<i32>} : memref<16x2048xf32, #tpu.memory_space<vmem>>, vector<1x128xf32>,
    %c53_776 = arith.constant 53 : index
    %c0_777 = arith.constant 0 : index
    %458 = vector.load %arg9[%c53_776, %c0_777] : memref<100x128xf32, #tpu.memory_space<vmem>>, vector<1x128xf32>
    %c5_778 = arith.constant 5 : index
    %c1664_779 = arith.constant 1664 : index
    %459 = vector.load %arg10[%c5_778, %c1664_779] : memref<16x2048xf32, #tpu.memory_space<vmem>>, vector<1x128xf32>
    tpu.vector_store %arg10[%c5_778, %c1664_779], %458 {strides = array<i32>} : memref<16x2048xf32, #tpu.memory_space<vmem>>, vector<1x128xf32>,
    %c55_780 = arith.constant 55 : index
    %c0_781 = arith.constant 0 : index
    %460 = vector.load %arg9[%c55_780, %c0_781] : memref<100x128xf32, #tpu.memory_space<vmem>>, vector<1x128xf32>
    %c6_782 = arith.constant 6 : index
    %c1664_783 = arith.constant 1664 : index
    %461 = vector.load %arg10[%c6_782, %c1664_783] : memref<16x2048xf32, #tpu.memory_space<vmem>>, vector<1x128xf32>
    tpu.vector_store %arg10[%c6_782, %c1664_783], %460 {strides = array<i32>} : memref<16x2048xf32, #tpu.memory_space<vmem>>, vector<1x128xf32>,
    %c57_784 = arith.constant 57 : index
    %c0_785 = arith.constant 0 : index
    %462 = vector.load %arg9[%c57_784, %c0_785] : memref<100x128xf32, #tpu.memory_space<vmem>>, vector<1x128xf32>
    %c7_786 = arith.constant 7 : index
    %c1664_787 = arith.constant 1664 : index
    %463 = vector.load %arg10[%c7_786, %c1664_787] : memref<16x2048xf32, #tpu.memory_space<vmem>>, vector<1x128xf32>
    tpu.vector_store %arg10[%c7_786, %c1664_787], %462 {strides = array<i32>} : memref<16x2048xf32, #tpu.memory_space<vmem>>, vector<1x128xf32>,
    %c71_788 = arith.constant 71 : index
    %c0_789 = arith.constant 0 : index
    %464 = vector.load %arg9[%c71_788, %c0_789] : memref<100x128xf32, #tpu.memory_space<vmem>>, vector<1x128xf32>
    %c8_790 = arith.constant 8 : index
    %c1664_791 = arith.constant 1664 : index
    %465 = vector.load %arg10[%c8_790, %c1664_791] : memref<16x2048xf32, #tpu.memory_space<vmem>>, vector<1x128xf32>
    tpu.vector_store %arg10[%c8_790, %c1664_791], %464 {strides = array<i32>} : memref<16x2048xf32, #tpu.memory_space<vmem>>, vector<1x128xf32>,
    %c73_792 = arith.constant 73 : index
    %c0_793 = arith.constant 0 : index
    %466 = vector.load %arg9[%c73_792, %c0_793] : memref<100x128xf32, #tpu.memory_space<vmem>>, vector<1x128xf32>
    %c9_794 = arith.constant 9 : index
    %c1664_795 = arith.constant 1664 : index
    %467 = vector.load %arg10[%c9_794, %c1664_795] : memref<16x2048xf32, #tpu.memory_space<vmem>>, vector<1x128xf32>
    tpu.vector_store %arg10[%c9_794, %c1664_795], %466 {strides = array<i32>} : memref<16x2048xf32, #tpu.memory_space<vmem>>, vector<1x128xf32>,
    %c75_796 = arith.constant 75 : index
    %c0_797 = arith.constant 0 : index
    %468 = vector.load %arg9[%c75_796, %c0_797] : memref<100x128xf32, #tpu.memory_space<vmem>>, vector<1x128xf32>
    %c10_798 = arith.constant 10 : index
    %c1664_799 = arith.constant 1664 : index
    %469 = vector.load %arg10[%c10_798, %c1664_799] : memref<16x2048xf32, #tpu.memory_space<vmem>>, vector<1x128xf32>
    tpu.vector_store %arg10[%c10_798, %c1664_799], %468 {strides = array<i32>} : memref<16x2048xf32, #tpu.memory_space<vmem>>, vector<1x128xf32>,
    %c77_800 = arith.constant 77 : index
    %c0_801 = arith.constant 0 : index
    %470 = vector.load %arg9[%c77_800, %c0_801] : memref<100x128xf32, #tpu.memory_space<vmem>>, vector<1x128xf32>
    %c11_802 = arith.constant 11 : index
    %c1664_803 = arith.constant 1664 : index
    %471 = vector.load %arg10[%c11_802, %c1664_803] : memref<16x2048xf32, #tpu.memory_space<vmem>>, vector<1x128xf32>
    tpu.vector_store %arg10[%c11_802, %c1664_803], %470 {strides = array<i32>} : memref<16x2048xf32, #tpu.memory_space<vmem>>, vector<1x128xf32>,
    %c91 = arith.constant 91 : index
    %c0_804 = arith.constant 0 : index
    %472 = vector.load %arg9[%c91, %c0_804] : memref<100x128xf32, #tpu.memory_space<vmem>>, vector<1x128xf32>
    %c12_805 = arith.constant 12 : index
    %c1664_806 = arith.constant 1664 : index
    %473 = vector.load %arg10[%c12_805, %c1664_806] : memref<16x2048xf32, #tpu.memory_space<vmem>>, vector<1x128xf32>
    tpu.vector_store %arg10[%c12_805, %c1664_806], %472 {strides = array<i32>} : memref<16x2048xf32, #tpu.memory_space<vmem>>, vector<1x128xf32>,
    %c93 = arith.constant 93 : index
    %c0_807 = arith.constant 0 : index
    %474 = vector.load %arg9[%c93, %c0_807] : memref<100x128xf32, #tpu.memory_space<vmem>>, vector<1x128xf32>
    %c13_808 = arith.constant 13 : index
    %c1664_809 = arith.constant 1664 : index
    %475 = vector.load %arg10[%c13_808, %c1664_809] : memref<16x2048xf32, #tpu.memory_space<vmem>>, vector<1x128xf32>
    tpu.vector_store %arg10[%c13_808, %c1664_809], %474 {strides = array<i32>} : memref<16x2048xf32, #tpu.memory_space<vmem>>, vector<1x128xf32>,
    %c95 = arith.constant 95 : index
    %c0_810 = arith.constant 0 : index
    %476 = vector.load %arg9[%c95, %c0_810] : memref<100x128xf32, #tpu.memory_space<vmem>>, vector<1x128xf32>
    %c14_811 = arith.constant 14 : index
    %c1664_812 = arith.constant 1664 : index
    %477 = vector.load %arg10[%c14_811, %c1664_812] : memref<16x2048xf32, #tpu.memory_space<vmem>>, vector<1x128xf32>
    tpu.vector_store %arg10[%c14_811, %c1664_812], %476 {strides = array<i32>} : memref<16x2048xf32, #tpu.memory_space<vmem>>, vector<1x128xf32>,
    %c97 = arith.constant 97 : index
    %c0_813 = arith.constant 0 : index
    %478 = vector.load %arg9[%c97, %c0_813] : memref<100x128xf32, #tpu.memory_space<vmem>>, vector<1x128xf32>
    %c15_814 = arith.constant 15 : index
    %c1664_815 = arith.constant 1664 : index
    %479 = vector.load %arg10[%c15_814, %c1664_815] : memref<16x2048xf32, #tpu.memory_space<vmem>>, vector<1x128xf32>
    tpu.vector_store %arg10[%c15_814, %c1664_815], %478 {strides = array<i32>} : memref<16x2048xf32, #tpu.memory_space<vmem>>, vector<1x128xf32>,
    %c32_816 = arith.constant 32 : index
    %c0_817 = arith.constant 0 : index
    %480 = vector.load %arg9[%c32_816, %c0_817] : memref<100x128xf32, #tpu.memory_space<vmem>>, vector<1x128xf32>
    %c0_818 = arith.constant 0 : index
    %c1792 = arith.constant 1792 : index
    %481 = vector.load %arg10[%c0_818, %c1792] : memref<16x2048xf32, #tpu.memory_space<vmem>>, vector<1x128xf32>
    tpu.vector_store %arg10[%c0_818, %c1792], %480 {strides = array<i32>} : memref<16x2048xf32, #tpu.memory_space<vmem>>, vector<1x128xf32>,
    %c34_819 = arith.constant 34 : index
    %c0_820 = arith.constant 0 : index
    %482 = vector.load %arg9[%c34_819, %c0_820] : memref<100x128xf32, #tpu.memory_space<vmem>>, vector<1x128xf32>
    %c1_821 = arith.constant 1 : index
    %c1792_822 = arith.constant 1792 : index
    %483 = vector.load %arg10[%c1_821, %c1792_822] : memref<16x2048xf32, #tpu.memory_space<vmem>>, vector<1x128xf32>
    tpu.vector_store %arg10[%c1_821, %c1792_822], %482 {strides = array<i32>} : memref<16x2048xf32, #tpu.memory_space<vmem>>, vector<1x128xf32>,
    %c36_823 = arith.constant 36 : index
    %c0_824 = arith.constant 0 : index
    %484 = vector.load %arg9[%c36_823, %c0_824] : memref<100x128xf32, #tpu.memory_space<vmem>>, vector<1x128xf32>
    %c2_825 = arith.constant 2 : index
    %c1792_826 = arith.constant 1792 : index
    %485 = vector.load %arg10[%c2_825, %c1792_826] : memref<16x2048xf32, #tpu.memory_space<vmem>>, vector<1x128xf32>
    tpu.vector_store %arg10[%c2_825, %c1792_826], %484 {strides = array<i32>} : memref<16x2048xf32, #tpu.memory_space<vmem>>, vector<1x128xf32>,
    %c38_827 = arith.constant 38 : index
    %c0_828 = arith.constant 0 : index
    %486 = vector.load %arg9[%c38_827, %c0_828] : memref<100x128xf32, #tpu.memory_space<vmem>>, vector<1x128xf32>
    %c3_829 = arith.constant 3 : index
    %c1792_830 = arith.constant 1792 : index
    %487 = vector.load %arg10[%c3_829, %c1792_830] : memref<16x2048xf32, #tpu.memory_space<vmem>>, vector<1x128xf32>
    tpu.vector_store %arg10[%c3_829, %c1792_830], %486 {strides = array<i32>} : memref<16x2048xf32, #tpu.memory_space<vmem>>, vector<1x128xf32>,
    %c52_831 = arith.constant 52 : index
    %c0_832 = arith.constant 0 : index
    %488 = vector.load %arg9[%c52_831, %c0_832] : memref<100x128xf32, #tpu.memory_space<vmem>>, vector<1x128xf32>
    %c4_833 = arith.constant 4 : index
    %c1792_834 = arith.constant 1792 : index
    %489 = vector.load %arg10[%c4_833, %c1792_834] : memref<16x2048xf32, #tpu.memory_space<vmem>>, vector<1x128xf32>
    tpu.vector_store %arg10[%c4_833, %c1792_834], %488 {strides = array<i32>} : memref<16x2048xf32, #tpu.memory_space<vmem>>, vector<1x128xf32>,
    %c54_835 = arith.constant 54 : index
    %c0_836 = arith.constant 0 : index
    %490 = vector.load %arg9[%c54_835, %c0_836] : memref<100x128xf32, #tpu.memory_space<vmem>>, vector<1x128xf32>
    %c5_837 = arith.constant 5 : index
    %c1792_838 = arith.constant 1792 : index
    %491 = vector.load %arg10[%c5_837, %c1792_838] : memref<16x2048xf32, #tpu.memory_space<vmem>>, vector<1x128xf32>
    tpu.vector_store %arg10[%c5_837, %c1792_838], %490 {strides = array<i32>} : memref<16x2048xf32, #tpu.memory_space<vmem>>, vector<1x128xf32>,
    %c56_839 = arith.constant 56 : index
    %c0_840 = arith.constant 0 : index
    %492 = vector.load %arg9[%c56_839, %c0_840] : memref<100x128xf32, #tpu.memory_space<vmem>>, vector<1x128xf32>
    %c6_841 = arith.constant 6 : index
    %c1792_842 = arith.constant 1792 : index
    %493 = vector.load %arg10[%c6_841, %c1792_842] : memref<16x2048xf32, #tpu.memory_space<vmem>>, vector<1x128xf32>
    tpu.vector_store %arg10[%c6_841, %c1792_842], %492 {strides = array<i32>} : memref<16x2048xf32, #tpu.memory_space<vmem>>, vector<1x128xf32>,
    %c58_843 = arith.constant 58 : index
    %c0_844 = arith.constant 0 : index
    %494 = vector.load %arg9[%c58_843, %c0_844] : memref<100x128xf32, #tpu.memory_space<vmem>>, vector<1x128xf32>
    %c7_845 = arith.constant 7 : index
    %c1792_846 = arith.constant 1792 : index
    %495 = vector.load %arg10[%c7_845, %c1792_846] : memref<16x2048xf32, #tpu.memory_space<vmem>>, vector<1x128xf32>
    tpu.vector_store %arg10[%c7_845, %c1792_846], %494 {strides = array<i32>} : memref<16x2048xf32, #tpu.memory_space<vmem>>, vector<1x128xf32>,
    %c72_847 = arith.constant 72 : index
    %c0_848 = arith.constant 0 : index
    %496 = vector.load %arg9[%c72_847, %c0_848] : memref<100x128xf32, #tpu.memory_space<vmem>>, vector<1x128xf32>
    %c8_849 = arith.constant 8 : index
    %c1792_850 = arith.constant 1792 : index
    %497 = vector.load %arg10[%c8_849, %c1792_850] : memref<16x2048xf32, #tpu.memory_space<vmem>>, vector<1x128xf32>
    tpu.vector_store %arg10[%c8_849, %c1792_850], %496 {strides = array<i32>} : memref<16x2048xf32, #tpu.memory_space<vmem>>, vector<1x128xf32>,
    %c74_851 = arith.constant 74 : index
    %c0_852 = arith.constant 0 : index
    %498 = vector.load %arg9[%c74_851, %c0_852] : memref<100x128xf32, #tpu.memory_space<vmem>>, vector<1x128xf32>
    %c9_853 = arith.constant 9 : index
    %c1792_854 = arith.constant 1792 : index
    %499 = vector.load %arg10[%c9_853, %c1792_854] : memref<16x2048xf32, #tpu.memory_space<vmem>>, vector<1x128xf32>
    tpu.vector_store %arg10[%c9_853, %c1792_854], %498 {strides = array<i32>} : memref<16x2048xf32, #tpu.memory_space<vmem>>, vector<1x128xf32>,
    %c76_855 = arith.constant 76 : index
    %c0_856 = arith.constant 0 : index
    %500 = vector.load %arg9[%c76_855, %c0_856] : memref<100x128xf32, #tpu.memory_space<vmem>>, vector<1x128xf32>
    %c10_857 = arith.constant 10 : index
    %c1792_858 = arith.constant 1792 : index
    %501 = vector.load %arg10[%c10_857, %c1792_858] : memref<16x2048xf32, #tpu.memory_space<vmem>>, vector<1x128xf32>
    tpu.vector_store %arg10[%c10_857, %c1792_858], %500 {strides = array<i32>} : memref<16x2048xf32, #tpu.memory_space<vmem>>, vector<1x128xf32>,
    %c78_859 = arith.constant 78 : index
    %c0_860 = arith.constant 0 : index
    %502 = vector.load %arg9[%c78_859, %c0_860] : memref<100x128xf32, #tpu.memory_space<vmem>>, vector<1x128xf32>
    %c11_861 = arith.constant 11 : index
    %c1792_862 = arith.constant 1792 : index
    %503 = vector.load %arg10[%c11_861, %c1792_862] : memref<16x2048xf32, #tpu.memory_space<vmem>>, vector<1x128xf32>
    tpu.vector_store %arg10[%c11_861, %c1792_862], %502 {strides = array<i32>} : memref<16x2048xf32, #tpu.memory_space<vmem>>, vector<1x128xf32>,
    %c92_863 = arith.constant 92 : index
    %c0_864 = arith.constant 0 : index
    %504 = vector.load %arg9[%c92_863, %c0_864] : memref<100x128xf32, #tpu.memory_space<vmem>>, vector<1x128xf32>
    %c12_865 = arith.constant 12 : index
    %c1792_866 = arith.constant 1792 : index
    %505 = vector.load %arg10[%c12_865, %c1792_866] : memref<16x2048xf32, #tpu.memory_space<vmem>>, vector<1x128xf32>
    tpu.vector_store %arg10[%c12_865, %c1792_866], %504 {strides = array<i32>} : memref<16x2048xf32, #tpu.memory_space<vmem>>, vector<1x128xf32>,
    %c94_867 = arith.constant 94 : index
    %c0_868 = arith.constant 0 : index
    %506 = vector.load %arg9[%c94_867, %c0_868] : memref<100x128xf32, #tpu.memory_space<vmem>>, vector<1x128xf32>
    %c13_869 = arith.constant 13 : index
    %c1792_870 = arith.constant 1792 : index
    %507 = vector.load %arg10[%c13_869, %c1792_870] : memref<16x2048xf32, #tpu.memory_space<vmem>>, vector<1x128xf32>
    tpu.vector_store %arg10[%c13_869, %c1792_870], %506 {strides = array<i32>} : memref<16x2048xf32, #tpu.memory_space<vmem>>, vector<1x128xf32>,
    %c96_871 = arith.constant 96 : index
    %c0_872 = arith.constant 0 : index
    %508 = vector.load %arg9[%c96_871, %c0_872] : memref<100x128xf32, #tpu.memory_space<vmem>>, vector<1x128xf32>
    %c14_873 = arith.constant 14 : index
    %c1792_874 = arith.constant 1792 : index
    %509 = vector.load %arg10[%c14_873, %c1792_874] : memref<16x2048xf32, #tpu.memory_space<vmem>>, vector<1x128xf32>
    tpu.vector_store %arg10[%c14_873, %c1792_874], %508 {strides = array<i32>} : memref<16x2048xf32, #tpu.memory_space<vmem>>, vector<1x128xf32>,
    %c98 = arith.constant 98 : index
    %c0_875 = arith.constant 0 : index
    %510 = vector.load %arg9[%c98, %c0_875] : memref<100x128xf32, #tpu.memory_space<vmem>>, vector<1x128xf32>
    %c15_876 = arith.constant 15 : index
    %c1792_877 = arith.constant 1792 : index
    %511 = vector.load %arg10[%c15_876, %c1792_877] : memref<16x2048xf32, #tpu.memory_space<vmem>>, vector<1x128xf32>
    tpu.vector_store %arg10[%c15_876, %c1792_877], %510 {strides = array<i32>} : memref<16x2048xf32, #tpu.memory_space<vmem>>, vector<1x128xf32>,
    %c33_878 = arith.constant 33 : index
    %c0_879 = arith.constant 0 : index
    %512 = vector.load %arg9[%c33_878, %c0_879] : memref<100x128xf32, #tpu.memory_space<vmem>>, vector<1x128xf32>
    %c0_880 = arith.constant 0 : index
    %c1920 = arith.constant 1920 : index
    %513 = vector.load %arg10[%c0_880, %c1920] : memref<16x2048xf32, #tpu.memory_space<vmem>>, vector<1x128xf32>
    tpu.vector_store %arg10[%c0_880, %c1920], %512 {strides = array<i32>} : memref<16x2048xf32, #tpu.memory_space<vmem>>, vector<1x128xf32>,
    %c35_881 = arith.constant 35 : index
    %c0_882 = arith.constant 0 : index
    %514 = vector.load %arg9[%c35_881, %c0_882] : memref<100x128xf32, #tpu.memory_space<vmem>>, vector<1x128xf32>
    %c1_883 = arith.constant 1 : index
    %c1920_884 = arith.constant 1920 : index
    %515 = vector.load %arg10[%c1_883, %c1920_884] : memref<16x2048xf32, #tpu.memory_space<vmem>>, vector<1x128xf32>
    tpu.vector_store %arg10[%c1_883, %c1920_884], %514 {strides = array<i32>} : memref<16x2048xf32, #tpu.memory_space<vmem>>, vector<1x128xf32>,
    %c37_885 = arith.constant 37 : index
    %c0_886 = arith.constant 0 : index
    %516 = vector.load %arg9[%c37_885, %c0_886] : memref<100x128xf32, #tpu.memory_space<vmem>>, vector<1x128xf32>
    %c2_887 = arith.constant 2 : index
    %c1920_888 = arith.constant 1920 : index
    %517 = vector.load %arg10[%c2_887, %c1920_888] : memref<16x2048xf32, #tpu.memory_space<vmem>>, vector<1x128xf32>
    tpu.vector_store %arg10[%c2_887, %c1920_888], %516 {strides = array<i32>} : memref<16x2048xf32, #tpu.memory_space<vmem>>, vector<1x128xf32>,
    %c39_889 = arith.constant 39 : index
    %c0_890 = arith.constant 0 : index
    %518 = vector.load %arg9[%c39_889, %c0_890] : memref<100x128xf32, #tpu.memory_space<vmem>>, vector<1x128xf32>
    %c3_891 = arith.constant 3 : index
    %c1920_892 = arith.constant 1920 : index
    %519 = vector.load %arg10[%c3_891, %c1920_892] : memref<16x2048xf32, #tpu.memory_space<vmem>>, vector<1x128xf32>
    tpu.vector_store %arg10[%c3_891, %c1920_892], %518 {strides = array<i32>} : memref<16x2048xf32, #tpu.memory_space<vmem>>, vector<1x128xf32>,
    %c53_893 = arith.constant 53 : index
    %c0_894 = arith.constant 0 : index
    %520 = vector.load %arg9[%c53_893, %c0_894] : memref<100x128xf32, #tpu.memory_space<vmem>>, vector<1x128xf32>
    %c4_895 = arith.constant 4 : index
    %c1920_896 = arith.constant 1920 : index
    %521 = vector.load %arg10[%c4_895, %c1920_896] : memref<16x2048xf32, #tpu.memory_space<vmem>>, vector<1x128xf32>
    tpu.vector_store %arg10[%c4_895, %c1920_896], %520 {strides = array<i32>} : memref<16x2048xf32, #tpu.memory_space<vmem>>, vector<1x128xf32>,
    %c55_897 = arith.constant 55 : index
    %c0_898 = arith.constant 0 : index
    %522 = vector.load %arg9[%c55_897, %c0_898] : memref<100x128xf32, #tpu.memory_space<vmem>>, vector<1x128xf32>
    %c5_899 = arith.constant 5 : index
    %c1920_900 = arith.constant 1920 : index
    %523 = vector.load %arg10[%c5_899, %c1920_900] : memref<16x2048xf32, #tpu.memory_space<vmem>>, vector<1x128xf32>
    tpu.vector_store %arg10[%c5_899, %c1920_900], %522 {strides = array<i32>} : memref<16x2048xf32, #tpu.memory_space<vmem>>, vector<1x128xf32>,
    %c57_901 = arith.constant 57 : index
    %c0_902 = arith.constant 0 : index
    %524 = vector.load %arg9[%c57_901, %c0_902] : memref<100x128xf32, #tpu.memory_space<vmem>>, vector<1x128xf32>
    %c6_903 = arith.constant 6 : index
    %c1920_904 = arith.constant 1920 : index
    %525 = vector.load %arg10[%c6_903, %c1920_904] : memref<16x2048xf32, #tpu.memory_space<vmem>>, vector<1x128xf32>
    tpu.vector_store %arg10[%c6_903, %c1920_904], %524 {strides = array<i32>} : memref<16x2048xf32, #tpu.memory_space<vmem>>, vector<1x128xf32>,
    %c59_905 = arith.constant 59 : index
    %c0_906 = arith.constant 0 : index
    %526 = vector.load %arg9[%c59_905, %c0_906] : memref<100x128xf32, #tpu.memory_space<vmem>>, vector<1x128xf32>
    %c7_907 = arith.constant 7 : index
    %c1920_908 = arith.constant 1920 : index
    %527 = vector.load %arg10[%c7_907, %c1920_908] : memref<16x2048xf32, #tpu.memory_space<vmem>>, vector<1x128xf32>
    tpu.vector_store %arg10[%c7_907, %c1920_908], %526 {strides = array<i32>} : memref<16x2048xf32, #tpu.memory_space<vmem>>, vector<1x128xf32>,
    %c73_909 = arith.constant 73 : index
    %c0_910 = arith.constant 0 : index
    %528 = vector.load %arg9[%c73_909, %c0_910] : memref<100x128xf32, #tpu.memory_space<vmem>>, vector<1x128xf32>
    %c8_911 = arith.constant 8 : index
    %c1920_912 = arith.constant 1920 : index
    %529 = vector.load %arg10[%c8_911, %c1920_912] : memref<16x2048xf32, #tpu.memory_space<vmem>>, vector<1x128xf32>
    tpu.vector_store %arg10[%c8_911, %c1920_912], %528 {strides = array<i32>} : memref<16x2048xf32, #tpu.memory_space<vmem>>, vector<1x128xf32>,
    %c75_913 = arith.constant 75 : index
    %c0_914 = arith.constant 0 : index
    %530 = vector.load %arg9[%c75_913, %c0_914] : memref<100x128xf32, #tpu.memory_space<vmem>>, vector<1x128xf32>
    %c9_915 = arith.constant 9 : index
    %c1920_916 = arith.constant 1920 : index
    %531 = vector.load %arg10[%c9_915, %c1920_916] : memref<16x2048xf32, #tpu.memory_space<vmem>>, vector<1x128xf32>
    tpu.vector_store %arg10[%c9_915, %c1920_916], %530 {strides = array<i32>} : memref<16x2048xf32, #tpu.memory_space<vmem>>, vector<1x128xf32>,
    %c77_917 = arith.constant 77 : index
    %c0_918 = arith.constant 0 : index
    %532 = vector.load %arg9[%c77_917, %c0_918] : memref<100x128xf32, #tpu.memory_space<vmem>>, vector<1x128xf32>
    %c10_919 = arith.constant 10 : index
    %c1920_920 = arith.constant 1920 : index
    %533 = vector.load %arg10[%c10_919, %c1920_920] : memref<16x2048xf32, #tpu.memory_space<vmem>>, vector<1x128xf32>
    tpu.vector_store %arg10[%c10_919, %c1920_920], %532 {strides = array<i32>} : memref<16x2048xf32, #tpu.memory_space<vmem>>, vector<1x128xf32>,
    %c79_921 = arith.constant 79 : index
    %c0_922 = arith.constant 0 : index
    %534 = vector.load %arg9[%c79_921, %c0_922] : memref<100x128xf32, #tpu.memory_space<vmem>>, vector<1x128xf32>
    %c11_923 = arith.constant 11 : index
    %c1920_924 = arith.constant 1920 : index
    %535 = vector.load %arg10[%c11_923, %c1920_924] : memref<16x2048xf32, #tpu.memory_space<vmem>>, vector<1x128xf32>
    tpu.vector_store %arg10[%c11_923, %c1920_924], %534 {strides = array<i32>} : memref<16x2048xf32, #tpu.memory_space<vmem>>, vector<1x128xf32>,
    %c93_925 = arith.constant 93 : index
    %c0_926 = arith.constant 0 : index
    %536 = vector.load %arg9[%c93_925, %c0_926] : memref<100x128xf32, #tpu.memory_space<vmem>>, vector<1x128xf32>
    %c12_927 = arith.constant 12 : index
    %c1920_928 = arith.constant 1920 : index
    %537 = vector.load %arg10[%c12_927, %c1920_928] : memref<16x2048xf32, #tpu.memory_space<vmem>>, vector<1x128xf32>
    tpu.vector_store %arg10[%c12_927, %c1920_928], %536 {strides = array<i32>} : memref<16x2048xf32, #tpu.memory_space<vmem>>, vector<1x128xf32>,
    %c95_929 = arith.constant 95 : index
    %c0_930 = arith.constant 0 : index
    %538 = vector.load %arg9[%c95_929, %c0_930] : memref<100x128xf32, #tpu.memory_space<vmem>>, vector<1x128xf32>
    %c13_931 = arith.constant 13 : index
    %c1920_932 = arith.constant 1920 : index
    %539 = vector.load %arg10[%c13_931, %c1920_932] : memref<16x2048xf32, #tpu.memory_space<vmem>>, vector<1x128xf32>
    tpu.vector_store %arg10[%c13_931, %c1920_932], %538 {strides = array<i32>} : memref<16x2048xf32, #tpu.memory_space<vmem>>, vector<1x128xf32>,
    %c97_933 = arith.constant 97 : index
    %c0_934 = arith.constant 0 : index
    %540 = vector.load %arg9[%c97_933, %c0_934] : memref<100x128xf32, #tpu.memory_space<vmem>>, vector<1x128xf32>
    %c14_935 = arith.constant 14 : index
    %c1920_936 = arith.constant 1920 : index
    %541 = vector.load %arg10[%c14_935, %c1920_936] : memref<16x2048xf32, #tpu.memory_space<vmem>>, vector<1x128xf32>
    tpu.vector_store %arg10[%c14_935, %c1920_936], %540 {strides = array<i32>} : memref<16x2048xf32, #tpu.memory_space<vmem>>, vector<1x128xf32>,
    %c99 = arith.constant 99 : index
    %c0_937 = arith.constant 0 : index
    %542 = vector.load %arg9[%c99, %c0_937] : memref<100x128xf32, #tpu.memory_space<vmem>>, vector<1x128xf32>
    %c15_938 = arith.constant 15 : index
    %c1920_939 = arith.constant 1920 : index
    %543 = vector.load %arg10[%c15_938, %c1920_939] : memref<16x2048xf32, #tpu.memory_space<vmem>>, vector<1x128xf32>
    tpu.vector_store %arg10[%c15_938, %c1920_939], %542 {strides = array<i32>} : memref<16x2048xf32, #tpu.memory_space<vmem>>, vector<1x128xf32>,
    %c0_940 = arith.constant 0 : index
    %c0_941 = arith.constant 0 : index
    %544 = vector.load %arg10[%c0_940, %c0_941] : memref<16x2048xf32, #tpu.memory_space<vmem>>, vector<16x2048xf32>
    %c0_942 = arith.constant 0 : index
    %c0_943 = arith.constant 0 : index
    %545 = vector.load %arg4[%c0_942, %c0_943] : memref<2048x64xf32, #tpu.memory_space<vmem>>, vector<2048x64xf32>
    %cst_944 = arith.constant dense<0.000000e+00> : vector<16x64xf32>
    %546 = tpu.matmul %544, %545, %cst_944 {dimension_numbers = #tpu.dot_dimension_numbers<[1], [0], [0], [1], [0, 0, 1, 1], [], []>} : vector<16x2048xf32>, vector<2048x64xf32>, vector<16x64xf32> -> vector<16x64xf32>
    %c0_945 = arith.constant 0 : index
    %c0_946 = arith.constant 0 : index
    %547 = vector.load %arg5[%c0_945, %c0_946] : memref<1x64xf32, #tpu.memory_space<vmem>>, vector<1x64xf32>
    %548 = vector.broadcast %547 : vector<1x64xf32> to vector<16x64xf32>
    %549 = arith.addf %546, %548 : vector<16x64xf32>
    %cst_947 = arith.constant 0.000000e+00 : f32
    %550 = vector.broadcast %cst_947 : f32 to vector<16x64xf32>
    %551 = arith.cmpf oge, %549, %550 : vector<16x64xf32>
    %cst_948 = arith.constant 0.00999999977 : f32
    %552 = vector.broadcast %cst_948 : f32 to vector<16x64xf32>
    %553 = arith.mulf %552, %549 : vector<16x64xf32>
    %554 = arith.select %551, %549, %553 : vector<16x64xi1>, vector<16x64xf32>
    %cst_949 = arith.constant 0.000000e+00 : f32
    %555 = vector.broadcast %cst_949 : f32 to vector<36x64xf32>
    %c0_950 = arith.constant 0 : index
    %c0_951 = arith.constant 0 : index
    %556 = vector.load %arg11[%c0_950, %c0_951] : memref<36x64xf32, #tpu.memory_space<vmem>>, vector<36x64xf32>
    tpu.vector_store %arg11[%c0_950, %c0_951], %555 {strides = array<i32>} : memref<36x64xf32, #tpu.memory_space<vmem>>, vector<36x64xf32>,
    %557 = vector.extract_strided_slice %554 {offsets = [0, 0], sizes = [4, 64], strides = [1, 1]} : vector<16x64xf32> to vector<4x64xf32>
    %c7_952 = arith.constant 7 : index
    %c0_953 = arith.constant 0 : index
    %558 = vector.load %arg11[%c7_952, %c0_953] : memref<36x64xf32, #tpu.memory_space<vmem>>, vector<4x64xf32>
    tpu.vector_store %arg11[%c7_952, %c0_953], %557 {strides = array<i32>} : memref<36x64xf32, #tpu.memory_space<vmem>>, vector<4x64xf32>,
    %559 = vector.extract_strided_slice %554 {offsets = [4, 0], sizes = [4, 64], strides = [1, 1]} : vector<16x64xf32> to vector<4x64xf32>
    %c13_954 = arith.constant 13 : index
    %c0_955 = arith.constant 0 : index
    %560 = vector.load %arg11[%c13_954, %c0_955] : memref<36x64xf32, #tpu.memory_space<vmem>>, vector<4x64xf32>
    tpu.vector_store %arg11[%c13_954, %c0_955], %559 {strides = array<i32>} : memref<36x64xf32, #tpu.memory_space<vmem>>, vector<4x64xf32>,
    %561 = vector.extract_strided_slice %554 {offsets = [8, 0], sizes = [4, 64], strides = [1, 1]} : vector<16x64xf32> to vector<4x64xf32>
    %c19_956 = arith.constant 19 : index
    %c0_957 = arith.constant 0 : index
    %562 = vector.load %arg11[%c19_956, %c0_957] : memref<36x64xf32, #tpu.memory_space<vmem>>, vector<4x64xf32>
    tpu.vector_store %arg11[%c19_956, %c0_957], %561 {strides = array<i32>} : memref<36x64xf32, #tpu.memory_space<vmem>>, vector<4x64xf32>,
    %563 = vector.extract_strided_slice %554 {offsets = [12, 0], sizes = [4, 64], strides = [1, 1]} : vector<16x64xf32> to vector<4x64xf32>
    %c25_958 = arith.constant 25 : index
    %c0_959 = arith.constant 0 : index
    %564 = vector.load %arg11[%c25_958, %c0_959] : memref<36x64xf32, #tpu.memory_space<vmem>>, vector<4x64xf32>
    tpu.vector_store %arg11[%c25_958, %c0_959], %563 {strides = array<i32>} : memref<36x64xf32, #tpu.memory_space<vmem>>, vector<4x64xf32>,
    %cst_960 = arith.constant 0.000000e+00 : f32
    %565 = vector.broadcast %cst_960 : f32 to vector<4x2048xf32>
    %c0_961 = arith.constant 0 : index
    %c0_962 = arith.constant 0 : index
    %566 = vector.load %arg12[%c0_961, %c0_962] : memref<4x2048xf32, #tpu.memory_space<vmem>>, vector<4x2048xf32>
    tpu.vector_store %arg12[%c0_961, %c0_962], %565 {strides = array<i32>} : memref<4x2048xf32, #tpu.memory_space<vmem>>, vector<4x2048xf32>,
    %c0_963 = arith.constant 0 : index
    %c0_964 = arith.constant 0 : index
    %567 = vector.load %arg11[%c0_963, %c0_964] : memref<36x64xf32, #tpu.memory_space<vmem>>, vector<1x64xf32>
    %c0_965 = arith.constant 0 : index
    %c0_966 = arith.constant 0 : index
    %568 = vector.load %arg12[%c0_965, %c0_966] : memref<4x2048xf32, #tpu.memory_space<vmem>>, vector<1x64xf32>
    tpu.vector_store %arg12[%c0_965, %c0_966], %567 {strides = array<i32>} : memref<4x2048xf32, #tpu.memory_space<vmem>>, vector<1x64xf32>,
    %c2_967 = arith.constant 2 : index
    %c0_968 = arith.constant 0 : index
    %569 = vector.load %arg11[%c2_967, %c0_968] : memref<36x64xf32, #tpu.memory_space<vmem>>, vector<1x64xf32>
    %c1_969 = arith.constant 1 : index
    %c0_970 = arith.constant 0 : index
    %570 = vector.load %arg12[%c1_969, %c0_970] : memref<4x2048xf32, #tpu.memory_space<vmem>>, vector<1x64xf32>
    tpu.vector_store %arg12[%c1_969, %c0_970], %569 {strides = array<i32>} : memref<4x2048xf32, #tpu.memory_space<vmem>>, vector<1x64xf32>,
    %c12_971 = arith.constant 12 : index
    %c0_972 = arith.constant 0 : index
    %571 = vector.load %arg11[%c12_971, %c0_972] : memref<36x64xf32, #tpu.memory_space<vmem>>, vector<1x64xf32>
    %c2_973 = arith.constant 2 : index
    %c0_974 = arith.constant 0 : index
    %572 = vector.load %arg12[%c2_973, %c0_974] : memref<4x2048xf32, #tpu.memory_space<vmem>>, vector<1x64xf32>
    tpu.vector_store %arg12[%c2_973, %c0_974], %571 {strides = array<i32>} : memref<4x2048xf32, #tpu.memory_space<vmem>>, vector<1x64xf32>,
    %c14_975 = arith.constant 14 : index
    %c0_976 = arith.constant 0 : index
    %573 = vector.load %arg11[%c14_975, %c0_976] : memref<36x64xf32, #tpu.memory_space<vmem>>, vector<1x64xf32>
    %c3_977 = arith.constant 3 : index
    %c0_978 = arith.constant 0 : index
    %574 = vector.load %arg12[%c3_977, %c0_978] : memref<4x2048xf32, #tpu.memory_space<vmem>>, vector<1x64xf32>
    tpu.vector_store %arg12[%c3_977, %c0_978], %573 {strides = array<i32>} : memref<4x2048xf32, #tpu.memory_space<vmem>>, vector<1x64xf32>,
    %c1_979 = arith.constant 1 : index
    %c0_980 = arith.constant 0 : index
    %575 = vector.load %arg11[%c1_979, %c0_980] : memref<36x64xf32, #tpu.memory_space<vmem>>, vector<1x64xf32>
    %c0_981 = arith.constant 0 : index
    %c128_982 = arith.constant 128 : index
    %576 = vector.load %arg12[%c0_981, %c128_982] : memref<4x2048xf32, #tpu.memory_space<vmem>>, vector<1x64xf32>
    tpu.vector_store %arg12[%c0_981, %c128_982], %575 {strides = array<i32>} : memref<4x2048xf32, #tpu.memory_space<vmem>>, vector<1x64xf32>,
    %c3_983 = arith.constant 3 : index
    %c0_984 = arith.constant 0 : index
    %577 = vector.load %arg11[%c3_983, %c0_984] : memref<36x64xf32, #tpu.memory_space<vmem>>, vector<1x64xf32>
    %c1_985 = arith.constant 1 : index
    %c128_986 = arith.constant 128 : index
    %578 = vector.load %arg12[%c1_985, %c128_986] : memref<4x2048xf32, #tpu.memory_space<vmem>>, vector<1x64xf32>
    tpu.vector_store %arg12[%c1_985, %c128_986], %577 {strides = array<i32>} : memref<4x2048xf32, #tpu.memory_space<vmem>>, vector<1x64xf32>,
    %c13_987 = arith.constant 13 : index
    %c0_988 = arith.constant 0 : index
    %579 = vector.load %arg11[%c13_987, %c0_988] : memref<36x64xf32, #tpu.memory_space<vmem>>, vector<1x64xf32>
    %c2_989 = arith.constant 2 : index
    %c128_990 = arith.constant 128 : index
    %580 = vector.load %arg12[%c2_989, %c128_990] : memref<4x2048xf32, #tpu.memory_space<vmem>>, vector<1x64xf32>
    tpu.vector_store %arg12[%c2_989, %c128_990], %579 {strides = array<i32>} : memref<4x2048xf32, #tpu.memory_space<vmem>>, vector<1x64xf32>,
    %c15_991 = arith.constant 15 : index
    %c0_992 = arith.constant 0 : index
    %581 = vector.load %arg11[%c15_991, %c0_992] : memref<36x64xf32, #tpu.memory_space<vmem>>, vector<1x64xf32>
    %c3_993 = arith.constant 3 : index
    %c128_994 = arith.constant 128 : index
    %582 = vector.load %arg12[%c3_993, %c128_994] : memref<4x2048xf32, #tpu.memory_space<vmem>>, vector<1x64xf32>
    tpu.vector_store %arg12[%c3_993, %c128_994], %581 {strides = array<i32>} : memref<4x2048xf32, #tpu.memory_space<vmem>>, vector<1x64xf32>,
    %c2_995 = arith.constant 2 : index
    %c0_996 = arith.constant 0 : index
    %583 = vector.load %arg11[%c2_995, %c0_996] : memref<36x64xf32, #tpu.memory_space<vmem>>, vector<1x64xf32>
    %c0_997 = arith.constant 0 : index
    %c256_998 = arith.constant 256 : index
    %584 = vector.load %arg12[%c0_997, %c256_998] : memref<4x2048xf32, #tpu.memory_space<vmem>>, vector<1x64xf32>
    tpu.vector_store %arg12[%c0_997, %c256_998], %583 {strides = array<i32>} : memref<4x2048xf32, #tpu.memory_space<vmem>>, vector<1x64xf32>,
    %c4_999 = arith.constant 4 : index
    %c0_1000 = arith.constant 0 : index
    %585 = vector.load %arg11[%c4_999, %c0_1000] : memref<36x64xf32, #tpu.memory_space<vmem>>, vector<1x64xf32>
    %c1_1001 = arith.constant 1 : index
    %c256_1002 = arith.constant 256 : index
    %586 = vector.load %arg12[%c1_1001, %c256_1002] : memref<4x2048xf32, #tpu.memory_space<vmem>>, vector<1x64xf32>
    tpu.vector_store %arg12[%c1_1001, %c256_1002], %585 {strides = array<i32>} : memref<4x2048xf32, #tpu.memory_space<vmem>>, vector<1x64xf32>,
    %c14_1003 = arith.constant 14 : index
    %c0_1004 = arith.constant 0 : index
    %587 = vector.load %arg11[%c14_1003, %c0_1004] : memref<36x64xf32, #tpu.memory_space<vmem>>, vector<1x64xf32>
    %c2_1005 = arith.constant 2 : index
    %c256_1006 = arith.constant 256 : index
    %588 = vector.load %arg12[%c2_1005, %c256_1006] : memref<4x2048xf32, #tpu.memory_space<vmem>>, vector<1x64xf32>
    tpu.vector_store %arg12[%c2_1005, %c256_1006], %587 {strides = array<i32>} : memref<4x2048xf32, #tpu.memory_space<vmem>>, vector<1x64xf32>,
    %c16_1007 = arith.constant 16 : index
    %c0_1008 = arith.constant 0 : index
    %589 = vector.load %arg11[%c16_1007, %c0_1008] : memref<36x64xf32, #tpu.memory_space<vmem>>, vector<1x64xf32>
    %c3_1009 = arith.constant 3 : index
    %c256_1010 = arith.constant 256 : index
    %590 = vector.load %arg12[%c3_1009, %c256_1010] : memref<4x2048xf32, #tpu.memory_space<vmem>>, vector<1x64xf32>
    tpu.vector_store %arg12[%c3_1009, %c256_1010], %589 {strides = array<i32>} : memref<4x2048xf32, #tpu.memory_space<vmem>>, vector<1x64xf32>,
    %c3_1011 = arith.constant 3 : index
    %c0_1012 = arith.constant 0 : index
    %591 = vector.load %arg11[%c3_1011, %c0_1012] : memref<36x64xf32, #tpu.memory_space<vmem>>, vector<1x64xf32>
    %c0_1013 = arith.constant 0 : index
    %c384_1014 = arith.constant 384 : index
    %592 = vector.load %arg12[%c0_1013, %c384_1014] : memref<4x2048xf32, #tpu.memory_space<vmem>>, vector<1x64xf32>
    tpu.vector_store %arg12[%c0_1013, %c384_1014], %591 {strides = array<i32>} : memref<4x2048xf32, #tpu.memory_space<vmem>>, vector<1x64xf32>,
    %c5_1015 = arith.constant 5 : index
    %c0_1016 = arith.constant 0 : index
    %593 = vector.load %arg11[%c5_1015, %c0_1016] : memref<36x64xf32, #tpu.memory_space<vmem>>, vector<1x64xf32>
    %c1_1017 = arith.constant 1 : index
    %c384_1018 = arith.constant 384 : index
    %594 = vector.load %arg12[%c1_1017, %c384_1018] : memref<4x2048xf32, #tpu.memory_space<vmem>>, vector<1x64xf32>
    tpu.vector_store %arg12[%c1_1017, %c384_1018], %593 {strides = array<i32>} : memref<4x2048xf32, #tpu.memory_space<vmem>>, vector<1x64xf32>,
    %c15_1019 = arith.constant 15 : index
    %c0_1020 = arith.constant 0 : index
    %595 = vector.load %arg11[%c15_1019, %c0_1020] : memref<36x64xf32, #tpu.memory_space<vmem>>, vector<1x64xf32>
    %c2_1021 = arith.constant 2 : index
    %c384_1022 = arith.constant 384 : index
    %596 = vector.load %arg12[%c2_1021, %c384_1022] : memref<4x2048xf32, #tpu.memory_space<vmem>>, vector<1x64xf32>
    tpu.vector_store %arg12[%c2_1021, %c384_1022], %595 {strides = array<i32>} : memref<4x2048xf32, #tpu.memory_space<vmem>>, vector<1x64xf32>,
    %c17_1023 = arith.constant 17 : index
    %c0_1024 = arith.constant 0 : index
    %597 = vector.load %arg11[%c17_1023, %c0_1024] : memref<36x64xf32, #tpu.memory_space<vmem>>, vector<1x64xf32>
    %c3_1025 = arith.constant 3 : index
    %c384_1026 = arith.constant 384 : index
    %598 = vector.load %arg12[%c3_1025, %c384_1026] : memref<4x2048xf32, #tpu.memory_space<vmem>>, vector<1x64xf32>
    tpu.vector_store %arg12[%c3_1025, %c384_1026], %597 {strides = array<i32>} : memref<4x2048xf32, #tpu.memory_space<vmem>>, vector<1x64xf32>,
    %c6_1027 = arith.constant 6 : index
    %c0_1028 = arith.constant 0 : index
    %599 = vector.load %arg11[%c6_1027, %c0_1028] : memref<36x64xf32, #tpu.memory_space<vmem>>, vector<1x64xf32>
    %c0_1029 = arith.constant 0 : index
    %c512_1030 = arith.constant 512 : index
    %600 = vector.load %arg12[%c0_1029, %c512_1030] : memref<4x2048xf32, #tpu.memory_space<vmem>>, vector<1x64xf32>
    tpu.vector_store %arg12[%c0_1029, %c512_1030], %599 {strides = array<i32>} : memref<4x2048xf32, #tpu.memory_space<vmem>>, vector<1x64xf32>,
    %c8_1031 = arith.constant 8 : index
    %c0_1032 = arith.constant 0 : index
    %601 = vector.load %arg11[%c8_1031, %c0_1032] : memref<36x64xf32, #tpu.memory_space<vmem>>, vector<1x64xf32>
    %c1_1033 = arith.constant 1 : index
    %c512_1034 = arith.constant 512 : index
    %602 = vector.load %arg12[%c1_1033, %c512_1034] : memref<4x2048xf32, #tpu.memory_space<vmem>>, vector<1x64xf32>
    tpu.vector_store %arg12[%c1_1033, %c512_1034], %601 {strides = array<i32>} : memref<4x2048xf32, #tpu.memory_space<vmem>>, vector<1x64xf32>,
    %c18_1035 = arith.constant 18 : index
    %c0_1036 = arith.constant 0 : index
    %603 = vector.load %arg11[%c18_1035, %c0_1036] : memref<36x64xf32, #tpu.memory_space<vmem>>, vector<1x64xf32>
    %c2_1037 = arith.constant 2 : index
    %c512_1038 = arith.constant 512 : index
    %604 = vector.load %arg12[%c2_1037, %c512_1038] : memref<4x2048xf32, #tpu.memory_space<vmem>>, vector<1x64xf32>
    tpu.vector_store %arg12[%c2_1037, %c512_1038], %603 {strides = array<i32>} : memref<4x2048xf32, #tpu.memory_space<vmem>>, vector<1x64xf32>,
    %c20_1039 = arith.constant 20 : index
    %c0_1040 = arith.constant 0 : index
    %605 = vector.load %arg11[%c20_1039, %c0_1040] : memref<36x64xf32, #tpu.memory_space<vmem>>, vector<1x64xf32>
    %c3_1041 = arith.constant 3 : index
    %c512_1042 = arith.constant 512 : index
    %606 = vector.load %arg12[%c3_1041, %c512_1042] : memref<4x2048xf32, #tpu.memory_space<vmem>>, vector<1x64xf32>
    tpu.vector_store %arg12[%c3_1041, %c512_1042], %605 {strides = array<i32>} : memref<4x2048xf32, #tpu.memory_space<vmem>>, vector<1x64xf32>,
    %c7_1043 = arith.constant 7 : index
    %c0_1044 = arith.constant 0 : index
    %607 = vector.load %arg11[%c7_1043, %c0_1044] : memref<36x64xf32, #tpu.memory_space<vmem>>, vector<1x64xf32>
    %c0_1045 = arith.constant 0 : index
    %c640_1046 = arith.constant 640 : index
    %608 = vector.load %arg12[%c0_1045, %c640_1046] : memref<4x2048xf32, #tpu.memory_space<vmem>>, vector<1x64xf32>
    tpu.vector_store %arg12[%c0_1045, %c640_1046], %607 {strides = array<i32>} : memref<4x2048xf32, #tpu.memory_space<vmem>>, vector<1x64xf32>,
    %c9_1047 = arith.constant 9 : index
    %c0_1048 = arith.constant 0 : index
    %609 = vector.load %arg11[%c9_1047, %c0_1048] : memref<36x64xf32, #tpu.memory_space<vmem>>, vector<1x64xf32>
    %c1_1049 = arith.constant 1 : index
    %c640_1050 = arith.constant 640 : index
    %610 = vector.load %arg12[%c1_1049, %c640_1050] : memref<4x2048xf32, #tpu.memory_space<vmem>>, vector<1x64xf32>
    tpu.vector_store %arg12[%c1_1049, %c640_1050], %609 {strides = array<i32>} : memref<4x2048xf32, #tpu.memory_space<vmem>>, vector<1x64xf32>,
    %c19_1051 = arith.constant 19 : index
    %c0_1052 = arith.constant 0 : index
    %611 = vector.load %arg11[%c19_1051, %c0_1052] : memref<36x64xf32, #tpu.memory_space<vmem>>, vector<1x64xf32>
    %c2_1053 = arith.constant 2 : index
    %c640_1054 = arith.constant 640 : index
    %612 = vector.load %arg12[%c2_1053, %c640_1054] : memref<4x2048xf32, #tpu.memory_space<vmem>>, vector<1x64xf32>
    tpu.vector_store %arg12[%c2_1053, %c640_1054], %611 {strides = array<i32>} : memref<4x2048xf32, #tpu.memory_space<vmem>>, vector<1x64xf32>,
    %c21_1055 = arith.constant 21 : index
    %c0_1056 = arith.constant 0 : index
    %613 = vector.load %arg11[%c21_1055, %c0_1056] : memref<36x64xf32, #tpu.memory_space<vmem>>, vector<1x64xf32>
    %c3_1057 = arith.constant 3 : index
    %c640_1058 = arith.constant 640 : index
    %614 = vector.load %arg12[%c3_1057, %c640_1058] : memref<4x2048xf32, #tpu.memory_space<vmem>>, vector<1x64xf32>
    tpu.vector_store %arg12[%c3_1057, %c640_1058], %613 {strides = array<i32>} : memref<4x2048xf32, #tpu.memory_space<vmem>>, vector<1x64xf32>,
    %c8_1059 = arith.constant 8 : index
    %c0_1060 = arith.constant 0 : index
    %615 = vector.load %arg11[%c8_1059, %c0_1060] : memref<36x64xf32, #tpu.memory_space<vmem>>, vector<1x64xf32>
    %c0_1061 = arith.constant 0 : index
    %c768_1062 = arith.constant 768 : index
    %616 = vector.load %arg12[%c0_1061, %c768_1062] : memref<4x2048xf32, #tpu.memory_space<vmem>>, vector<1x64xf32>
    tpu.vector_store %arg12[%c0_1061, %c768_1062], %615 {strides = array<i32>} : memref<4x2048xf32, #tpu.memory_space<vmem>>, vector<1x64xf32>,
    %c10_1063 = arith.constant 10 : index
    %c0_1064 = arith.constant 0 : index
    %617 = vector.load %arg11[%c10_1063, %c0_1064] : memref<36x64xf32, #tpu.memory_space<vmem>>, vector<1x64xf32>
    %c1_1065 = arith.constant 1 : index
    %c768_1066 = arith.constant 768 : index
    %618 = vector.load %arg12[%c1_1065, %c768_1066] : memref<4x2048xf32, #tpu.memory_space<vmem>>, vector<1x64xf32>
    tpu.vector_store %arg12[%c1_1065, %c768_1066], %617 {strides = array<i32>} : memref<4x2048xf32, #tpu.memory_space<vmem>>, vector<1x64xf32>,
    %c20_1067 = arith.constant 20 : index
    %c0_1068 = arith.constant 0 : index
    %619 = vector.load %arg11[%c20_1067, %c0_1068] : memref<36x64xf32, #tpu.memory_space<vmem>>, vector<1x64xf32>
    %c2_1069 = arith.constant 2 : index
    %c768_1070 = arith.constant 768 : index
    %620 = vector.load %arg12[%c2_1069, %c768_1070] : memref<4x2048xf32, #tpu.memory_space<vmem>>, vector<1x64xf32>
    tpu.vector_store %arg12[%c2_1069, %c768_1070], %619 {strides = array<i32>} : memref<4x2048xf32, #tpu.memory_space<vmem>>, vector<1x64xf32>,
    %c22_1071 = arith.constant 22 : index
    %c0_1072 = arith.constant 0 : index
    %621 = vector.load %arg11[%c22_1071, %c0_1072] : memref<36x64xf32, #tpu.memory_space<vmem>>, vector<1x64xf32>
    %c3_1073 = arith.constant 3 : index
    %c768_1074 = arith.constant 768 : index
    %622 = vector.load %arg12[%c3_1073, %c768_1074] : memref<4x2048xf32, #tpu.memory_space<vmem>>, vector<1x64xf32>
    tpu.vector_store %arg12[%c3_1073, %c768_1074], %621 {strides = array<i32>} : memref<4x2048xf32, #tpu.memory_space<vmem>>, vector<1x64xf32>,
    %c9_1075 = arith.constant 9 : index
    %c0_1076 = arith.constant 0 : index
    %623 = vector.load %arg11[%c9_1075, %c0_1076] : memref<36x64xf32, #tpu.memory_space<vmem>>, vector<1x64xf32>
    %c0_1077 = arith.constant 0 : index
    %c896_1078 = arith.constant 896 : index
    %624 = vector.load %arg12[%c0_1077, %c896_1078] : memref<4x2048xf32, #tpu.memory_space<vmem>>, vector<1x64xf32>
    tpu.vector_store %arg12[%c0_1077, %c896_1078], %623 {strides = array<i32>} : memref<4x2048xf32, #tpu.memory_space<vmem>>, vector<1x64xf32>,
    %c11_1079 = arith.constant 11 : index
    %c0_1080 = arith.constant 0 : index
    %625 = vector.load %arg11[%c11_1079, %c0_1080] : memref<36x64xf32, #tpu.memory_space<vmem>>, vector<1x64xf32>
    %c1_1081 = arith.constant 1 : index
    %c896_1082 = arith.constant 896 : index
    %626 = vector.load %arg12[%c1_1081, %c896_1082] : memref<4x2048xf32, #tpu.memory_space<vmem>>, vector<1x64xf32>
    tpu.vector_store %arg12[%c1_1081, %c896_1082], %625 {strides = array<i32>} : memref<4x2048xf32, #tpu.memory_space<vmem>>, vector<1x64xf32>,
    %c21_1083 = arith.constant 21 : index
    %c0_1084 = arith.constant 0 : index
    %627 = vector.load %arg11[%c21_1083, %c0_1084] : memref<36x64xf32, #tpu.memory_space<vmem>>, vector<1x64xf32>
    %c2_1085 = arith.constant 2 : index
    %c896_1086 = arith.constant 896 : index
    %628 = vector.load %arg12[%c2_1085, %c896_1086] : memref<4x2048xf32, #tpu.memory_space<vmem>>, vector<1x64xf32>
    tpu.vector_store %arg12[%c2_1085, %c896_1086], %627 {strides = array<i32>} : memref<4x2048xf32, #tpu.memory_space<vmem>>, vector<1x64xf32>,
    %c23_1087 = arith.constant 23 : index
    %c0_1088 = arith.constant 0 : index
    %629 = vector.load %arg11[%c23_1087, %c0_1088] : memref<36x64xf32, #tpu.memory_space<vmem>>, vector<1x64xf32>
    %c3_1089 = arith.constant 3 : index
    %c896_1090 = arith.constant 896 : index
    %630 = vector.load %arg12[%c3_1089, %c896_1090] : memref<4x2048xf32, #tpu.memory_space<vmem>>, vector<1x64xf32>
    tpu.vector_store %arg12[%c3_1089, %c896_1090], %629 {strides = array<i32>} : memref<4x2048xf32, #tpu.memory_space<vmem>>, vector<1x64xf32>,
    %c12_1091 = arith.constant 12 : index
    %c0_1092 = arith.constant 0 : index
    %631 = vector.load %arg11[%c12_1091, %c0_1092] : memref<36x64xf32, #tpu.memory_space<vmem>>, vector<1x64xf32>
    %c0_1093 = arith.constant 0 : index
    %c1024_1094 = arith.constant 1024 : index
    %632 = vector.load %arg12[%c0_1093, %c1024_1094] : memref<4x2048xf32, #tpu.memory_space<vmem>>, vector<1x64xf32>
    tpu.vector_store %arg12[%c0_1093, %c1024_1094], %631 {strides = array<i32>} : memref<4x2048xf32, #tpu.memory_space<vmem>>, vector<1x64xf32>,
    %c14_1095 = arith.constant 14 : index
    %c0_1096 = arith.constant 0 : index
    %633 = vector.load %arg11[%c14_1095, %c0_1096] : memref<36x64xf32, #tpu.memory_space<vmem>>, vector<1x64xf32>
    %c1_1097 = arith.constant 1 : index
    %c1024_1098 = arith.constant 1024 : index
    %634 = vector.load %arg12[%c1_1097, %c1024_1098] : memref<4x2048xf32, #tpu.memory_space<vmem>>, vector<1x64xf32>
    tpu.vector_store %arg12[%c1_1097, %c1024_1098], %633 {strides = array<i32>} : memref<4x2048xf32, #tpu.memory_space<vmem>>, vector<1x64xf32>,
    %c24_1099 = arith.constant 24 : index
    %c0_1100 = arith.constant 0 : index
    %635 = vector.load %arg11[%c24_1099, %c0_1100] : memref<36x64xf32, #tpu.memory_space<vmem>>, vector<1x64xf32>
    %c2_1101 = arith.constant 2 : index
    %c1024_1102 = arith.constant 1024 : index
    %636 = vector.load %arg12[%c2_1101, %c1024_1102] : memref<4x2048xf32, #tpu.memory_space<vmem>>, vector<1x64xf32>
    tpu.vector_store %arg12[%c2_1101, %c1024_1102], %635 {strides = array<i32>} : memref<4x2048xf32, #tpu.memory_space<vmem>>, vector<1x64xf32>,
    %c26_1103 = arith.constant 26 : index
    %c0_1104 = arith.constant 0 : index
    %637 = vector.load %arg11[%c26_1103, %c0_1104] : memref<36x64xf32, #tpu.memory_space<vmem>>, vector<1x64xf32>
    %c3_1105 = arith.constant 3 : index
    %c1024_1106 = arith.constant 1024 : index
    %638 = vector.load %arg12[%c3_1105, %c1024_1106] : memref<4x2048xf32, #tpu.memory_space<vmem>>, vector<1x64xf32>
    tpu.vector_store %arg12[%c3_1105, %c1024_1106], %637 {strides = array<i32>} : memref<4x2048xf32, #tpu.memory_space<vmem>>, vector<1x64xf32>,
    %c13_1107 = arith.constant 13 : index
    %c0_1108 = arith.constant 0 : index
    %639 = vector.load %arg11[%c13_1107, %c0_1108] : memref<36x64xf32, #tpu.memory_space<vmem>>, vector<1x64xf32>
    %c0_1109 = arith.constant 0 : index
    %c1152_1110 = arith.constant 1152 : index
    %640 = vector.load %arg12[%c0_1109, %c1152_1110] : memref<4x2048xf32, #tpu.memory_space<vmem>>, vector<1x64xf32>
    tpu.vector_store %arg12[%c0_1109, %c1152_1110], %639 {strides = array<i32>} : memref<4x2048xf32, #tpu.memory_space<vmem>>, vector<1x64xf32>,
    %c15_1111 = arith.constant 15 : index
    %c0_1112 = arith.constant 0 : index
    %641 = vector.load %arg11[%c15_1111, %c0_1112] : memref<36x64xf32, #tpu.memory_space<vmem>>, vector<1x64xf32>
    %c1_1113 = arith.constant 1 : index
    %c1152_1114 = arith.constant 1152 : index
    %642 = vector.load %arg12[%c1_1113, %c1152_1114] : memref<4x2048xf32, #tpu.memory_space<vmem>>, vector<1x64xf32>
    tpu.vector_store %arg12[%c1_1113, %c1152_1114], %641 {strides = array<i32>} : memref<4x2048xf32, #tpu.memory_space<vmem>>, vector<1x64xf32>,
    %c25_1115 = arith.constant 25 : index
    %c0_1116 = arith.constant 0 : index
    %643 = vector.load %arg11[%c25_1115, %c0_1116] : memref<36x64xf32, #tpu.memory_space<vmem>>, vector<1x64xf32>
    %c2_1117 = arith.constant 2 : index
    %c1152_1118 = arith.constant 1152 : index
    %644 = vector.load %arg12[%c2_1117, %c1152_1118] : memref<4x2048xf32, #tpu.memory_space<vmem>>, vector<1x64xf32>
    tpu.vector_store %arg12[%c2_1117, %c1152_1118], %643 {strides = array<i32>} : memref<4x2048xf32, #tpu.memory_space<vmem>>, vector<1x64xf32>,
    %c27_1119 = arith.constant 27 : index
    %c0_1120 = arith.constant 0 : index
    %645 = vector.load %arg11[%c27_1119, %c0_1120] : memref<36x64xf32, #tpu.memory_space<vmem>>, vector<1x64xf32>
    %c3_1121 = arith.constant 3 : index
    %c1152_1122 = arith.constant 1152 : index
    %646 = vector.load %arg12[%c3_1121, %c1152_1122] : memref<4x2048xf32, #tpu.memory_space<vmem>>, vector<1x64xf32>
    tpu.vector_store %arg12[%c3_1121, %c1152_1122], %645 {strides = array<i32>} : memref<4x2048xf32, #tpu.memory_space<vmem>>, vector<1x64xf32>,
    %c14_1123 = arith.constant 14 : index
    %c0_1124 = arith.constant 0 : index
    %647 = vector.load %arg11[%c14_1123, %c0_1124] : memref<36x64xf32, #tpu.memory_space<vmem>>, vector<1x64xf32>
    %c0_1125 = arith.constant 0 : index
    %c1280_1126 = arith.constant 1280 : index
    %648 = vector.load %arg12[%c0_1125, %c1280_1126] : memref<4x2048xf32, #tpu.memory_space<vmem>>, vector<1x64xf32>
    tpu.vector_store %arg12[%c0_1125, %c1280_1126], %647 {strides = array<i32>} : memref<4x2048xf32, #tpu.memory_space<vmem>>, vector<1x64xf32>,
    %c16_1127 = arith.constant 16 : index
    %c0_1128 = arith.constant 0 : index
    %649 = vector.load %arg11[%c16_1127, %c0_1128] : memref<36x64xf32, #tpu.memory_space<vmem>>, vector<1x64xf32>
    %c1_1129 = arith.constant 1 : index
    %c1280_1130 = arith.constant 1280 : index
    %650 = vector.load %arg12[%c1_1129, %c1280_1130] : memref<4x2048xf32, #tpu.memory_space<vmem>>, vector<1x64xf32>
    tpu.vector_store %arg12[%c1_1129, %c1280_1130], %649 {strides = array<i32>} : memref<4x2048xf32, #tpu.memory_space<vmem>>, vector<1x64xf32>,
    %c26_1131 = arith.constant 26 : index
    %c0_1132 = arith.constant 0 : index
    %651 = vector.load %arg11[%c26_1131, %c0_1132] : memref<36x64xf32, #tpu.memory_space<vmem>>, vector<1x64xf32>
    %c2_1133 = arith.constant 2 : index
    %c1280_1134 = arith.constant 1280 : index
    %652 = vector.load %arg12[%c2_1133, %c1280_1134] : memref<4x2048xf32, #tpu.memory_space<vmem>>, vector<1x64xf32>
    tpu.vector_store %arg12[%c2_1133, %c1280_1134], %651 {strides = array<i32>} : memref<4x2048xf32, #tpu.memory_space<vmem>>, vector<1x64xf32>,
    %c28_1135 = arith.constant 28 : index
    %c0_1136 = arith.constant 0 : index
    %653 = vector.load %arg11[%c28_1135, %c0_1136] : memref<36x64xf32, #tpu.memory_space<vmem>>, vector<1x64xf32>
    %c3_1137 = arith.constant 3 : index
    %c1280_1138 = arith.constant 1280 : index
    %654 = vector.load %arg12[%c3_1137, %c1280_1138] : memref<4x2048xf32, #tpu.memory_space<vmem>>, vector<1x64xf32>
    tpu.vector_store %arg12[%c3_1137, %c1280_1138], %653 {strides = array<i32>} : memref<4x2048xf32, #tpu.memory_space<vmem>>, vector<1x64xf32>,
    %c15_1139 = arith.constant 15 : index
    %c0_1140 = arith.constant 0 : index
    %655 = vector.load %arg11[%c15_1139, %c0_1140] : memref<36x64xf32, #tpu.memory_space<vmem>>, vector<1x64xf32>
    %c0_1141 = arith.constant 0 : index
    %c1408_1142 = arith.constant 1408 : index
    %656 = vector.load %arg12[%c0_1141, %c1408_1142] : memref<4x2048xf32, #tpu.memory_space<vmem>>, vector<1x64xf32>
    tpu.vector_store %arg12[%c0_1141, %c1408_1142], %655 {strides = array<i32>} : memref<4x2048xf32, #tpu.memory_space<vmem>>, vector<1x64xf32>,
    %c17_1143 = arith.constant 17 : index
    %c0_1144 = arith.constant 0 : index
    %657 = vector.load %arg11[%c17_1143, %c0_1144] : memref<36x64xf32, #tpu.memory_space<vmem>>, vector<1x64xf32>
    %c1_1145 = arith.constant 1 : index
    %c1408_1146 = arith.constant 1408 : index
    %658 = vector.load %arg12[%c1_1145, %c1408_1146] : memref<4x2048xf32, #tpu.memory_space<vmem>>, vector<1x64xf32>
    tpu.vector_store %arg12[%c1_1145, %c1408_1146], %657 {strides = array<i32>} : memref<4x2048xf32, #tpu.memory_space<vmem>>, vector<1x64xf32>,
    %c27_1147 = arith.constant 27 : index
    %c0_1148 = arith.constant 0 : index
    %659 = vector.load %arg11[%c27_1147, %c0_1148] : memref<36x64xf32, #tpu.memory_space<vmem>>, vector<1x64xf32>
    %c2_1149 = arith.constant 2 : index
    %c1408_1150 = arith.constant 1408 : index
    %660 = vector.load %arg12[%c2_1149, %c1408_1150] : memref<4x2048xf32, #tpu.memory_space<vmem>>, vector<1x64xf32>
    tpu.vector_store %arg12[%c2_1149, %c1408_1150], %659 {strides = array<i32>} : memref<4x2048xf32, #tpu.memory_space<vmem>>, vector<1x64xf32>,
    %c29_1151 = arith.constant 29 : index
    %c0_1152 = arith.constant 0 : index
    %661 = vector.load %arg11[%c29_1151, %c0_1152] : memref<36x64xf32, #tpu.memory_space<vmem>>, vector<1x64xf32>
    %c3_1153 = arith.constant 3 : index
    %c1408_1154 = arith.constant 1408 : index
    %662 = vector.load %arg12[%c3_1153, %c1408_1154] : memref<4x2048xf32, #tpu.memory_space<vmem>>, vector<1x64xf32>
    tpu.vector_store %arg12[%c3_1153, %c1408_1154], %661 {strides = array<i32>} : memref<4x2048xf32, #tpu.memory_space<vmem>>, vector<1x64xf32>,
    %c18_1155 = arith.constant 18 : index
    %c0_1156 = arith.constant 0 : index
    %663 = vector.load %arg11[%c18_1155, %c0_1156] : memref<36x64xf32, #tpu.memory_space<vmem>>, vector<1x64xf32>
    %c0_1157 = arith.constant 0 : index
    %c1536_1158 = arith.constant 1536 : index
    %664 = vector.load %arg12[%c0_1157, %c1536_1158] : memref<4x2048xf32, #tpu.memory_space<vmem>>, vector<1x64xf32>
    tpu.vector_store %arg12[%c0_1157, %c1536_1158], %663 {strides = array<i32>} : memref<4x2048xf32, #tpu.memory_space<vmem>>, vector<1x64xf32>,
    %c20_1159 = arith.constant 20 : index
    %c0_1160 = arith.constant 0 : index
    %665 = vector.load %arg11[%c20_1159, %c0_1160] : memref<36x64xf32, #tpu.memory_space<vmem>>, vector<1x64xf32>
    %c1_1161 = arith.constant 1 : index
    %c1536_1162 = arith.constant 1536 : index
    %666 = vector.load %arg12[%c1_1161, %c1536_1162] : memref<4x2048xf32, #tpu.memory_space<vmem>>, vector<1x64xf32>
    tpu.vector_store %arg12[%c1_1161, %c1536_1162], %665 {strides = array<i32>} : memref<4x2048xf32, #tpu.memory_space<vmem>>, vector<1x64xf32>,
    %c30_1163 = arith.constant 30 : index
    %c0_1164 = arith.constant 0 : index
    %667 = vector.load %arg11[%c30_1163, %c0_1164] : memref<36x64xf32, #tpu.memory_space<vmem>>, vector<1x64xf32>
    %c2_1165 = arith.constant 2 : index
    %c1536_1166 = arith.constant 1536 : index
    %668 = vector.load %arg12[%c2_1165, %c1536_1166] : memref<4x2048xf32, #tpu.memory_space<vmem>>, vector<1x64xf32>
    tpu.vector_store %arg12[%c2_1165, %c1536_1166], %667 {strides = array<i32>} : memref<4x2048xf32, #tpu.memory_space<vmem>>, vector<1x64xf32>,
    %c32_1167 = arith.constant 32 : index
    %c0_1168 = arith.constant 0 : index
    %669 = vector.load %arg11[%c32_1167, %c0_1168] : memref<36x64xf32, #tpu.memory_space<vmem>>, vector<1x64xf32>
    %c3_1169 = arith.constant 3 : index
    %c1536_1170 = arith.constant 1536 : index
    %670 = vector.load %arg12[%c3_1169, %c1536_1170] : memref<4x2048xf32, #tpu.memory_space<vmem>>, vector<1x64xf32>
    tpu.vector_store %arg12[%c3_1169, %c1536_1170], %669 {strides = array<i32>} : memref<4x2048xf32, #tpu.memory_space<vmem>>, vector<1x64xf32>,
    %c19_1171 = arith.constant 19 : index
    %c0_1172 = arith.constant 0 : index
    %671 = vector.load %arg11[%c19_1171, %c0_1172] : memref<36x64xf32, #tpu.memory_space<vmem>>, vector<1x64xf32>
    %c0_1173 = arith.constant 0 : index
    %c1664_1174 = arith.constant 1664 : index
    %672 = vector.load %arg12[%c0_1173, %c1664_1174] : memref<4x2048xf32, #tpu.memory_space<vmem>>, vector<1x64xf32>
    tpu.vector_store %arg12[%c0_1173, %c1664_1174], %671 {strides = array<i32>} : memref<4x2048xf32, #tpu.memory_space<vmem>>, vector<1x64xf32>,
    %c21_1175 = arith.constant 21 : index
    %c0_1176 = arith.constant 0 : index
    %673 = vector.load %arg11[%c21_1175, %c0_1176] : memref<36x64xf32, #tpu.memory_space<vmem>>, vector<1x64xf32>
    %c1_1177 = arith.constant 1 : index
    %c1664_1178 = arith.constant 1664 : index
    %674 = vector.load %arg12[%c1_1177, %c1664_1178] : memref<4x2048xf32, #tpu.memory_space<vmem>>, vector<1x64xf32>
    tpu.vector_store %arg12[%c1_1177, %c1664_1178], %673 {strides = array<i32>} : memref<4x2048xf32, #tpu.memory_space<vmem>>, vector<1x64xf32>,
    %c31_1179 = arith.constant 31 : index
    %c0_1180 = arith.constant 0 : index
    %675 = vector.load %arg11[%c31_1179, %c0_1180] : memref<36x64xf32, #tpu.memory_space<vmem>>, vector<1x64xf32>
    %c2_1181 = arith.constant 2 : index
    %c1664_1182 = arith.constant 1664 : index
    %676 = vector.load %arg12[%c2_1181, %c1664_1182] : memref<4x2048xf32, #tpu.memory_space<vmem>>, vector<1x64xf32>
    tpu.vector_store %arg12[%c2_1181, %c1664_1182], %675 {strides = array<i32>} : memref<4x2048xf32, #tpu.memory_space<vmem>>, vector<1x64xf32>,
    %c33_1183 = arith.constant 33 : index
    %c0_1184 = arith.constant 0 : index
    %677 = vector.load %arg11[%c33_1183, %c0_1184] : memref<36x64xf32, #tpu.memory_space<vmem>>, vector<1x64xf32>
    %c3_1185 = arith.constant 3 : index
    %c1664_1186 = arith.constant 1664 : index
    %678 = vector.load %arg12[%c3_1185, %c1664_1186] : memref<4x2048xf32, #tpu.memory_space<vmem>>, vector<1x64xf32>
    tpu.vector_store %arg12[%c3_1185, %c1664_1186], %677 {strides = array<i32>} : memref<4x2048xf32, #tpu.memory_space<vmem>>, vector<1x64xf32>,
    %c20_1187 = arith.constant 20 : index
    %c0_1188 = arith.constant 0 : index
    %679 = vector.load %arg11[%c20_1187, %c0_1188] : memref<36x64xf32, #tpu.memory_space<vmem>>, vector<1x64xf32>
    %c0_1189 = arith.constant 0 : index
    %c1792_1190 = arith.constant 1792 : index
    %680 = vector.load %arg12[%c0_1189, %c1792_1190] : memref<4x2048xf32, #tpu.memory_space<vmem>>, vector<1x64xf32>
    tpu.vector_store %arg12[%c0_1189, %c1792_1190], %679 {strides = array<i32>} : memref<4x2048xf32, #tpu.memory_space<vmem>>, vector<1x64xf32>,
    %c22_1191 = arith.constant 22 : index
    %c0_1192 = arith.constant 0 : index
    %681 = vector.load %arg11[%c22_1191, %c0_1192] : memref<36x64xf32, #tpu.memory_space<vmem>>, vector<1x64xf32>
    %c1_1193 = arith.constant 1 : index
    %c1792_1194 = arith.constant 1792 : index
    %682 = vector.load %arg12[%c1_1193, %c1792_1194] : memref<4x2048xf32, #tpu.memory_space<vmem>>, vector<1x64xf32>
    tpu.vector_store %arg12[%c1_1193, %c1792_1194], %681 {strides = array<i32>} : memref<4x2048xf32, #tpu.memory_space<vmem>>, vector<1x64xf32>,
    %c32_1195 = arith.constant 32 : index
    %c0_1196 = arith.constant 0 : index
    %683 = vector.load %arg11[%c32_1195, %c0_1196] : memref<36x64xf32, #tpu.memory_space<vmem>>, vector<1x64xf32>
    %c2_1197 = arith.constant 2 : index
    %c1792_1198 = arith.constant 1792 : index
    %684 = vector.load %arg12[%c2_1197, %c1792_1198] : memref<4x2048xf32, #tpu.memory_space<vmem>>, vector<1x64xf32>
    tpu.vector_store %arg12[%c2_1197, %c1792_1198], %683 {strides = array<i32>} : memref<4x2048xf32, #tpu.memory_space<vmem>>, vector<1x64xf32>,
    %c34_1199 = arith.constant 34 : index
    %c0_1200 = arith.constant 0 : index
    %685 = vector.load %arg11[%c34_1199, %c0_1200] : memref<36x64xf32, #tpu.memory_space<vmem>>, vector<1x64xf32>
    %c3_1201 = arith.constant 3 : index
    %c1792_1202 = arith.constant 1792 : index
    %686 = vector.load %arg12[%c3_1201, %c1792_1202] : memref<4x2048xf32, #tpu.memory_space<vmem>>, vector<1x64xf32>
    tpu.vector_store %arg12[%c3_1201, %c1792_1202], %685 {strides = array<i32>} : memref<4x2048xf32, #tpu.memory_space<vmem>>, vector<1x64xf32>,
    %c21_1203 = arith.constant 21 : index
    %c0_1204 = arith.constant 0 : index
    %687 = vector.load %arg11[%c21_1203, %c0_1204] : memref<36x64xf32, #tpu.memory_space<vmem>>, vector<1x64xf32>
    %c0_1205 = arith.constant 0 : index
    %c1920_1206 = arith.constant 1920 : index
    %688 = vector.load %arg12[%c0_1205, %c1920_1206] : memref<4x2048xf32, #tpu.memory_space<vmem>>, vector<1x64xf32>
    tpu.vector_store %arg12[%c0_1205, %c1920_1206], %687 {strides = array<i32>} : memref<4x2048xf32, #tpu.memory_space<vmem>>, vector<1x64xf32>,
    %c23_1207 = arith.constant 23 : index
    %c0_1208 = arith.constant 0 : index
    %689 = vector.load %arg11[%c23_1207, %c0_1208] : memref<36x64xf32, #tpu.memory_space<vmem>>, vector<1x64xf32>
    %c1_1209 = arith.constant 1 : index
    %c1920_1210 = arith.constant 1920 : index
    %690 = vector.load %arg12[%c1_1209, %c1920_1210] : memref<4x2048xf32, #tpu.memory_space<vmem>>, vector<1x64xf32>
    tpu.vector_store %arg12[%c1_1209, %c1920_1210], %689 {strides = array<i32>} : memref<4x2048xf32, #tpu.memory_space<vmem>>, vector<1x64xf32>,
    %c33_1211 = arith.constant 33 : index
    %c0_1212 = arith.constant 0 : index
    %691 = vector.load %arg11[%c33_1211, %c0_1212] : memref<36x64xf32, #tpu.memory_space<vmem>>, vector<1x64xf32>
    %c2_1213 = arith.constant 2 : index
    %c1920_1214 = arith.constant 1920 : index
    %692 = vector.load %arg12[%c2_1213, %c1920_1214] : memref<4x2048xf32, #tpu.memory_space<vmem>>, vector<1x64xf32>
    tpu.vector_store %arg12[%c2_1213, %c1920_1214], %691 {strides = array<i32>} : memref<4x2048xf32, #tpu.memory_space<vmem>>, vector<1x64xf32>,
    %c35_1215 = arith.constant 35 : index
    %c0_1216 = arith.constant 0 : index
    %693 = vector.load %arg11[%c35_1215, %c0_1216] : memref<36x64xf32, #tpu.memory_space<vmem>>, vector<1x64xf32>
    %c3_1217 = arith.constant 3 : index
    %c1920_1218 = arith.constant 1920 : index
    %694 = vector.load %arg12[%c3_1217, %c1920_1218] : memref<4x2048xf32, #tpu.memory_space<vmem>>, vector<1x64xf32>
    tpu.vector_store %arg12[%c3_1217, %c1920_1218], %693 {strides = array<i32>} : memref<4x2048xf32, #tpu.memory_space<vmem>>, vector<1x64xf32>,
    %c0_1219 = arith.constant 0 : index
    %c0_1220 = arith.constant 0 : index
    %695 = vector.load %arg12[%c0_1219, %c0_1220] : memref<4x2048xf32, #tpu.memory_space<vmem>>, vector<4x2048xf32>
    %c0_1221 = arith.constant 0 : index
    %c0_1222 = arith.constant 0 : index
    %696 = vector.load %arg6[%c0_1221, %c0_1222] : memref<2048x16xf32, #tpu.memory_space<vmem>>, vector<2048x16xf32>
    %cst_1223 = arith.constant dense<0.000000e+00> : vector<4x16xf32>
    %697 = tpu.matmul %695, %696, %cst_1223 {dimension_numbers = #tpu.dot_dimension_numbers<[1], [0], [0], [1], [0, 0, 1, 1], [], []>} : vector<4x2048xf32>, vector<2048x16xf32>, vector<4x16xf32> -> vector<4x16xf32>
    %c0_1224 = arith.constant 0 : index
    %c0_1225 = arith.constant 0 : index
    %698 = vector.load %arg7[%c0_1224, %c0_1225] : memref<1x16xf32, #tpu.memory_space<vmem>>, vector<1x16xf32>
    %699 = vector.broadcast %698 : vector<1x16xf32> to vector<4x16xf32>
    %700 = arith.addf %697, %699 : vector<4x16xf32>
    %cst_1226 = arith.constant 0.000000e+00 : f32
    %701 = vector.broadcast %cst_1226 : f32 to vector<4x16xf32>
    %702 = arith.cmpf oge, %700, %701 : vector<4x16xf32>
    %cst_1227 = arith.constant 0.00999999977 : f32
    %703 = vector.broadcast %cst_1227 : f32 to vector<4x16xf32>
    %704 = arith.mulf %703, %700 : vector<4x16xf32>
    %705 = arith.select %702, %700, %704 : vector<4x16xi1>, vector<4x16xf32>
    %c0_1228 = arith.constant 0 : index
    %c0_1229 = arith.constant 0 : index
    %c0_1230 = arith.constant 0 : index
    %706 = vector.load %arg8[%c0_1228, %c0_1229, %c0_1230] : memref<1x4x16xf32, #tpu.memory_space<vmem>>, vector<1x4x16xf32>
    %707 = vector.shape_cast %706 : vector<1x4x16xf32> to vector<4x16xf32>
    %708 = vector.shape_cast %705 : vector<4x16xf32> to vector<1x4x16xf32>
    tpu.vector_store %arg8[%c0_1228, %c0_1229, %c0_1230], %708 {strides = array<i32>} : memref<1x4x16xf32, #tpu.memory_space<vmem>>, vector<1x4x16xf32>,
    return
  }
  func.func @transform_0(%arg0: i32) -> (i32, i32, i32) {
    %c0_i32 = arith.constant 0 : i32
    %c0_i32_0 = arith.constant 0 : i32
    %c0_i32_1 = arith.constant 0 : i32
    return %arg0, %c0_i32, %c0_i32_0 : i32, i32, i32
  }
  func.func @transform_1(%arg0: i32) -> (i32, i32) {
    %c0_i32 = arith.constant 0 : i32
    %c0_i32_0 = arith.constant 0 : i32
    %c0_i32_1 = arith.constant 0 : i32
    return %c0_i32, %c0_i32_0 : i32, i32
  }
  func.func @transform_2(%arg0: i32) -> (i32, i32) {
    %c0_i32 = arith.constant 0 : i32
    %c0_i32_0 = arith.constant 0 : i32
    %c0_i32_1 = arith.constant 0 : i32
    return %c0_i32, %c0_i32_0 : i32, i32
  }
  func.func @transform_3(%arg0: i32) -> (i32, i32) {
    %c0_i32 = arith.constant 0 : i32
    %c0_i32_0 = arith.constant 0 : i32
    %c0_i32_1 = arith.constant 0 : i32
    return %c0_i32, %c0_i32_0 : i32, i32
  }
  func.func @transform_4(%arg0: i32) -> (i32, i32) {
    %c0_i32 = arith.constant 0 : i32
    %c0_i32_0 = arith.constant 0 : i32
    %c0_i32_1 = arith.constant 0 : i32
    return %c0_i32, %c0_i32_0 : i32, i32
  }
  func.func @transform_5(%arg0: i32) -> (i32, i32) {
    %c0_i32 = arith.constant 0 : i32
    %c0_i32_0 = arith.constant 0 : i32
    %c0_i32_1 = arith.constant 0 : i32
    return %c0_i32, %c0_i32_0 : i32, i32
  }
  func.func @transform_6(%arg0: i32) -> (i32, i32) {
    %c0_i32 = arith.constant 0 : i32
    %c0_i32_0 = arith.constant 0 : i32
    %c0_i32_1 = arith.constant 0 : i32
    return %c0_i32, %c0_i32_0 : i32, i32
  }
  func.func @transform_7(%arg0: i32) -> (i32, i32, i32) {
    %c0_i32 = arith.constant 0 : i32
    %c0_i32_0 = arith.constant 0 : i32
    %c0_i32_1 = arith.constant 0 : i32
    return %arg0, %c0_i32, %c0_i32_0 : i32, i32, i32
  }
}

</mosaic_0001>

<bundles_post_ra>
// kernel: tpu_custom_call.1
= control target key start
LH: loop header
LB: loop body
LE: loop exit
PB: predicated region body
PF: predicated region fallthrough
CT: control target
= control target key end

     0   :  { %12 = vsyncpa [#allocation7], 0  ;;  %s6744_s0 = inlined_call_operand.vmem [shape: f32[2,64,1024], index: 0, kind: input, shape index: {}]   ;;  %s6745_s1 = inlined_call_operand.vmem [shape: f32[1024,128], index: 1, kind: input, shape index: {}]   ;;  %s6746_s2 = inlined_call_operand.vmem [shape: f32[1,128], index: 2, kind: input, shape index: {}]   ;;  %s6747_s3 = inlined_call_operand.vmem [shape: f32[2048,64], index: 3, kind: input, shape index: {}]   ;;  %s6748_s4 = inlined_call_operand.vmem [shape: f32[1,64], index: 4, kind: input, shape index: {}]   ;;  %s6749_s5 = inlined_call_operand.vmem [shape: f32[2048,16], index: 5, kind: input, shape index: {}]   ;;  %s6750_s6 = inlined_call_operand.vmem [shape: f32[1,16], index: 6, kind: input, shape index: {}]   ;;  %s6751_s7 = inlined_call_operand.hbm [shape: f32[2,4,16], index: 7, kind: output, shape index: {}]  }
   0x1   :  { %14 = vsyncpa [#allocation7 + $0x1], 0  ;;  %s4444_s24 = smov 0   ;;  %s4446_s25 = smov 0  }
   0x2   :  { %s4448_s26 = smov 0   ;;  %s4450_s27 = smov 0  }
   0x3 LB: > { %s4465_s28 = sadd.s32 4294967295, %s4400_s27   ;;  %s3468_s29 = sadd.s32 4294967294, %s4400_s27   ;;  %s4400_s27 = sphi %s4450_s27, %s6757_s27   ;;  %s4396_s26 = sphi %s4448_s26, %s6756_s26   ;;  %s4392_s25 = sphi %s4446_s25, %s6755_s25   ;;  %s4388_s24 = sphi %s4444_s24, %s6754_s24  }
   0x4   : > { %s4469_s30 = sadd.s32 1, %s4400_s27   ;;  %s179_s8 = sadd.s32 1, %s4396_s26 }
   0x5   : > { %s176_s9 = ssub.s32 %s4400_s27, %s4469_s30  ;;  %p189_p0 = scmp.ne.s32.totalorder %s4396_s26, %s4392_s25 }
   0x6   : > { %p177_p1 = scmp.eq.s32.totalorder %s176_s9, 0  ;;  %p190_p2 = scmp.eq.s32.totalorder %s4465_s28, 1 }
   0x7   : > { %p195_p3 = scmp.ne.s32.totalorder %s4392_s25, %s4388_s24  ;;  %p196_p4 = scmp.eq.s32.totalorder %s3468_s29, 1 }
   0x8   : > { %s4480_s10 = scalar_select %p177_p1, %s4396_s26, %s179_s8  }
   0x9   : > { %p4482_p5 = por %p190_p2, %p189_p0  ;;  %p4486_p6 = por %p196_p4, %p195_p3 }
   0xa   : > { %p3471_p7 = scmp.ge.s32.totalorder %s4400_s27, 1  ;;  %p240_p8 = scmp.lt.s32.totalorder %s4400_s27, 3 }
   0xc   : > { %p241_p9 = pnand %p3471_p7, %p240_p8 }
   0xd   : > { %p272_p10 = scmp.lt.s32.totalorder (!%p241_p9), %s4465_s28, 1  ;;  %s3479_s15 = sshll.u32 (!%p241_p9), %s4465_s28, 6 }
   0xe   : > { %244 = sbr.rel (%p241_p9) target bundleno = 1062 (0x426), region = 48  ;;  %s6709_s22 = scalar_lea.hbm (!%p241_p9), %s6751_s7, %s3479_s15 }
  0x13   : > { %v372_v0 = vld [vmem:[%s6745_s1 + $0xf8] sm:$0xff]  ;;  %v371_v3 = vld [vmem:[%s6745_s1 + $0xf0] sm:$0xff]  ;;  %v370_v7 = vld [vmem:[%s6745_s1 + $0xe8] sm:$0xff]  ;;  %s4622_s13 = scalar_select %p272_p10, %s4465_s28, 1  ;;  %vm2386_vm8 = vcmask 523264   ;;  %vm2391_vm9 = vcmask 519168  }
  0x14   : > { %v356_v1 = vld [vmem:[%s6745_s1 + $0x78] sm:$0xff]  ;;  %3483 = vmatprep.subr.mxu0 %v372_v0  ;;  %v355_v5 = vld [vmem:[%s6745_s1 + $0x70] sm:$0xff]  ;;  %v354_v9 = vld [vmem:[%s6745_s1 + $0x68] sm:$0xff]  ;;  %vm2407_vm10 = vcmask 516096   ;;  %vm2394_vm11 = vcmask 523268   ;;  %vm3393_vm15 = vcmask 125952  }
  0x15   : > { %v404_v2 = vld [vmem:[%s6745_s1 + $0x1f8] sm:$0xff]  ;;  %3484 = vmatpush3.msra.mxu0 %v356_v1  ;;  %v403_v6 = vld [vmem:[%s6745_s1 + $0x1f0] sm:$0xff]  ;;  %v402_v10 = vld [vmem:[%s6745_s1 + $0x1e8] sm:$0xff]  ;;  %s3482_s17 = sshll.u32 %s4622_s13, 9  ;;  %s4403_s28 = smov [#allocation6]  }
  0x16   : > { %3539 = vmatprep.subr.mxu1 %v404_v2  ;;  %v388_v4 = vld [vmem:[%s6745_s1 + $0x178] sm:$0xff]  ;;  %v387_v8 = vld [vmem:[%s6745_s1 + $0x170] sm:$0xff]  ;;  %3485 = vmatprep.subr.mxu0 %v371_v3  ;;  %v369_v11 = vld [vmem:[%s6745_s1 + $0xe0] sm:$0xff]  ;;  %s4670_s19 = scalar_lea.vmem %s6744_s0, %s3482_s17  ;;  %s4344_s8 = sshll.u32 %s4403_s28, 4  ;;  %s4345_s8 = int_to_ptr.vmem [resolvable:$false] %s4344_s8 }
  0x17   : > { %3540 = vmatpush3.msra.mxu1 %v388_v4  ;;  %3486 = vmatpush3.msra.mxu0 %v355_v5  ;;  %v386_v12 = vld [vmem:[%s6745_s1 + $0x168] sm:$0xff]  ;;  %v401_v13 = vld [vmem:[%s6745_s1 + $0x1e0] sm:$0xff]  ;;  %v368_v16 = vld [vmem:[%s6745_s1 + $0xd8] sm:$0xff]  ;;  %s4346_s17 = scalar_lea.vmem %s4345_s8, 128 }
  0x18   : > { %3541 = vmatprep.subr.mxu1 %v403_v6  ;;  %3487 = vmatprep.subr.mxu0 %v370_v7  ;;  %v353_v14 = vld [vmem:[%s6745_s1 + $0x60] sm:$0xff]  ;;  %v400_v17 = vld [vmem:[%s6745_s1 + $0x1d8] sm:$0xff]  ;;  %v367_v20 = vld [vmem:[%s6745_s1 + $0xd0] sm:$0xff] }
  0x19   : > { %3542 = vmatpush3.msra.mxu1 %v387_v8  ;;  %v385_v15 = vld [vmem:[%s6745_s1 + $0x160] sm:$0xff]  ;;  %3488 = vmatpush3.msra.mxu0 %v354_v9  ;;  %v352_v18 = vld [vmem:[%s6745_s1 + $0x58] sm:$0xff]  ;;  %v399_v21 = vld [vmem:[%s6745_s1 + $0x1d0] sm:$0xff] }
  0x1a   : > { %3543 = vmatprep.subr.mxu1 %v402_v10  ;;  %3489 = vmatprep.subr.mxu0 %v369_v11  ;;  %v384_v19 = vld [vmem:[%s6745_s1 + $0x158] sm:$0xff]  ;;  %v351_v22 = vld [vmem:[%s6745_s1 + $0x50] sm:$0xff]  ;;  %v366_v24 = vld [vmem:[%s6745_s1 + $0xc8] sm:$0xff] }
  0x1b   : > { %3544 = vmatpush3.msra.mxu1 %v386_v12  ;;  %3490 = vmatpush3.msra.mxu0 %v353_v14  ;;  %v383_v23 = vld [vmem:[%s6745_s1 + $0x150] sm:$0xff]  ;;  %v398_v25 = vld [vmem:[%s6745_s1 + $0x1c8] sm:$0xff]  ;;  %v365_v28 = vld [vmem:[%s6745_s1 + $0xc0] sm:$0xff] }
  0x1c   : > { %3545 = vmatprep.subr.mxu1 %v401_v13  ;;  %3491 = vmatprep.subr.mxu0 %v368_v16  ;;  %v350_v26 = vld [vmem:[%s6745_s1 + $0x48] sm:$0xff]  ;;  %v397_v29 = vld [vmem:[%s6745_s1 + $0x1c0] sm:$0xff]  ;;  %v364_v32 = vld [vmem:[%s6745_s1 + $0xb8] sm:$0xff] }
  0x1d   : > { %3546 = vmatpush3.msra.mxu1 %v385_v15  ;;  %3492 = vmatpush3.msra.mxu0 %v352_v18  ;;  %v382_v27 = vld [vmem:[%s6745_s1 + $0x148] sm:$0xff]  ;;  %v349_v30 = vld [vmem:[%s6745_s1 + $0x40] sm:$0xff]  ;;  %v396_v33 = vld [vmem:[%s6745_s1 + $0x1b8] sm:$0xff] }
  0x1e   : > { %3547 = vmatprep.subr.mxu1 %v400_v17  ;;  %3493 = vmatprep.subr.mxu0 %v367_v20  ;;  %v381_v31 = vld [vmem:[%s6745_s1 + $0x140] sm:$0xff]  ;;  %v348_v34 = vld [vmem:[%s6745_s1 + $0x38] sm:$0xff]  ;;  %v363_v36 = vld [vmem:[%s6745_s1 + $0xb0] sm:$0xff] }
  0x1f   : > { %3548 = vmatpush3.msra.mxu1 %v384_v19  ;;  %3494 = vmatpush3.msra.mxu0 %v351_v22  ;;  %v380_v35 = vld [vmem:[%s6745_s1 + $0x138] sm:$0xff]  ;;  %v395_v37 = vld [vmem:[%s6745_s1 + $0x1b0] sm:$0xff]  ;;  %v362_v40 = vld [vmem:[%s6745_s1 + $0xa8] sm:$0xff] }
  0x20   : > { %3549 = vmatprep.subr.mxu1 %v399_v21  ;;  %3495 = vmatprep.subr.mxu0 %v366_v24  ;;  %v347_v38 = vld [vmem:[%s6745_s1 + $0x30] sm:$0xff]  ;;  %v394_v41 = vld [vmem:[%s6745_s1 + $0x1a8] sm:$0xff]  ;;  %v361_v44 = vld [vmem:[%s6745_s1 + $0xa0] sm:$0xff] }
  0x21   : > { %3550 = vmatpush3.msra.mxu1 %v383_v23  ;;  %3496 = vmatpush3.msra.mxu0 %v350_v26  ;;  %v379_v39 = vld [vmem:[%s6745_s1 + $0x130] sm:$0xff]  ;;  %v346_v42 = vld [vmem:[%s6745_s1 + $0x28] sm:$0xff]  ;;  %v393_v45 = vld [vmem:[%s6745_s1 + $0x1a0] sm:$0xff] }
  0x22   : > { %3551 = vmatprep.subr.mxu1 %v398_v25  ;;  %3497 = vmatprep.subr.mxu0 %v365_v28  ;;  %v378_v43 = vld [vmem:[%s6745_s1 + $0x128] sm:$0xff]  ;;  %v345_v46 = vld [vmem:[%s6745_s1 + $0x20] sm:$0xff]  ;;  %v360_v48 = vld [vmem:[%s6745_s1 + $0x98] sm:$0xff] }
  0x23   : > { %3552 = vmatpush3.msra.mxu1 %v382_v27  ;;  %3498 = vmatpush3.msra.mxu0 %v349_v30  ;;  %v377_v47 = vld [vmem:[%s6745_s1 + $0x120] sm:$0xff]  ;;  %v392_v49 = vld [vmem:[%s6745_s1 + $0x198] sm:$0xff]  ;;  %v359_v52 = vld [vmem:[%s6745_s1 + $0x90] sm:$0xff] }
  0x24   : > { %3553 = vmatprep.subr.mxu1 %v397_v29  ;;  %3499 = vmatprep.subr.mxu0 %v364_v32  ;;  %v344_v50 = vld [vmem:[%s6745_s1 + $0x18] sm:$0xff]  ;;  %v391_v53 = vld [vmem:[%s6745_s1 + $0x190] sm:$0xff]  ;;  %v358_v56 = vld [vmem:[%s6745_s1 + $0x88] sm:$0xff] }
  0x25   : > { %3554 = vmatpush3.msra.mxu1 %v381_v31  ;;  %3500 = vmatpush3.msra.mxu0 %v348_v34  ;;  %v376_v51 = vld [vmem:[%s6745_s1 + $0x118] sm:$0xff]  ;;  %v343_v54 = vld [vmem:[%s6745_s1 + $0x10] sm:$0xff]  ;;  %v390_v57 = vld [vmem:[%s6745_s1 + $0x188] sm:$0xff] }
  0x26   : > { %3555 = vmatprep.subr.mxu1 %v396_v33  ;;  %3501 = vmatprep.subr.mxu0 %v363_v36  ;;  %v375_v55 = vld [vmem:[%s6745_s1 + $0x110] sm:$0xff]  ;;  %v342_v58 = vld [vmem:[%s6745_s1 + $0x8] sm:$0xff]  ;;  %v357_v60 = vld [vmem:[%s6745_s1 + $0x80] sm:$0xff] }
  0x27   : > { %3556 = vmatpush3.msra.mxu1 %v380_v35  ;;  %3502 = vmatpush3.msra.mxu0 %v347_v38  ;;  %v374_v59 = vld [vmem:[%s6745_s1 + $0x108] sm:$0xff]  ;;  %v341_v62 = vld [vmem:[%s6745_s1] sm:$0xff]  ;;  %v280_v2 = vld [vmem:[%s4670_s19 + $0x18] sm:$0xff] }
  0x28   : > { %3557 = vmatprep.subr.mxu1 %v395_v37  ;;  %3503 = vmatprep.subr.mxu0 %v362_v40  ;;  %v278_v61 = vld [vmem:[%s4670_s19 + $0x8] sm:$0xff]  ;;  %v389_v63 = vld [vmem:[%s6745_s1 + $0x180] sm:$0xff]  ;;  %v436_v3 = vld [vmem:[%s6745_s1 + $0x2f8] sm:$0xff] }
  0x29   : > { %3558 = vmatpush3.msra.mxu1 %v379_v39  ;;  %3504 = vmatpush3.msra.mxu0 %v346_v42  ;;  %v277_v0 = vld [vmem:[%s4670_s19] sm:$0xff]  ;;  %v279_v4 = vld [vmem:[%s4670_s19 + $0x10] sm:$0xff]  ;;  %v420_v5 = vld [vmem:[%s6745_s1 + $0x278] sm:$0xff] }
  0x2a   : > { %3559 = vmatprep.subr.mxu1 %v394_v41  ;;  %3505 = vmatprep.subr.mxu0 %v361_v44  ;;  %v373_v1 = vld [vmem:[%s6745_s1 + $0x100] sm:$0xff]  ;;  %v468_v6 = vld [vmem:[%s6745_s1 + $0x3f8] sm:$0xff]  ;;  %v435_v7 = vld [vmem:[%s6745_s1 + $0x2f0] sm:$0xff] }
  0x2b   : > { %3560 = vmatpush3.msra.mxu1 %v378_v43  ;;  %3506 = vmatpush3.msra.mxu0 %v345_v46  ;;  %v452_v8 = vld [vmem:[%s6745_s1 + $0x378] sm:$0xff]  ;;  %v286_v9 = vld [vmem:[%s4670_s19 + $0x48] sm:$0xff]  ;;  %v419_v10 = vld [vmem:[%s6745_s1 + $0x270] sm:$0xff] }
  0x2c   : > { %3561 = vmatprep.subr.mxu1 %v393_v45  ;;  %3507 = vmatprep.subr.mxu0 %v360_v48  ;;  %v467_v11 = vld [vmem:[%s6745_s1 + $0x3f0] sm:$0xff]  ;;  %v285_v12 = vld [vmem:[%s4670_s19 + $0x40] sm:$0xff]  ;;  %v288_v13 = vld [vmem:[%s4670_s19 + $0x58] sm:$0xff] }
  0x2d   : > { %3562 = vmatpush3.msra.mxu1 %v377_v47  ;;  %3508 = vmatpush3.msra.mxu0 %v344_v50  ;;  %v434_v14 = vld [vmem:[%s6745_s1 + $0x2e8] sm:$0xff]  ;;  %v451_v15 = vld [vmem:[%s6745_s1 + $0x370] sm:$0xff]  ;;  %v433_v19 = vld [vmem:[%s6745_s1 + $0x2e0] sm:$0xff] }
  0x2e   : > { %3563 = vmatprep.subr.mxu1 %v392_v49  ;;  %3509 = vmatprep.subr.mxu0 %v359_v52  ;;  %v287_v16 = vld [vmem:[%s4670_s19 + $0x50] sm:$0xff]  ;;  %v418_v17 = vld [vmem:[%s6745_s1 + $0x268] sm:$0xff]  ;;  %v417_v22 = vld [vmem:[%s6745_s1 + $0x260] sm:$0xff] }
  0x2f   : > { %3564 = vmatpush3.msra.mxu1 %v376_v51  ;;  %3510 = vmatpush3.msra.mxu0 %v343_v54  ;;  %v466_v18 = vld [vmem:[%s6745_s1 + $0x3e8] sm:$0xff]  ;;  %v465_v23 = vld [vmem:[%s6745_s1 + $0x3e0] sm:$0xff]  ;;  %v296_v25 = vld [vmem:[%s4670_s19 + $0x98] sm:$0xff] }
  0x30   : > { %3565 = vmatprep.subr.mxu1 %v391_v53  ;;  %3511 = vmatprep.subr.mxu0 %v358_v56  ;;  %v450_v20 = vld [vmem:[%s6745_s1 + $0x368] sm:$0xff]  ;;  %v293_v24 = vld [vmem:[%s4670_s19 + $0x80] sm:$0xff]  ;;  %v432_v26 = vld [vmem:[%s6745_s1 + $0x2d8] sm:$0xff] }
  0x31   : > { %3566 = vmatpush3.msra.mxu1 %v375_v55  ;;  %3512 = vmatpush3.msra.mxu0 %v342_v58  ;;  %v294_v21 = vld [vmem:[%s4670_s19 + $0x88] sm:$0xff]  ;;  %v449_v27 = vld [vmem:[%s6745_s1 + $0x360] sm:$0xff]  ;;  %v295_v28 = vld [vmem:[%s4670_s19 + $0x90] sm:$0xff] }
  0x32   : > { %3567 = vmatprep.subr.mxu1 %v390_v57  ;;  %3513 = vmatprep.subr.mxu0 %v357_v60  ;;  %v416_v29 = vld [vmem:[%s6745_s1 + $0x258] sm:$0xff]  ;;  %v431_v31 = vld [vmem:[%s6745_s1 + $0x2d0] sm:$0xff]  ;;  %v302_v33 = vld [vmem:[%s4670_s19 + $0xc8] sm:$0xff] }
  0x33   : > { %3568 = vmatpush3.msra.mxu1 %v374_v59  ;;  %540 = vmatprep.mubr.f32.mxu0 %v278_v61  ;;  %v464_v30 = vld [vmem:[%s6745_s1 + $0x3d8] sm:$0xff]  ;;  %v415_v34 = vld [vmem:[%s6745_s1 + $0x250] sm:$0xff]  ;;  %v301_v36 = vld [vmem:[%s4670_s19 + $0xc0] sm:$0xff] }
  0x34   : > { %3514 = vmatpush3.msra.mxu0 %v341_v62  ;;  %3569 = vmatprep.subr.mxu1 %v389_v63  ;;  %v448_v32 = vld [vmem:[%s6745_s1 + $0x358] sm:$0xff]  ;;  %v463_v35 = vld [vmem:[%s6745_s1 + $0x3d0] sm:$0xff]  ;;  %v430_v38 = vld [vmem:[%s6745_s1 + $0x2c8] sm:$0xff] }
  0x35   : > { %541 = vmatmul.mubr.f32.vlgmr.msra.gmra.mxu0 %v277_v0  ;;  %3570 = vmatpush3.msra.mxu1 %v373_v1  ;;  %v304_v37 = vld [vmem:[%s4670_s19 + $0xd8] sm:$0xff]  ;;  %v447_v39 = vld [vmem:[%s6745_s1 + $0x350] sm:$0xff]  ;;  %v414_v41 = vld [vmem:[%s6745_s1 + $0x248] sm:$0xff] }
  0x36   : > { %645 = vmatprep.mubr.f32.mxu1 %v280_v2  ;;  %3595 = vmatprep.subr.mxu0 %v436_v3  ;;  %v303_v40 = vld [vmem:[%s4670_s19 + $0xd0] sm:$0xff]  ;;  %v462_v42 = vld [vmem:[%s6745_s1 + $0x3c8] sm:$0xff]  ;;  %v429_v43 = vld [vmem:[%s6745_s1 + $0x2c0] sm:$0xff] }
  0x37   : > { %646 = vmatmul.mubr.f32.vlgmr.msra.gmra.mxu1 %v279_v4  ;;  %3596 = vmatpush3.msra.mxu0 %v420_v5  ;;  %v446_v44 = vld [vmem:[%s6745_s1 + $0x348] sm:$0xff]  ;;  %v413_v46 = vld [vmem:[%s6745_s1 + $0x240] sm:$0xff]  ;;  %v312_v49 = vld [vmem:[%s4670_s19 + $0x118] sm:$0xff] }
  0x38   : > { %3651 = vmatprep.subr.mxu1 %v468_v6  ;;  %3597 = vmatprep.subr.mxu0 %v435_v7  ;;  %v310_v45 = vld [vmem:[%s4670_s19 + $0x108] sm:$0xff]  ;;  %v461_v47 = vld [vmem:[%s6745_s1 + $0x3c0] sm:$0xff]  ;;  %v428_v50 = vld [vmem:[%s6745_s1 + $0x2b8] sm:$0xff] }
  0x39   : > { %3652 = vmatpush3.msra.mxu1 %v452_v8  ;;  %545 = vmatprep.mubr.f32.mxu0 %v286_v9  ;;  %v309_v48 = vld [vmem:[%s4670_s19 + $0x100] sm:$0xff]  ;;  %v311_v52 = vld [vmem:[%s4670_s19 + $0x110] sm:$0xff]  ;;  %v412_v53 = vld [vmem:[%s6745_s1 + $0x238] sm:$0xff] }
  0x3a   : > { %3598 = vmatpush3.msra.mxu0 %v419_v10  ;;  %3653 = vmatprep.subr.mxu1 %v467_v11  ;;  %v445_v51 = vld [vmem:[%s6745_s1 + $0x340] sm:$0xff]  ;;  %v460_v54 = vld [vmem:[%s6745_s1 + $0x3b8] sm:$0xff]  ;;  %v427_v55 = vld [vmem:[%s6745_s1 + $0x2b0] sm:$0xff] }
  0x3b   : > { %546 = vmatmul.mubr.f32.gmra.mxu0 %v285_v12  ;;  %650 = vmatprep.mubr.f32.mxu1 %v288_v13  ;;  %v444_v56 = vld [vmem:[%s6745_s1 + $0x338] sm:$0xff]  ;;  %v318_v57 = vld [vmem:[%s4670_s19 + $0x148] sm:$0xff]  ;;  %v411_v58 = vld [vmem:[%s6745_s1 + $0x230] sm:$0xff] }
  0x3c   : > { %3599 = vmatprep.subr.mxu0 %v434_v14  ;;  %3654 = vmatpush3.msra.mxu1 %v451_v15  ;;  %v459_v59 = vld [vmem:[%s6745_s1 + $0x3b0] sm:$0xff]  ;;  %v317_v60 = vld [vmem:[%s4670_s19 + $0x140] sm:$0xff]  ;;  %v320_v61 = vld [vmem:[%s4670_s19 + $0x158] sm:$0xff] }
  0x3d   : > { %651 = vmatmul.mubr.f32.gmra.mxu1 %v287_v16  ;;  %3600 = vmatpush3.msra.mxu0 %v418_v17  ;;  %v426_v62 = vld [vmem:[%s6745_s1 + $0x2a8] sm:$0xff]  ;;  %v443_v63 = vld [vmem:[%s6745_s1 + $0x330] sm:$0xff]  ;;  %v425_v3 = vld [vmem:[%s6745_s1 + $0x2a0] sm:$0xff] }
  0x3e   : > { %3655 = vmatprep.subr.mxu1 %v466_v18  ;;  %3601 = vmatprep.subr.mxu0 %v433_v19  ;;  %v319_v0 = vld [vmem:[%s4670_s19 + $0x150] sm:$0xff]  ;;  %v410_v1 = vld [vmem:[%s6745_s1 + $0x228] sm:$0xff]  ;;  %v409_v6 = vld [vmem:[%s6745_s1 + $0x220] sm:$0xff] }
  0x3f   : > { %3656 = vmatpush3.msra.mxu1 %v450_v20  ;;  %550 = vmatprep.mubr.f32.mxu0 %v294_v21  ;;  %v458_v2 = vld [vmem:[%s6745_s1 + $0x3a8] sm:$0xff]  ;;  %v457_v7 = vld [vmem:[%s6745_s1 + $0x3a0] sm:$0xff]  ;;  %v328_v9 = vld [vmem:[%s4670_s19 + $0x198] sm:$0xff] }
  0x40   : > { %3602 = vmatpush3.msra.mxu0 %v417_v22  ;;  %3657 = vmatprep.subr.mxu1 %v465_v23  ;;  %v442_v4 = vld [vmem:[%s6745_s1 + $0x328] sm:$0xff]  ;;  %v325_v8 = vld [vmem:[%s4670_s19 + $0x180] sm:$0xff]  ;;  %v424_v10 = vld [vmem:[%s6745_s1 + $0x298] sm:$0xff] }
  0x41   : > { %551 = vmatmul.mubr.f32.gmra.mxu0 %v293_v24  ;;  %655 = vmatprep.mubr.f32.mxu1 %v296_v25  ;;  %v326_v5 = vld [vmem:[%s4670_s19 + $0x188] sm:$0xff]  ;;  %v441_v11 = vld [vmem:[%s6745_s1 + $0x320] sm:$0xff]  ;;  %v327_v12 = vld [vmem:[%s4670_s19 + $0x190] sm:$0xff] }
  0x42   : > { %3603 = vmatprep.subr.mxu0 %v432_v26  ;;  %3658 = vmatpush3.msra.mxu1 %v449_v27  ;;  %v408_v13 = vld [vmem:[%s6745_s1 + $0x218] sm:$0xff]  ;;  %v423_v15 = vld [vmem:[%s6745_s1 + $0x290] sm:$0xff]  ;;  %v334_v17 = vld [vmem:[%s4670_s19 + $0x1c8] sm:$0xff] }
  0x43   : > { %656 = vmatmul.mubr.f32.gmra.mxu1 %v295_v28  ;;  %3604 = vmatpush3.msra.mxu0 %v416_v29  ;;  %v456_v14 = vld [vmem:[%s6745_s1 + $0x398] sm:$0xff]  ;;  %v407_v18 = vld [vmem:[%s6745_s1 + $0x210] sm:$0xff]  ;;  %v333_v20 = vld [vmem:[%s4670_s19 + $0x1c0] sm:$0xff] }
  0x44   : > { %3659 = vmatprep.subr.mxu1 %v464_v30  ;;  %3605 = vmatprep.subr.mxu0 %v431_v31  ;;  %v440_v16 = vld [vmem:[%s6745_s1 + $0x318] sm:$0xff]  ;;  %v455_v19 = vld [vmem:[%s6745_s1 + $0x390] sm:$0xff]  ;;  %v422_v22 = vld [vmem:[%s6745_s1 + $0x288] sm:$0xff] }
  0x45   : > { %3660 = vmatpush3.msra.mxu1 %v448_v32  ;;  %555 = vmatprep.mubr.f32.mxu0 %v302_v33  ;;  %v336_v21 = vld [vmem:[%s4670_s19 + $0x1d8] sm:$0xff]  ;;  %v439_v23 = vld [vmem:[%s6745_s1 + $0x310] sm:$0xff]  ;;  %v406_v25 = vld [vmem:[%s6745_s1 + $0x208] sm:$0xff] }
  0x46   : > { %3606 = vmatpush3.msra.mxu0 %v415_v34  ;;  %3661 = vmatprep.subr.mxu1 %v463_v35  ;;  %v335_v24 = vld [vmem:[%s4670_s19 + $0x1d0] sm:$0xff]  ;;  %v454_v26 = vld [vmem:[%s6745_s1 + $0x388] sm:$0xff]  ;;  %v421_v27 = vld [vmem:[%s6745_s1 + $0x280] sm:$0xff] }
  0x47   : > { %556 = vmatmul.mubr.f32.gmra.mxu0 %v301_v36  ;;  %660 = vmatprep.mubr.f32.mxu1 %v304_v37  ;;  %v438_v28 = vld [vmem:[%s6745_s1 + $0x308] sm:$0xff]  ;;  %v405_v29 = vld [vmem:[%s6745_s1 + $0x200] sm:$0xff]  ;;  %v284_v34 = vld [vmem:[%s4670_s19 + $0x38] sm:$0xff] }
  0x48   : > { %3607 = vmatprep.subr.mxu0 %v430_v38  ;;  %3662 = vmatpush3.msra.mxu1 %v447_v39  ;;  %v282_v30 = vld [vmem:[%s4670_s19 + $0x28] sm:$0xff]  ;;  %v453_v31 = vld [vmem:[%s6745_s1 + $0x380] sm:$0xff]  ;;  %v283_v36 = vld [vmem:[%s4670_s19 + $0x30] sm:$0xff] }
  0x49   : > { %661 = vmatmul.mubr.f32.gmra.mxu1 %v303_v40  ;;  %3608 = vmatpush3.msra.mxu0 %v414_v41  ;;  %v281_v32 = vld [vmem:[%s4670_s19 + $0x20] sm:$0xff]  ;;  %v290_v35 = vld [vmem:[%s4670_s19 + $0x68] sm:$0xff]  ;;  %v292_v37 = vld [vmem:[%s4670_s19 + $0x78] sm:$0xff] }
  0x4a   : > { %3663 = vmatprep.subr.mxu1 %v462_v42  ;;  %3609 = vmatprep.subr.mxu0 %v429_v43  ;;  %v437_v33 = vld [vmem:[%s6745_s1 + $0x300] sm:$0xff]  ;;  %v298_v39 = vld [vmem:[%s4670_s19 + $0xa8] sm:$0xff]  ;;  %v291_v40 = vld [vmem:[%s4670_s19 + $0x70] sm:$0xff] }
  0x4b   : > { %3664 = vmatpush3.msra.mxu1 %v446_v44  ;;  %560 = vmatprep.mubr.f32.mxu0 %v310_v45  ;;  %v289_v38 = vld [vmem:[%s4670_s19 + $0x60] sm:$0xff]  ;;  %v300_v41 = vld [vmem:[%s4670_s19 + $0xb8] sm:$0xff]  ;;  %v306_v43 = vld [vmem:[%s4670_s19 + $0xe8] sm:$0xff] }
  0x4c   : > { %3610 = vmatpush3.msra.mxu0 %v413_v46  ;;  %3665 = vmatprep.subr.mxu1 %v461_v47  ;;  %v297_v42 = vld [vmem:[%s4670_s19 + $0xa0] sm:$0xff]  ;;  %v299_v44 = vld [vmem:[%s4670_s19 + $0xb0] sm:$0xff]  ;;  %v308_v45 = vld [vmem:[%s4670_s19 + $0xf8] sm:$0xff] }
  0x4d   : > { %561 = vmatmul.mubr.f32.gmra.mxu0 %v309_v48  ;;  %665 = vmatprep.mubr.f32.mxu1 %v312_v49  ;;  %v305_v46 = vld [vmem:[%s4670_s19 + $0xe0] sm:$0xff]  ;;  %v314_v47 = vld [vmem:[%s4670_s19 + $0x128] sm:$0xff]  ;;  %v307_v48 = vld [vmem:[%s4670_s19 + $0xf0] sm:$0xff] }
  0x4e   : > { %3611 = vmatprep.subr.mxu0 %v428_v50  ;;  %3666 = vmatpush3.msra.mxu1 %v445_v51  ;;  %v316_v49 = vld [vmem:[%s4670_s19 + $0x138] sm:$0xff]  ;;  %v313_v50 = vld [vmem:[%s4670_s19 + $0x120] sm:$0xff]  ;;  %v322_v51 = vld [vmem:[%s4670_s19 + $0x168] sm:$0xff] }
  0x4f   : > { %666 = vmatmul.mubr.f32.gmra.mxu1 %v311_v52  ;;  %3612 = vmatpush3.msra.mxu0 %v412_v53  ;;  %v315_v52 = vld [vmem:[%s4670_s19 + $0x130] sm:$0xff]  ;;  %v324_v53 = vld [vmem:[%s4670_s19 + $0x178] sm:$0xff] }
  0x50   : > { %3667 = vmatprep.subr.mxu1 %v460_v54  ;;  %3613 = vmatprep.subr.mxu0 %v427_v55  ;;  %v321_v54 = vld [vmem:[%s4670_s19 + $0x160] sm:$0xff]  ;;  %v330_v55 = vld [vmem:[%s4670_s19 + $0x1a8] sm:$0xff] }
  0x51   : > { %3668 = vmatpush3.msra.mxu1 %v444_v56  ;;  %565 = vmatprep.mubr.f32.mxu0 %v318_v57  ;;  %v323_v56 = vld [vmem:[%s4670_s19 + $0x170] sm:$0xff]  ;;  %v332_v57 = vld [vmem:[%s4670_s19 + $0x1b8] sm:$0xff] }
  0x52   : > { %3614 = vmatpush3.msra.mxu0 %v411_v58  ;;  %3669 = vmatprep.subr.mxu1 %v459_v59  ;;  %v329_v58 = vld [vmem:[%s4670_s19 + $0x1a0] sm:$0xff]  ;;  %v338_v59 = vld [vmem:[%s4670_s19 + $0x1e8] sm:$0xff] }
  0x53   : > { %566 = vmatmul.mubr.f32.gmra.mxu0 %v317_v60  ;;  %670 = vmatprep.mubr.f32.mxu1 %v320_v61  ;;  %v331_v60 = vld [vmem:[%s4670_s19 + $0x1b0] sm:$0xff]  ;;  %v340_v61 = vld [vmem:[%s4670_s19 + $0x1f8] sm:$0xff] }
  0x54   : > { %3615 = vmatprep.subr.mxu0 %v426_v62  ;;  %3670 = vmatpush3.msra.mxu1 %v443_v63  ;;  %v337_v62 = vld [vmem:[%s4670_s19 + $0x1e0] sm:$0xff]  ;;  %v339_v63 = vld [vmem:[%s4670_s19 + $0x1f0] sm:$0xff]  ;;  %s269_s19 = sand.u32 1, %s4392_s25  }
  0x55   : > { %671 = vmatmul.mubr.f32.gmra.mxu1 %v319_v0  ;;  %3616 = vmatpush3.msra.mxu0 %v410_v1  ;;  %v1548_v0 = vld [vmem:[%s6747_s3 + $0xf8] sm:$0xff]  ;;  %s3472_s14 = sshll.u32 %s269_s19, 2  ;;  %s3396_s23 = scalar_lea.sflag [#allocation7], %s269_s19 }
  0x56   : > { %3671 = vmatprep.subr.mxu1 %v458_v2  ;;  %3617 = vmatprep.subr.mxu0 %v425_v3  ;;  %v1580_v1 = vld [vmem:[%s6747_s3 + $0x1f8] sm:$0xff]  ;;  %s271_s16 = scalar_lea.vmem [#allocation6], %s3472_s14 }
  0x57   : > { %3672 = vmatpush3.msra.mxu1 %v442_v4  ;;  %570 = vmatprep.mubr.f32.mxu0 %v326_v5  ;;  %v1532_v2 = vld [vmem:[%s6747_s3 + $0x78] sm:$0xff]  ;;  %v1547_v4 = vld [vmem:[%s6747_s3 + $0xf0] sm:$0xff]  ;;  %s3409_s18 = sshll.u32 %s271_s16, 4  ;;  %s3410_s18 = int_to_ptr.vmem [resolvable:$true] %s3409_s18 }
  0x58   : > { %3618 = vmatpush3.msra.mxu0 %v409_v6  ;;  %3673 = vmatprep.subr.mxu1 %v457_v7  ;;  %v1564_v3 = vld [vmem:[%s6747_s3 + $0x178] sm:$0xff]  ;;  %v1579_v5 = vld [vmem:[%s6747_s3 + $0x1f0] sm:$0xff]  ;;  %s4340_s29 = scalar_lea.vmem %s3410_s18, 64  ;;  %p4347_p0 = scmp.lt.s32.totalorder %s3410_s18, %s4345_s8 }
  0x59   : > { %571 = vmatmul.mubr.f32.gmra.mxu0 %v325_v8  ;;  %675 = vmatprep.mubr.f32.mxu1 %v328_v9  ;;  %v1531_v6 = vld [vmem:[%s6747_s3 + $0x70] sm:$0xff]  ;;  %v1546_v8 = vld [vmem:[%s6747_s3 + $0xe8] sm:$0xff]  ;;  %p4341_p11 = scmp.ne.s32.totalorder %s3410_s18, %s4340_s29  ;;  %p4348_p1 = scmp.lt.s32.totalorder %s4346_s17, %s4340_s29 }
  0x5a   : > { %3619 = vmatprep.subr.mxu0 %v424_v10  ;;  %3674 = vmatpush3.msra.mxu1 %v441_v11  ;;  %v1563_v7 = vld [vmem:[%s6747_s3 + $0x170] sm:$0xff]  ;;  %v1578_v9 = vld [vmem:[%s6747_s3 + $0x1e8] sm:$0xff] }
  0x5b   : > { %676 = vmatmul.mubr.f32.gmra.mxu1 %v327_v12  ;;  %3620 = vmatpush3.msra.mxu0 %v408_v13  ;;  %v1530_v10 = vld [vmem:[%s6747_s3 + $0x68] sm:$0xff]  ;;  %v1545_v12 = vld [vmem:[%s6747_s3 + $0xe0] sm:$0xff]  ;;  %p4342_p12 = pnand %p4341_p11, %p4482_p5  ;;  %p4349_p2 = por %p4348_p1, %p4347_p0 }
  0x5c   : > { %3675 = vmatprep.subr.mxu1 %v456_v14  ;;  %3621 = vmatprep.subr.mxu0 %v423_v15  ;;  %v1562_v11 = vld [vmem:[%s6747_s3 + $0x168] sm:$0xff]  ;;  %v1577_v13 = vld [vmem:[%s6747_s3 + $0x1e0] sm:$0xff] }
  0x5d   : > { %3676 = vmatpush3.msra.mxu1 %v440_v16  ;;  %575 = vmatprep.mubr.f32.mxu0 %v334_v17  ;;  %v1529_v14 = vld [vmem:[%s6747_s3 + $0x60] sm:$0xff]  ;;  %v1544_v16 = vld [vmem:[%s6747_s3 + $0xd8] sm:$0xff]  ;;  %p4343_p13 = pneg %p4342_p12 }
  0x5e   : > { %3622 = vmatpush3.msra.mxu0 %v407_v18  ;;  %3677 = vmatprep.subr.mxu1 %v455_v19  ;;  %v1561_v15 = vld [vmem:[%s6747_s3 + $0x160] sm:$0xff]  ;;  %v1576_v17 = vld [vmem:[%s6747_s3 + $0x1d8] sm:$0xff] }
  0x5f   : > { %576 = vmatmul.mubr.f32.gmra.mxu0 %v333_v20  ;;  %680 = vmatprep.mubr.f32.mxu1 %v336_v21  ;;  %v1528_v18 = vld [vmem:[%s6747_s3 + $0x58] sm:$0xff]  ;;  %v1543_v20 = vld [vmem:[%s6747_s3 + $0xd0] sm:$0xff]  ;;  %p4350_p3 = pnand %p4349_p2, %p4343_p13 }
  0x60   : > { %3623 = vmatprep.subr.mxu0 %v422_v22  ;;  %3678 = vmatpush3.msra.mxu1 %v439_v23  ;;  %v1560_v19 = vld [vmem:[%s6747_s3 + $0x158] sm:$0xff]  ;;  %v1575_v21 = vld [vmem:[%s6747_s3 + $0x1d0] sm:$0xff]  ;;  %v4402_v22 = vmov 0.0  }
  0x61   : > { %681 = vmatmul.mubr.f32.gmra.mxu1 %v335_v24  ;;  %3624 = vmatpush3.msra.mxu0 %v406_v25  ;;  %921 = vst [vmem:[#allocation2 + $0x8] sm:$0xff] %v4402_v22  ;;  %922 = vst [vmem:[#allocation2 + $0x10] sm:$0xff] %v4402_v22  ;;  %v1527_v23 = vld [vmem:[%s6747_s3 + $0x50] sm:$0xff]  ;;  %v1542_v25 = vld [vmem:[%s6747_s3 + $0xc8] sm:$0xff] }
  0x62   : > { %3679 = vmatprep.subr.mxu1 %v454_v26  ;;  %3625 = vmatprep.subr.mxu0 %v421_v27  ;;  %920 = vst [vmem:[#allocation2] sm:$0xff] %v4402_v22  ;;  %923 = vst [vmem:[#allocation2 + $0x18] sm:$0xff] %v4402_v22  ;;  %v1559_v24 = vld [vmem:[%s6747_s3 + $0x150] sm:$0xff]  ;;  %v1574_v26 = vld [vmem:[%s6747_s3 + $0x1c8] sm:$0xff] }
  0x63   : > { %3680 = vmatpush3.msra.mxu1 %v438_v28  ;;  %3626 = vmatpush3.msra.mxu0 %v405_v29  ;;  %924 = vst [vmem:[#allocation2 + $0x20] sm:$0xff] %v4402_v22  ;;  %925 = vst [vmem:[#allocation2 + $0x28] sm:$0xff] %v4402_v22  ;;  %v1526_v27 = vld [vmem:[%s6747_s3 + $0x48] sm:$0xff]  ;;  %v1541_v29 = vld [vmem:[%s6747_s3 + $0xc0] sm:$0xff] }
  0x64   : > { %750 = vmatprep.mubr.f32.mxu0 %v282_v30  ;;  %3681 = vmatprep.subr.mxu1 %v453_v31  ;;  %926 = vst [vmem:[#allocation2 + $0x30] sm:$0xff] %v4402_v22  ;;  %927 = vst [vmem:[#allocation2 + $0x38] sm:$0xff] %v4402_v22  ;;  %v1558_v28 = vld [vmem:[%s6747_s3 + $0x148] sm:$0xff]  ;;  %v1573_v30 = vld [vmem:[%s6747_s3 + $0x1c0] sm:$0xff] }
  0x65   : > { %751 = vmatmul.mubr.f32.vlgmr.msra.gmra.mxu0 %v281_v32  ;;  %3682 = vmatpush3.msra.mxu1 %v437_v33  ;;  %928 = vst [vmem:[#allocation2 + $0x40] sm:$0xff] %v4402_v22  ;;  %929 = vst [vmem:[#allocation2 + $0x48] sm:$0xff] %v4402_v22  ;;  %v1525_v31 = vld [vmem:[%s6747_s3 + $0x40] sm:$0xff]  ;;  %v1540_v33 = vld [vmem:[%s6747_s3 + $0xb8] sm:$0xff] }
  0x66   : > { %855 = vmatprep.mubr.f32.mxu1 %v284_v34  ;;  %755 = vmatprep.mubr.f32.mxu0 %v290_v35  ;;  %930 = vst [vmem:[#allocation2 + $0x50] sm:$0xff] %v4402_v22  ;;  %931 = vst [vmem:[#allocation2 + $0x58] sm:$0xff] %v4402_v22  ;;  %v1557_v32 = vld [vmem:[%s6747_s3 + $0x140] sm:$0xff]  ;;  %v1572_v34 = vld [vmem:[%s6747_s3 + $0x1b8] sm:$0xff] }
  0x67   : > { %856 = vmatmul.mubr.f32.vlgmr.msra.gmra.mxu1 %v283_v36  ;;  %3707 = vmatprep.subr.mxu0 %v1548_v0  ;;  %932 = vst [vmem:[#allocation2 + $0x60] sm:$0xf] %v4402_v22  ;;  %941 = vst [vmem:[#allocation3] sm:$0xff] %v4402_v22  ;;  %v1524_v35 = vld [vmem:[%s6747_s3 + $0x38] sm:$0xff]  ;;  %v1518_v0 = vld [vmem:[%s6747_s3 + $0x8] sm:$0xff] }
  0x68   : > { %860 = vmatprep.mubr.f32.mxu1 %v292_v37  ;;  %3745 = vmatprep.subr.mxu1 %v1580_v1  ;;  %942 = vst [vmem:[#allocation3 + $0x8] sm:$0xff] %v4402_v22  ;;  %943 = vst [vmem:[#allocation3 + $0x10] sm:$0xff] %v4402_v22  ;;  %v1556_v36 = vld [vmem:[%s6747_s3 + $0x138] sm:$0xff]  ;;  %v1539_v37 = vld [vmem:[%s6747_s3 + $0xb0] sm:$0xff] }
  0x69   : > { %756 = vmatmul.mubr.f32.gmra.mxu0 %v289_v38  ;;  %3746 = vmatpush3.msra.mxu1 %v1564_v3  ;;  %944 = vst [vmem:[#allocation3 + $0x18] sm:$0xff] %v4402_v22  ;;  %945 = vst [vmem:[#allocation3 + $0x20] sm:$0xff] %v4402_v22  ;;  %v1571_v38 = vld [vmem:[%s6747_s3 + $0x1b0] sm:$0xff]  ;;  %v1550_v1 = vld [vmem:[%s6747_s3 + $0x108] sm:$0xff] }
  0x6a   : > { %760 = vmatprep.mubr.f32.mxu0 %v298_v39  ;;  %3708 = vmatpush3.msra.mxu0 %v1532_v2  ;;  %946 = vst [vmem:[#allocation3 + $0x28] sm:$0xff] %v4402_v22  ;;  %947 = vst [vmem:[#allocation3 + $0x30] sm:$0xff] %v4402_v22  ;;  %v1523_v39 = vld [vmem:[%s6747_s3 + $0x30] sm:$0xff]  ;;  %v1071_v2 = vld [vmem:[#allocation2 + $0x5] sm:$0x1] }
  0x6b   : > { %861 = vmatmul.mubr.f32.gmra.mxu1 %v291_v40  ;;  %3709 = vmatprep.subr.mxu0 %v1547_v4  ;;  %948 = vst [vmem:[#allocation3 + $0x38] sm:$0xff] %v4402_v22  ;;  %949 = vst [vmem:[#allocation3 + $0x40] sm:$0xff] %v4402_v22  ;;  %v1555_v40 = vld [vmem:[%s6747_s3 + $0x130] sm:$0xff]  ;;  %v1533_v3 = vld [vmem:[%s6747_s3 + $0x80] sm:$0xff] }
  0x6c   : > { %865 = vmatprep.mubr.f32.mxu1 %v300_v41  ;;  %3747 = vmatprep.subr.mxu1 %v1579_v5  ;;  %950 = vst [vmem:[#allocation3 + $0x48] sm:$0xff] %v4402_v22  ;;  %951 = vst [vmem:[#allocation3 + $0x50] sm:$0xff] %v4402_v22  ;;  %v1538_v41 = vld [vmem:[%s6747_s3 + $0xa8] sm:$0xff]  ;;  %v1565_v4 = vld [vmem:[%s6747_s3 + $0x180] sm:$0xff] }
  0x6d   : > { %761 = vmatmul.mubr.f32.gmra.mxu0 %v297_v42  ;;  %3748 = vmatpush3.msra.mxu1 %v1563_v7  ;;  %952 = vst [vmem:[#allocation3 + $0x58] sm:$0xff] %v4402_v22  ;;  %953 = vst [vmem:[#allocation3 + $0x60] sm:$0xff] %v4402_v22  ;;  %v1570_v42 = vld [vmem:[%s6747_s3 + $0x1a8] sm:$0xff]  ;;  %v1073_v5 = vld [vmem:[#allocation2 + $0x7] sm:$0x1] }
  0x6e   : > { %765 = vmatprep.mubr.f32.mxu0 %v306_v43  ;;  %3710 = vmatpush3.msra.mxu0 %v1531_v6  ;;  %954 = vst [vmem:[#allocation3 + $0x68] sm:$0xff] %v4402_v22  ;;  %955 = vst [vmem:[#allocation3 + $0x70] sm:$0xff] %v4402_v22  ;;  %v1522_v43 = vld [vmem:[%s6747_s3 + $0x28] sm:$0xff]  ;;  %v1517_v6 = vld [vmem:[%s6747_s3] sm:$0xff] }
  0x6f   : > { %866 = vmatmul.mubr.f32.gmra.mxu1 %v299_v44  ;;  %3711 = vmatprep.subr.mxu0 %v1546_v8  ;;  %956 = vst [vmem:[#allocation3 + $0x78] sm:$0xff] %v4402_v22  ;;  %957 = vst [vmem:[#allocation3 + $0x80] sm:$0xff] %v4402_v22  ;;  %v1554_v44 = vld [vmem:[%s6747_s3 + $0x128] sm:$0xff]  ;;  %v1549_v7 = vld [vmem:[%s6747_s3 + $0x100] sm:$0xff] }
  0x70   : > { %870 = vmatprep.mubr.f32.mxu1 %v308_v45  ;;  %3749 = vmatprep.subr.mxu1 %v1578_v9  ;;  %958 = vst [vmem:[#allocation3 + $0x88] sm:$0xff] %v4402_v22  ;;  %959 = vst [vmem:[#allocation3 + $0x90] sm:$0xff] %v4402_v22  ;;  %v1537_v45 = vld [vmem:[%s6747_s3 + $0xa0] sm:$0xff]  ;;  %v1075_v8 = vld [vmem:[#allocation2 + $0x9] sm:$0x1] }
  0x71   : > { %766 = vmatmul.mubr.f32.gmra.mxu0 %v305_v46  ;;  %3750 = vmatpush3.msra.mxu1 %v1562_v11  ;;  %960 = vst [vmem:[#allocation3 + $0x98] sm:$0xff] %v4402_v22  ;;  %961 = vst [vmem:[#allocation3 + $0xa0] sm:$0xff] %v4402_v22  ;;  %v1569_v46 = vld [vmem:[%s6747_s3 + $0x1a0] sm:$0xff]  ;;  %v1083_v9 = vld [vmem:[#allocation2 + $0x1d] sm:$0x1] }
  0x72   : > { %770 = vmatprep.mubr.f32.mxu0 %v314_v47  ;;  %3712 = vmatpush3.msra.mxu0 %v1530_v10  ;;  %962 = vst [vmem:[#allocation3 + $0xa8] sm:$0xff] %v4402_v22  ;;  %963 = vst [vmem:[#allocation3 + $0xb0] sm:$0xff] %v4402_v22  ;;  %v1521_v47 = vld [vmem:[%s6747_s3 + $0x20] sm:$0xff]  ;;  %v1612_v10 = vld [vmem:[%s6747_s3 + $0x2f8] sm:$0xff] }
  0x73   : > { %871 = vmatmul.mubr.f32.gmra.mxu1 %v307_v48  ;;  %3713 = vmatprep.subr.mxu0 %v1545_v12  ;;  %964 = vst [vmem:[#allocation3 + $0xb8] sm:$0xff] %v4402_v22  ;;  %965 = vst [vmem:[#allocation3 + $0xc0] sm:$0xff] %v4402_v22  ;;  %v1553_v48 = vld [vmem:[%s6747_s3 + $0x120] sm:$0xff]  ;;  %v1644_v11 = vld [vmem:[%s6747_s3 + $0x3f8] sm:$0xff] }
  0x74   : > { %875 = vmatprep.mubr.f32.mxu1 %v316_v49  ;;  %3751 = vmatprep.subr.mxu1 %v1577_v13  ;;  %966 = vst [vmem:[#allocation3 + $0xc8] sm:$0xff] %v4402_v22  ;;  %967 = vst [vmem:[#allocation3 + $0xd0] sm:$0xff] %v4402_v22  ;;  %v1536_v49 = vld [vmem:[%s6747_s3 + $0x98] sm:$0xff]  ;;  %v973_v12 = vld [vmem:[#allocation2] sm:$0x1] }
  0x75   : > { %771 = vmatmul.mubr.f32.gmra.mxu0 %v313_v50  ;;  %3752 = vmatpush3.msra.mxu1 %v1561_v15  ;;  %968 = vst [vmem:[#allocation3 + $0xd8] sm:$0xff] %v4402_v22  ;;  %969 = vst [vmem:[#allocation3 + $0xe0] sm:$0xff] %v4402_v22  ;;  %v1568_v50 = vld [vmem:[%s6747_s3 + $0x198] sm:$0xff]  ;;  %v975_v13 = vld [vmem:[#allocation2 + $0x2] sm:$0x1] }
  0x76   : > { %775 = vmatprep.mubr.f32.mxu0 %v322_v51  ;;  %3714 = vmatpush3.msra.mxu0 %v1529_v14  ;;  %970 = vst [vmem:[#allocation3 + $0xe8] sm:$0xff] %v4402_v22  ;;  %971 = vst [vmem:[#allocation3 + $0xf0] sm:$0xff] %v4402_v22  ;;  %v1005_v51 = vld [vmem:[#allocation2 + $0x1] sm:$0x1]  ;;  %v977_v14 = vld [vmem:[#allocation2 + $0x4] sm:$0x1] }
  0x77   : > { %876 = vmatmul.mubr.f32.gmra.mxu1 %v315_v52  ;;  %3715 = vmatprep.subr.mxu0 %v1544_v16  ;;  %972 = vst [vmem:[#allocation3 + $0xf8] sm:$0xff] %v4402_v22  ;;  %2398 = vst [vmem:[#allocation5] sm:$0xff] %v4402_v22  ;;  %v1520_v52 = vld [vmem:[%s6747_s3 + $0x18] sm:$0xff]  ;;  %v979_v15 = vld [vmem:[#allocation2 + $0x6] sm:$0x1] }
  0x78   : > { %880 = vmatprep.mubr.f32.mxu1 %v324_v53  ;;  %3753 = vmatprep.subr.mxu1 %v1576_v17  ;;  %2399 = vst [vmem:[#allocation5 + $0x8] sm:$0xff] %v4402_v22  ;;  %2400 = vst [vmem:[#allocation5 + $0x10] sm:$0xff] %v4402_v22  ;;  %v1552_v53 = vld [vmem:[%s6747_s3 + $0x118] sm:$0xff]  ;;  %v981_v16 = vld [vmem:[#allocation2 + $0x14] sm:$0x1] }
  0x79   : > { %776 = vmatmul.mubr.f32.gmra.mxu0 %v321_v54  ;;  %3754 = vmatpush3.msra.mxu1 %v1560_v19  ;;  %2401 = vst [vmem:[#allocation5 + $0x18] sm:$0xff] %v4402_v22  ;;  %2402 = vst [vmem:[#allocation5 + $0x20] sm:$0xff] %v4402_v22  ;;  %v1007_v54 = vld [vmem:[#allocation2 + $0x3] sm:$0x1]  ;;  %v1037_v17 = vld [vmem:[#allocation2 + $0x2] sm:$0x1] }
  0x7a   : > { %780 = vmatprep.mubr.f32.mxu0 %v330_v55  ;;  %3716 = vmatpush3.msra.mxu0 %v1528_v18  ;;  %2403 = vst [vmem:[#allocation5 + $0x28] sm:$0xff] %v4402_v22  ;;  %2404 = vst [vmem:[#allocation5 + $0x30] sm:$0xff] %v4402_v22  ;;  %v1535_v55 = vld [vmem:[%s6747_s3 + $0x90] sm:$0xff]  ;;  %v1039_v18 = vld [vmem:[#allocation2 + $0x4] sm:$0x1] }
  0x7b   : > { %881 = vmatmul.mubr.f32.gmra.mxu1 %v323_v56  ;;  %2405 = vst [vmem:[#allocation5 + $0x38] sm:$0xff] %v4402_v22  ;;  %3717 = vmatprep.subr.mxu0 %v1543_v20  ;;  %1006 = vst [vmem:[#allocation3 + $0x8] sm:$0x1] %v1005_v51  ;;  %v1567_v56 = vld [vmem:[%s6747_s3 + $0x190] sm:$0xff]  ;;  %v1041_v19 = vld [vmem:[#allocation2 + $0x6] sm:$0x1] }
  0x7c   : > { %885 = vmatprep.mubr.f32.mxu1 %v332_v57  ;;  %3755 = vmatprep.subr.mxu1 %v1575_v21  ;;  %1008 = vst [vmem:[#allocation3 + $0x9] sm:$0x1] %v1007_v54  ;;  %v1009_v57 = vld [vmem:[#allocation2 + $0x5] sm:$0x1]  ;;  %1072 = vst [vmem:[#allocation3 + $0x19] sm:$0x1] %v1071_v2 }
  0x7d   : > { %781 = vmatmul.mubr.f32.gmra.mxu0 %v329_v58  ;;  %3756 = vmatpush3.msra.mxu1 %v1559_v24  ;;  %v1519_v58 = vld [vmem:[%s6747_s3 + $0x10] sm:$0xff]  ;;  %1010 = vst [vmem:[#allocation3 + $0xa] sm:$0x1] %v1009_v57  ;;  %1074 = vst [vmem:[#allocation3 + $0x1a] sm:$0x1] %v1073_v5 }
  0x7e   : > { %785 = vmatprep.mubr.f32.mxu0 %v338_v59  ;;  %3718 = vmatpush3.msra.mxu0 %v1527_v23  ;;  %v1551_v59 = vld [vmem:[%s6747_s3 + $0x110] sm:$0xff]  ;;  %1076 = vst [vmem:[#allocation3 + $0x1b] sm:$0x1] %v1075_v8  ;;  %1084 = vst [vmem:[#allocation3 + $0x1f] sm:$0x1] %v1083_v9 }
  0x7f   : > { %886 = vmatmul.mubr.f32.gmra.mxu1 %v331_v60  ;;  %3719 = vmatprep.subr.mxu0 %v1542_v25  ;;  %v1011_v60 = vld [vmem:[#allocation2 + $0x7] sm:$0x1]  ;;  %974 = vst [vmem:[#allocation3] sm:$0x1] %v973_v12  ;;  %976 = vst [vmem:[#allocation3 + $0x1] sm:$0x1] %v975_v13 }
  0x80   : > { %890 = vmatprep.mubr.f32.mxu1 %v340_v61  ;;  %3757 = vmatprep.subr.mxu1 %v1574_v26  ;;  %v1534_v61 = vld [vmem:[%s6747_s3 + $0x88] sm:$0xff]  ;;  %1012 = vst [vmem:[#allocation3 + $0xb] sm:$0x1] %v1011_v60  ;;  %978 = vst [vmem:[#allocation3 + $0x2] sm:$0x1] %v977_v14 }
  0x81   : > { %786 = vmatmul.mubr.f32.gmra.mxu0 %v337_v62  ;;  %3758 = vmatpush3.msra.mxu1 %v1558_v28  ;;  %v1566_v62 = vld [vmem:[%s6747_s3 + $0x188] sm:$0xff]  ;;  %980 = vst [vmem:[#allocation3 + $0x3] sm:$0x1] %v979_v15  ;;  %982 = vst [vmem:[#allocation3 + $0x4] sm:$0x1] %v981_v16 }
  0x82   : > { %3720 = vmatpush3.msra.mxu0 %v1526_v27  ;;  %3759 = vmatprep.subr.mxu1 %v1573_v30  ;;  %1038 = vst [vmem:[#allocation3 + $0x10] sm:$0x1] %v1037_v17  ;;  %v1043_v20 = vld [vmem:[#allocation2 + $0x8] sm:$0x1]  ;;  %1040 = vst [vmem:[#allocation3 + $0x11] sm:$0x1] %v1039_v18 }
  0x83   : > { %891 = vmatmul.mubr.f32.gmra.mxu1 %v339_v63  ;;  %3721 = vmatprep.subr.mxu0 %v1541_v29  ;;  %v1069_v63 = vld [vmem:[#allocation2 + $0x3] sm:$0x1]  ;;  %1042 = vst [vmem:[#allocation3 + $0x12] sm:$0x1] %v1041_v19  ;;  %1044 = vst [vmem:[#allocation3 + $0x13] sm:$0x1] %v1043_v20 }
  0x84   : > { %3722 = vmatpush3.msra.mxu0 %v1525_v31  ;;  %3760 = vmatpush3.msra.mxu1 %v1557_v32  ;;  %1070 = vst [vmem:[#allocation3 + $0x18] sm:$0x1] %v1069_v63  ;;  %v1203_v21 = vld [vmem:[#allocation2 + $0x13] sm:$0x1]  ;;  %v1211_v22 = vld [vmem:[#allocation2 + $0x27] sm:$0x1] }
  0x85   : > { %3723 = vmatprep.subr.mxu0 %v1540_v33  ;;  %3761 = vmatprep.subr.mxu1 %v1572_v34  ;;  %1204 = vst [vmem:[#allocation3 + $0x3b] sm:$0x1] %v1203_v21  ;;  %1212 = vst [vmem:[#allocation3 + $0x3f] sm:$0x1] %v1211_v22  ;;  %v1101_v23 = vld [vmem:[#allocation2 + $0xa] sm:$0x1] }
  0x86   : > { %3724 = vmatpush3.msra.mxu0 %v1524_v35  ;;  %3762 = vmatpush3.msra.mxu1 %v1556_v36  ;;  %1102 = vst [vmem:[#allocation3 + $0x20] sm:$0x1] %v1101_v23  ;;  %v1109_v24 = vld [vmem:[#allocation2 + $0x1e] sm:$0x1]  ;;  %v1091_v25 = vld [vmem:[#allocation2 + $0x31] sm:$0x1] }
  0x87   : > { %3725 = vmatprep.subr.mxu0 %v1539_v37  ;;  %3763 = vmatprep.subr.mxu1 %v1571_v38  ;;  %1110 = vst [vmem:[#allocation3 + $0x24] sm:$0x1] %v1109_v24  ;;  %1092 = vst [vmem:[#allocation3 + $0x9b] sm:$0x1] %v1091_v25  ;;  %v1099_v26 = vld [vmem:[#allocation2 + $0x45] sm:$0x1] }
  0x88   : > { %3726 = vmatpush3.msra.mxu0 %v1523_v39  ;;  %3764 = vmatpush3.msra.mxu1 %v1555_v40  ;;  %1100 = vst [vmem:[#allocation3 + $0x9f] sm:$0x1] %v1099_v26  ;;  %v989_v27 = vld [vmem:[#allocation2 + $0x28] sm:$0x1]  ;;  %v997_v28 = vld [vmem:[#allocation2 + $0x3c] sm:$0x1] }
  0x89   : > { %3727 = vmatprep.subr.mxu0 %v1538_v41  ;;  %3765 = vmatprep.subr.mxu1 %v1570_v42  ;;  %990 = vst [vmem:[#allocation3 + $0x80] sm:$0x1] %v989_v27  ;;  %998 = vst [vmem:[#allocation3 + $0x84] sm:$0x1] %v997_v28  ;;  %v1219_v29 = vld [vmem:[#allocation2 + $0x3b] sm:$0x1] }
  0x8a   : > { %3728 = vmatpush3.msra.mxu0 %v1522_v43  ;;  %3766 = vmatpush3.msra.mxu1 %v1554_v44  ;;  %1220 = vst [vmem:[#allocation3 + $0xbb] sm:$0x1] %v1219_v29  ;;  %v1227_v30 = vld [vmem:[#allocation2 + $0x4f] sm:$0x1]  ;;  %v1117_v31 = vld [vmem:[#allocation2 + $0x32] sm:$0x1] }
  0x8b   : > { %3729 = vmatprep.subr.mxu0 %v1537_v45  ;;  %3767 = vmatprep.subr.mxu1 %v1569_v46  ;;  %1228 = vst [vmem:[#allocation3 + $0xbf] sm:$0x1] %v1227_v30  ;;  %1118 = vst [vmem:[#allocation3 + $0xa0] sm:$0x1] %v1117_v31  ;;  %v1125_v32 = vld [vmem:[#allocation2 + $0x46] sm:$0x1] }
  0x8c   : > { %3730 = vmatpush3.msra.mxu0 %v1521_v47  ;;  %3768 = vmatpush3.msra.mxu1 %v1553_v48  ;;  %v1331_v33 = vld [vmem:[#allocation2 + $0x1d] sm:$0x1]  ;;  %1126 = vst [vmem:[#allocation3 + $0xa4] sm:$0x1] %v1125_v32  ;;  %v1339_v34 = vld [vmem:[#allocation2 + $0x31] sm:$0x1] }
  0x8d   : > { %3731 = vmatprep.subr.mxu0 %v1536_v49  ;;  %3769 = vmatprep.subr.mxu1 %v1568_v50  ;;  %1332 = vst [vmem:[#allocation3 + $0x5b] sm:$0x1] %v1331_v33  ;;  %v1229_v35 = vld [vmem:[#allocation2 + $0x14] sm:$0x1]  ;;  %1340 = vst [vmem:[#allocation3 + $0x5f] sm:$0x1] %v1339_v34 }
  0x8e   : > { %3732 = vmatpush3.msra.mxu0 %v1520_v52  ;;  %3770 = vmatpush3.msra.mxu1 %v1552_v53  ;;  %1230 = vst [vmem:[#allocation3 + $0x40] sm:$0x1] %v1229_v35  ;;  %v1237_v36 = vld [vmem:[#allocation2 + $0x28] sm:$0x1]  ;;  %v1347_v45 = vld [vmem:[#allocation2 + $0x45] sm:$0x1] }
  0x8f   : > { %3733 = vmatprep.subr.mxu0 %v1535_v55  ;;  %3771 = vmatprep.subr.mxu1 %v1567_v56  ;;  %1238 = vst [vmem:[#allocation3 + $0x44] sm:$0x1] %v1237_v36  ;;  %1348 = vst [vmem:[#allocation3 + $0xdb] sm:$0x1] %v1347_v45  ;;  %v1355_v47 = vld [vmem:[#allocation2 + $0x59] sm:$0x1] }
  0x90   : > { %3734 = vmatpush3.msra.mxu0 %v1519_v58  ;;  %3772 = vmatpush3.msra.mxu1 %v1551_v59  ;;  %1356 = vst [vmem:[#allocation3 + $0xdf] sm:$0x1] %v1355_v47  ;;  %v1245_v48 = vld [vmem:[#allocation2 + $0x3c] sm:$0x1]  ;;  %v1253_v51 = vld [vmem:[#allocation2 + $0x50] sm:$0x1] }
  0x91   : > { %3735 = vmatprep.subr.mxu0 %v1534_v61  ;;  %3773 = vmatprep.subr.mxu1 %v1566_v62  ;;  %1246 = vst [vmem:[#allocation3 + $0xc0] sm:$0x1] %v1245_v48  ;;  %1254 = vst [vmem:[#allocation3 + $0xc4] sm:$0x1] %v1253_v51  ;;  %v1459_v52 = vld [vmem:[#allocation2 + $0x27] sm:$0x1] }
  0x92   : > { %3736 = vmatpush3.msra.mxu0 %v1518_v0  ;;  %3774 = vmatpush3.msra.mxu1 %v1550_v1  ;;  %1460 = vst [vmem:[#allocation3 + $0x7b] sm:$0x1] %v1459_v52  ;;  %v1467_v54 = vld [vmem:[#allocation2 + $0x3b] sm:$0x1]  ;;  %v1357_v55 = vld [vmem:[#allocation2 + $0x1e] sm:$0x1] }
  0x93   : > { %3737 = vmatprep.subr.mxu0 %v1533_v3  ;;  %3775 = vmatprep.subr.mxu1 %v1565_v4  ;;  %1468 = vst [vmem:[#allocation3 + $0x7f] sm:$0x1] %v1467_v54  ;;  %1358 = vst [vmem:[#allocation3 + $0x60] sm:$0x1] %v1357_v55  ;;  %v1365_v57 = vld [vmem:[#allocation2 + $0x32] sm:$0x1] }
  0x94   : > { %3738 = vmatpush3.msra.mxu0 %v1517_v6  ;;  %3776 = vmatpush3.msra.mxu1 %v1549_v7  ;;  %1366 = vst [vmem:[#allocation3 + $0x64] sm:$0x1] %v1365_v57  ;;  %v1413_v62 = vld [vmem:[#allocation2 + $0x5b] sm:$0x1]  ;;  %v1415_v1 = vld [vmem:[#allocation2 + $0x5d] sm:$0x1] }
  0x95   : > { %3783 = vmatprep.subr.mxu0 %v1612_v10  ;;  %3821 = vmatprep.subr.mxu1 %v1644_v11  ;;  %1414 = vst [vmem:[#allocation3 + $0xec] sm:$0x1] %v1413_v62  ;;  %v1417_v2 = vld [vmem:[#allocation2 + $0x5f] sm:$0x1]  ;;  %1416 = vst [vmem:[#allocation3 + $0xed] sm:$0x1] %v1415_v1 }
  0x96   : > { %1418 = vst [vmem:[#allocation3 + $0xee] sm:$0x1] %v1417_v2  ;;  %v1419_v3 = vld [vmem:[#allocation2 + $0x61] sm:$0x1]  ;;  %v1475_v4 = vld [vmem:[#allocation2 + $0x4f] sm:$0x1] }
  0x97   : > { %1420 = vst [vmem:[#allocation3 + $0xef] sm:$0x1] %v1419_v3  ;;  %1476 = vst [vmem:[#allocation3 + $0xfb] sm:$0x1] %v1475_v4  ;;  %v1477_v6 = vld [vmem:[#allocation2 + $0x5d] sm:$0x1] }
  0x98   : > { %v1479_v7 = vld [vmem:[#allocation2 + $0x5f] sm:$0x1]  ;;  %1478 = vst [vmem:[#allocation3 + $0xfc] sm:$0x1] %v1477_v6  ;;  %v1481_v8 = vld [vmem:[#allocation2 + $0x61] sm:$0x1] }
  0x99   : > { %1480 = vst [vmem:[#allocation3 + $0xfd] sm:$0x1] %v1479_v7  ;;  %v1483_v9 = vld [vmem:[#allocation2 + $0x63] sm:$0x1]  ;;  %1482 = vst [vmem:[#allocation3 + $0xfe] sm:$0x1] %v1481_v8 }
  0x9a   : > { %1484 = vst [vmem:[#allocation3 + $0xff] sm:$0x1] %v1483_v9  ;;  %v1373_v11 = vld [vmem:[#allocation2 + $0x46] sm:$0x1]  ;;  %v1381_v12 = vld [vmem:[#allocation2 + $0x5a] sm:$0x1] }
  0x9b   : > { %1374 = vst [vmem:[#allocation3 + $0xe0] sm:$0x1] %v1373_v11  ;;  %1382 = vst [vmem:[#allocation3 + $0xe4] sm:$0x1] %v1381_v12  ;;  %v1383_v15 = vld [vmem:[#allocation2 + $0x5c] sm:$0x1] }
  0x9c   : > { %v1385_v16 = vld [vmem:[#allocation2 + $0x5e] sm:$0x1]  ;;  %1384 = vst [vmem:[#allocation3 + $0xe5] sm:$0x1] %v1383_v15  ;;  %v1387_v17 = vld [vmem:[#allocation2 + $0x60] sm:$0x1] }
  0x9d   : > { %1386 = vst [vmem:[#allocation3 + $0xe6] sm:$0x1] %v1385_v16  ;;  %v1445_v18 = vld [vmem:[#allocation2 + $0x5c] sm:$0x1]  ;;  %1388 = vst [vmem:[#allocation3 + $0xe7] sm:$0x1] %v1387_v17 }
  0x9e   : > { %1446 = vst [vmem:[#allocation3 + $0xf4] sm:$0x1] %v1445_v18  ;;  %v1447_v20 = vld [vmem:[#allocation2 + $0x5e] sm:$0x1]  ;;  %v1449_v21 = vld [vmem:[#allocation2 + $0x60] sm:$0x1] }
  0x9f   : > { %1448 = vst [vmem:[#allocation3 + $0xf5] sm:$0x1] %v1447_v20  ;;  %v1451_v22 = vld [vmem:[#allocation2 + $0x62] sm:$0x1]  ;;  %1450 = vst [vmem:[#allocation3 + $0xf6] sm:$0x1] %v1449_v21 }
  0xa0   : > { %1452 = vst [vmem:[#allocation3 + $0xf7] sm:$0x1] %v1451_v22  ;;  %v5213_v29 = vld [vmem:[%s6746_s2] ss:$0 sm:$0xff] }
  0xf5   : > { %v5150_v37 = vpop.f32.mrf.mxu0 }
  0xf7   : > { %v5152_v38 = vpop.f32.mrf.mxu1  ;;  %v5154_v39 = vpop.f32.mrf.mxu0 }
  0xf8   : > { %v3517_v28 = vadd.f32 %v5154_v39, %v5150_v37 }
  0xf9   : > { %v5156_v40 = vpop.f32.mrf.mxu1 }
  0xfa   : > { %v543_v33 = vadd.f32 %v3517_v28, %v5213_v29  ;;  %v3573_v36 = vadd.f32 %v5156_v40, %v5152_v38 }
  0xfb   : > { %v5158_v41 = vpop.f32.mrf.mxu0 }
  0xfc   : > { %v648_v47 = vadd.f32 %v3573_v36, %v543_v33 }
  0xfd   : > { %v5160_v42 = vpop.f32.mrf.mxu1  ;;  %v5162_v43 = vpop.f32.mrf.mxu0 }
  0xfe   : > { %v3520_v34 = vadd.f32 %v5162_v43, %v5158_v41 }
  0xff   : > { %v5164_v44 = vpop.f32.mrf.mxu1 }
 0x100   : > { %v548_v48 = vadd.f32 %v3520_v34, %v5213_v29  ;;  %v3576_v55 = vadd.f32 %v5164_v44, %v5160_v42 }
 0x101   : > { %v5166_v46 = vpop.f32.mrf.mxu0 }
 0x103   : > { %v5168_v49 = vpop.f32.mrf.mxu1  ;;  %v5170_v50 = vpop.f32.mrf.mxu0 }
 0x104   : > { %v3523_v37 = vadd.f32 %v5170_v50, %v5166_v46  ;;  %v653_v50 = vadd.f32 %v3576_v55, %v548_v48 }
 0x105   : > { %v5172_v53 = vpop.f32.mrf.mxu1 }
 0x106   : > { %v553_v43 = vadd.f32 %v3523_v37, %v5213_v29  ;;  %v3579_v2 = vadd.f32 %v5172_v53, %v5168_v49 }
 0x107   : > { %v5174_v56 = vpop.f32.mrf.mxu0 }
 0x108   : > { %v658_v7 = vadd.f32 %v3579_v2, %v553_v43 }
 0x109   : > { %v5176_v58 = vpop.f32.mrf.mxu1  ;;  %v5178_v59 = vpop.f32.mrf.mxu0 }
 0x10a   : > { %v3526_v38 = vadd.f32 %v5178_v59, %v5174_v56 }
 0x10b   : > { %v5180_v60 = vpop.f32.mrf.mxu1 }
 0x10c   : > { %v558_v8 = vadd.f32 %v3526_v38, %v5213_v29  ;;  %v3582_v49 = vadd.f32 %v5180_v60, %v5176_v58 }
 0x10d   : > { %v5182_v61 = vpop.f32.mrf.mxu0 }
 0x10e   : > { %v663_v21 = vadd.f32 %v3582_v49, %v558_v8 }
 0x10f   : > { %v5184_v63 = vpop.f32.mrf.mxu1  ;;  %v5186_v0 = vpop.f32.mrf.mxu0 }
 0x110   : > { %v3529_v56 = vadd.f32 %v5186_v0, %v5182_v61 }
 0x111   : > { %v5188_v5 = vpop.f32.mrf.mxu1 }
 0x112   : > { %v563_v61 = vadd.f32 %v3529_v56, %v5213_v29  ;;  %v3585_v58 = vadd.f32 %v5188_v5, %v5184_v63 }
 0x113   : > { %v5190_v10 = vpop.f32.mrf.mxu0 }
 0x115   : > { %v5192_v13 = vpop.f32.mrf.mxu1  ;;  %v5194_v14 = vpop.f32.mrf.mxu0 }
 0x116   : > { %v3532_v22 = vadd.f32 %v5194_v14, %v5190_v10 }
 0x117   : > { %v5196_v19 = vpop.f32.mrf.mxu1 }
 0x119   : > { %v5198_v23 = vpop.f32.mrf.mxu0 }
 0x11b   : > { %v5200_v24 = vpop.f32.mrf.mxu1  ;;  %v5202_v25 = vpop.f32.mrf.mxu0 }
 0x11c   : > { %v3535_v10 = vadd.f32 %v5202_v25, %v5198_v23 }
 0x11d   : > { %v5204_v26 = vpop.f32.mrf.mxu1 }
 0x11f   : > { %v5206_v27 = vpop.f32.mrf.mxu0 }
 0x121   : > { %v5215_v30 = vpop.f32.mrf.mxu1  ;;  %v5217_v31 = vpop.f32.mrf.mxu0 }
 0x123   : > { %v5219_v32 = vpop.f32.mrf.mxu1 }
 0x125   : > { %v3627_v35 = vpop.f32.mrf.mxu0 }
 0x127   : > { %v3683_v39 = vpop.f32.mrf.mxu1  ;;  %v3628_v45 = vpop.f32.mrf.mxu0 }
 0x128   : > { %v3629_v51 = vadd.f32 %v3628_v45, %v3627_v35 }
 0x129   : > { %v3684_v52 = vpop.f32.mrf.mxu1  ;;  %v3630_v54 = vpop.f32.mrf.mxu0 }
 0x12a   : > { %v753_v57 = vadd.f32 %v3629_v51, %v648_v47  ;;  %v3685_v41 = vadd.f32 %v3684_v52, %v3683_v39  ;;  %v568_v47 = vadd.f32 %v3532_v22, %v5213_v29  ;;  %v668_v51 = vadd.f32 %v3585_v58, %v563_v61 }
 0x12b   : > { %v3686_v40 = vpop.f32.mrf.mxu1  ;;  %v3631_v46 = vpop.f32.mrf.mxu0 }
 0x12c   : > { %v858_v62 = vadd.f32 %v3685_v41, %v753_v57  ;;  %v3632_v1 = vadd.f32 %v3631_v46, %v3630_v54  ;;  %v3588_v41 = vadd.f32 %v5196_v19, %v5192_v13  ;;  %v573_v13 = vadd.f32 %v3535_v10, %v5213_v29 }
 0x12d   : > { %v3687_v3 = vpop.f32.mrf.mxu1  ;;  %v3633_v4 = vpop.f32.mrf.mxu0 }
 0x12e   : > { %vm896_vm0 = vcmp.ge.f32.partialorder %v858_v62, 0.0  ;;  %v904_v6 = vmul.f32 0.01, %v858_v62  ;;  %v758_v42 = vadd.f32 %v3632_v1, %v653_v50  ;;  %v3688_v44 = vadd.f32 %v3687_v3, %v3686_v40 }
 0x12f   : > { %v3634_v9 = vpop.f32.mrf.mxu0  ;;  %v3689_v11 = vpop.f32.mrf.mxu1  ;;  %v673_v2 = vadd.f32 %v3588_v41, %v568_v47 }
 0x130   : > { %v912_v59 = vsel %vm896_vm0, %v858_v62, %v904_v6  ;;  %v863_v12 = vadd.f32 %v3688_v44, %v758_v42  ;;  %v3635_v15 = vadd.f32 %v3634_v9, %v3633_v4  ;;  %v3538_v44 = vadd.f32 %v5217_v31, %v5206_v27 }
 0x131   : > { %933 = vst [vmem:[#allocation2 + $0xb] sm:$0xff] %v912_v59  ;;  %v3636_v53 = vpop.f32.mrf.mxu0  ;;  %v3690_v16 = vpop.f32.mrf.mxu1 }
 0x132   : > { %vm897_vm1 = vcmp.ge.f32.partialorder %v863_v12, 0.0  ;;  %v905_v17 = vmul.f32 0.01, %v863_v12  ;;  %v763_v18 = vadd.f32 %v3635_v15, %v658_v7  ;;  %v3691_v20 = vadd.f32 %v3690_v16, %v3689_v11 }
 0x133   : > { %v3637_v28 = vpop.f32.mrf.mxu0  ;;  %v3692_v33 = vpop.f32.mrf.mxu1  ;;  %v578_v61 = vadd.f32 %v3538_v44, %v5213_v29 }
 0x134   : > { %v913_v0 = vsel %vm897_vm1, %v863_v12, %v905_v17  ;;  %v868_v34 = vadd.f32 %v3691_v20, %v763_v18  ;;  %v3638_v35 = vadd.f32 %v3637_v28, %v3636_v53  ;;  %v3591_v12 = vadd.f32 %v5204_v26, %v5200_v24 }
 0x135   : > { %934 = vst [vmem:[#allocation2 + $0x15] sm:$0xff] %v913_v0  ;;  %v3639_v60 = vpop.f32.mrf.mxu0  ;;  %v3693_v36 = vpop.f32.mrf.mxu1 }
 0x136   : > { %vm898_vm2 = vcmp.ge.f32.partialorder %v868_v34, 0.0  ;;  %v906_v37 = vmul.f32 0.01, %v868_v34  ;;  %v768_v39 = vadd.f32 %v3638_v35, %v663_v21  ;;  %v3694_v45 = vadd.f32 %v3693_v36, %v3692_v33 }
 0x137   : > { %v3640_v14 = vpop.f32.mrf.mxu0  ;;  %v3695_v48 = vpop.f32.mrf.mxu1  ;;  %v678_v21 = vadd.f32 %v3591_v12, %v573_v13 }
 0x138   : > { %v914_v52 = vsel %vm898_vm2, %v868_v34, %v906_v37  ;;  %v873_v54 = vadd.f32 %v3694_v45, %v768_v39  ;;  %v3641_v55 = vadd.f32 %v3640_v14, %v3639_v60  ;;  %v1133_v57 = vld [vmem:[#allocation2 + $0xb] sm:$0x1]  ;;  %v1135_v63 = vld [vmem:[#allocation2 + $0xd] sm:$0x1]  ;;  %v1137_v5 = vld [vmem:[#allocation2 + $0xf] sm:$0x1]  ;;  %v3594_v37 = vadd.f32 %v5219_v32, %v5215_v30 }
 0x139   : > { %935 = vst [vmem:[#allocation2 + $0x1f] sm:$0xff] %v914_v52  ;;  %v3642_v43 = vpop.f32.mrf.mxu0  ;;  %v3696_v38 = vpop.f32.mrf.mxu1  ;;  %1134 = vst [vmem:[#allocation3 + $0x28] sm:$0x1] %v1133_v57  ;;  %v1139_v40 = vld [vmem:[#allocation2 + $0x11] sm:$0x1] }
 0x13a   : > { %1136 = vst [vmem:[#allocation3 + $0x29] sm:$0x1] %v1135_v63  ;;  %1138 = vst [vmem:[#allocation3 + $0x2a] sm:$0x1] %v1137_v5  ;;  %v1197_v23 = vld [vmem:[#allocation2 + $0xd] sm:$0x1]  ;;  %v773_v50 = vadd.f32 %v3641_v55, %v668_v51  ;;  %v3697_v62 = vadd.f32 %v3696_v38, %v3695_v48  ;;  %v683_v63 = vadd.f32 %v3594_v37, %v578_v61 }
 0x13b   : > { %v1199_v25 = vld [vmem:[#allocation2 + $0xf] sm:$0x1]  ;;  %vm899_vm3 = vcmp.ge.f32.partialorder %v873_v54, 0.0  ;;  %v907_v46 = vmul.f32 0.01, %v873_v54  ;;  %v3643_v19 = vpop.f32.mrf.mxu0  ;;  %v3698_v3 = vpop.f32.mrf.mxu1  ;;  %v1596_v38 = vld [vmem:[%s6747_s3 + $0x278] sm:$0xff] }
 0x13c   : > { %1140 = vst [vmem:[#allocation3 + $0x2b] sm:$0x1] %v1139_v40  ;;  %1198 = vst [vmem:[#allocation3 + $0x38] sm:$0x1] %v1197_v23  ;;  %v1201_v1 = vld [vmem:[#allocation2 + $0x11] sm:$0x1]  ;;  %v878_v8 = vadd.f32 %v3697_v62, %v773_v50  ;;  %v3644_v9 = vadd.f32 %v3643_v19, %v3642_v43 }
 0x13d   : > { %1200 = vst [vmem:[#allocation3 + $0x39] sm:$0x1] %v1199_v25  ;;  %1202 = vst [vmem:[#allocation3 + $0x3a] sm:$0x1] %v1201_v1  ;;  %v1103_v4 = vld [vmem:[#allocation2 + $0xc] sm:$0x1]  ;;  %v915_v7 = vsel %vm899_vm3, %v873_v54, %v907_v46  ;;  %v3645_v15 = vpop.f32.mrf.mxu0  ;;  %v3699_v49 = vpop.f32.mrf.mxu1 }
 0x13e   : > { %v1105_v6 = vld [vmem:[#allocation2 + $0xe] sm:$0x1]  ;;  %v1107_v42 = vld [vmem:[#allocation2 + $0x10] sm:$0x1]  ;;  %v1013_v11 = vld [vmem:[#allocation2 + $0x15] sm:$0x1]  ;;  %v778_v17 = vadd.f32 %v3644_v9, %v673_v2  ;;  %v3700_v18 = vadd.f32 %v3699_v49, %v3698_v3 }
 0x13f   : > { %v1015_v56 = vld [vmem:[#allocation2 + $0x17] sm:$0x1]  ;;  %v1017_v59 = vld [vmem:[#allocation2 + $0x19] sm:$0x1]  ;;  %1104 = vst [vmem:[#allocation3 + $0x21] sm:$0x1] %v1103_v4  ;;  %v3646_v22 = vpop.f32.mrf.mxu0  ;;  %v3701_v24 = vpop.f32.mrf.mxu1 }
 0x140   : > { %1106 = vst [vmem:[#allocation3 + $0x22] sm:$0x1] %v1105_v6  ;;  %1108 = vst [vmem:[#allocation3 + $0x23] sm:$0x1] %v1107_v42  ;;  %v1019_v27 = vld [vmem:[#allocation2 + $0x1b] sm:$0x1]  ;;  %v883_v34 = vadd.f32 %v3700_v18, %v778_v17  ;;  %v3647_v35 = vadd.f32 %v3646_v22, %v3645_v15 }
 0x141   : > { %936 = vst [vmem:[#allocation2 + $0x29] sm:$0xff] %v915_v7  ;;  %1014 = vst [vmem:[#allocation3 + $0xc] sm:$0x1] %v1013_v11  ;;  %v1077_v31 = vld [vmem:[#allocation2 + $0x17] sm:$0x1]  ;;  %vm900_vm4 = vcmp.ge.f32.partialorder %v878_v8, 0.0  ;;  %v3648_v39 = vpop.f32.mrf.mxu0  ;;  %v3702_v45 = vpop.f32.mrf.mxu1 }
 0x142   : > { %1016 = vst [vmem:[#allocation3 + $0xd] sm:$0x1] %v1015_v56  ;;  %1018 = vst [vmem:[#allocation3 + $0xe] sm:$0x1] %v1017_v59  ;;  %v1079_v53 = vld [vmem:[#allocation2 + $0x19] sm:$0x1]  ;;  %v783_v48 = vadd.f32 %v3647_v35, %v678_v21  ;;  %v3703_v51 = vadd.f32 %v3702_v45, %v3701_v24 }
 0x143   : > { %v908_v16 = vmul.f32 0.01, %v878_v8  ;;  %1020 = vst [vmem:[#allocation3 + $0xf] sm:$0x1] %v1019_v27  ;;  %1078 = vst [vmem:[#allocation3 + $0x1c] sm:$0x1] %v1077_v31  ;;  %v3649_v54 = vpop.f32.mrf.mxu0  ;;  %v3704_v55 = vpop.f32.mrf.mxu1 }
 0x144   : > { %1080 = vst [vmem:[#allocation3 + $0x1d] sm:$0x1] %v1079_v53  ;;  %v1081_v20 = vld [vmem:[#allocation2 + $0x1b] sm:$0x1]  ;;  %v983_v26 = vld [vmem:[#allocation2 + $0x16] sm:$0x1]  ;;  %v888_v41 = vadd.f32 %v3703_v51, %v783_v48  ;;  %v3650_v43 = vadd.f32 %v3649_v54, %v3648_v39 }
 0x145   : > { %1082 = vst [vmem:[#allocation3 + $0x1e] sm:$0x1] %v1081_v20  ;;  %v985_v28 = vld [vmem:[#allocation2 + $0x18] sm:$0x1]  ;;  %v987_v33 = vld [vmem:[#allocation2 + $0x1a] sm:$0x1]  ;;  %v916_v0 = vsel %vm900_vm4, %v878_v8, %v908_v16  ;;  %v3705_v46 = vpop.f32.mrf.mxu1 }
 0x146   : > { %984 = vst [vmem:[#allocation3 + $0x5] sm:$0x1] %v983_v26  ;;  %986 = vst [vmem:[#allocation3 + $0x6] sm:$0x1] %v985_v28  ;;  %v1045_v58 = vld [vmem:[#allocation2 + $0x16] sm:$0x1]  ;;  %v788_v19 = vadd.f32 %v3650_v43, %v683_v63  ;;  %v3706_v3 = vadd.f32 %v3705_v46, %v3704_v55 }
 0x147   : > { %988 = vst [vmem:[#allocation3 + $0x7] sm:$0x1] %v987_v33  ;;  %v1047_v60 = vld [vmem:[#allocation2 + $0x18] sm:$0x1]  ;;  %v1049_v36 = vld [vmem:[#allocation2 + $0x1a] sm:$0x1] }
 0x148   : > { %937 = vst [vmem:[#allocation2 + $0x33] sm:$0xff] %v916_v0  ;;  %1046 = vst [vmem:[#allocation3 + $0x14] sm:$0x1] %v1045_v58  ;;  %v1051_v29 = vld [vmem:[#allocation2 + $0x1c] sm:$0x1]  ;;  %vm901_vm5 = vcmp.ge.f32.partialorder %v883_v34, 0.0  ;;  %v893_v12 = vadd.f32 %v3706_v3, %v788_v19 }
 0x149   : > { %1048 = vst [vmem:[#allocation3 + $0x15] sm:$0x1] %v1047_v60  ;;  %1050 = vst [vmem:[#allocation3 + $0x16] sm:$0x1] %v1049_v36  ;;  %v1141_v47 = vld [vmem:[#allocation2 + $0x1f] sm:$0x1] }
 0x14a   : > { %v1143_v10 = vld [vmem:[#allocation2 + $0x21] sm:$0x1]  ;;  %v909_v14 = vmul.f32 0.01, %v883_v34  ;;  %1052 = vst [vmem:[#allocation3 + $0x17] sm:$0x1] %v1051_v29 }
 0x14b   : > { %1142 = vst [vmem:[#allocation3 + $0x2c] sm:$0x1] %v1141_v47  ;;  %1144 = vst [vmem:[#allocation3 + $0x2d] sm:$0x1] %v1143_v10  ;;  %v1145_v52 = vld [vmem:[#allocation2 + $0x23] sm:$0x1] }
 0x14c   : > { %1146 = vst [vmem:[#allocation3 + $0x2e] sm:$0x1] %v1145_v52  ;;  %v1147_v30 = vld [vmem:[#allocation2 + $0x25] sm:$0x1]  ;;  %v1205_v32 = vld [vmem:[#allocation2 + $0x21] sm:$0x1]  ;;  %v917_v5 = vsel %vm901_vm5, %v883_v34, %v909_v14 }
 0x14d   : > { %v1207_v57 = vld [vmem:[#allocation2 + $0x23] sm:$0x1]  ;;  %v1021_v40 = vld [vmem:[#allocation2 + $0x29] sm:$0x1]  ;;  %v1023_v23 = vld [vmem:[#allocation2 + $0x2b] sm:$0x1] }
 0x14e   : > { %v1025_v25 = vld [vmem:[#allocation2 + $0x2d] sm:$0x1]  ;;  %1148 = vst [vmem:[#allocation3 + $0x2f] sm:$0x1] %v1147_v30  ;;  %1206 = vst [vmem:[#allocation3 + $0x3c] sm:$0x1] %v1205_v32 }
 0x14f   : > { %1208 = vst [vmem:[#allocation3 + $0x3d] sm:$0x1] %v1207_v57  ;;  %938 = vst [vmem:[#allocation2 + $0x3d] sm:$0xff] %v917_v5  ;;  %v1486_v50 = vld [vmem:[#allocation3 + $0x8] sm:$0xff]  ;;  %v1027_v1 = vld [vmem:[#allocation2 + $0x2f] sm:$0x1] }
 0x150   : > { %v1611_v62 = vld [vmem:[%s6747_s3 + $0x2f0] sm:$0xff]  ;;  %1022 = vst [vmem:[#allocation3 + $0x88] sm:$0x1] %v1021_v40  ;;  %1024 = vst [vmem:[#allocation3 + $0x89] sm:$0x1] %v1023_v23  ;;  %vm902_vm6 = vcmp.ge.f32.partialorder %v888_v41, 0.0  ;;  %1844 = vmatprep.mubr.f32.mxu0 %v1486_v50 }
 0x151   : > { %1026 = vst [vmem:[#allocation3 + $0x8a] sm:$0x1] %v1025_v25  ;;  %v1085_v2 = vld [vmem:[#allocation2 + $0x2b] sm:$0x1]  ;;  %v910_v13 = vmul.f32 0.01, %v888_v41 }
 0x152   : > { %v1488_v4 = vld [vmem:[#allocation3 + $0x18] sm:$0xff]  ;;  %v1628_v6 = vld [vmem:[%s6747_s3 + $0x378] sm:$0xff]  ;;  %v1595_v42 = vld [vmem:[%s6747_s3 + $0x270] sm:$0xff]  ;;  %1028 = vst [vmem:[#allocation3 + $0x8b] sm:$0x1] %v1027_v1  ;;  %vm903_vm7 = vcmp.ge.f32.partialorder %v893_v12, 0.0 }
 0x153   : > { %1086 = vst [vmem:[#allocation3 + $0x98] sm:$0x1] %v1085_v2  ;;  %v1087_v44 = vld [vmem:[#allocation2 + $0x2d] sm:$0x1]  ;;  %1919 = vmatprep.mubr.f32.mxu1 %v1488_v4  ;;  %v1643_v8 = vld [vmem:[%s6747_s3 + $0x3f0] sm:$0xff]  ;;  %v918_v59 = vsel %vm902_vm6, %v888_v41, %v910_v13  ;;  %v1487_v16 = vld [vmem:[#allocation3 + $0x10] sm:$0xff] }
 0x154   : > { %v1485_v7 = vld [vmem:[#allocation3] sm:$0xff]  ;;  %1088 = vst [vmem:[#allocation3 + $0x99] sm:$0x1] %v1087_v44  ;;  %v1627_v15 = vld [vmem:[%s6747_s3 + $0x370] sm:$0xff]  ;;  %939 = vst [vmem:[#allocation2 + $0x47] sm:$0xff] %v918_v59  ;;  %1920 = vmatmul.mubr.f32.vlgmr.msra.gmra.mxu1 %v1487_v16 }
 0x155   : > { %v1610_v9 = vld [vmem:[%s6747_s3 + $0x2e8] sm:$0xff]  ;;  %1845 = vmatmul.mubr.f32.vlgmr.msra.gmra.mxu0 %v1485_v7  ;;  %v1609_v18 = vld [vmem:[%s6747_s3 + $0x2e0] sm:$0xff]  ;;  %v911_v22 = vmul.f32 0.01, %v893_v12  ;;  %v1059_v28 = vld [vmem:[#allocation2 + $0x30] sm:$0x1]  ;;  %3822 = vmatpush3.msra.mxu1 %v1628_v6 }
 0x156   : > { %v1089_v11 = vld [vmem:[#allocation2 + $0x2f] sm:$0x1]  ;;  %v991_v56 = vld [vmem:[#allocation2 + $0x2a] sm:$0x1]  ;;  %v993_v27 = vld [vmem:[#allocation2 + $0x2c] sm:$0x1]  ;;  %3784 = vmatpush3.msra.mxu0 %v1596_v38  ;;  %3823 = vmatprep.subr.mxu1 %v1643_v8 }
 0x157   : > { %v1594_v49 = vld [vmem:[%s6747_s3 + $0x268] sm:$0xff]  ;;  %1090 = vst [vmem:[#allocation3 + $0x9a] sm:$0x1] %v1089_v11  ;;  %992 = vst [vmem:[#allocation3 + $0x81] sm:$0x1] %v991_v56  ;;  %3785 = vmatprep.subr.mxu0 %v1611_v62  ;;  %v1593_v26 = vld [vmem:[%s6747_s3 + $0x260] sm:$0xff]  ;;  %v919_v35 = vsel %vm903_vm7, %v893_v12, %v911_v22  ;;  %3824 = vmatpush3.msra.mxu1 %v1627_v15 }
 0x158   : > { %v995_v31 = vld [vmem:[#allocation2 + $0x2e] sm:$0x1]  ;;  %v1053_v53 = vld [vmem:[#allocation2 + $0x2a] sm:$0x1]  ;;  %994 = vst [vmem:[#allocation3 + $0x82] sm:$0x1] %v993_v27  ;;  %3786 = vmatpush3.msra.mxu0 %v1595_v42 }
 0x159   : > { %v1642_v17 = vld [vmem:[%s6747_s3 + $0x3e8] sm:$0xff]  ;;  %996 = vst [vmem:[#allocation3 + $0x83] sm:$0x1] %v995_v31  ;;  %1054 = vst [vmem:[#allocation3 + $0x90] sm:$0x1] %v1053_v53  ;;  %v1641_v33 = vld [vmem:[%s6747_s3 + $0x3e0] sm:$0xff]  ;;  %3787 = vmatprep.subr.mxu0 %v1610_v9 }
 0x15a   : > { %v1055_v20 = vld [vmem:[#allocation2 + $0x2c] sm:$0x1]  ;;  %v1057_v21 = vld [vmem:[#allocation2 + $0x2e] sm:$0x1]  ;;  %v1608_v61 = vld [vmem:[%s6747_s3 + $0x2d8] sm:$0xff]  ;;  %940 = vst [vmem:[#allocation2 + $0x51] sm:$0xff] %v919_v35  ;;  %3788 = vmatpush3.msra.mxu0 %v1594_v49  ;;  %3825 = vmatprep.subr.mxu1 %v1642_v17 }
 0x15b   : > { %v1626_v24 = vld [vmem:[%s6747_s3 + $0x368] sm:$0xff]  ;;  %1056 = vst [vmem:[#allocation3 + $0x91] sm:$0x1] %v1055_v20  ;;  %1058 = vst [vmem:[#allocation3 + $0x92] sm:$0x1] %v1057_v21  ;;  %v1625_v58 = vld [vmem:[%s6747_s3 + $0x360] sm:$0xff]  ;;  %3789 = vmatprep.subr.mxu0 %v1609_v18 }
 0x15c   : > { %1060 = vst [vmem:[#allocation3 + $0x93] sm:$0x1] %v1059_v28  ;;  %v1209_v0 = vld [vmem:[#allocation2 + $0x25] sm:$0x1]  ;;  %v1111_v34 = vld [vmem:[#allocation2 + $0x20] sm:$0x1]  ;;  %3826 = vmatpush3.msra.mxu1 %v1626_v24  ;;  %3790 = vmatpush3.msra.mxu0 %v1593_v26 }
 0x15d   : > { %v1592_v60 = vld [vmem:[%s6747_s3 + $0x258] sm:$0xff]  ;;  %v1033_v39 = vld [vmem:[#allocation2 + $0x41] sm:$0x1]  ;;  %1210 = vst [vmem:[#allocation3 + $0x3e] sm:$0x1] %v1209_v0  ;;  %v1607_v29 = vld [vmem:[%s6747_s3 + $0x2d0] sm:$0xff]  ;;  %3827 = vmatprep.subr.mxu1 %v1641_v33  ;;  %3791 = vmatprep.subr.mxu0 %v1608_v61 }
 0x15e   : > { %v1029_v36 = vld [vmem:[#allocation2 + $0x3d] sm:$0x1]  ;;  %v1031_v37 = vld [vmem:[#allocation2 + $0x3f] sm:$0x1]  ;;  %1112 = vst [vmem:[#allocation3 + $0x25] sm:$0x1] %v1111_v34  ;;  %3828 = vmatpush3.msra.mxu1 %v1625_v58  ;;  %3792 = vmatpush3.msra.mxu0 %v1592_v60 }
 0x15f   : > { %v1640_v45 = vld [vmem:[%s6747_s3 + $0x3d8] sm:$0xff]  ;;  %1030 = vst [vmem:[#allocation3 + $0x8c] sm:$0x1] %v1029_v36  ;;  %1032 = vst [vmem:[#allocation3 + $0x8d] sm:$0x1] %v1031_v37  ;;  %v1591_v51 = vld [vmem:[%s6747_s3 + $0x250] sm:$0xff]  ;;  %3793 = vmatprep.subr.mxu0 %v1607_v29 }
 0x160   : > { %1034 = vst [vmem:[#allocation3 + $0x8e] sm:$0x1] %v1033_v39  ;;  %v1035_v47 = vld [vmem:[#allocation2 + $0x43] sm:$0x1]  ;;  %v1093_v10 = vld [vmem:[#allocation2 + $0x3f] sm:$0x1]  ;;  %3829 = vmatprep.subr.mxu1 %v1640_v45  ;;  %3794 = vmatpush3.msra.mxu0 %v1591_v51 }
 0x161   : > { %v1095_v14 = vld [vmem:[#allocation2 + $0x41] sm:$0x1]  ;;  %v1624_v48 = vld [vmem:[%s6747_s3 + $0x358] sm:$0xff]  ;;  %1036 = vst [vmem:[#allocation3 + $0x8f] sm:$0x1] %v1035_v47  ;;  %v1639_v30 = vld [vmem:[%s6747_s3 + $0x3d0] sm:$0xff] }
 0x162   : > { %1094 = vst [vmem:[#allocation3 + $0x9c] sm:$0x1] %v1093_v10  ;;  %1096 = vst [vmem:[#allocation3 + $0x9d] sm:$0x1] %v1095_v14  ;;  %v1097_v52 = vld [vmem:[#allocation2 + $0x43] sm:$0x1]  ;;  %3830 = vmatpush3.msra.mxu1 %v1624_v48 }
 0x163   : > { %v999_v54 = vld [vmem:[#allocation2 + $0x3e] sm:$0x1]  ;;  %v1001_v55 = vld [vmem:[#allocation2 + $0x40] sm:$0x1]  ;;  %v1606_v32 = vld [vmem:[%s6747_s3 + $0x2c8] sm:$0xff]  ;;  %3831 = vmatprep.subr.mxu1 %v1639_v30 }
 0x164   : > { %1098 = vst [vmem:[#allocation3 + $0x9e] sm:$0x1] %v1097_v52  ;;  %1000 = vst [vmem:[#allocation3 + $0x85] sm:$0x1] %v999_v54  ;;  %v1003_v57 = vld [vmem:[#allocation2 + $0x42] sm:$0x1]  ;;  %3795 = vmatprep.subr.mxu0 %v1606_v32 }
 0x165   : > { %1002 = vst [vmem:[#allocation3 + $0x86] sm:$0x1] %v1001_v55  ;;  %v1061_v63 = vld [vmem:[#allocation2 + $0x3e] sm:$0x1]  ;;  %v1063_v5 = vld [vmem:[#allocation2 + $0x40] sm:$0x1] }
 0x166   : > { %v1623_v41 = vld [vmem:[%s6747_s3 + $0x350] sm:$0xff]  ;;  %v1590_v43 = vld [vmem:[%s6747_s3 + $0x248] sm:$0xff]  ;;  %1004 = vst [vmem:[#allocation3 + $0x87] sm:$0x1] %v1003_v57  ;;  %1062 = vst [vmem:[#allocation3 + $0x94] sm:$0x1] %v1061_v63 }
 0x167   : > { %1064 = vst [vmem:[#allocation3 + $0x95] sm:$0x1] %v1063_v5  ;;  %v1065_v38 = vld [vmem:[#allocation2 + $0x42] sm:$0x1]  ;;  %v1067_v40 = vld [vmem:[#allocation2 + $0x44] sm:$0x1]  ;;  %3832 = vmatpush3.msra.mxu1 %v1623_v41  ;;  %3796 = vmatpush3.msra.mxu0 %v1590_v43 }
 0x168   : > { %v1113_v23 = vld [vmem:[#allocation2 + $0x22] sm:$0x1]  ;;  %v1638_v25 = vld [vmem:[%s6747_s3 + $0x3c8] sm:$0xff]  ;;  %1066 = vst [vmem:[#allocation3 + $0x96] sm:$0x1] %v1065_v38  ;;  %v1502_v56 = vld [vmem:[#allocation3 + $0x88] sm:$0xff] }
 0x169   : > { %v1605_v46 = vld [vmem:[%s6747_s3 + $0x2c0] sm:$0xff]  ;;  %1068 = vst [vmem:[#allocation3 + $0x97] sm:$0x1] %v1067_v40  ;;  %1114 = vst [vmem:[#allocation3 + $0x26] sm:$0x1] %v1113_v23  ;;  %v1622_v2 = vld [vmem:[%s6747_s3 + $0x348] sm:$0xff]  ;;  %3833 = vmatprep.subr.mxu1 %v1638_v25  ;;  %1849 = vmatprep.mubr.f32.mxu0 %v1502_v56 }
 0x16a   : > { %v1115_v50 = vld [vmem:[#allocation2 + $0x24] sm:$0x1]  ;;  %v1165_v62 = vld [vmem:[#allocation2 + $0xc] sm:$0x1]  ;;  %v1167_v1 = vld [vmem:[#allocation2 + $0xe] sm:$0x1]  ;;  %3797 = vmatprep.subr.mxu0 %v1605_v46  ;;  %3834 = vmatpush3.msra.mxu1 %v1622_v2 }
 0x16b   : > { %1116 = vst [vmem:[#allocation3 + $0x27] sm:$0x1] %v1115_v50  ;;  %1166 = vst [vmem:[#allocation3 + $0x30] sm:$0x1] %v1165_v62  ;;  %v1169_v13 = vld [vmem:[#allocation2 + $0x10] sm:$0x1] }
 0x16c   : > { %1168 = vst [vmem:[#allocation3 + $0x31] sm:$0x1] %v1167_v1  ;;  %v1171_v19 = vld [vmem:[#allocation2 + $0x12] sm:$0x1]  ;;  %v1173_v3 = vld [vmem:[#allocation2 + $0x20] sm:$0x1] }
 0x16d   : > { %v1637_v4 = vld [vmem:[%s6747_s3 + $0x3c0] sm:$0xff]  ;;  %1170 = vst [vmem:[#allocation3 + $0x32] sm:$0x1] %v1169_v13  ;;  %1172 = vst [vmem:[#allocation3 + $0x33] sm:$0x1] %v1171_v19  ;;  %v1604_v59 = vld [vmem:[%s6747_s3 + $0x2b8] sm:$0xff] }
 0x16e   : > { %v1589_v6 = vld [vmem:[%s6747_s3 + $0x240] sm:$0xff]  ;;  %1174 = vst [vmem:[#allocation3 + $0x34] sm:$0x1] %v1173_v3  ;;  %v1149_v9 = vld [vmem:[#allocation2 + $0x33] sm:$0x1]  ;;  %v1636_v12 = vld [vmem:[%s6747_s3 + $0x3b8] sm:$0xff]  ;;  %3835 = vmatprep.subr.mxu1 %v1637_v4 }
 0x16f   : > { %v1175_v42 = vld [vmem:[#allocation2 + $0x22] sm:$0x1]  ;;  %v1177_v44 = vld [vmem:[#allocation2 + $0x24] sm:$0x1]  ;;  %v1179_v8 = vld [vmem:[#allocation2 + $0x26] sm:$0x1]  ;;  %3798 = vmatpush3.msra.mxu0 %v1589_v6 }
 0x170   : > { %v1621_v7 = vld [vmem:[%s6747_s3 + $0x340] sm:$0xff]  ;;  %1176 = vst [vmem:[#allocation3 + $0x35] sm:$0x1] %v1175_v42  ;;  %1178 = vst [vmem:[#allocation3 + $0x36] sm:$0x1] %v1177_v44  ;;  %v1501_v16 = vld [vmem:[#allocation3 + $0x80] sm:$0xff]  ;;  %3799 = vmatprep.subr.mxu0 %v1604_v59 }
 0x171   : > { %v1151_v11 = vld [vmem:[#allocation2 + $0x35] sm:$0x1]  ;;  %1180 = vst [vmem:[#allocation3 + $0x37] sm:$0x1] %v1179_v8  ;;  %1150 = vst [vmem:[#allocation3 + $0xa8] sm:$0x1] %v1149_v9  ;;  %3836 = vmatpush3.msra.mxu1 %v1621_v7  ;;  %1850 = vmatmul.mubr.f32.gmra.mxu0 %v1501_v16 }
 0x172   : > { %1152 = vst [vmem:[#allocation3 + $0xa9] sm:$0x1] %v1151_v11  ;;  %v1153_v15 = vld [vmem:[#allocation2 + $0x37] sm:$0x1]  ;;  %v1155_v49 = vld [vmem:[#allocation2 + $0x39] sm:$0x1]  ;;  %3837 = vmatprep.subr.mxu1 %v1636_v12 }
 0x173   : > { %v1504_v27 = vld [vmem:[#allocation3 + $0x98] sm:$0xff]  ;;  %1154 = vst [vmem:[#allocation3 + $0xaa] sm:$0x1] %v1153_v15  ;;  %1156 = vst [vmem:[#allocation3 + $0xab] sm:$0x1] %v1155_v49  ;;  %v1588_v17 = vld [vmem:[%s6747_s3 + $0x238] sm:$0xff] }
 0x174   : > { %v1157_v31 = vld [vmem:[#allocation2 + $0x47] sm:$0x1]  ;;  %v1159_v53 = vld [vmem:[#allocation2 + $0x49] sm:$0x1]  ;;  %v1620_v18 = vld [vmem:[%s6747_s3 + $0x338] sm:$0xff]  ;;  %1924 = vmatprep.mubr.f32.mxu1 %v1504_v27  ;;  %3800 = vmatpush3.msra.mxu0 %v1588_v17 }
 0x175   : > { %1158 = vst [vmem:[#allocation3 + $0xac] sm:$0x1] %v1157_v31  ;;  %1160 = vst [vmem:[#allocation3 + $0xad] sm:$0x1] %v1159_v53  ;;  %v1161_v20 = vld [vmem:[#allocation2 + $0x4b] sm:$0x1]  ;;  %3838 = vmatpush3.msra.mxu1 %v1620_v18 }
 0x176   : > { %v1163_v21 = vld [vmem:[#allocation2 + $0x4d] sm:$0x1]  ;;  %v1503_v22 = vld [vmem:[#allocation3 + $0x90] sm:$0xff]  ;;  %v1603_v24 = vld [vmem:[%s6747_s3 + $0x2b0] sm:$0xff]  ;;  %1162 = vst [vmem:[#allocation3 + $0xae] sm:$0x1] %v1161_v20 }
 0x177   : > { %1164 = vst [vmem:[#allocation3 + $0xaf] sm:$0x1] %v1163_v21  ;;  %v1213_v26 = vld [vmem:[#allocation2 + $0x35] sm:$0x1]  ;;  %v1215_v28 = vld [vmem:[#allocation2 + $0x37] sm:$0x1]  ;;  %1925 = vmatmul.mubr.f32.gmra.mxu1 %v1503_v22  ;;  %3801 = vmatprep.subr.mxu0 %v1603_v24 }
 0x178   : > { %v1635_v33 = vld [vmem:[%s6747_s3 + $0x3b0] sm:$0xff]  ;;  %1214 = vst [vmem:[#allocation3 + $0xb8] sm:$0x1] %v1213_v26  ;;  %1216 = vst [vmem:[#allocation3 + $0xb9] sm:$0x1] %v1215_v28  ;;  %v1602_v39 = vld [vmem:[%s6747_s3 + $0x2a8] sm:$0xff] }
 0x179   : > { %v1217_v61 = vld [vmem:[#allocation2 + $0x39] sm:$0x1]  ;;  %v1221_v0 = vld [vmem:[#allocation2 + $0x49] sm:$0x1]  ;;  %v1490_v34 = vld [vmem:[#allocation3 + $0x28] sm:$0xff]  ;;  %3839 = vmatprep.subr.mxu1 %v1635_v33 }
 0x17a   : > { %v1587_v35 = vld [vmem:[%s6747_s3 + $0x230] sm:$0xff]  ;;  %1218 = vst [vmem:[#allocation3 + $0xba] sm:$0x1] %v1217_v61  ;;  %1222 = vst [vmem:[#allocation3 + $0xbc] sm:$0x1] %v1221_v0  ;;  %v1634_v45 = vld [vmem:[%s6747_s3 + $0x3a8] sm:$0xff]  ;;  %1994 = vmatprep.mubr.f32.mxu0 %v1490_v34 }
 0x17b   : > { %v1619_v58 = vld [vmem:[%s6747_s3 + $0x330] sm:$0xff]  ;;  %v1223_v60 = vld [vmem:[#allocation2 + $0x4b] sm:$0x1]  ;;  %v1225_v36 = vld [vmem:[#allocation2 + $0x4d] sm:$0x1]  ;;  %3802 = vmatpush3.msra.mxu0 %v1587_v35 }
 0x17c   : > { %v1119_v37 = vld [vmem:[#allocation2 + $0x34] sm:$0x1]  ;;  %1224 = vst [vmem:[#allocation3 + $0xbd] sm:$0x1] %v1223_v60  ;;  %1226 = vst [vmem:[#allocation3 + $0xbe] sm:$0x1] %v1225_v36  ;;  %3840 = vmatpush3.msra.mxu1 %v1619_v58  ;;  %3803 = vmatprep.subr.mxu0 %v1602_v39 }
 0x17d   : > { %1120 = vst [vmem:[#allocation3 + $0xa1] sm:$0x1] %v1119_v37  ;;  %v1121_v29 = vld [vmem:[#allocation2 + $0x36] sm:$0x1]  ;;  %v1123_v47 = vld [vmem:[#allocation2 + $0x38] sm:$0x1]  ;;  %3841 = vmatprep.subr.mxu1 %v1634_v45 }
 0x17e   : > { %v1127_v10 = vld [vmem:[#allocation2 + $0x48] sm:$0x1]  ;;  %v1492_v14 = vld [vmem:[#allocation3 + $0x38] sm:$0xff]  ;;  %1122 = vst [vmem:[#allocation3 + $0xa2] sm:$0x1] %v1121_v29  ;;  %v1600_v23 = vld [vmem:[%s6747_s3 + $0x298] sm:$0xff] }
 0x17f   : > { %v1586_v48 = vld [vmem:[%s6747_s3 + $0x228] sm:$0xff]  ;;  %1124 = vst [vmem:[#allocation3 + $0xa3] sm:$0x1] %v1123_v47  ;;  %1128 = vst [vmem:[#allocation3 + $0xa5] sm:$0x1] %v1127_v10  ;;  %v1601_v55 = vld [vmem:[%s6747_s3 + $0x2a0] sm:$0xff]  ;;  %2069 = vmatprep.mubr.f32.mxu1 %v1492_v14 }
 0x180   : > { %v1618_v51 = vld [vmem:[%s6747_s3 + $0x328] sm:$0xff]  ;;  %v1633_v30 = vld [vmem:[%s6747_s3 + $0x3a0] sm:$0xff]  ;;  %v1181_v32 = vld [vmem:[#allocation2 + $0x34] sm:$0x1]  ;;  %3804 = vmatpush3.msra.mxu0 %v1586_v48 }
 0x181   : > { %v1129_v52 = vld [vmem:[#allocation2 + $0x4a] sm:$0x1]  ;;  %v1131_v54 = vld [vmem:[#allocation2 + $0x4c] sm:$0x1]  ;;  %v1183_v57 = vld [vmem:[#allocation2 + $0x36] sm:$0x1]  ;;  %3842 = vmatpush3.msra.mxu1 %v1618_v51  ;;  %3805 = vmatprep.subr.mxu0 %v1601_v55 }
 0x182   : > { %1130 = vst [vmem:[#allocation3 + $0xa6] sm:$0x1] %v1129_v52  ;;  %1132 = vst [vmem:[#allocation3 + $0xa7] sm:$0x1] %v1131_v54  ;;  %v1185_v63 = vld [vmem:[#allocation2 + $0x38] sm:$0x1]  ;;  %3843 = vmatprep.subr.mxu1 %v1633_v30 }
 0x183   : > { %v1585_v5 = vld [vmem:[%s6747_s3 + $0x220] sm:$0xff]  ;;  %1182 = vst [vmem:[#allocation3 + $0xb0] sm:$0x1] %v1181_v32  ;;  %1184 = vst [vmem:[#allocation3 + $0xb1] sm:$0x1] %v1183_v57  ;;  %v1632_v25 = vld [vmem:[%s6747_s3 + $0x398] sm:$0xff] }
 0x184   : > { %v1617_v41 = vld [vmem:[%s6747_s3 + $0x320] sm:$0xff]  ;;  %1186 = vst [vmem:[#allocation3 + $0xb2] sm:$0x1] %v1185_v63  ;;  %v1187_v43 = vld [vmem:[#allocation2 + $0x3a] sm:$0x1]  ;;  %v1599_v3 = vld [vmem:[%s6747_s3 + $0x290] sm:$0xff]  ;;  %3806 = vmatpush3.msra.mxu0 %v1585_v5 }
 0x185   : > { %v1189_v38 = vld [vmem:[#allocation2 + $0x48] sm:$0x1]  ;;  %v1191_v40 = vld [vmem:[#allocation2 + $0x4a] sm:$0x1]  ;;  %1188 = vst [vmem:[#allocation3 + $0xb3] sm:$0x1] %v1187_v43  ;;  %3844 = vmatpush3.msra.mxu1 %v1617_v41  ;;  %3807 = vmatprep.subr.mxu0 %v1600_v23 }
 0x186   : > { %1190 = vst [vmem:[#allocation3 + $0xb4] sm:$0x1] %v1189_v38  ;;  %1192 = vst [vmem:[#allocation3 + $0xb5] sm:$0x1] %v1191_v40  ;;  %v1193_v46 = vld [vmem:[#allocation2 + $0x4c] sm:$0x1]  ;;  %3845 = vmatprep.subr.mxu1 %v1632_v25 }
 0x187   : > { %v1195_v50 = vld [vmem:[#allocation2 + $0x4e] sm:$0x1]  ;;  %v1584_v62 = vld [vmem:[%s6747_s3 + $0x218] sm:$0xff]  ;;  %1194 = vst [vmem:[#allocation3 + $0xb6] sm:$0x1] %v1193_v46  ;;  %v1631_v4 = vld [vmem:[%s6747_s3 + $0x390] sm:$0xff] }
 0x188   : > { %v1616_v1 = vld [vmem:[%s6747_s3 + $0x318] sm:$0xff]  ;;  %1196 = vst [vmem:[#allocation3 + $0xb7] sm:$0x1] %v1195_v50  ;;  %v1261_v2 = vld [vmem:[#allocation2 + $0x15] sm:$0x1]  ;;  %v1598_v56 = vld [vmem:[%s6747_s3 + $0x288] sm:$0xff]  ;;  %3808 = vmatpush3.msra.mxu0 %v1584_v62 }
 0x189   : > { %v1263_v13 = vld [vmem:[#allocation2 + $0x17] sm:$0x1]  ;;  %v1265_v19 = vld [vmem:[#allocation2 + $0x19] sm:$0x1]  ;;  %1262 = vst [vmem:[#allocation3 + $0x48] sm:$0x1] %v1261_v2  ;;  %3846 = vmatpush3.msra.mxu1 %v1616_v1  ;;  %3809 = vmatprep.subr.mxu0 %v1599_v3 }
 0x18a   : > { %1264 = vst [vmem:[#allocation3 + $0x49] sm:$0x1] %v1263_v13  ;;  %1266 = vst [vmem:[#allocation3 + $0x4a] sm:$0x1] %v1265_v19  ;;  %v1267_v6 = vld [vmem:[#allocation2 + $0x1b] sm:$0x1]  ;;  %3847 = vmatprep.subr.mxu1 %v1631_v4 }
 0x18b   : > { %v1269_v42 = vld [vmem:[#allocation2 + $0x29] sm:$0x1]  ;;  %v1271_v44 = vld [vmem:[#allocation2 + $0x2b] sm:$0x1]  ;;  %v1583_v7 = vld [vmem:[%s6747_s3 + $0x210] sm:$0xff] }
 0x18c   : > { %v1615_v8 = vld [vmem:[%s6747_s3 + $0x310] sm:$0xff]  ;;  %1268 = vst [vmem:[#allocation3 + $0x4b] sm:$0x1] %v1267_v6  ;;  %1270 = vst [vmem:[#allocation3 + $0x4c] sm:$0x1] %v1269_v42  ;;  %v1630_v59 = vld [vmem:[%s6747_s3 + $0x388] sm:$0xff]  ;;  %3810 = vmatpush3.msra.mxu0 %v1583_v7 }
 0x18d   : > { %1272 = vst [vmem:[#allocation3 + $0x4d] sm:$0x1] %v1271_v44  ;;  %v1273_v9 = vld [vmem:[#allocation2 + $0x2d] sm:$0x1]  ;;  %v1275_v11 = vld [vmem:[#allocation2 + $0x2f] sm:$0x1]  ;;  %3848 = vmatpush3.msra.mxu1 %v1615_v8  ;;  %3811 = vmatprep.subr.mxu0 %v1598_v56 }
 0x18e   : > { %1274 = vst [vmem:[#allocation3 + $0x4e] sm:$0x1] %v1273_v9  ;;  %1276 = vst [vmem:[#allocation3 + $0x4f] sm:$0x1] %v1275_v11  ;;  %v1325_v12 = vld [vmem:[#allocation2 + $0x17] sm:$0x1]  ;;  %3849 = vmatprep.subr.mxu1 %v1630_v59 }
 0x18f   : > { %v1327_v15 = vld [vmem:[#allocation2 + $0x19] sm:$0x1]  ;;  %v1329_v49 = vld [vmem:[#allocation2 + $0x1b] sm:$0x1]  ;;  %v1582_v27 = vld [vmem:[%s6747_s3 + $0x208] sm:$0xff] }
 0x190   : > { %v1614_v31 = vld [vmem:[%s6747_s3 + $0x308] sm:$0xff]  ;;  %1326 = vst [vmem:[#allocation3 + $0x58] sm:$0x1] %v1325_v12  ;;  %1328 = vst [vmem:[#allocation3 + $0x59] sm:$0x1] %v1327_v15  ;;  %v1597_v17 = vld [vmem:[%s6747_s3 + $0x280] sm:$0xff]  ;;  %3812 = vmatpush3.msra.mxu0 %v1582_v27 }
 0x191   : > { %1330 = vst [vmem:[#allocation3 + $0x5a] sm:$0x1] %v1329_v49  ;;  %v1333_v53 = vld [vmem:[#allocation2 + $0x2b] sm:$0x1]  ;;  %v1335_v16 = vld [vmem:[#allocation2 + $0x2d] sm:$0x1]  ;;  %3850 = vmatpush3.msra.mxu1 %v1614_v31  ;;  %3813 = vmatprep.subr.mxu0 %v1597_v17 }
 0x192   : > { %v1629_v18 = vld [vmem:[%s6747_s3 + $0x380] sm:$0xff]  ;;  %1334 = vst [vmem:[#allocation3 + $0x5c] sm:$0x1] %v1333_v53  ;;  %1336 = vst [vmem:[#allocation3 + $0x5d] sm:$0x1] %v1335_v16  ;;  %v1676_v35 = vld [vmem:[%s6747_s3 + $0x4f8] sm:$0xff] }
 0x193   : > { %v1337_v20 = vld [vmem:[#allocation2 + $0x2f] sm:$0x1]  ;;  %v1231_v21 = vld [vmem:[#allocation2 + $0x16] sm:$0x1]  ;;  %v1233_v22 = vld [vmem:[#allocation2 + $0x18] sm:$0x1]  ;;  %3851 = vmatprep.subr.mxu1 %v1629_v18 }
 0x194   : > { %v1581_v24 = vld [vmem:[%s6747_s3 + $0x200] sm:$0xff]  ;;  %1338 = vst [vmem:[#allocation3 + $0x5e] sm:$0x1] %v1337_v20  ;;  %1232 = vst [vmem:[#allocation3 + $0x41] sm:$0x1] %v1231_v21  ;;  %v1708_v58 = vld [vmem:[%s6747_s3 + $0x5f8] sm:$0xff] }
 0x195   : > { %1234 = vst [vmem:[#allocation3 + $0x42] sm:$0x1] %v1233_v22  ;;  %v1235_v26 = vld [vmem:[#allocation2 + $0x1a] sm:$0x1]  ;;  %v1239_v28 = vld [vmem:[#allocation2 + $0x2a] sm:$0x1]  ;;  %3814 = vmatpush3.msra.mxu0 %v1581_v24 }
 0x196   : > { %v1241_v33 = vld [vmem:[#allocation2 + $0x2c] sm:$0x1]  ;;  %v1613_v61 = vld [vmem:[%s6747_s3 + $0x300] sm:$0xff]  ;;  %1236 = vst [vmem:[#allocation3 + $0x43] sm:$0x1] %v1235_v26  ;;  %v1491_v10 = vld [vmem:[#allocation3 + $0x30] sm:$0xff]  ;;  %3859 = vmatprep.subr.mxu0 %v1676_v35 }
 0x197   : > { %1240 = vst [vmem:[#allocation3 + $0x45] sm:$0x1] %v1239_v28  ;;  %1242 = vst [vmem:[#allocation3 + $0x46] sm:$0x1] %v1241_v33  ;;  %v1243_v0 = vld [vmem:[#allocation2 + $0x2e] sm:$0x1]  ;;  %3852 = vmatpush3.msra.mxu1 %v1613_v61 }
 0x198   : > { %v1293_v34 = vld [vmem:[#allocation2 + $0x16] sm:$0x1]  ;;  %1244 = vst [vmem:[#allocation3 + $0x47] sm:$0x1] %v1243_v0  ;;  %v1295_v60 = vld [vmem:[#allocation2 + $0x18] sm:$0x1]  ;;  %2070 = vmatmul.mubr.f32.vlgmr.msra.gmra.mxu1 %v1491_v10  ;;  %3897 = vmatprep.subr.mxu1 %v1708_v58 }
 0x199   : > { %1294 = vst [vmem:[#allocation3 + $0x50] sm:$0x1] %v1293_v34  ;;  %v1297_v36 = vld [vmem:[#allocation2 + $0x1a] sm:$0x1]  ;;  %v1299_v37 = vld [vmem:[#allocation2 + $0x1c] sm:$0x1] }
 0x19a   : > { %v1489_v39 = vld [vmem:[#allocation3 + $0x20] sm:$0xff]  ;;  %1296 = vst [vmem:[#allocation3 + $0x51] sm:$0x1] %v1295_v60  ;;  %1298 = vst [vmem:[#allocation3 + $0x52] sm:$0x1] %v1297_v36  ;;  %v1660_v14 = vld [vmem:[%s6747_s3 + $0x478] sm:$0xff] }
 0x19b   : > { %1300 = vst [vmem:[#allocation3 + $0x53] sm:$0x1] %v1299_v37  ;;  %v1301_v45 = vld [vmem:[#allocation2 + $0x2a] sm:$0x1]  ;;  %v1303_v29 = vld [vmem:[#allocation2 + $0x2c] sm:$0x1]  ;;  %1995 = vmatmul.mubr.f32.vlgmr.msra.gmra.mxu0 %v1489_v39 }
 0x19c   : > { %v1305_v47 = vld [vmem:[#allocation2 + $0x2e] sm:$0x1]  ;;  %v1692_v48 = vld [vmem:[%s6747_s3 + $0x578] sm:$0xff]  ;;  %1302 = vst [vmem:[#allocation3 + $0x54] sm:$0x1] %v1301_v45  ;;  %v1506_v54 = vld [vmem:[#allocation3 + $0xa8] sm:$0xff]  ;;  %3860 = vmatpush3.msra.mxu0 %v1660_v14 }
 0x19d   : > { %1304 = vst [vmem:[#allocation3 + $0x55] sm:$0x1] %v1303_v29  ;;  %1306 = vst [vmem:[#allocation3 + $0x56] sm:$0x1] %v1305_v47  ;;  %v1307_v51 = vld [vmem:[#allocation2 + $0x30] sm:$0x1]  ;;  %1999 = vmatprep.mubr.f32.mxu0 %v1506_v54  ;;  %3898 = vmatpush3.msra.mxu1 %v1692_v48 }
 0x19e   : > { %v1277_v52 = vld [vmem:[#allocation2 + $0x3d] sm:$0x1]  ;;  %v1675_v55 = vld [vmem:[%s6747_s3 + $0x4f0] sm:$0xff]  ;;  %1308 = vst [vmem:[#allocation3 + $0x57] sm:$0x1] %v1307_v51  ;;  %v1508_v23 = vld [vmem:[#allocation3 + $0xb8] sm:$0xff] }
 0x19f   : > { %v1707_v30 = vld [vmem:[%s6747_s3 + $0x5f0] sm:$0xff]  ;;  %1278 = vst [vmem:[#allocation3 + $0xc8] sm:$0x1] %v1277_v52  ;;  %v1279_v32 = vld [vmem:[#allocation2 + $0x3f] sm:$0x1]  ;;  %2074 = vmatprep.mubr.f32.mxu1 %v1508_v23  ;;  %v1674_v50 = vld [vmem:[%s6747_s3 + $0x4e8] sm:$0xff]  ;;  %3861 = vmatprep.subr.mxu0 %v1675_v55 }
 0x1a0   : > { %v1281_v57 = vld [vmem:[#allocation2 + $0x41] sm:$0x1]  ;;  %v1283_v63 = vld [vmem:[#allocation2 + $0x43] sm:$0x1]  ;;  %v1659_v5 = vld [vmem:[%s6747_s3 + $0x470] sm:$0xff]  ;;  %3899 = vmatprep.subr.mxu1 %v1707_v30 }
 0x1a1   : > { %v1691_v41 = vld [vmem:[%s6747_s3 + $0x570] sm:$0xff]  ;;  %1280 = vst [vmem:[#allocation3 + $0xc9] sm:$0x1] %v1279_v32  ;;  %1282 = vst [vmem:[#allocation3 + $0xca] sm:$0x1] %v1281_v57  ;;  %v1706_v62 = vld [vmem:[%s6747_s3 + $0x5e8] sm:$0xff]  ;;  %3862 = vmatpush3.msra.mxu0 %v1659_v5 }
 0x1a2   : > { %1284 = vst [vmem:[#allocation3 + $0xcb] sm:$0x1] %v1283_v63  ;;  %v1285_v43 = vld [vmem:[#allocation2 + $0x51] sm:$0x1]  ;;  %v1287_v38 = vld [vmem:[#allocation2 + $0x53] sm:$0x1]  ;;  %3900 = vmatpush3.msra.mxu1 %v1691_v41  ;;  %3863 = vmatprep.subr.mxu0 %v1674_v50 }
 0x1a3   : > { %v1289_v40 = vld [vmem:[#allocation2 + $0x55] sm:$0x1]  ;;  %1286 = vst [vmem:[#allocation3 + $0xcc] sm:$0x1] %v1285_v43  ;;  %1288 = vst [vmem:[#allocation3 + $0xcd] sm:$0x1] %v1287_v38  ;;  %3901 = vmatprep.subr.mxu1 %v1706_v62 }
 0x1a4   : > { %1290 = vst [vmem:[#allocation3 + $0xce] sm:$0x1] %v1289_v40  ;;  %v1291_v25 = vld [vmem:[#allocation2 + $0x57] sm:$0x1]  ;;  %v1341_v46 = vld [vmem:[#allocation2 + $0x3f] sm:$0x1] }
 0x1a5   : > { %1292 = vst [vmem:[#allocation3 + $0xcf] sm:$0x1] %v1291_v25  ;;  %1342 = vst [vmem:[#allocation3 + $0xd8] sm:$0x1] %v1341_v46  ;;  %v1343_v1 = vld [vmem:[#allocation2 + $0x41] sm:$0x1] }
 0x1a6   : > { %v1345_v2 = vld [vmem:[#allocation2 + $0x43] sm:$0x1]  ;;  %v1349_v13 = vld [vmem:[#allocation2 + $0x53] sm:$0x1]  ;;  %v1505_v19 = vld [vmem:[#allocation3 + $0xa0] sm:$0xff] }
 0x1a7   : > { %v1507_v3 = vld [vmem:[#allocation3 + $0xb0] sm:$0xff]  ;;  %v1658_v4 = vld [vmem:[%s6747_s3 + $0x468] sm:$0xff]  ;;  %1344 = vst [vmem:[#allocation3 + $0xd9] sm:$0x1] %v1343_v1  ;;  %1346 = vst [vmem:[#allocation3 + $0xda] sm:$0x1] %v1345_v2  ;;  %2000 = vmatmul.mubr.f32.gmra.mxu0 %v1505_v19 }
 0x1a8   : > { %1350 = vst [vmem:[#allocation3 + $0xdc] sm:$0x1] %v1349_v13  ;;  %v1351_v6 = vld [vmem:[#allocation2 + $0x55] sm:$0x1]  ;;  %v1353_v42 = vld [vmem:[#allocation2 + $0x57] sm:$0x1]  ;;  %2075 = vmatmul.mubr.f32.gmra.mxu1 %v1507_v3  ;;  %3864 = vmatpush3.msra.mxu0 %v1658_v4 }
 0x1a9   : > { %v1690_v44 = vld [vmem:[%s6747_s3 + $0x568] sm:$0xff]  ;;  %1352 = vst [vmem:[#allocation3 + $0xdd] sm:$0x1] %v1351_v6  ;;  %1354 = vst [vmem:[#allocation3 + $0xde] sm:$0x1] %v1353_v42  ;;  %v1494_v11 = vld [vmem:[#allocation3 + $0x48] sm:$0xff] }
 0x1aa   : > { %v1247_v7 = vld [vmem:[#allocation2 + $0x3e] sm:$0x1]  ;;  %v1249_v8 = vld [vmem:[#allocation2 + $0x40] sm:$0x1]  ;;  %v1251_v9 = vld [vmem:[#allocation2 + $0x42] sm:$0x1]  ;;  %2144 = vmatprep.mubr.f32.mxu0 %v1494_v11  ;;  %3902 = vmatpush3.msra.mxu1 %v1690_v44 }
 0x1ab   : > { %v1673_v56 = vld [vmem:[%s6747_s3 + $0x4e0] sm:$0xff]  ;;  %1248 = vst [vmem:[#allocation3 + $0xc1] sm:$0x1] %v1247_v7  ;;  %1250 = vst [vmem:[#allocation3 + $0xc2] sm:$0x1] %v1249_v8  ;;  %v1672_v18 = vld [vmem:[%s6747_s3 + $0x4d8] sm:$0xff] }
 0x1ac   : > { %v1705_v59 = vld [vmem:[%s6747_s3 + $0x5e0] sm:$0xff]  ;;  %1252 = vst [vmem:[#allocation3 + $0xc3] sm:$0x1] %v1251_v9  ;;  %v1255_v12 = vld [vmem:[#allocation2 + $0x52] sm:$0x1]  ;;  %v1704_v20 = vld [vmem:[%s6747_s3 + $0x5d8] sm:$0xff]  ;;  %3865 = vmatprep.subr.mxu0 %v1673_v56 }
 0x1ad   : > { %v1257_v15 = vld [vmem:[#allocation2 + $0x54] sm:$0x1]  ;;  %v1259_v49 = vld [vmem:[#allocation2 + $0x56] sm:$0x1]  ;;  %v1496_v27 = vld [vmem:[#allocation3 + $0x58] sm:$0xff]  ;;  %3903 = vmatprep.subr.mxu1 %v1705_v59 }
 0x1ae   : > { %v1657_v31 = vld [vmem:[%s6747_s3 + $0x460] sm:$0xff]  ;;  %1256 = vst [vmem:[#allocation3 + $0xc5] sm:$0x1] %v1255_v12  ;;  %1258 = vst [vmem:[#allocation3 + $0xc6] sm:$0x1] %v1257_v15  ;;  %v1656_v26 = vld [vmem:[%s6747_s3 + $0x458] sm:$0xff]  ;;  %2219 = vmatprep.mubr.f32.mxu1 %v1496_v27 }
 0x1af   : > { %v1689_v53 = vld [vmem:[%s6747_s3 + $0x560] sm:$0xff]  ;;  %1260 = vst [vmem:[#allocation3 + $0xc7] sm:$0x1] %v1259_v49  ;;  %v1309_v16 = vld [vmem:[#allocation2 + $0x3e] sm:$0x1]  ;;  %v1671_v34 = vld [vmem:[%s6747_s3 + $0x4d0] sm:$0xff]  ;;  %3866 = vmatpush3.msra.mxu0 %v1657_v31 }
 0x1b0   : > { %v1311_v17 = vld [vmem:[#allocation2 + $0x40] sm:$0x1]  ;;  %1310 = vst [vmem:[#allocation3 + $0xd0] sm:$0x1] %v1309_v16  ;;  %v1313_v21 = vld [vmem:[#allocation2 + $0x42] sm:$0x1]  ;;  %3904 = vmatpush3.msra.mxu1 %v1689_v53  ;;  %3867 = vmatprep.subr.mxu0 %v1672_v18 }
 0x1b1   : > { %1312 = vst [vmem:[#allocation3 + $0xd1] sm:$0x1] %v1311_v17  ;;  %v1315_v22 = vld [vmem:[#allocation2 + $0x44] sm:$0x1]  ;;  %v1317_v24 = vld [vmem:[#allocation2 + $0x52] sm:$0x1]  ;;  %3905 = vmatprep.subr.mxu1 %v1704_v20  ;;  %3868 = vmatpush3.msra.mxu0 %v1656_v26 }
 0x1b2   : > { %v1688_v28 = vld [vmem:[%s6747_s3 + $0x558] sm:$0xff]  ;;  %1314 = vst [vmem:[#allocation3 + $0xd2] sm:$0x1] %v1313_v21  ;;  %1316 = vst [vmem:[#allocation3 + $0xd3] sm:$0x1] %v1315_v22  ;;  %v1703_v35 = vld [vmem:[%s6747_s3 + $0x5d0] sm:$0xff]  ;;  %3869 = vmatprep.subr.mxu0 %v1671_v34 }
 0x1b3   : > { %1318 = vst [vmem:[#allocation3 + $0xd4] sm:$0x1] %v1317_v24  ;;  %v1319_v33 = vld [vmem:[#allocation2 + $0x54] sm:$0x1]  ;;  %v1321_v61 = vld [vmem:[#allocation2 + $0x56] sm:$0x1]  ;;  %3906 = vmatpush3.msra.mxu1 %v1688_v28 }
 0x1b4   : > { %v1323_v0 = vld [vmem:[#allocation2 + $0x58] sm:$0x1]  ;;  %1320 = vst [vmem:[#allocation3 + $0xd5] sm:$0x1] %v1319_v33  ;;  %1322 = vst [vmem:[#allocation3 + $0xd6] sm:$0x1] %v1321_v61  ;;  %3907 = vmatprep.subr.mxu1 %v1703_v35 }
 0x1b5   : > { %1324 = vst [vmem:[#allocation3 + $0xd7] sm:$0x1] %v1323_v0  ;;  %v1389_v58 = vld [vmem:[#allocation2 + $0x1f] sm:$0x1]  ;;  %v1391_v60 = vld [vmem:[#allocation2 + $0x21] sm:$0x1] }
 0x1b6   : > { %v1655_v36 = vld [vmem:[%s6747_s3 + $0x450] sm:$0xff]  ;;  %1390 = vst [vmem:[#allocation3 + $0x68] sm:$0x1] %v1389_v58  ;;  %1392 = vst [vmem:[#allocation3 + $0x69] sm:$0x1] %v1391_v60  ;;  %v1670_v47 = vld [vmem:[%s6747_s3 + $0x4c8] sm:$0xff] }
 0x1b7   : > { %v1687_v37 = vld [vmem:[%s6747_s3 + $0x550] sm:$0xff]  ;;  %v1393_v39 = vld [vmem:[#allocation2 + $0x23] sm:$0x1]  ;;  %v1395_v45 = vld [vmem:[#allocation2 + $0x25] sm:$0x1]  ;;  %3870 = vmatpush3.msra.mxu0 %v1655_v36 }
 0x1b8   : > { %v1397_v29 = vld [vmem:[#allocation2 + $0x33] sm:$0x1]  ;;  %v1702_v10 = vld [vmem:[%s6747_s3 + $0x5c8] sm:$0xff]  ;;  %1394 = vst [vmem:[#allocation3 + $0x6a] sm:$0x1] %v1393_v39  ;;  %v1669_v32 = vld [vmem:[%s6747_s3 + $0x4c0] sm:$0xff]  ;;  %3908 = vmatpush3.msra.mxu1 %v1687_v37  ;;  %3871 = vmatprep.subr.mxu0 %v1670_v47 }
 0x1b9   : > { %1396 = vst [vmem:[#allocation3 + $0x6b] sm:$0x1] %v1395_v45  ;;  %1398 = vst [vmem:[#allocation3 + $0x6c] sm:$0x1] %v1397_v29  ;;  %v1399_v14 = vld [vmem:[#allocation2 + $0x35] sm:$0x1]  ;;  %3909 = vmatprep.subr.mxu1 %v1702_v10 }
 0x1ba   : > { %v1401_v48 = vld [vmem:[#allocation2 + $0x37] sm:$0x1]  ;;  %v1654_v51 = vld [vmem:[%s6747_s3 + $0x448] sm:$0xff]  ;;  %1400 = vst [vmem:[#allocation3 + $0x6d] sm:$0x1] %v1399_v14  ;;  %v1701_v57 = vld [vmem:[%s6747_s3 + $0x5c0] sm:$0xff] }
 0x1bb   : > { %v1686_v52 = vld [vmem:[%s6747_s3 + $0x548] sm:$0xff]  ;;  %1402 = vst [vmem:[#allocation3 + $0x6e] sm:$0x1] %v1401_v48  ;;  %v1403_v54 = vld [vmem:[#allocation2 + $0x39] sm:$0x1]  ;;  %v1653_v41 = vld [vmem:[%s6747_s3 + $0x440] sm:$0xff]  ;;  %3872 = vmatpush3.msra.mxu0 %v1654_v51 }
 0x1bc   : > { %v1453_v55 = vld [vmem:[#allocation2 + $0x21] sm:$0x1]  ;;  %v1455_v30 = vld [vmem:[#allocation2 + $0x23] sm:$0x1]  ;;  %1404 = vst [vmem:[#allocation3 + $0x6f] sm:$0x1] %v1403_v54  ;;  %3910 = vmatpush3.msra.mxu1 %v1686_v52  ;;  %3873 = vmatprep.subr.mxu0 %v1669_v32 }
 0x1bd   : > { %1454 = vst [vmem:[#allocation3 + $0x78] sm:$0x1] %v1453_v55  ;;  %1456 = vst [vmem:[#allocation3 + $0x79] sm:$0x1] %v1455_v30  ;;  %v1457_v63 = vld [vmem:[#allocation2 + $0x25] sm:$0x1]  ;;  %3911 = vmatprep.subr.mxu1 %v1701_v57  ;;  %3874 = vmatpush3.msra.mxu0 %v1653_v41 }
 0x1be   : > { %v1461_v5 = vld [vmem:[#allocation2 + $0x35] sm:$0x1]  ;;  %v1685_v43 = vld [vmem:[%s6747_s3 + $0x540] sm:$0xff]  ;;  %1458 = vst [vmem:[#allocation3 + $0x7a] sm:$0x1] %v1457_v63  ;;  %v1668_v25 = vld [vmem:[%s6747_s3 + $0x4b8] sm:$0xff] }
 0x1bf   : > { %1462 = vst [vmem:[#allocation3 + $0x7c] sm:$0x1] %v1461_v5  ;;  %v1463_v38 = vld [vmem:[#allocation2 + $0x37] sm:$0x1]  ;;  %v1465_v40 = vld [vmem:[#allocation2 + $0x39] sm:$0x1]  ;;  %3912 = vmatpush3.msra.mxu1 %v1685_v43  ;;  %3875 = vmatprep.subr.mxu0 %v1668_v25 }
 0x1c0   : > { %v1359_v23 = vld [vmem:[#allocation2 + $0x20] sm:$0x1]  ;;  %v1700_v46 = vld [vmem:[%s6747_s3 + $0x5b8] sm:$0xff]  ;;  %1464 = vst [vmem:[#allocation3 + $0x7d] sm:$0x1] %v1463_v38  ;;  %v1667_v4 = vld [vmem:[%s6747_s3 + $0x4b0] sm:$0xff] }
 0x1c1   : > { %1466 = vst [vmem:[#allocation3 + $0x7e] sm:$0x1] %v1465_v40  ;;  %1360 = vst [vmem:[#allocation3 + $0x61] sm:$0x1] %v1359_v23  ;;  %v1361_v50 = vld [vmem:[#allocation2 + $0x22] sm:$0x1]  ;;  %3913 = vmatprep.subr.mxu1 %v1700_v46 }
 0x1c2   : > { %v1363_v62 = vld [vmem:[#allocation2 + $0x24] sm:$0x1]  ;;  %v1367_v1 = vld [vmem:[#allocation2 + $0x34] sm:$0x1]  ;;  %v1652_v2 = vld [vmem:[%s6747_s3 + $0x438] sm:$0xff] }
 0x1c3   : > { %v1684_v13 = vld [vmem:[%s6747_s3 + $0x538] sm:$0xff]  ;;  %1362 = vst [vmem:[#allocation3 + $0x62] sm:$0x1] %v1361_v50  ;;  %1364 = vst [vmem:[#allocation3 + $0x63] sm:$0x1] %v1363_v62  ;;  %v1699_v6 = vld [vmem:[%s6747_s3 + $0x5b0] sm:$0xff]  ;;  %3876 = vmatpush3.msra.mxu0 %v1652_v2 }
 0x1c4   : > { %1368 = vst [vmem:[#allocation3 + $0x65] sm:$0x1] %v1367_v1  ;;  %v1369_v19 = vld [vmem:[#allocation2 + $0x36] sm:$0x1]  ;;  %v1371_v3 = vld [vmem:[#allocation2 + $0x38] sm:$0x1]  ;;  %3914 = vmatpush3.msra.mxu1 %v1684_v13  ;;  %3877 = vmatprep.subr.mxu0 %v1667_v4 }
 0x1c5   : > { %1370 = vst [vmem:[#allocation3 + $0x66] sm:$0x1] %v1369_v19  ;;  %1372 = vst [vmem:[#allocation3 + $0x67] sm:$0x1] %v1371_v3  ;;  %v1421_v42 = vld [vmem:[#allocation2 + $0x20] sm:$0x1]  ;;  %3915 = vmatprep.subr.mxu1 %v1699_v6 }
 0x1c6   : > { %v1423_v44 = vld [vmem:[#allocation2 + $0x22] sm:$0x1]  ;;  %v1425_v7 = vld [vmem:[#allocation2 + $0x24] sm:$0x1]  ;;  %v1651_v8 = vld [vmem:[%s6747_s3 + $0x430] sm:$0xff] }
 0x1c7   : > { %v1683_v9 = vld [vmem:[%s6747_s3 + $0x530] sm:$0xff]  ;;  %1422 = vst [vmem:[#allocation3 + $0x70] sm:$0x1] %v1421_v42  ;;  %1424 = vst [vmem:[#allocation3 + $0x71] sm:$0x1] %v1423_v44  ;;  %v1666_v12 = vld [vmem:[%s6747_s3 + $0x4a8] sm:$0xff]  ;;  %3878 = vmatpush3.msra.mxu0 %v1651_v8 }
 0x1c8   : > { %1426 = vst [vmem:[#allocation3 + $0x72] sm:$0x1] %v1425_v7  ;;  %v1427_v11 = vld [vmem:[#allocation2 + $0x26] sm:$0x1]  ;;  %v1429_v56 = vld [vmem:[#allocation2 + $0x34] sm:$0x1]  ;;  %3916 = vmatpush3.msra.mxu1 %v1683_v9  ;;  %3879 = vmatprep.subr.mxu0 %v1666_v12 }
 0x1c9   : > { %v1431_v59 = vld [vmem:[#allocation2 + $0x36] sm:$0x1]  ;;  %v1698_v15 = vld [vmem:[%s6747_s3 + $0x5a8] sm:$0xff]  ;;  %1428 = vst [vmem:[#allocation3 + $0x73] sm:$0x1] %v1427_v11  ;;  %v1665_v20 = vld [vmem:[%s6747_s3 + $0x4a0] sm:$0xff] }
 0x1ca   : > { %1430 = vst [vmem:[#allocation3 + $0x74] sm:$0x1] %v1429_v56  ;;  %1432 = vst [vmem:[#allocation3 + $0x75] sm:$0x1] %v1431_v59  ;;  %v1433_v49 = vld [vmem:[#allocation2 + $0x38] sm:$0x1]  ;;  %3917 = vmatprep.subr.mxu1 %v1698_v15 }
 0x1cb   : > { %v1435_v27 = vld [vmem:[#allocation2 + $0x3a] sm:$0x1]  ;;  %v1405_v31 = vld [vmem:[#allocation2 + $0x47] sm:$0x1]  ;;  %v1650_v53 = vld [vmem:[%s6747_s3 + $0x428] sm:$0xff] }
 0x1cc   : > { %v1682_v16 = vld [vmem:[%s6747_s3 + $0x528] sm:$0xff]  ;;  %1434 = vst [vmem:[#allocation3 + $0x76] sm:$0x1] %v1433_v49  ;;  %1436 = vst [vmem:[#allocation3 + $0x77] sm:$0x1] %v1435_v27  ;;  %v1697_v21 = vld [vmem:[%s6747_s3 + $0x5a0] sm:$0xff]  ;;  %3880 = vmatpush3.msra.mxu0 %v1650_v53 }
 0x1cd   : > { %1406 = vst [vmem:[#allocation3 + $0xe8] sm:$0x1] %v1405_v31  ;;  %v1407_v17 = vld [vmem:[#allocation2 + $0x49] sm:$0x1]  ;;  %v1409_v18 = vld [vmem:[#allocation2 + $0x4b] sm:$0x1]  ;;  %3918 = vmatpush3.msra.mxu1 %v1682_v16  ;;  %3881 = vmatprep.subr.mxu0 %v1665_v20 }
 0x1ce   : > { %1408 = vst [vmem:[#allocation3 + $0xe9] sm:$0x1] %v1407_v17  ;;  %1410 = vst [vmem:[#allocation3 + $0xea] sm:$0x1] %v1409_v18  ;;  %v1411_v22 = vld [vmem:[#allocation2 + $0x4d] sm:$0x1]  ;;  %3919 = vmatprep.subr.mxu1 %v1697_v21 }
 0x1cf   : > { %v1469_v24 = vld [vmem:[#allocation2 + $0x49] sm:$0x1]  ;;  %v1471_v26 = vld [vmem:[#allocation2 + $0x4b] sm:$0x1]  ;;  %v1649_v28 = vld [vmem:[%s6747_s3 + $0x420] sm:$0xff] }
 0x1d0   : > { %1412 = vst [vmem:[#allocation3 + $0xeb] sm:$0x1] %v1411_v22  ;;  %1470 = vst [vmem:[#allocation3 + $0xf8] sm:$0x1] %v1469_v24  ;;  %v1473_v33 = vld [vmem:[#allocation2 + $0x4d] sm:$0x1]  ;;  %3882 = vmatpush3.msra.mxu0 %v1649_v28 }
 0x1d1   : > { %1472 = vst [vmem:[#allocation3 + $0xf9] sm:$0x1] %v1471_v26  ;;  %v1375_v61 = vld [vmem:[#allocation2 + $0x48] sm:$0x1]  ;;  %1474 = vst [vmem:[#allocation3 + $0xfa] sm:$0x1] %v1473_v33 }
 0x1d2   : > { %1376 = vst [vmem:[#allocation3 + $0xe1] sm:$0x1] %v1375_v61  ;;  %v1377_v0 = vld [vmem:[#allocation2 + $0x4a] sm:$0x1]  ;;  %v1379_v34 = vld [vmem:[#allocation2 + $0x4c] sm:$0x1] }
 0x1d3   : > { %v1437_v35 = vld [vmem:[#allocation2 + $0x48] sm:$0x1]  ;;  %v1681_v58 = vld [vmem:[%s6747_s3 + $0x520] sm:$0xff]  ;;  %1378 = vst [vmem:[#allocation3 + $0xe2] sm:$0x1] %v1377_v0  ;;  %v1664_v37 = vld [vmem:[%s6747_s3 + $0x498] sm:$0xff] }
 0x1d4   : > { %1380 = vst [vmem:[#allocation3 + $0xe3] sm:$0x1] %v1379_v34  ;;  %1438 = vst [vmem:[#allocation3 + $0xf0] sm:$0x1] %v1437_v35  ;;  %v1439_v60 = vld [vmem:[#allocation2 + $0x4a] sm:$0x1]  ;;  %3920 = vmatpush3.msra.mxu1 %v1681_v58  ;;  %3883 = vmatprep.subr.mxu0 %v1664_v37 }
 0x1d5   : > { %v1441_v36 = vld [vmem:[#allocation2 + $0x4c] sm:$0x1]  ;;  %v1696_v39 = vld [vmem:[%s6747_s3 + $0x598] sm:$0xff]  ;;  %1440 = vst [vmem:[#allocation3 + $0xf1] sm:$0x1] %v1439_v60  ;;  %v1663_v10 = vld [vmem:[%s6747_s3 + $0x490] sm:$0xff] }
 0x1d6   : > { %1442 = vst [vmem:[#allocation3 + $0xf2] sm:$0x1] %v1441_v36  ;;  %v1443_v45 = vld [vmem:[#allocation2 + $0x4e] sm:$0x1]  ;;  %v1648_v29 = vld [vmem:[%s6747_s3 + $0x418] sm:$0xff]  ;;  %v1695_v14 = vld [vmem:[%s6747_s3 + $0x590] sm:$0xff]  ;;  %3921 = vmatprep.subr.mxu1 %v1696_v39 }
 0x1d7   : > { %v1680_v47 = vld [vmem:[%s6747_s3 + $0x518] sm:$0xff]  ;;  %1444 = vst [vmem:[#allocation3 + $0xf3] sm:$0x1] %v1443_v45  ;;  %v1647_v48 = vld [vmem:[%s6747_s3 + $0x410] sm:$0xff]  ;;  %3884 = vmatpush3.msra.mxu0 %v1648_v29  ;;  %v1662_v52 = vld [vmem:[%s6747_s3 + $0x488] sm:$0xff] }
 0x1d8   : > { %v1679_v51 = vld [vmem:[%s6747_s3 + $0x510] sm:$0xff]  ;;  %3922 = vmatpush3.msra.mxu1 %v1680_v47  ;;  %v1694_v54 = vld [vmem:[%s6747_s3 + $0x588] sm:$0xff]  ;;  %3885 = vmatprep.subr.mxu0 %v1663_v10  ;;  %v1661_v32 = vld [vmem:[%s6747_s3 + $0x480] sm:$0xff] }
 0x1d9   : > { %3923 = vmatprep.subr.mxu1 %v1695_v14  ;;  %v1646_v55 = vld [vmem:[%s6747_s3 + $0x408] sm:$0xff]  ;;  %3886 = vmatpush3.msra.mxu0 %v1647_v48  ;;  %v1693_v57 = vld [vmem:[%s6747_s3 + $0x580] sm:$0xff]  ;;  %v1740_v41 = vld [vmem:[%s6747_s3 + $0x6f8] sm:$0xff] }
 0x1da   : > { %v1678_v30 = vld [vmem:[%s6747_s3 + $0x508] sm:$0xff]  ;;  %3924 = vmatpush3.msra.mxu1 %v1679_v51  ;;  %3887 = vmatprep.subr.mxu0 %v1662_v52  ;;  %v1645_v63 = vld [vmem:[%s6747_s3 + $0x400] sm:$0xff]  ;;  %v1772_v43 = vld [vmem:[%s6747_s3 + $0x7f8] sm:$0xff] }
 0x1db   : > { %3925 = vmatprep.subr.mxu1 %v1694_v54  ;;  %v1677_v5 = vld [vmem:[%s6747_s3 + $0x500] sm:$0xff]  ;;  %3888 = vmatpush3.msra.mxu0 %v1646_v55  ;;  %v1493_v38 = vld [vmem:[#allocation3 + $0x40] sm:$0xff]  ;;  %v1495_v40 = vld [vmem:[#allocation3 + $0x50] sm:$0xff] }
 0x1dc   : > { %3926 = vmatpush3.msra.mxu1 %v1678_v30  ;;  %3889 = vmatprep.subr.mxu0 %v1661_v32  ;;  %v1724_v23 = vld [vmem:[%s6747_s3 + $0x678] sm:$0xff]  ;;  %v1739_v46 = vld [vmem:[%s6747_s3 + $0x6f0] sm:$0xff]  ;;  %v1512_v62 = vld [vmem:[#allocation3 + $0xd8] sm:$0xff] }
 0x1dd   : > { %3927 = vmatprep.subr.mxu1 %v1693_v57  ;;  %3890 = vmatpush3.msra.mxu0 %v1645_v63  ;;  %v1756_v25 = vld [vmem:[%s6747_s3 + $0x778] sm:$0xff]  ;;  %v1510_v50 = vld [vmem:[#allocation3 + $0xc8] sm:$0xff]  ;;  %v1738_v19 = vld [vmem:[%s6747_s3 + $0x6e8] sm:$0xff] }
 0x1de   : > { %3928 = vmatpush3.msra.mxu1 %v1677_v5  ;;  %2145 = vmatmul.mubr.f32.vlgmr.msra.gmra.mxu0 %v1493_v38  ;;  %v1771_v1 = vld [vmem:[%s6747_s3 + $0x7f0] sm:$0xff]  ;;  %v1770_v3 = vld [vmem:[%s6747_s3 + $0x7e8] sm:$0xff]  ;;  %v1511_v6 = vld [vmem:[#allocation3 + $0xd0] sm:$0xff] }
 0x1df   : > { %2220 = vmatmul.mubr.f32.vlgmr.msra.gmra.mxu1 %v1495_v40  ;;  %3935 = vmatprep.subr.mxu0 %v1740_v41  ;;  %v1723_v2 = vld [vmem:[%s6747_s3 + $0x670] sm:$0xff]  ;;  %v1509_v4 = vld [vmem:[#allocation3 + $0xc0] sm:$0xff]  ;;  %v1737_v8 = vld [vmem:[%s6747_s3 + $0x6e0] sm:$0xff] }
 0x1e0   : > { %3973 = vmatprep.subr.mxu1 %v1772_v43  ;;  %2149 = vmatprep.mubr.f32.mxu0 %v1510_v50  ;;  %v1755_v13 = vld [vmem:[%s6747_s3 + $0x770] sm:$0xff]  ;;  %v1722_v42 = vld [vmem:[%s6747_s3 + $0x668] sm:$0xff]  ;;  %v1769_v9 = vld [vmem:[%s6747_s3 + $0x7e0] sm:$0xff] }
 0x1e1   : > { %2224 = vmatprep.mubr.f32.mxu1 %v1512_v62  ;;  %3936 = vmatpush3.msra.mxu0 %v1724_v23  ;;  %v1754_v44 = vld [vmem:[%s6747_s3 + $0x768] sm:$0xff]  ;;  %v1498_v7 = vld [vmem:[#allocation3 + $0x68] sm:$0xff]  ;;  %v1500_v11 = vld [vmem:[#allocation3 + $0x78] sm:$0xff] }
 0x1e2   : > { %3974 = vmatpush3.msra.mxu1 %v1756_v25  ;;  %3937 = vmatprep.subr.mxu0 %v1739_v46  ;;  %v1721_v56 = vld [vmem:[%s6747_s3 + $0x660] sm:$0xff]  ;;  %v1736_v12 = vld [vmem:[%s6747_s3 + $0x6d8] sm:$0xff]  ;;  %v1735_v31 = vld [vmem:[%s6747_s3 + $0x6d0] sm:$0xff] }
 0x1e3   : > { %3975 = vmatprep.subr.mxu1 %v1771_v1  ;;  %3938 = vmatpush3.msra.mxu0 %v1723_v2  ;;  %v1753_v59 = vld [vmem:[%s6747_s3 + $0x760] sm:$0xff]  ;;  %v1768_v15 = vld [vmem:[%s6747_s3 + $0x7d8] sm:$0xff]  ;;  %v1767_v53 = vld [vmem:[%s6747_s3 + $0x7d0] sm:$0xff] }
 0x1e4   : > { %3976 = vmatpush3.msra.mxu1 %v1755_v13  ;;  %2150 = vmatmul.mubr.f32.gmra.mxu0 %v1509_v4  ;;  %v1720_v49 = vld [vmem:[%s6747_s3 + $0x658] sm:$0xff]  ;;  %v1719_v16 = vld [vmem:[%s6747_s3 + $0x650] sm:$0xff]  ;;  %v1734_v18 = vld [vmem:[%s6747_s3 + $0x6c8] sm:$0xff] }
 0x1e5   : > { %2225 = vmatmul.mubr.f32.gmra.mxu1 %v1511_v6  ;;  %3939 = vmatprep.subr.mxu0 %v1738_v19  ;;  %v1752_v27 = vld [vmem:[%s6747_s3 + $0x758] sm:$0xff]  ;;  %v1751_v17 = vld [vmem:[%s6747_s3 + $0x750] sm:$0xff]  ;;  %v1766_v20 = vld [vmem:[%s6747_s3 + $0x7c8] sm:$0xff] }
 0x1e6   : > { %3977 = vmatprep.subr.mxu1 %v1770_v3  ;;  %3940 = vmatpush3.msra.mxu0 %v1722_v42  ;;  %v1718_v21 = vld [vmem:[%s6747_s3 + $0x648] sm:$0xff]  ;;  %v1733_v24 = vld [vmem:[%s6747_s3 + $0x6c0] sm:$0xff]  ;;  %v1732_v61 = vld [vmem:[%s6747_s3 + $0x6b8] sm:$0xff] }
 0x1e7   : > { %2294 = vmatprep.mubr.f32.mxu0 %v1498_v7  ;;  %3978 = vmatpush3.msra.mxu1 %v1754_v44  ;;  %v1750_v22 = vld [vmem:[%s6747_s3 + $0x748] sm:$0xff]  ;;  %v1765_v26 = vld [vmem:[%s6747_s3 + $0x7c0] sm:$0xff]  ;;  %v1764_v0 = vld [vmem:[%s6747_s3 + $0x7b8] sm:$0xff] }
 0x1e8   : > { %2369 = vmatprep.mubr.f32.mxu1 %v1500_v11  ;;  %3941 = vmatprep.subr.mxu0 %v1737_v8  ;;  %v1717_v28 = vld [vmem:[%s6747_s3 + $0x640] sm:$0xff]  ;;  %v1716_v34 = vld [vmem:[%s6747_s3 + $0x638] sm:$0xff]  ;;  %v1731_v58 = vld [vmem:[%s6747_s3 + $0x6b0] sm:$0xff] }
 0x1e9   : > { %3979 = vmatprep.subr.mxu1 %v1769_v9  ;;  %3942 = vmatpush3.msra.mxu0 %v1721_v56  ;;  %v1749_v33 = vld [vmem:[%s6747_s3 + $0x740] sm:$0xff]  ;;  %v1748_v35 = vld [vmem:[%s6747_s3 + $0x738] sm:$0xff]  ;;  %v1763_v60 = vld [vmem:[%s6747_s3 + $0x7b0] sm:$0xff] }
 0x1ea   : > { %3980 = vmatpush3.msra.mxu1 %v1753_v59  ;;  %3943 = vmatprep.subr.mxu0 %v1736_v12  ;;  %v1715_v36 = vld [vmem:[%s6747_s3 + $0x630] sm:$0xff]  ;;  %v1730_v39 = vld [vmem:[%s6747_s3 + $0x6a8] sm:$0xff]  ;;  %v1729_v10 = vld [vmem:[%s6747_s3 + $0x6a0] sm:$0xff] }
 0x1eb   : > { %3981 = vmatprep.subr.mxu1 %v1768_v15  ;;  %3944 = vmatpush3.msra.mxu0 %v1720_v49  ;;  %v1747_v37 = vld [vmem:[%s6747_s3 + $0x730] sm:$0xff]  ;;  %v1762_v45 = vld [vmem:[%s6747_s3 + $0x7a8] sm:$0xff]  ;;  %v1761_v14 = vld [vmem:[%s6747_s3 + $0x7a0] sm:$0xff] }
 0x1ec   : > { %3982 = vmatpush3.msra.mxu1 %v1752_v27  ;;  %3945 = vmatprep.subr.mxu0 %v1735_v31  ;;  %v1714_v29 = vld [vmem:[%s6747_s3 + $0x628] sm:$0xff]  ;;  %v1713_v48 = vld [vmem:[%s6747_s3 + $0x620] sm:$0xff]  ;;  %v1728_v52 = vld [vmem:[%s6747_s3 + $0x698] sm:$0xff] }
 0x1ed   : > { %3983 = vmatprep.subr.mxu1 %v1767_v53  ;;  %3946 = vmatpush3.msra.mxu0 %v1719_v16  ;;  %v1746_v47 = vld [vmem:[%s6747_s3 + $0x728] sm:$0xff]  ;;  %v1745_v51 = vld [vmem:[%s6747_s3 + $0x720] sm:$0xff]  ;;  %v1760_v54 = vld [vmem:[%s6747_s3 + $0x798] sm:$0xff] }
 0x1ee   : > { %3984 = vmatpush3.msra.mxu1 %v1751_v17  ;;  %3947 = vmatprep.subr.mxu0 %v1734_v18  ;;  %v1712_v55 = vld [vmem:[%s6747_s3 + $0x618] sm:$0xff]  ;;  %v1727_v32 = vld [vmem:[%s6747_s3 + $0x690] sm:$0xff]  ;;  %v1726_v41 = vld [vmem:[%s6747_s3 + $0x688] sm:$0xff] }
 0x1ef   : > { %3985 = vmatprep.subr.mxu1 %v1766_v20  ;;  %3948 = vmatpush3.msra.mxu0 %v1718_v21  ;;  %v1744_v30 = vld [vmem:[%s6747_s3 + $0x718] sm:$0xff]  ;;  %v1759_v57 = vld [vmem:[%s6747_s3 + $0x790] sm:$0xff]  ;;  %v1758_v43 = vld [vmem:[%s6747_s3 + $0x788] sm:$0xff] }
 0x1f0   : > { %3986 = vmatpush3.msra.mxu1 %v1750_v22  ;;  %3949 = vmatprep.subr.mxu0 %v1733_v24  ;;  %v1711_v63 = vld [vmem:[%s6747_s3 + $0x610] sm:$0xff]  ;;  %v1710_v38 = vld [vmem:[%s6747_s3 + $0x608] sm:$0xff]  ;;  %v1725_v23 = vld [vmem:[%s6747_s3 + $0x680] sm:$0xff] }
 0x1f1   : > { %3987 = vmatprep.subr.mxu1 %v1765_v26  ;;  %3950 = vmatpush3.msra.mxu0 %v1717_v28  ;;  %v1743_v5 = vld [vmem:[%s6747_s3 + $0x710] sm:$0xff]  ;;  %v1742_v40 = vld [vmem:[%s6747_s3 + $0x708] sm:$0xff]  ;;  %v1757_v25 = vld [vmem:[%s6747_s3 + $0x780] sm:$0xff] }
 0x1f2   : > { %3988 = vmatpush3.msra.mxu1 %v1749_v33  ;;  %3951 = vmatprep.subr.mxu0 %v1732_v61  ;;  %v1709_v46 = vld [vmem:[%s6747_s3 + $0x600] sm:$0xff]  ;;  %v1497_v62 = vld [vmem:[#allocation3 + $0x60] sm:$0xff]  ;;  %v1499_v1 = vld [vmem:[#allocation3 + $0x70] sm:$0xff] }
 0x1f3   : > { %3989 = vmatprep.subr.mxu1 %v1764_v0  ;;  %3952 = vmatpush3.msra.mxu0 %v1716_v34  ;;  %v1741_v50 = vld [vmem:[%s6747_s3 + $0x700] sm:$0xff]  ;;  %v1514_v2 = vld [vmem:[#allocation3 + $0xe8] sm:$0xff]  ;;  %v1513_v19 = vld [vmem:[#allocation3 + $0xe0] sm:$0xff] }
 0x1f4   : > { %3990 = vmatpush3.msra.mxu1 %v1748_v35  ;;  %3953 = vmatprep.subr.mxu0 %v1731_v58  ;;  %v1516_v13 = vld [vmem:[#allocation3 + $0xf8] sm:$0xff]  ;;  %v1515_v3 = vld [vmem:[#allocation3 + $0xf0] sm:$0xff]  ;;  %v2573_v7 = vld [vmem:[%s6749_s5 + $0xf0] sm:$0xff] }
 0x1f5   : > { %3991 = vmatprep.subr.mxu1 %v1763_v60  ;;  %3954 = vmatpush3.msra.mxu0 %v1715_v36  ;;  %v2574_v4 = vld [vmem:[%s6749_s5 + $0xf8] sm:$0xff]  ;;  %v2605_v8 = vld [vmem:[%s6749_s5 + $0x1f0] sm:$0xff]  ;;  %v4339_v56 = vld [vmem:[#allocation2] sm:$0xff] }
 0x1f6   : > { %3992 = vmatpush3.msra.mxu1 %v1747_v37  ;;  %3955 = vmatprep.subr.mxu0 %v1730_v39  ;;  %v2606_v6 = vld [vmem:[%s6749_s5 + $0x1f8] sm:$0xff]  ;;  %v2557_v9 = vld [vmem:[%s6749_s5 + $0x70] sm:$0xff]  ;;  %2387 = vst.msk [vmem:[#allocation4] sm:$0xff] %vm2386_vm8, %v4339_v56  ;;  %2388 = vst.msk [vmem:[#allocation4 + $0x8] sm:$0xff] %vm2386_vm8, %v4339_v56 }
 0x1f7   : > { %3993 = vmatprep.subr.mxu1 %v1762_v45  ;;  %3956 = vmatpush3.msra.mxu0 %v1714_v29  ;;  %v2558_v42 = vld [vmem:[%s6749_s5 + $0x78] sm:$0xff]  ;;  %v2589_v11 = vld [vmem:[%s6749_s5 + $0x170] sm:$0xff]  ;;  %2389 = vst.msk [vmem:[#allocation4 + $0x10] sm:$0xff] %vm2386_vm8, %v4339_v56  ;;  %2390 = vst.msk [vmem:[#allocation4 + $0x18] sm:$0xff] %vm2386_vm8, %v4339_v56 }
 0x1f8   : > { %3994 = vmatpush3.msra.mxu1 %v1746_v47  ;;  %3957 = vmatprep.subr.mxu0 %v1729_v10  ;;  %v2590_v44 = vld [vmem:[%s6749_s5 + $0x178] sm:$0xff]  ;;  %2392 = vst.msk [vmem:[#allocation4 + $0x20] sm:$0xf] %vm2391_vm9, %v4339_v56  ;;  %v2572_v59 = vld [vmem:[%s6749_s5 + $0xe8] sm:$0xff]  ;;  %v2571_v27 = vld [vmem:[%s6749_s5 + $0xe0] sm:$0xff] }
 0x1f9   : > { %3995 = vmatprep.subr.mxu1 %v1761_v14  ;;  %3958 = vmatpush3.msra.mxu0 %v1713_v48  ;;  %v2604_v12 = vld [vmem:[%s6749_s5 + $0x1e8] sm:$0xff]  ;;  %v2603_v31 = vld [vmem:[%s6749_s5 + $0x1e0] sm:$0xff]  ;;  %v2570_v17 = vld [vmem:[%s6749_s5 + $0xd8] sm:$0xff] }
 0x1fa   : > { %3996 = vmatpush3.msra.mxu1 %v1745_v51  ;;  %3959 = vmatprep.subr.mxu0 %v1728_v52  ;;  %v2556_v15 = vld [vmem:[%s6749_s5 + $0x68] sm:$0xff]  ;;  %v2555_v53 = vld [vmem:[%s6749_s5 + $0x60] sm:$0xff]  ;;  %v2602_v18 = vld [vmem:[%s6749_s5 + $0x1d8] sm:$0xff] }
 0x1fb   : > { %3997 = vmatprep.subr.mxu1 %v1760_v54  ;;  %3960 = vmatpush3.msra.mxu0 %v1712_v55  ;;  %v2588_v49 = vld [vmem:[%s6749_s5 + $0x168] sm:$0xff]  ;;  %v2587_v16 = vld [vmem:[%s6749_s5 + $0x160] sm:$0xff]  ;;  %v2554_v20 = vld [vmem:[%s6749_s5 + $0x58] sm:$0xff] }
 0x1fc   : > { %3998 = vmatpush3.msra.mxu1 %v1744_v30  ;;  %3961 = vmatprep.subr.mxu0 %v1727_v32  ;;  %v2586_v21 = vld [vmem:[%s6749_s5 + $0x158] sm:$0xff]  ;;  %v2569_v22 = vld [vmem:[%s6749_s5 + $0xd0] sm:$0xff]  ;;  %v2568_v33 = vld [vmem:[%s6749_s5 + $0xc8] sm:$0xff] }
 0x1fd   : > { %3999 = vmatprep.subr.mxu1 %v1759_v57  ;;  %3962 = vmatpush3.msra.mxu0 %v1711_v63  ;;  %v2601_v24 = vld [vmem:[%s6749_s5 + $0x1d0] sm:$0xff]  ;;  %v2600_v61 = vld [vmem:[%s6749_s5 + $0x1c8] sm:$0xff]  ;;  %v2567_v35 = vld [vmem:[%s6749_s5 + $0xc0] sm:$0xff] }
 0x1fe   : > { %4000 = vmatpush3.msra.mxu1 %v1743_v5  ;;  %3963 = vmatprep.subr.mxu0 %v1726_v41  ;;  %v2553_v26 = vld [vmem:[%s6749_s5 + $0x50] sm:$0xff]  ;;  %v2552_v0 = vld [vmem:[%s6749_s5 + $0x48] sm:$0xff]  ;;  %v2599_v58 = vld [vmem:[%s6749_s5 + $0x1c0] sm:$0xff] }
 0x1ff   : > { %4001 = vmatprep.subr.mxu1 %v1758_v43  ;;  %3964 = vmatpush3.msra.mxu0 %v1710_v38  ;;  %v2585_v28 = vld [vmem:[%s6749_s5 + $0x150] sm:$0xff]  ;;  %v2584_v34 = vld [vmem:[%s6749_s5 + $0x148] sm:$0xff]  ;;  %v2551_v60 = vld [vmem:[%s6749_s5 + $0x40] sm:$0xff] }
 0x200   : > { %4002 = vmatpush3.msra.mxu1 %v1742_v40  ;;  %3965 = vmatprep.subr.mxu0 %v1725_v23  ;;  %v2583_v36 = vld [vmem:[%s6749_s5 + $0x140] sm:$0xff]  ;;  %v2566_v37 = vld [vmem:[%s6749_s5 + $0xb8] sm:$0xff]  ;;  %v2565_v47 = vld [vmem:[%s6749_s5 + $0xb0] sm:$0xff] }
 0x201   : > { %4003 = vmatprep.subr.mxu1 %v1757_v25  ;;  %3966 = vmatpush3.msra.mxu0 %v1709_v46  ;;  %v2598_v39 = vld [vmem:[%s6749_s5 + $0x1b8] sm:$0xff]  ;;  %v2597_v10 = vld [vmem:[%s6749_s5 + $0x1b0] sm:$0xff]  ;;  %v2564_v51 = vld [vmem:[%s6749_s5 + $0xa8] sm:$0xff] }
 0x202   : > { %4004 = vmatpush3.msra.mxu1 %v1741_v50  ;;  %2295 = vmatmul.mubr.f32.vlgmr.msra.gmra.mxu0 %v1497_v62  ;;  %v2550_v45 = vld [vmem:[%s6749_s5 + $0x38] sm:$0xff]  ;;  %v2549_v14 = vld [vmem:[%s6749_s5 + $0x30] sm:$0xff]  ;;  %v2596_v52 = vld [vmem:[%s6749_s5 + $0x1a8] sm:$0xff] }
 0x203   : > { %2370 = vmatmul.mubr.f32.vlgmr.msra.gmra.mxu1 %v1499_v1  ;;  %2299 = vmatprep.mubr.f32.mxu0 %v1514_v2  ;;  %v2582_v29 = vld [vmem:[%s6749_s5 + $0x138] sm:$0xff]  ;;  %v2581_v48 = vld [vmem:[%s6749_s5 + $0x130] sm:$0xff]  ;;  %v2548_v54 = vld [vmem:[%s6749_s5 + $0x28] sm:$0xff] }
 0x204   : > { %2374 = vmatprep.mubr.f32.mxu1 %v1516_v13  ;;  %4011 = vmatprep.subr.mxu0 %v2574_v4  ;;  %v2580_v55 = vld [vmem:[%s6749_s5 + $0x128] sm:$0xff]  ;;  %v2563_v30 = vld [vmem:[%s6749_s5 + $0xa0] sm:$0xff]  ;;  %v2562_v5 = vld [vmem:[%s6749_s5 + $0x98] sm:$0xff] }
 0x205   : > { %4046 = vmatprep.subr.mxu1 %v2606_v6  ;;  %4012 = vmatpush3.msra.mxu0 %v2558_v42  ;;  %v2595_v32 = vld [vmem:[%s6749_s5 + $0x1a0] sm:$0xff]  ;;  %v2594_v41 = vld [vmem:[%s6749_s5 + $0x198] sm:$0xff]  ;;  %v2561_v40 = vld [vmem:[%s6749_s5 + $0x90] sm:$0xff] }
 0x206   : > { %2300 = vmatmul.mubr.f32.gmra.mxu0 %v1513_v19  ;;  %4047 = vmatpush3.msra.mxu1 %v2590_v44  ;;  %v2547_v57 = vld [vmem:[%s6749_s5 + $0x20] sm:$0xff]  ;;  %v2546_v43 = vld [vmem:[%s6749_s5 + $0x18] sm:$0xff]  ;;  %v2593_v23 = vld [vmem:[%s6749_s5 + $0x190] sm:$0xff] }
 0x207   : > { %2375 = vmatmul.mubr.f32.gmra.mxu1 %v1515_v3  ;;  %4013 = vmatprep.subr.mxu0 %v2573_v7  ;;  %v2579_v63 = vld [vmem:[%s6749_s5 + $0x120] sm:$0xff]  ;;  %v2578_v38 = vld [vmem:[%s6749_s5 + $0x118] sm:$0xff]  ;;  %v2545_v25 = vld [vmem:[%s6749_s5 + $0x10] sm:$0xff] }
 0x208   : > { %4048 = vmatprep.subr.mxu1 %v2605_v8  ;;  %4014 = vmatpush3.msra.mxu0 %v2557_v9  ;;  %v2577_v46 = vld [vmem:[%s6749_s5 + $0x110] sm:$0xff]  ;;  %v2560_v50 = vld [vmem:[%s6749_s5 + $0x88] sm:$0xff]  ;;  %v2437_v9 = vld [vmem:[#allocation4 + $0x11] sm:$0x1] }
 0x209   : > { %4049 = vmatpush3.msra.mxu1 %v2589_v11  ;;  %4015 = vmatprep.subr.mxu0 %v2572_v59  ;;  %v2592_v62 = vld [vmem:[%s6749_s5 + $0x188] sm:$0xff]  ;;  %v2411_v13 = vld [vmem:[#allocation4 + $0xc] sm:$0x1]  ;;  %v2559_v11 = vld [vmem:[%s6749_s5 + $0x80] sm:$0xff]  ;;  %2438 = vst.msk [vmem:[#allocation5 + $0xf] sm:$0x1] %vm2407_vm10, %v2437_v9 }
 0x20a   : > { %4050 = vmatprep.subr.mxu1 %v2604_v12  ;;  %4016 = vmatpush3.msra.mxu0 %v2556_v15  ;;  %v2406_v1 = vld [vmem:[#allocation4] sm:$0x1]  ;;  %v2409_v2 = vld [vmem:[#allocation4 + $0x2] sm:$0x1]  ;;  %2412 = vst.msk [vmem:[#allocation5 + $0x2] sm:$0x1] %vm2407_vm10, %v2411_v13 }
 0x20b   : > { %4051 = vmatpush3.msra.mxu1 %v2588_v49  ;;  %4017 = vmatprep.subr.mxu0 %v2571_v27  ;;  %2408 = vst.msk [vmem:[#allocation5] sm:$0x1] %vm2407_vm10, %v2406_v1  ;;  %2410 = vst.msk [vmem:[#allocation5 + $0x1] sm:$0x1] %vm2407_vm10, %v2409_v2  ;;  %v2415_v19 = vld [vmem:[#allocation4 + $0x1] sm:$0x1] }
 0x20c   : > { %4052 = vmatprep.subr.mxu1 %v2603_v31  ;;  %4018 = vmatpush3.msra.mxu0 %v2555_v53  ;;  %v2417_v3 = vld [vmem:[#allocation4 + $0x3] sm:$0x1]  ;;  %v2423_v4 = vld [vmem:[#allocation4 + $0x2] sm:$0x1]  ;;  %2416 = vst.msk [vmem:[#allocation5 + $0x4] sm:$0x1] %vm2407_vm10, %v2415_v19 }
 0x20d   : > { %4053 = vmatpush3.msra.mxu1 %v2587_v16  ;;  %4019 = vmatprep.subr.mxu0 %v2570_v17  ;;  %2418 = vst.msk [vmem:[#allocation5 + $0x5] sm:$0x1] %vm2407_vm10, %v2417_v3  ;;  %2424 = vst.msk [vmem:[#allocation5 + $0x8] sm:$0x1] %vm2407_vm10, %v2423_v4  ;;  %v2425_v6 = vld [vmem:[#allocation4 + $0x4] sm:$0x1] }
 0x20e   : > { %4054 = vmatprep.subr.mxu1 %v2602_v18  ;;  %4020 = vmatpush3.msra.mxu0 %v2554_v20  ;;  %v2431_v42 = vld [vmem:[#allocation4 + $0x3] sm:$0x1]  ;;  %v2433_v44 = vld [vmem:[#allocation4 + $0x5] sm:$0x1]  ;;  %2426 = vst.msk [vmem:[#allocation5 + $0x9] sm:$0x1] %vm2407_vm10, %v2425_v6 }
 0x20f   : > { %4055 = vmatpush3.msra.mxu1 %v2586_v21  ;;  %4021 = vmatprep.subr.mxu0 %v2569_v22  ;;  %v2544_v7 = vld [vmem:[%s6749_s5 + $0x8] sm:$0xff]  ;;  %2432 = vst.msk [vmem:[#allocation5 + $0xc] sm:$0x1] %vm2407_vm10, %v2431_v42  ;;  %2434 = vst.msk [vmem:[#allocation5 + $0xd] sm:$0x1] %vm2407_vm10, %v2433_v44  ;;  %v2591_v56 = vld [vmem:[%s6749_s5 + $0x180] sm:$0xff] }
 0x210   : > { %4056 = vmatprep.subr.mxu1 %v2601_v24  ;;  %4022 = vmatpush3.msra.mxu0 %v2553_v26  ;;  %v2576_v8 = vld [vmem:[%s6749_s5 + $0x108] sm:$0xff]  ;;  %v2543_v59 = vld [vmem:[%s6749_s5] sm:$0xff]  ;;  %v2638_v15 = vld [vmem:[%s6749_s5 + $0x2f8] sm:$0xff] }
 0x211   : > { %4057 = vmatpush3.msra.mxu1 %v2585_v28  ;;  %4023 = vmatprep.subr.mxu0 %v2568_v33  ;;  %v2575_v12 = vld [vmem:[%s6749_s5 + $0x100] sm:$0xff]  ;;  %v2670_v49 = vld [vmem:[%s6749_s5 + $0x3f8] sm:$0xff]  ;;  %v2439_v27 = vld [vmem:[#allocation4 + $0x6] sm:$0x1] }
 0x212   : > { %4058 = vmatprep.subr.mxu1 %v2600_v61  ;;  %4024 = vmatpush3.msra.mxu0 %v2552_v0  ;;  %v2443_v31 = vld [vmem:[#allocation4 + $0x12] sm:$0x1]  ;;  %2440 = vst.msk [vmem:[#allocation5 + $0x10] sm:$0x1] %vm2407_vm10, %v2439_v27  ;;  %v2465_v53 = vld [vmem:[#allocation4 + $0xb] sm:$0x1] }
 0x213   : > { %4059 = vmatpush3.msra.mxu1 %v2584_v34  ;;  %4025 = vmatprep.subr.mxu0 %v2567_v35  ;;  %2444 = vst.msk [vmem:[#allocation5 + $0x12] sm:$0x1] %vm2407_vm10, %v2443_v31  ;;  %v2469_v16 = vld [vmem:[#allocation4 + $0x17] sm:$0x1]  ;;  %2466 = vst.msk [vmem:[#allocation5 + $0x1d] sm:$0x1] %vm2407_vm10, %v2465_v53 }
 0x214   : > { %4060 = vmatprep.subr.mxu1 %v2599_v58  ;;  %4026 = vmatpush3.msra.mxu0 %v2551_v60  ;;  %2470 = vst.msk [vmem:[#allocation5 + $0x1f] sm:$0x1] %vm2407_vm10, %v2469_v16  ;;  %v2471_v17 = vld [vmem:[#allocation4 + $0xc] sm:$0x1]  ;;  %v2475_v18 = vld [vmem:[#allocation4 + $0x18] sm:$0x1] }
 0x215   : > { %4061 = vmatpush3.msra.mxu1 %v2583_v36  ;;  %4027 = vmatprep.subr.mxu0 %v2566_v37  ;;  %2472 = vst.msk [vmem:[#allocation5 + $0x20] sm:$0x1] %vm2407_vm10, %v2471_v17  ;;  %2476 = vst.msk [vmem:[#allocation5 + $0x22] sm:$0x1] %vm2407_vm10, %v2475_v18  ;;  %v2497_v20 = vld [vmem:[#allocation4 + $0x11] sm:$0x1]  ;;  %v3739_v60 = vpop.f32.mrf.mxu0  ;;  %v3777_v36 = vpop.f32.mrf.mxu1 }
 0x216   : > { %4062 = vmatprep.subr.mxu1 %v2598_v39  ;;  %4028 = vmatpush3.msra.mxu0 %v2550_v45  ;;  %v2501_v21 = vld [vmem:[#allocation4 + $0x1d] sm:$0x1]  ;;  %2498 = vst.msk [vmem:[#allocation5 + $0x2d] sm:$0x1] %vm2407_vm10, %v2497_v20  ;;  %v2503_v22 = vld [vmem:[#allocation4 + $0x12] sm:$0x1] }
 0x217   : > { %4063 = vmatpush3.msra.mxu1 %v2582_v29  ;;  %4029 = vmatprep.subr.mxu0 %v2565_v47  ;;  %2502 = vst.msk [vmem:[#allocation5 + $0x2f] sm:$0x1] %vm2407_vm10, %v2501_v21  ;;  %2504 = vst.msk [vmem:[#allocation5 + $0x30] sm:$0x1] %vm2407_vm10, %v2503_v22  ;;  %v2507_v24 = vld [vmem:[#allocation4 + $0x1e] sm:$0x1]  ;;  %v3740_v37 = vpop.f32.mrf.mxu0  ;;  %v3778_v39 = vpop.f32.mrf.mxu1 }
 0x218   : > { %4064 = vmatprep.subr.mxu1 %v2597_v10  ;;  %4030 = vmatpush3.msra.mxu0 %v2549_v14  ;;  %2508 = vst.msk [vmem:[#allocation5 + $0x32] sm:$0x1] %vm2407_vm10, %v2507_v24  ;;  %v2509_v26 = vld [vmem:[#allocation4 + $0x20] sm:$0x1]  ;;  %v2515_v28 = vld [vmem:[#allocation4 + $0x1f] sm:$0x1] }
 0x219   : > { %4065 = vmatpush3.msra.mxu1 %v2581_v48  ;;  %4031 = vmatprep.subr.mxu0 %v2564_v51  ;;  %2510 = vst.msk [vmem:[#allocation5 + $0x33] sm:$0x1] %vm2407_vm10, %v2509_v26  ;;  %2516 = vst.msk [vmem:[#allocation5 + $0x36] sm:$0x1] %vm2407_vm10, %v2515_v28  ;;  %v2517_v33 = vld [vmem:[#allocation4 + $0x21] sm:$0x1] }
 0x21a   : > { %4066 = vmatprep.subr.mxu1 %v2596_v52  ;;  %4032 = vmatpush3.msra.mxu0 %v2548_v54  ;;  %2518 = vst.msk [vmem:[#allocation5 + $0x37] sm:$0x1] %vm2407_vm10, %v2517_v33  ;;  %v2523_v61 = vld [vmem:[#allocation4 + $0x20] sm:$0x1]  ;;  %v2525_v0 = vld [vmem:[#allocation4 + $0x22] sm:$0x1] }
 0x21b   : > { %4067 = vmatpush3.msra.mxu1 %v2580_v55  ;;  %4033 = vmatprep.subr.mxu0 %v2563_v30  ;;  %2524 = vst.msk [vmem:[#allocation5 + $0x3a] sm:$0x1] %vm2407_vm10, %v2523_v61  ;;  %2526 = vst.msk [vmem:[#allocation5 + $0x3b] sm:$0x1] %vm2407_vm10, %v2525_v0  ;;  %v2529_v34 = vld [vmem:[#allocation4 + $0x17] sm:$0x1] }
 0x21c   : > { %4068 = vmatprep.subr.mxu1 %v2595_v32  ;;  %4034 = vmatpush3.msra.mxu0 %v2547_v57  ;;  %2530 = vst.msk [vmem:[#allocation5 + $0x3d] sm:$0x1] %vm2407_vm10, %v2529_v34  ;;  %v2531_v35 = vld [vmem:[#allocation4 + $0x21] sm:$0x1]  ;;  %v2533_v58 = vld [vmem:[#allocation4 + $0x23] sm:$0x1]  ;;  %v3741_v32 = vadd.f32 %v3740_v37, %v3739_v60 }
 0x21d   : > { %4069 = vmatpush3.msra.mxu1 %v2579_v63  ;;  %4035 = vmatprep.subr.mxu0 %v2562_v5  ;;  %2532 = vst.msk [vmem:[#allocation5 + $0x3e] sm:$0x1] %vm2407_vm10, %v2531_v35  ;;  %2534 = vst.msk [vmem:[#allocation5 + $0x3f] sm:$0x1] %vm2407_vm10, %v2533_v58  ;;  %v3476_v57 = vld [vmem:[%s6748_s4] ss:$0 sm:$0xff] }
 0x21e   : > { %4070 = vmatprep.subr.mxu1 %v2594_v41  ;;  %4036 = vmatpush3.msra.mxu0 %v2546_v43  ;;  %v1847_v43 = vadd.f32 %v3741_v32, %v3476_v57 }
 0x21f   : > { %4071 = vmatpush3.msra.mxu1 %v2578_v38  ;;  %4037 = vmatprep.subr.mxu0 %v2561_v40 }
 0x220   : > { %4072 = vmatprep.subr.mxu1 %v2593_v23  ;;  %4038 = vmatpush3.msra.mxu0 %v2545_v25  ;;  %v3779_v23 = vadd.f32 %v3778_v39, %v3777_v36 }
 0x221   : > { %4073 = vmatpush3.msra.mxu1 %v2577_v46  ;;  %4039 = vmatprep.subr.mxu0 %v2560_v50 }
 0x222   : > { %4074 = vmatprep.subr.mxu1 %v2592_v62  ;;  %4040 = vmatpush3.msra.mxu0 %v2544_v7  ;;  %v1922_v50 = vadd.f32 %v3779_v23, %v1847_v43 }
 0x223   : > { %4075 = vmatpush3.msra.mxu1 %v2576_v8  ;;  %4041 = vmatprep.subr.mxu0 %v2559_v11 }
 0x224   : > { %4076 = vmatprep.subr.mxu1 %v2591_v56  ;;  %4042 = vmatpush3.msra.mxu0 %v2543_v59 }
 0x225   : > { %4077 = vmatpush3.msra.mxu1 %v2575_v12  ;;  %4081 = vmatprep.subr.mxu0 %v2638_v15 }
 0x226   : > { %4116 = vmatprep.subr.mxu1 %v2670_v49 }
 0x231   : > { %v3742_v45 = vpop.f32.mrf.mxu0 }
 0x233   : > { %v3743_v47 = vpop.f32.mrf.mxu0 }
 0x234   : > { %v3744_v38 = vadd.f32 %v3743_v47, %v3742_v45 }
 0x236   : > { %v1852_v62 = vadd.f32 %v3744_v38, %v3476_v57 }
 0x237   : > { %v3780_v29 = vpop.f32.mrf.mxu1 }
 0x239   : > { %v3781_v10 = vpop.f32.mrf.mxu1 }
 0x23a   : > { %v3782_v2 = vadd.f32 %v3781_v10, %v3780_v29 }
 0x23c   : > { %v1927_v4 = vadd.f32 %v3782_v2, %v1852_v62 }
 0x258   : > { %v3853_v48 = vpop.f32.mrf.mxu1 }
 0x25a   : > { %v3854_v52 = vpop.f32.mrf.mxu1 }
 0x25b   : > { %v3815_v14 = vpop.f32.mrf.mxu0  ;;  %v3855_v6 = vadd.f32 %v3854_v52, %v3853_v48 }
 0x25d   : > { %v3816_v51 = vpop.f32.mrf.mxu0 }
 0x25e   : > { %v3817_v25 = vadd.f32 %v3816_v51, %v3815_v14 }
 0x260   : > { %v1997_v13 = vadd.f32 %v3817_v25, %v1922_v50 }
 0x262   : > { %v2072_v7 = vadd.f32 %v3855_v6, %v1997_v13  ;;  %v2622_v13 = vld [vmem:[%s6749_s5 + $0x278] sm:$0xff] }
 0x267   : > { %v3818_v54 = vpop.f32.mrf.mxu0 }
 0x268   : > { %v3856_v55 = vpop.f32.mrf.mxu1 }
 0x269   : > { %v3819_v30 = vpop.f32.mrf.mxu0 }
 0x26a   : > { %v3857_v63 = vpop.f32.mrf.mxu1  ;;  %v3820_v19 = vadd.f32 %v3819_v30, %v3818_v54 }
 0x26b   : > { %v3858_v11 = vadd.f32 %v3857_v63, %v3856_v55 }
 0x26c   : > { %v2002_v8 = vadd.f32 %v3820_v19, %v1927_v4 }
 0x26e   : > { %v2077_v49 = vadd.f32 %v3858_v11, %v2002_v8  ;;  %v2669_v11 = vld [vmem:[%s6749_s5 + $0x3f0] sm:$0xff] }
 0x29e   : > { %v3891_v5 = vpop.f32.mrf.mxu0 }
 0x29f   : > { %v3929_v41 = vpop.f32.mrf.mxu1 }
 0x2a0   : > { %v3892_v40 = vpop.f32.mrf.mxu0 }
 0x2a1   : > { %v3930_v46 = vpop.f32.mrf.mxu1  ;;  %v3893_v42 = vadd.f32 %v3892_v40, %v3891_v5 }
 0x2a2   : > { %v3931_v27 = vadd.f32 %v3930_v46, %v3929_v41 }
 0x2a3   : > { %v2147_v56 = vadd.f32 %v3893_v42, %v2072_v7  ;;  %v2654_v42 = vld [vmem:[%s6749_s5 + $0x378] sm:$0xff] }
 0x2a4   : > { %v3894_v1 = vpop.f32.mrf.mxu0 }
 0x2a5   : > { %v3932_v3 = vpop.f32.mrf.mxu1  ;;  %v2222_v16 = vadd.f32 %v3931_v27, %v2147_v56  ;;  %v2621_v56 = vld [vmem:[%s6749_s5 + $0x270] sm:$0xff] }
 0x2a6   : > { %v3895_v44 = vpop.f32.mrf.mxu0 }
 0x2a7   : > { %v3933_v9 = vpop.f32.mrf.mxu1  ;;  %v3896_v59 = vadd.f32 %v3895_v44, %v3894_v1  ;;  %v2637_v44 = vld [vmem:[%s6749_s5 + $0x2f0] sm:$0xff] }
 0x2a8   : > { %v3934_v22 = vadd.f32 %v3933_v9, %v3932_v3 }
 0x2a9   : > { %v2152_v17 = vadd.f32 %v3896_v59, %v2077_v49 }
 0x2ab   : > { %v2227_v61 = vadd.f32 %v3934_v22, %v2152_v17 }
 0x2c2   : > { %v3967_v12 = vpop.f32.mrf.mxu0 }
 0x2c3   : > { %v4005_v15 = vpop.f32.mrf.mxu1 }
 0x2c4   : > { %v3968_v31 = vpop.f32.mrf.mxu0 }
 0x2c5   : > { %v4006_v53 = vpop.f32.mrf.mxu1  ;;  %v3969_v18 = vadd.f32 %v3968_v31, %v3967_v12 }
 0x2c6   : > { %v3970_v20 = vpop.f32.mrf.mxu0  ;;  %v4007_v26 = vadd.f32 %v4006_v53, %v4005_v15 }
 0x2c7   : > { %v4008_v21 = vpop.f32.mrf.mxu1  ;;  %v2297_v24 = vadd.f32 %v3969_v18, %v2222_v16  ;;  %v2653_v18 = vld [vmem:[%s6749_s5 + $0x370] sm:$0xff] }
 0x2c8   : > { %v3971_v28 = vpop.f32.mrf.mxu0 }
 0x2c9   : > { %v4009_v33 = vpop.f32.mrf.mxu1  ;;  %v2372_v0 = vadd.f32 %v4007_v26, %v2297_v24  ;;  %v3972_v34 = vadd.f32 %v3971_v28, %v3970_v20  ;;  %v2636_v20 = vld [vmem:[%s6749_s5 + $0x2e8] sm:$0xff] }
 0x2ca   : > { %v4010_v60 = vadd.f32 %v4009_v33, %v4008_v21  ;;  %v2668_v24 = vld [vmem:[%s6749_s5 + $0x3e8] sm:$0xff] }
 0x2cb   : > { %vm2380_vm12 = vcmp.ge.f32.partialorder %v2372_v0, 0.0  ;;  %v2382_v35 = vmul.f32 0.01, %v2372_v0  ;;  %v2302_v58 = vadd.f32 %v3972_v34, %v2227_v61  ;;  %v2620_v28 = vld [vmem:[%s6749_s5 + $0x268] sm:$0xff]  ;;  %v2635_v61 = vld [vmem:[%s6749_s5 + $0x2e0] sm:$0xff] }
 0x2cc   : > { %v2652_v33 = vld [vmem:[%s6749_s5 + $0x368] sm:$0xff]  ;;  %v2619_v34 = vld [vmem:[%s6749_s5 + $0x260] sm:$0xff] }
 0x2cd   : > { %v2384_v36 = vsel %vm2380_vm12, %v2372_v0, %v2382_v35  ;;  %v2377_v37 = vadd.f32 %v4010_v60, %v2302_v58  ;;  %v2667_v0 = vld [vmem:[%s6749_s5 + $0x3e0] sm:$0xff]  ;;  %v2634_v58 = vld [vmem:[%s6749_s5 + $0x2d8] sm:$0xff] }
 0x2ce   : > { %2393 = vst.msk [vmem:[#allocation4 + $0x7] sm:$0xf] %vm2391_vm9, %v2384_v36  ;;  %v2651_v35 = vld [vmem:[%s6749_s5 + $0x360] sm:$0xff]  ;;  %v2666_v60 = vld [vmem:[%s6749_s5 + $0x3d8] sm:$0xff] }
 0x2cf   : > { %2395 = vst.msk [vmem:[#allocation4 + $0x9] sm:$0xf0] %vm2394_vm11, %v2384_v36  ;;  %vm2381_vm13 = vcmp.ge.f32.partialorder %v2377_v37, 0.0  ;;  %v2383_v39 = vmul.f32 0.01, %v2377_v37  ;;  %v2618_v36 = vld [vmem:[%s6749_s5 + $0x258] sm:$0xff] }
 0x2d1   : > { %v2385_v45 = vsel %vm2381_vm13, %v2377_v37, %v2383_v39  ;;  %v2650_v37 = vld [vmem:[%s6749_s5 + $0x358] sm:$0xff]  ;;  %v2633_v39 = vld [vmem:[%s6749_s5 + $0x2d0] sm:$0xff] }
 0x2d2   : > { %2396 = vst.msk [vmem:[#allocation4 + $0x13] sm:$0xf] %vm2391_vm9, %v2385_v45 }
 0x2d3   : > { %2397 = vst.msk [vmem:[#allocation4 + $0x15] sm:$0xf0] %vm2394_vm11, %v2385_v45  ;;  %v2665_v45 = vld [vmem:[%s6749_s5 + $0x3d0] sm:$0xff] }
 0x2d5   : > { %v2441_v52 = vld [vmem:[#allocation4 + $0x8] sm:$0x1]  ;;  %v2447_v54 = vld [vmem:[#allocation4 + $0x7] sm:$0x1]  ;;  %v2449_v55 = vld [vmem:[#allocation4 + $0x9] sm:$0x1] }
 0x2d6   : > { %v2413_v29 = vld [vmem:[#allocation4 + $0xe] sm:$0x1]  ;;  %v2419_v47 = vld [vmem:[#allocation4 + $0xd] sm:$0x1]  ;;  %v2421_v10 = vld [vmem:[#allocation4 + $0xf] sm:$0x1] }
 0x2d7   : > { %2414 = vst.msk [vmem:[#allocation5 + $0x3] sm:$0x1] %vm2407_vm10, %v2413_v29  ;;  %2420 = vst.msk [vmem:[#allocation5 + $0x6] sm:$0x1] %vm2407_vm10, %v2419_v47  ;;  %v2427_v14 = vld [vmem:[#allocation4 + $0xe] sm:$0x1] }
 0x2d8   : > { %2422 = vst.msk [vmem:[#allocation5 + $0x7] sm:$0x1] %vm2407_vm10, %v2421_v10  ;;  %v2429_v48 = vld [vmem:[#allocation4 + $0x10] sm:$0x1]  ;;  %v2435_v51 = vld [vmem:[#allocation4 + $0xf] sm:$0x1] }
 0x2d9   : > { %2428 = vst.msk [vmem:[#allocation5 + $0xa] sm:$0x1] %vm2407_vm10, %v2427_v14  ;;  %2430 = vst.msk [vmem:[#allocation5 + $0xb] sm:$0x1] %vm2407_vm10, %v2429_v48  ;;  %v2455_v30 = vld [vmem:[#allocation4 + $0x8] sm:$0x1] }
 0x2da   : > { %2436 = vst.msk [vmem:[#allocation5 + $0xe] sm:$0x1] %vm2407_vm10, %v2435_v51  ;;  %2442 = vst.msk [vmem:[#allocation5 + $0x11] sm:$0x1] %vm2407_vm10, %v2441_v52  ;;  %v2457_v32 = vld [vmem:[#allocation4 + $0xa] sm:$0x1] }
 0x2db   : > { %2448 = vst.msk [vmem:[#allocation5 + $0x14] sm:$0x1] %vm2407_vm10, %v2447_v54  ;;  %2450 = vst.msk [vmem:[#allocation5 + $0x15] sm:$0x1] %vm2407_vm10, %v2449_v55  ;;  %v2463_v57 = vld [vmem:[#allocation4 + $0x9] sm:$0x1] }
 0x2dc   : > { %v2445_v63 = vld [vmem:[#allocation4 + $0x14] sm:$0x1]  ;;  %v2451_v5 = vld [vmem:[#allocation4 + $0x13] sm:$0x1]  ;;  %v2453_v41 = vld [vmem:[#allocation4 + $0x15] sm:$0x1] }
 0x2dd   : > { %2456 = vst.msk [vmem:[#allocation5 + $0x18] sm:$0x1] %vm2407_vm10, %v2455_v30  ;;  %2458 = vst.msk [vmem:[#allocation5 + $0x19] sm:$0x1] %vm2407_vm10, %v2457_v32  ;;  %v2459_v43 = vld [vmem:[#allocation4 + $0x14] sm:$0x1] }
 0x2de   : > { %2464 = vst.msk [vmem:[#allocation5 + $0x1c] sm:$0x1] %vm2407_vm10, %v2463_v57  ;;  %2446 = vst.msk [vmem:[#allocation5 + $0x13] sm:$0x1] %vm2407_vm10, %v2445_v63  ;;  %v2461_v38 = vld [vmem:[#allocation4 + $0x16] sm:$0x1] }
 0x2df   : > { %2452 = vst.msk [vmem:[#allocation5 + $0x16] sm:$0x1] %vm2407_vm10, %v2451_v5  ;;  %2454 = vst.msk [vmem:[#allocation5 + $0x17] sm:$0x1] %vm2407_vm10, %v2453_v41  ;;  %v2467_v40 = vld [vmem:[#allocation4 + $0x15] sm:$0x1] }
 0x2e0   : > { %2460 = vst.msk [vmem:[#allocation5 + $0x1a] sm:$0x1] %vm2407_vm10, %v2459_v43  ;;  %2462 = vst.msk [vmem:[#allocation5 + $0x1b] sm:$0x1] %vm2407_vm10, %v2461_v38  ;;  %v2473_v23 = vld [vmem:[#allocation4 + $0xe] sm:$0x1] }
 0x2e1   : > { %2468 = vst.msk [vmem:[#allocation5 + $0x1e] sm:$0x1] %vm2407_vm10, %v2467_v40  ;;  %v2477_v25 = vld [vmem:[#allocation4 + $0x1a] sm:$0x1]  ;;  %v2479_v46 = vld [vmem:[#allocation4 + $0xd] sm:$0x1] }
 0x2e2   : > { %2474 = vst.msk [vmem:[#allocation5 + $0x21] sm:$0x1] %vm2407_vm10, %v2473_v23  ;;  %2478 = vst.msk [vmem:[#allocation5 + $0x23] sm:$0x1] %vm2407_vm10, %v2477_v25  ;;  %v2481_v50 = vld [vmem:[#allocation4 + $0xf] sm:$0x1] }
 0x2e3   : > { %2480 = vst.msk [vmem:[#allocation5 + $0x24] sm:$0x1] %vm2407_vm10, %v2479_v46  ;;  %v2483_v62 = vld [vmem:[#allocation4 + $0x19] sm:$0x1]  ;;  %v2485_v1 = vld [vmem:[#allocation4 + $0x1b] sm:$0x1] }
 0x2e4   : > { %v2535_v2 = vld [vmem:[#allocation5] sm:$0xff]  ;;  %2482 = vst.msk [vmem:[#allocation5 + $0x25] sm:$0x1] %vm2407_vm10, %v2481_v50  ;;  %2484 = vst.msk [vmem:[#allocation5 + $0x26] sm:$0x1] %vm2407_vm10, %v2483_v62  ;;  %v2536_v6 = vld [vmem:[#allocation5 + $0x8] sm:$0xff] }
 0x2e5   : > { %2486 = vst.msk [vmem:[#allocation5 + $0x27] sm:$0x1] %vm2407_vm10, %v2485_v1  ;;  %v2487_v19 = vld [vmem:[#allocation4 + $0xe] sm:$0x1]  ;;  %v2489_v3 = vld [vmem:[#allocation4 + $0x10] sm:$0x1]  ;;  %v2814_v4 = vcombine.high %v2535_v2, %v2535_v2  ;;  %v2815_v9 = vcombine.high %v2536_v6, %v2536_v6 }
 0x2e6   : > { %2488 = vst.msk [vmem:[#allocation5 + $0x28] sm:$0x1] %vm2407_vm10, %v2487_v19  ;;  %2490 = vst.msk [vmem:[#allocation5 + $0x29] sm:$0x1] %vm2407_vm10, %v2489_v3  ;;  %v2491_v7 = vld [vmem:[#allocation4 + $0x1a] sm:$0x1] }
 0x2e7   : > { %v2493_v8 = vld [vmem:[#allocation4 + $0x1c] sm:$0x1]  ;;  %2492 = vst.msk [vmem:[#allocation5 + $0x2a] sm:$0x1] %vm2407_vm10, %v2491_v7  ;;  %v2495_v59 = vld [vmem:[#allocation4 + $0xf] sm:$0x1]  ;;  %2894 = vmatprep.mubr.f32.mxu0 %v2814_v4  ;;  %2964 = vmatprep.mubr.f32.mxu1 %v2815_v9 }
 0x2e8   : > { %2494 = vst.msk [vmem:[#allocation5 + $0x2b] sm:$0x1] %vm2407_vm10, %v2493_v8  ;;  %v2499_v12 = vld [vmem:[#allocation4 + $0x1b] sm:$0x1]  ;;  %v2505_v15 = vld [vmem:[#allocation4 + $0x14] sm:$0x1]  ;;  %2895 = vmatmul.mubr.f32.vlgmr.msra.gmra.mxu0 %v2535_v2  ;;  %2965 = vmatmul.mubr.f32.vlgmr.msra.gmra.mxu1 %v2536_v6 }
 0x2e9   : > { %2496 = vst.msk [vmem:[#allocation5 + $0x2c] sm:$0x1] %vm2407_vm10, %v2495_v59  ;;  %2500 = vst.msk [vmem:[#allocation5 + $0x2e] sm:$0x1] %vm2407_vm10, %v2499_v12  ;;  %v2511_v49 = vld [vmem:[#allocation4 + $0x13] sm:$0x1]  ;;  %4082 = vmatpush3.msra.mxu0 %v2622_v13  ;;  %4117 = vmatpush3.msra.mxu1 %v2654_v42 }
 0x2ea   : > { %2506 = vst.msk [vmem:[#allocation5 + $0x31] sm:$0x1] %vm2407_vm10, %v2505_v15  ;;  %v2513_v27 = vld [vmem:[#allocation4 + $0x15] sm:$0x1]  ;;  %v2519_v31 = vld [vmem:[#allocation4 + $0x14] sm:$0x1]  ;;  %4083 = vmatprep.subr.mxu0 %v2637_v44  ;;  %4118 = vmatprep.subr.mxu1 %v2669_v11 }
 0x2eb   : > { %v6111_v53 = vld [vmem:[#allocation5 + $0x10] sm:$0xff]  ;;  %2512 = vst.msk [vmem:[#allocation5 + $0x34] sm:$0x1] %vm2407_vm10, %v2511_v49  ;;  %2514 = vst.msk [vmem:[#allocation5 + $0x35] sm:$0x1] %vm2407_vm10, %v2513_v27  ;;  %v6124_v22 = vld [vmem:[#allocation5 + $0x18] sm:$0xff]  ;;  %4084 = vmatpush3.msra.mxu0 %v2621_v56  ;;  %4119 = vmatpush3.msra.mxu1 %v2653_v18 }
 0x2ec   : > { %2520 = vst.msk [vmem:[#allocation5 + $0x38] sm:$0x1] %vm2407_vm10, %v2519_v31  ;;  %v2521_v16 = vld [vmem:[#allocation4 + $0x16] sm:$0x1]  ;;  %v2527_v17 = vld [vmem:[#allocation4 + $0x15] sm:$0x1]  ;;  %v2816_v21 = vcombine.high %v6111_v53, %v6111_v53  ;;  %v2817_v26 = vcombine.high %v6124_v22, %v6124_v22  ;;  %4085 = vmatprep.subr.mxu0 %v2636_v20  ;;  %4120 = vmatprep.subr.mxu1 %v2668_v24 }
 0x2ed   : > { %2522 = vst.msk [vmem:[#allocation5 + $0x39] sm:$0x1] %vm2407_vm10, %v2521_v16  ;;  %2528 = vst.msk [vmem:[#allocation5 + $0x3c] sm:$0x1] %vm2407_vm10, %v2527_v17  ;;  %4086 = vmatpush3.msra.mxu0 %v2620_v28  ;;  %4121 = vmatpush3.msra.mxu1 %v2652_v33  ;;  %v2617_v29 = vld [vmem:[%s6749_s5 + $0x250] sm:$0xff]  ;;  %v2632_v10 = vld [vmem:[%s6749_s5 + $0x2c8] sm:$0xff] }
 0x2ee   : > { %3034 = vmatprep.mubr.f32.mxu0 %v2816_v21  ;;  %3104 = vmatprep.mubr.f32.mxu1 %v2817_v26  ;;  %v2649_v47 = vld [vmem:[%s6749_s5 + $0x350] sm:$0xff]  ;;  %v2664_v14 = vld [vmem:[%s6749_s5 + $0x3c8] sm:$0xff]  ;;  %v2631_v52 = vld [vmem:[%s6749_s5 + $0x2c0] sm:$0xff] }
 0x2ef   : > { %4087 = vmatprep.subr.mxu0 %v2635_v61  ;;  %4122 = vmatprep.subr.mxu1 %v2667_v0  ;;  %v2616_v48 = vld [vmem:[%s6749_s5 + $0x248] sm:$0xff]  ;;  %v2663_v54 = vld [vmem:[%s6749_s5 + $0x3c0] sm:$0xff]  ;;  %v2630_v32 = vld [vmem:[%s6749_s5 + $0x2b8] sm:$0xff] }
 0x2f0   : > { %4088 = vmatpush3.msra.mxu0 %v2619_v34  ;;  %4123 = vmatpush3.msra.mxu1 %v2651_v35  ;;  %v2648_v51 = vld [vmem:[%s6749_s5 + $0x348] sm:$0xff]  ;;  %v2615_v55 = vld [vmem:[%s6749_s5 + $0x240] sm:$0xff]  ;;  %v2662_v57 = vld [vmem:[%s6749_s5 + $0x3b8] sm:$0xff] }
 0x2f1   : > { %4089 = vmatprep.subr.mxu0 %v2634_v58  ;;  %4124 = vmatprep.subr.mxu1 %v2666_v60  ;;  %v2647_v30 = vld [vmem:[%s6749_s5 + $0x340] sm:$0xff]  ;;  %v2614_v63 = vld [vmem:[%s6749_s5 + $0x238] sm:$0xff]  ;;  %v2629_v41 = vld [vmem:[%s6749_s5 + $0x2b0] sm:$0xff] }
 0x2f2   : > { %4090 = vmatpush3.msra.mxu0 %v2618_v36  ;;  %4125 = vmatpush3.msra.mxu1 %v2650_v37  ;;  %v2646_v5 = vld [vmem:[%s6749_s5 + $0x338] sm:$0xff]  ;;  %v2661_v43 = vld [vmem:[%s6749_s5 + $0x3b0] sm:$0xff]  ;;  %v2628_v23 = vld [vmem:[%s6749_s5 + $0x2a8] sm:$0xff] }
 0x2f3   : > { %4091 = vmatprep.subr.mxu0 %v2633_v39  ;;  %4126 = vmatprep.subr.mxu1 %v2665_v45  ;;  %v2613_v38 = vld [vmem:[%s6749_s5 + $0x230] sm:$0xff]  ;;  %v2660_v25 = vld [vmem:[%s6749_s5 + $0x3a8] sm:$0xff]  ;;  %v2627_v62 = vld [vmem:[%s6749_s5 + $0x2a0] sm:$0xff] }
 0x2f4   : > { %4092 = vmatpush3.msra.mxu0 %v2617_v29  ;;  %4127 = vmatpush3.msra.mxu1 %v2649_v47  ;;  %v2645_v40 = vld [vmem:[%s6749_s5 + $0x330] sm:$0xff]  ;;  %v2612_v46 = vld [vmem:[%s6749_s5 + $0x228] sm:$0xff]  ;;  %v2659_v1 = vld [vmem:[%s6749_s5 + $0x3a0] sm:$0xff] }
 0x2f5   : > { %4093 = vmatprep.subr.mxu0 %v2632_v10  ;;  %4128 = vmatprep.subr.mxu1 %v2664_v14  ;;  %v2644_v50 = vld [vmem:[%s6749_s5 + $0x328] sm:$0xff]  ;;  %v2611_v2 = vld [vmem:[%s6749_s5 + $0x220] sm:$0xff]  ;;  %v2626_v19 = vld [vmem:[%s6749_s5 + $0x298] sm:$0xff] }
 0x2f6   : > { %4094 = vmatpush3.msra.mxu0 %v2616_v48  ;;  %4129 = vmatpush3.msra.mxu1 %v2648_v51  ;;  %v2643_v13 = vld [vmem:[%s6749_s5 + $0x320] sm:$0xff]  ;;  %v2658_v3 = vld [vmem:[%s6749_s5 + $0x398] sm:$0xff]  ;;  %v2625_v42 = vld [vmem:[%s6749_s5 + $0x290] sm:$0xff] }
 0x2f7   : > { %4095 = vmatprep.subr.mxu0 %v2631_v52  ;;  %4130 = vmatprep.subr.mxu1 %v2663_v54  ;;  %v2610_v4 = vld [vmem:[%s6749_s5 + $0x218] sm:$0xff]  ;;  %v2657_v44 = vld [vmem:[%s6749_s5 + $0x390] sm:$0xff]  ;;  %v2624_v9 = vld [vmem:[%s6749_s5 + $0x288] sm:$0xff] }
 0x2f8   : > { %4096 = vmatpush3.msra.mxu0 %v2615_v55  ;;  %4131 = vmatpush3.msra.mxu1 %v2647_v30  ;;  %v2642_v6 = vld [vmem:[%s6749_s5 + $0x318] sm:$0xff]  ;;  %v2609_v7 = vld [vmem:[%s6749_s5 + $0x210] sm:$0xff]  ;;  %v2656_v11 = vld [vmem:[%s6749_s5 + $0x388] sm:$0xff] }
 0x2f9   : > { %4097 = vmatprep.subr.mxu0 %v2630_v32  ;;  %4132 = vmatprep.subr.mxu1 %v2662_v57  ;;  %v2641_v8 = vld [vmem:[%s6749_s5 + $0x310] sm:$0xff]  ;;  %v2608_v56 = vld [vmem:[%s6749_s5 + $0x208] sm:$0xff]  ;;  %v2623_v12 = vld [vmem:[%s6749_s5 + $0x280] sm:$0xff] }
 0x2fa   : > { %4098 = vmatpush3.msra.mxu0 %v2614_v63  ;;  %4133 = vmatpush3.msra.mxu1 %v2646_v5  ;;  %v2640_v59 = vld [vmem:[%s6749_s5 + $0x308] sm:$0xff]  ;;  %v2655_v15 = vld [vmem:[%s6749_s5 + $0x380] sm:$0xff]  ;;  %v2702_v31 = vld [vmem:[%s6749_s5 + $0x4f8] sm:$0xff] }
 0x2fb   : > { %4099 = vmatprep.subr.mxu0 %v2629_v41  ;;  %4134 = vmatprep.subr.mxu1 %v2661_v43  ;;  %v2607_v49 = vld [vmem:[%s6749_s5 + $0x200] sm:$0xff]  ;;  %v6298_v16 = vld [vmem:[#allocation5 + $0x20] sm:$0xff]  ;;  %v2734_v17 = vld [vmem:[%s6749_s5 + $0x5f8] sm:$0xff] }
 0x2fc   : > { %4100 = vmatpush3.msra.mxu0 %v2613_v38  ;;  %4135 = vmatpush3.msra.mxu1 %v2645_v40  ;;  %v2639_v27 = vld [vmem:[%s6749_s5 + $0x300] sm:$0xff]  ;;  %v2686_v18 = vld [vmem:[%s6749_s5 + $0x478] sm:$0xff]  ;;  %v2818_v24 = vcombine.high %v6298_v16, %v6298_v16  ;;  %v2701_v26 = vld [vmem:[%s6749_s5 + $0x4f0] sm:$0xff] }
 0x2fd   : > { %4101 = vmatprep.subr.mxu0 %v2628_v23  ;;  %4136 = vmatprep.subr.mxu1 %v2660_v25  ;;  %v6306_v20 = vld [vmem:[#allocation5 + $0x28] sm:$0xff]  ;;  %v2717_v33 = vld [vmem:[%s6749_s5 + $0x570] sm:$0xff]  ;;  %v2700_v61 = vld [vmem:[%s6749_s5 + $0x4e8] sm:$0xff] }
 0x2fe   : > { %4102 = vmatpush3.msra.mxu0 %v2612_v46  ;;  %4137 = vmatpush3.msra.mxu1 %v2644_v50  ;;  %v2718_v21 = vld [vmem:[%s6749_s5 + $0x578] sm:$0xff]  ;;  %v2819_v28 = vcombine.high %v6306_v20, %v6306_v20  ;;  %v2732_v0 = vld [vmem:[%s6749_s5 + $0x5e8] sm:$0xff]  ;;  %v2699_v58 = vld [vmem:[%s6749_s5 + $0x4e0] sm:$0xff] }
 0x2ff   : > { %4103 = vmatprep.subr.mxu0 %v2627_v62  ;;  %4138 = vmatprep.subr.mxu1 %v2659_v1  ;;  %v2684_v34 = vld [vmem:[%s6749_s5 + $0x468] sm:$0xff]  ;;  %v2731_v60 = vld [vmem:[%s6749_s5 + $0x5e0] sm:$0xff]  ;;  %v2698_v39 = vld [vmem:[%s6749_s5 + $0x4d8] sm:$0xff] }
 0x300   : > { %4104 = vmatpush3.msra.mxu0 %v2611_v2  ;;  %4139 = vmatpush3.msra.mxu1 %v2643_v13  ;;  %v2716_v35 = vld [vmem:[%s6749_s5 + $0x568] sm:$0xff]  ;;  %v2683_v36 = vld [vmem:[%s6749_s5 + $0x460] sm:$0xff]  ;;  %v2730_v45 = vld [vmem:[%s6749_s5 + $0x5d8] sm:$0xff] }
 0x301   : > { %4105 = vmatprep.subr.mxu0 %v2626_v19  ;;  %4140 = vmatprep.subr.mxu1 %v2658_v3  ;;  %v2715_v37 = vld [vmem:[%s6749_s5 + $0x560] sm:$0xff]  ;;  %v2682_v29 = vld [vmem:[%s6749_s5 + $0x458] sm:$0xff]  ;;  %v2697_v10 = vld [vmem:[%s6749_s5 + $0x4d0] sm:$0xff] }
 0x302   : > { %4106 = vmatpush3.msra.mxu0 %v2610_v4  ;;  %4141 = vmatpush3.msra.mxu1 %v2642_v6  ;;  %v2714_v47 = vld [vmem:[%s6749_s5 + $0x558] sm:$0xff]  ;;  %v2729_v14 = vld [vmem:[%s6749_s5 + $0x5d0] sm:$0xff]  ;;  %v2696_v52 = vld [vmem:[%s6749_s5 + $0x4c8] sm:$0xff] }
 0x303   : > { %4107 = vmatprep.subr.mxu0 %v2625_v42  ;;  %4142 = vmatprep.subr.mxu1 %v2657_v44  ;;  %v2681_v48 = vld [vmem:[%s6749_s5 + $0x450] sm:$0xff]  ;;  %v2728_v54 = vld [vmem:[%s6749_s5 + $0x5c8] sm:$0xff]  ;;  %v2695_v32 = vld [vmem:[%s6749_s5 + $0x4c0] sm:$0xff] }
 0x304   : > { %4108 = vmatpush3.msra.mxu0 %v2609_v7  ;;  %4143 = vmatpush3.msra.mxu1 %v2641_v8  ;;  %v2713_v51 = vld [vmem:[%s6749_s5 + $0x550] sm:$0xff]  ;;  %v2680_v55 = vld [vmem:[%s6749_s5 + $0x448] sm:$0xff]  ;;  %v2727_v57 = vld [vmem:[%s6749_s5 + $0x5c0] sm:$0xff] }
 0x305   : > { %4109 = vmatprep.subr.mxu0 %v2624_v9  ;;  %4144 = vmatprep.subr.mxu1 %v2656_v11  ;;  %v2712_v30 = vld [vmem:[%s6749_s5 + $0x548] sm:$0xff]  ;;  %v2679_v63 = vld [vmem:[%s6749_s5 + $0x440] sm:$0xff]  ;;  %v2694_v41 = vld [vmem:[%s6749_s5 + $0x4b8] sm:$0xff] }
 0x306   : > { %4110 = vmatpush3.msra.mxu0 %v2608_v56  ;;  %4145 = vmatpush3.msra.mxu1 %v2640_v59  ;;  %v2711_v5 = vld [vmem:[%s6749_s5 + $0x540] sm:$0xff]  ;;  %v2726_v43 = vld [vmem:[%s6749_s5 + $0x5b8] sm:$0xff]  ;;  %v2693_v23 = vld [vmem:[%s6749_s5 + $0x4b0] sm:$0xff] }
 0x307   : > { %4111 = vmatprep.subr.mxu0 %v2623_v12  ;;  %4146 = vmatprep.subr.mxu1 %v2655_v15  ;;  %v2678_v38 = vld [vmem:[%s6749_s5 + $0x438] sm:$0xff]  ;;  %v2725_v25 = vld [vmem:[%s6749_s5 + $0x5b0] sm:$0xff]  ;;  %v2692_v62 = vld [vmem:[%s6749_s5 + $0x4a8] sm:$0xff] }
 0x308   : > { %4112 = vmatpush3.msra.mxu0 %v2607_v49  ;;  %4147 = vmatpush3.msra.mxu1 %v2639_v27  ;;  %v2710_v40 = vld [vmem:[%s6749_s5 + $0x538] sm:$0xff]  ;;  %v2677_v46 = vld [vmem:[%s6749_s5 + $0x430] sm:$0xff]  ;;  %v2724_v1 = vld [vmem:[%s6749_s5 + $0x5a8] sm:$0xff] }
 0x309   : > { %3035 = vmatmul.mubr.f32.vlgmr.msra.gmra.mxu0 %v6111_v53  ;;  %3105 = vmatmul.mubr.f32.vlgmr.msra.gmra.mxu1 %v6124_v22  ;;  %v2733_v53 = vld [vmem:[%s6749_s5 + $0x5f0] sm:$0xff]  ;;  %v2676_v2 = vld [vmem:[%s6749_s5 + $0x428] sm:$0xff]  ;;  %v2691_v19 = vld [vmem:[%s6749_s5 + $0x4a0] sm:$0xff] }
 0x30a   : > { %4151 = vmatprep.subr.mxu0 %v2702_v31  ;;  %4186 = vmatprep.subr.mxu1 %v2734_v17  ;;  %v2685_v22 = vld [vmem:[%s6749_s5 + $0x470] sm:$0xff]  ;;  %v2708_v13 = vld [vmem:[%s6749_s5 + $0x528] sm:$0xff]  ;;  %v2723_v3 = vld [vmem:[%s6749_s5 + $0x5a0] sm:$0xff] }
 0x30b   : > { %4152 = vmatpush3.msra.mxu0 %v2686_v18  ;;  %3174 = vmatprep.mubr.f32.mxu0 %v2818_v24  ;;  %v2709_v50 = vld [vmem:[%s6749_s5 + $0x530] sm:$0xff]  ;;  %v2675_v4 = vld [vmem:[%s6749_s5 + $0x420] sm:$0xff]  ;;  %v2690_v42 = vld [vmem:[%s6749_s5 + $0x498] sm:$0xff] }
 0x30c   : > { %4187 = vmatpush3.msra.mxu1 %v2718_v21  ;;  %3244 = vmatprep.mubr.f32.mxu1 %v2819_v28  ;;  %v2707_v6 = vld [vmem:[%s6749_s5 + $0x520] sm:$0xff]  ;;  %v2722_v44 = vld [vmem:[%s6749_s5 + $0x598] sm:$0xff]  ;;  %v2689_v9 = vld [vmem:[%s6749_s5 + $0x490] sm:$0xff] }
 0x30d   : > { %4153 = vmatprep.subr.mxu0 %v2701_v26  ;;  %4188 = vmatprep.subr.mxu1 %v2733_v53  ;;  %v2674_v7 = vld [vmem:[%s6749_s5 + $0x418] sm:$0xff]  ;;  %v2721_v11 = vld [vmem:[%s6749_s5 + $0x590] sm:$0xff]  ;;  %v2688_v12 = vld [vmem:[%s6749_s5 + $0x488] sm:$0xff] }
 0x30e   : > { %4154 = vmatpush3.msra.mxu0 %v2685_v22  ;;  %4189 = vmatpush3.msra.mxu1 %v2717_v33  ;;  %v2706_v8 = vld [vmem:[%s6749_s5 + $0x518] sm:$0xff]  ;;  %v2673_v56 = vld [vmem:[%s6749_s5 + $0x410] sm:$0xff]  ;;  %v2720_v15 = vld [vmem:[%s6749_s5 + $0x588] sm:$0xff] }
 0x30f   : > { %4155 = vmatprep.subr.mxu0 %v2700_v61  ;;  %4190 = vmatprep.subr.mxu1 %v2732_v0  ;;  %v2705_v59 = vld [vmem:[%s6749_s5 + $0x510] sm:$0xff]  ;;  %v2672_v49 = vld [vmem:[%s6749_s5 + $0x408] sm:$0xff]  ;;  %v2687_v31 = vld [vmem:[%s6749_s5 + $0x480] sm:$0xff] }
 0x310   : > { %4156 = vmatpush3.msra.mxu0 %v2684_v34  ;;  %4191 = vmatpush3.msra.mxu1 %v2716_v35  ;;  %v2704_v27 = vld [vmem:[%s6749_s5 + $0x508] sm:$0xff]  ;;  %v2719_v17 = vld [vmem:[%s6749_s5 + $0x580] sm:$0xff]  ;;  %v2766_v24 = vld [vmem:[%s6749_s5 + $0x6f8] sm:$0xff] }
 0x311   : > { %4157 = vmatprep.subr.mxu0 %v2699_v58  ;;  %4192 = vmatprep.subr.mxu1 %v2731_v60  ;;  %v2671_v18 = vld [vmem:[%s6749_s5 + $0x400] sm:$0xff]  ;;  %v2798_v28 = vld [vmem:[%s6749_s5 + $0x7f8] sm:$0xff]  ;;  %v6508_v22 = vld [vmem:[#allocation5 + $0x38] sm:$0xff] }
 0x312   : > { %4158 = vmatpush3.msra.mxu0 %v2683_v36  ;;  %4193 = vmatpush3.msra.mxu1 %v2715_v37  ;;  %v2703_v21 = vld [vmem:[%s6749_s5 + $0x500] sm:$0xff]  ;;  %v2750_v53 = vld [vmem:[%s6749_s5 + $0x678] sm:$0xff]  ;;  %v2765_v0 = vld [vmem:[%s6749_s5 + $0x6f0] sm:$0xff]  ;;  %v2821_v34 = vcombine.high %v6508_v22, %v6508_v22 }
 0x313   : > { %4159 = vmatprep.subr.mxu0 %v2698_v39  ;;  %4194 = vmatprep.subr.mxu1 %v2730_v45  ;;  %v6500_v26 = vld [vmem:[#allocation5 + $0x30] sm:$0xff]  ;;  %v2782_v33 = vld [vmem:[%s6749_s5 + $0x778] sm:$0xff]  ;;  %v2781_v35 = vld [vmem:[%s6749_s5 + $0x770] sm:$0xff] }
 0x314   : > { %4160 = vmatpush3.msra.mxu0 %v2682_v29  ;;  %4195 = vmatpush3.msra.mxu1 %v2714_v47  ;;  %v2820_v61 = vcombine.high %v6500_v26, %v6500_v26  ;;  %v2764_v58 = vld [vmem:[%s6749_s5 + $0x6e8] sm:$0xff]  ;;  %v2763_v39 = vld [vmem:[%s6749_s5 + $0x6e0] sm:$0xff] }
 0x315   : > { %4161 = vmatprep.subr.mxu0 %v2697_v10  ;;  %4196 = vmatprep.subr.mxu1 %v2729_v14  ;;  %v2796_v60 = vld [vmem:[%s6749_s5 + $0x7e8] sm:$0xff]  ;;  %v2795_v45 = vld [vmem:[%s6749_s5 + $0x7e0] sm:$0xff]  ;;  %v2762_v10 = vld [vmem:[%s6749_s5 + $0x6d8] sm:$0xff] }
 0x316   : > { %4162 = vmatpush3.msra.mxu0 %v2681_v48  ;;  %4197 = vmatpush3.msra.mxu1 %v2713_v51  ;;  %v2748_v36 = vld [vmem:[%s6749_s5 + $0x668] sm:$0xff]  ;;  %v2747_v29 = vld [vmem:[%s6749_s5 + $0x660] sm:$0xff]  ;;  %v2794_v14 = vld [vmem:[%s6749_s5 + $0x7d8] sm:$0xff] }
 0x317   : > { %4163 = vmatprep.subr.mxu0 %v2696_v52  ;;  %4198 = vmatprep.subr.mxu1 %v2728_v54  ;;  %v2780_v37 = vld [vmem:[%s6749_s5 + $0x768] sm:$0xff]  ;;  %v2779_v47 = vld [vmem:[%s6749_s5 + $0x760] sm:$0xff]  ;;  %v2746_v48 = vld [vmem:[%s6749_s5 + $0x658] sm:$0xff] }
 0x318   : > { %4164 = vmatpush3.msra.mxu0 %v2680_v55  ;;  %4199 = vmatpush3.msra.mxu1 %v2712_v30  ;;  %v2778_v51 = vld [vmem:[%s6749_s5 + $0x758] sm:$0xff]  ;;  %v2761_v52 = vld [vmem:[%s6749_s5 + $0x6d0] sm:$0xff] }
 0x319   : > { %4165 = vmatprep.subr.mxu0 %v2695_v32  ;;  %4200 = vmatprep.subr.mxu1 %v2727_v57  ;;  %v2793_v54 = vld [vmem:[%s6749_s5 + $0x7d0] sm:$0xff]  ;;  %v2760_v32 = vld [vmem:[%s6749_s5 + $0x6c8] sm:$0xff] }
 0x31a   : > { %4166 = vmatpush3.msra.mxu0 %v2679_v63  ;;  %4201 = vmatpush3.msra.mxu1 %v2711_v5  ;;  %v2745_v55 = vld [vmem:[%s6749_s5 + $0x650] sm:$0xff]  ;;  %v2792_v57 = vld [vmem:[%s6749_s5 + $0x7c8] sm:$0xff] }
 0x31b   : > { %4167 = vmatprep.subr.mxu0 %v2694_v41  ;;  %4202 = vmatprep.subr.mxu1 %v2726_v43  ;;  %v2777_v30 = vld [vmem:[%s6749_s5 + $0x750] sm:$0xff]  ;;  %v2744_v63 = vld [vmem:[%s6749_s5 + $0x648] sm:$0xff]  ;;  %v2759_v41 = vld [vmem:[%s6749_s5 + $0x6c0] sm:$0xff] }
 0x31c   : > { %4168 = vmatpush3.msra.mxu0 %v2678_v38  ;;  %4203 = vmatpush3.msra.mxu1 %v2710_v40  ;;  %v2776_v5 = vld [vmem:[%s6749_s5 + $0x748] sm:$0xff]  ;;  %v2791_v43 = vld [vmem:[%s6749_s5 + $0x7c0] sm:$0xff] }
 0x31d   : > { %4169 = vmatprep.subr.mxu0 %v2693_v23  ;;  %4204 = vmatprep.subr.mxu1 %v2725_v25  ;;  %v2743_v38 = vld [vmem:[%s6749_s5 + $0x640] sm:$0xff]  ;;  %v2758_v23 = vld [vmem:[%s6749_s5 + $0x6b8] sm:$0xff] }
 0x31e   : > { %4170 = vmatpush3.msra.mxu0 %v2677_v46  ;;  %4205 = vmatpush3.msra.mxu1 %v2709_v50  ;;  %v2775_v40 = vld [vmem:[%s6749_s5 + $0x740] sm:$0xff]  ;;  %v2790_v25 = vld [vmem:[%s6749_s5 + $0x7b8] sm:$0xff] }
 0x31f   : > { %4171 = vmatprep.subr.mxu0 %v2692_v62  ;;  %4206 = vmatprep.subr.mxu1 %v2724_v1  ;;  %v2742_v46 = vld [vmem:[%s6749_s5 + $0x638] sm:$0xff]  ;;  %v2757_v62 = vld [vmem:[%s6749_s5 + $0x6b0] sm:$0xff] }
 0x320   : > { %4172 = vmatpush3.msra.mxu0 %v2676_v2  ;;  %4207 = vmatpush3.msra.mxu1 %v2708_v13  ;;  %v2774_v50 = vld [vmem:[%s6749_s5 + $0x738] sm:$0xff]  ;;  %v2789_v1 = vld [vmem:[%s6749_s5 + $0x7b0] sm:$0xff] }
 0x321   : > { %4173 = vmatprep.subr.mxu0 %v2691_v19  ;;  %4208 = vmatprep.subr.mxu1 %v2723_v3  ;;  %v2741_v2 = vld [vmem:[%s6749_s5 + $0x630] sm:$0xff]  ;;  %v2756_v19 = vld [vmem:[%s6749_s5 + $0x6a8] sm:$0xff] }
 0x322   : > { %4174 = vmatpush3.msra.mxu0 %v2675_v4  ;;  %4209 = vmatpush3.msra.mxu1 %v2707_v6  ;;  %v2773_v13 = vld [vmem:[%s6749_s5 + $0x730] sm:$0xff]  ;;  %v2788_v3 = vld [vmem:[%s6749_s5 + $0x7a8] sm:$0xff] }
 0x323   : > { %4175 = vmatprep.subr.mxu0 %v2690_v42  ;;  %4210 = vmatprep.subr.mxu1 %v2722_v44  ;;  %v2740_v4 = vld [vmem:[%s6749_s5 + $0x628] sm:$0xff]  ;;  %v2755_v42 = vld [vmem:[%s6749_s5 + $0x6a0] sm:$0xff] }
 0x324   : > { %4176 = vmatpush3.msra.mxu0 %v2674_v7  ;;  %4211 = vmatpush3.msra.mxu1 %v2706_v8  ;;  %v2772_v6 = vld [vmem:[%s6749_s5 + $0x728] sm:$0xff]  ;;  %v2787_v44 = vld [vmem:[%s6749_s5 + $0x7a0] sm:$0xff] }
 0x325   : > { %4177 = vmatprep.subr.mxu0 %v2689_v9  ;;  %4212 = vmatprep.subr.mxu1 %v2721_v11  ;;  %v2739_v7 = vld [vmem:[%s6749_s5 + $0x620] sm:$0xff]  ;;  %v2754_v9 = vld [vmem:[%s6749_s5 + $0x698] sm:$0xff] }
 0x326   : > { %4178 = vmatpush3.msra.mxu0 %v2673_v56  ;;  %4213 = vmatpush3.msra.mxu1 %v2705_v59  ;;  %v2771_v8 = vld [vmem:[%s6749_s5 + $0x720] sm:$0xff]  ;;  %v2786_v11 = vld [vmem:[%s6749_s5 + $0x798] sm:$0xff] }
 0x327   : > { %4179 = vmatprep.subr.mxu0 %v2688_v12  ;;  %4214 = vmatprep.subr.mxu1 %v2720_v15  ;;  %v2738_v56 = vld [vmem:[%s6749_s5 + $0x618] sm:$0xff]  ;;  %v2753_v12 = vld [vmem:[%s6749_s5 + $0x690] sm:$0xff] }
 0x328   : > { %4180 = vmatpush3.msra.mxu0 %v2672_v49  ;;  %4215 = vmatpush3.msra.mxu1 %v2704_v27  ;;  %v2770_v59 = vld [vmem:[%s6749_s5 + $0x718] sm:$0xff]  ;;  %v2785_v15 = vld [vmem:[%s6749_s5 + $0x790] sm:$0xff] }
 0x329   : > { %4181 = vmatprep.subr.mxu0 %v2687_v31  ;;  %4216 = vmatprep.subr.mxu1 %v2719_v17  ;;  %v2737_v49 = vld [vmem:[%s6749_s5 + $0x610] sm:$0xff]  ;;  %v2752_v31 = vld [vmem:[%s6749_s5 + $0x688] sm:$0xff] }
 0x32a   : > { %4182 = vmatpush3.msra.mxu0 %v2671_v18  ;;  %4217 = vmatpush3.msra.mxu1 %v2703_v21  ;;  %v2769_v27 = vld [vmem:[%s6749_s5 + $0x710] sm:$0xff]  ;;  %v2784_v17 = vld [vmem:[%s6749_s5 + $0x788] sm:$0xff] }
 0x32b   : > { %3175 = vmatmul.mubr.f32.vlgmr.msra.gmra.mxu0 %v6298_v16  ;;  %3245 = vmatmul.mubr.f32.vlgmr.msra.gmra.mxu1 %v6306_v20  ;;  %v2797_v16 = vld [vmem:[%s6749_s5 + $0x7f0] sm:$0xff]  ;;  %v2736_v18 = vld [vmem:[%s6749_s5 + $0x608] sm:$0xff] }
 0x32c   : > { %4221 = vmatprep.subr.mxu0 %v2766_v24  ;;  %4256 = vmatprep.subr.mxu1 %v2798_v28  ;;  %v2749_v20 = vld [vmem:[%s6749_s5 + $0x670] sm:$0xff]  ;;  %v2768_v21 = vld [vmem:[%s6749_s5 + $0x708] sm:$0xff]  ;;  %v2751_v24 = vld [vmem:[%s6749_s5 + $0x680] sm:$0xff] }
 0x32d   : > { %4222 = vmatpush3.msra.mxu0 %v2750_v53  ;;  %3314 = vmatprep.mubr.f32.mxu0 %v2820_v61  ;;  %v2783_v28 = vld [vmem:[%s6749_s5 + $0x780] sm:$0xff] }
 0x32e   : > { %4257 = vmatpush3.msra.mxu1 %v2782_v33  ;;  %3384 = vmatprep.mubr.f32.mxu1 %v2821_v34  ;;  %v2735_v53 = vld [vmem:[%s6749_s5 + $0x600] sm:$0xff] }
 0x32f   : > { %4223 = vmatprep.subr.mxu0 %v2765_v0  ;;  %4258 = vmatprep.subr.mxu1 %v2797_v16  ;;  %v2767_v33 = vld [vmem:[%s6749_s5 + $0x700] sm:$0xff] }
 0x330   : > { %4224 = vmatpush3.msra.mxu0 %v2749_v20  ;;  %4259 = vmatpush3.msra.mxu1 %v2781_v35  ;;  %v3477_v35 = vld [vmem:[%s6750_s6] ss:$0 sm:$0xff] }
 0x331   : > { %4225 = vmatprep.subr.mxu0 %v2764_v58  ;;  %4260 = vmatprep.subr.mxu1 %v2796_v60 }
 0x332   : > { %4226 = vmatpush3.msra.mxu0 %v2748_v36  ;;  %4261 = vmatpush3.msra.mxu1 %v2780_v37 }
 0x333   : > { %4227 = vmatprep.subr.mxu0 %v2763_v39  ;;  %4262 = vmatprep.subr.mxu1 %v2795_v45 }
 0x334   : > { %4228 = vmatpush3.msra.mxu0 %v2747_v29  ;;  %4263 = vmatpush3.msra.mxu1 %v2779_v47 }
 0x335   : > { %4229 = vmatprep.subr.mxu0 %v2762_v10  ;;  %4264 = vmatprep.subr.mxu1 %v2794_v14 }
 0x336   : > { %4230 = vmatpush3.msra.mxu0 %v2746_v48  ;;  %4265 = vmatpush3.msra.mxu1 %v2778_v51 }
 0x337   : > { %4231 = vmatprep.subr.mxu0 %v2761_v52  ;;  %4266 = vmatprep.subr.mxu1 %v2793_v54 }
 0x338   : > { %4232 = vmatpush3.msra.mxu0 %v2745_v55  ;;  %4267 = vmatpush3.msra.mxu1 %v2777_v30 }
 0x339   : > { %4233 = vmatprep.subr.mxu0 %v2760_v32  ;;  %4268 = vmatprep.subr.mxu1 %v2792_v57 }
 0x33a   : > { %4234 = vmatpush3.msra.mxu0 %v2744_v63  ;;  %4269 = vmatpush3.msra.mxu1 %v2776_v5 }
 0x33b   : > { %4235 = vmatprep.subr.mxu0 %v2759_v41  ;;  %4270 = vmatprep.subr.mxu1 %v2791_v43 }
 0x33c   : > { %4236 = vmatpush3.msra.mxu0 %v2743_v38  ;;  %4271 = vmatpush3.msra.mxu1 %v2775_v40 }
 0x33d   : > { %4237 = vmatprep.subr.mxu0 %v2758_v23  ;;  %4272 = vmatprep.subr.mxu1 %v2790_v25 }
 0x33e   : > { %4238 = vmatpush3.msra.mxu0 %v2742_v46  ;;  %4273 = vmatpush3.msra.mxu1 %v2774_v50 }
 0x33f   : > { %4239 = vmatprep.subr.mxu0 %v2757_v62  ;;  %4274 = vmatprep.subr.mxu1 %v2789_v1 }
 0x340   : > { %4240 = vmatpush3.msra.mxu0 %v2741_v2  ;;  %4275 = vmatpush3.msra.mxu1 %v2773_v13 }
 0x341   : > { %4241 = vmatprep.subr.mxu0 %v2756_v19  ;;  %4276 = vmatprep.subr.mxu1 %v2788_v3 }
 0x342   : > { %4242 = vmatpush3.msra.mxu0 %v2740_v4  ;;  %4277 = vmatpush3.msra.mxu1 %v2772_v6 }
 0x343   : > { %4243 = vmatprep.subr.mxu0 %v2755_v42  ;;  %4278 = vmatprep.subr.mxu1 %v2787_v44 }
 0x344   : > { %4244 = vmatpush3.msra.mxu0 %v2739_v7  ;;  %4279 = vmatpush3.msra.mxu1 %v2771_v8 }
 0x345   : > { %4245 = vmatprep.subr.mxu0 %v2754_v9  ;;  %4280 = vmatprep.subr.mxu1 %v2786_v11 }
 0x346   : > { %4246 = vmatpush3.msra.mxu0 %v2738_v56  ;;  %4281 = vmatpush3.msra.mxu1 %v2770_v59 }
 0x347   : > { %4247 = vmatprep.subr.mxu0 %v2753_v12  ;;  %4282 = vmatprep.subr.mxu1 %v2785_v15 }
 0x348   : > { %4248 = vmatpush3.msra.mxu0 %v2737_v49  ;;  %4283 = vmatpush3.msra.mxu1 %v2769_v27 }
 0x349   : > { %4249 = vmatprep.subr.mxu0 %v2752_v31  ;;  %4284 = vmatprep.subr.mxu1 %v2784_v17 }
 0x34a   : > { %4250 = vmatpush3.msra.mxu0 %v2736_v18  ;;  %4285 = vmatpush3.msra.mxu1 %v2768_v21 }
 0x34b   : > { %4251 = vmatprep.subr.mxu0 %v2751_v24  ;;  %4286 = vmatprep.subr.mxu1 %v2783_v28 }
 0x34c   : > { %4252 = vmatpush3.msra.mxu0 %v2735_v53  ;;  %4287 = vmatpush3.msra.mxu1 %v2767_v33 }
 0x34d   : > { %3315 = vmatmul.mubr.f32.vlgmr.msra.gmra.mxu0 %v6500_v26  ;;  %3385 = vmatmul.mubr.f32.vlgmr.msra.gmra.mxu1 %v6508_v22 }
 0x3a8   : > { %v4043_v61 = vpop.f32.mrf.mxu0  ;;  %v4078_v34 = vpop.f32.mrf.mxu1 }
 0x3aa   : > { %v4044_v0 = vpop.f32.mrf.mxu0  ;;  %v4079_v58 = vpop.f32.mrf.mxu1 }
 0x3ab   : > { %v4045_v20 = vadd.f32 %v4044_v0, %v4043_v61  ;;  %v4080_v45 = vadd.f32 %v4079_v58, %v4078_v34 }
 0x3ad   : > { %v2897_v36 = vadd.f32 %v4045_v20, %v3477_v35 }
 0x3af   : > { %v2967_v26 = vadd.f32 %v4080_v45, %v2897_v36 }
 0x3c9   : > { %v4113_v16 = vpop.f32.mrf.mxu0  ;;  %v4148_v37 = vpop.f32.mrf.mxu1 }
 0x3cb   : > { %v4114_v60 = vpop.f32.mrf.mxu0  ;;  %v4149_v47 = vpop.f32.mrf.mxu1 }
 0x3cc   : > { %v4115_v29 = vadd.f32 %v4114_v60, %v4113_v16  ;;  %v4150_v48 = vadd.f32 %v4149_v47, %v4148_v37 }
 0x3ce   : > { %v3037_v10 = vadd.f32 %v4115_v29, %v2967_v26 }
 0x3d0   : > { %v3107_v52 = vadd.f32 %v4150_v48, %v3037_v10 }
 0x3eb   : > { %v4183_v39 = vpop.f32.mrf.mxu0  ;;  %v4218_v14 = vpop.f32.mrf.mxu1 }
 0x3ed   : > { %v4184_v22 = vpop.f32.mrf.mxu0  ;;  %v4219_v54 = vpop.f32.mrf.mxu1 }
 0x3ee   : > { %v4185_v51 = vadd.f32 %v4184_v22, %v4183_v39  ;;  %v4220_v32 = vadd.f32 %v4219_v54, %v4218_v14 }
 0x3f0   : > { %v3177_v55 = vadd.f32 %v4185_v51, %v3107_v52 }
 0x3f2   : > { %v3247_v5 = vadd.f32 %v4220_v32, %v3177_v55 }
 0x40d   : > { %v4253_v30 = vpop.f32.mrf.mxu0  ;;  %v4288_v57 = vpop.f32.mrf.mxu1 }
 0x40f   : > { %v4254_v63 = vpop.f32.mrf.mxu0  ;;  %v4289_v43 = vpop.f32.mrf.mxu1 }
 0x410   : > { %v4255_v41 = vadd.f32 %v4254_v63, %v4253_v30  ;;  %v4290_v40 = vadd.f32 %v4289_v43, %v4288_v57 }
 0x412   : > { %v3317_v38 = vadd.f32 %v4255_v41, %v3247_v5 }
 0x414   : > { %v3387_v23 = vadd.f32 %v4290_v40, %v3317_v38 }
 0x416   : > { %vm3390_vm14 = vcmp.ge.f32.partialorder %v3387_v23, 0.0  ;;  %v3391_v25 = vmul.f32 0.01, %v3387_v23 }
 0x418   : > { %v3392_v46 = vsel %vm3390_vm14, %v3387_v23, %v3391_v25 }
 0x419   : > { %3394 = vst.msk [vmem:[%s271_s16] sm:$0xf] %vm3393_vm15, %v3392_v46 }
 0x41a   : > { %4353 = shalt.err (!%p4350_p3)
}
 0x41b   : > { %s4354_s13 = scalar_lea.hbm %s6709_s22, 64  ;;  %s4358_s14 = scalar_lea.hbm %s6751_s7, 128 }
 0x41c   : > { %p4355_p4 = scmp.ne.s32.totalorder %s6709_s22, %s4354_s13  ;;  %p4359_p9 = scmp.lt.s32.totalorder %s6709_s22, %s6751_s7 }
 0x41d   : > { %p4360_p10 = scmp.lt.s32.totalorder %s4358_s14, %s4354_s13 }
 0x41e   : > { %p4356_p7 = pnand %p4355_p4, %p4482_p5 }
 0x41f   : > { %p4361_p11 = por %p4360_p10, %p4359_p9 }
 0x420   : > { %p4357_p8 = pneg %p4356_p7 }
 0x422   : > { %p4362_p12 = pnand %p4361_p11, %p4357_p8 }
 0x424   : > { %4365 = shalt.err (!%p4362_p12)
}
 0x425   : > { %4291 = dma.vmem_to_hbm [thread:$0]  (%p4482_p5), %s3410_s18, 64, %s6709_s22, %s3396_s23  }
 0x426 PF: > { %p4297_p13 = scmp.ge.s32.totalorder %s4400_s27, 2  ;;  %s3421_s20 = sand.u32 1, %s4388_s24  }
 0x427   : > { %s3422_s21 = scalar_lea.sflag [#allocation7], %s3421_s20 }
 0x428   : > { %p4294_p0 = pnand %p4297_p13, %p4486_p6 }
 0x42a   : > { %p4295_p1 = pneg %p4294_p0 }
 0x42c   : > { %4383 = dma.done.wait (%p4295_p1), %s3422_s21, 64  }
 0x42d   : > { %4385 = vsyncadd (%p4295_p1), %s3422_s21, 4294967232  ;;  %p17_p2 = scmp.ge.s32.totalorder %s4469_s30, 4   ;;  %s6754_s24 = smov %s4392_s25 }
 0x42e   : > { %s6755_s25 = smov %s4396_s26  ;;  %s6756_s26 = smov %s4480_s10 }
 0x42f   : > { %s6757_s27 = smov %s4469_s30  ;;  %19 = sbr.rel (!%p17_p2) target bundleno = 3 (0x3), region = 83 }
 0x434   :  { %3427 = vsyncpa [#allocation7], 1 }
 0x435   :  { %3429 = vsyncpa [#allocation7 + $0x1], 1 }

</bundles_post_ra>
